<compile_context>
chip_gen: v7x
topology: tpu7x:2x2x1
jax: 0.10.0
libtpu: 0.0.40
codegen_flags: <defaults>
</compile_context>

<pallas_src>
import functools
import math

import jax
import jax.numpy as jnp
from jax.experimental import pallas as pl
from jax.experimental.pallas import tpu as pltpu

CONV_CHANNELS = [(3, 32), (32, 64), (64, 128), (128, 256)]
LANE = 128


# -----------------------------------------------------------------------------
# Kernel
# -----------------------------------------------------------------------------
def _conv_relu_pool(x, pad_ref, w_ref, b_ref):
    """3x3 same-conv (one K=9*Cin matmul) + bias + ReLU + 2x2 max-pool.

    x:       (1, H, W, Cin)      bf16 value
    pad_ref: (1, H+2, W+2, Cin)  bf16 VMEM halo scratch
    w_ref:   (9*Cin, Cout)       bf16 (taps flattened dy-major, dx, cin)
    b_ref:   (1, Cout)           f32
    returns: (1, H//2, W//2, Cout) bf16
    """
    _, H, W, Cin = x.shape
    Cout = b_ref.shape[-1]

    # In-kernel zero padding into the VMEM halo buffer.
    pad_ref[...] = jnp.zeros_like(pad_ref)
    pad_ref[:, 1:H + 1, 1:W + 1, :] = x
    xp = pad_ref[...]

    # im2col: concatenate the 9 shifted views along channels -> K = 9*Cin.
    cols = [xp[:, dy:dy + H, dx:dx + W, :] for dy in range(3) for dx in range(3)]
    patches = jnp.concatenate(cols, axis=-1).reshape(H * W, 9 * Cin)

    acc = jnp.dot(patches, w_ref[...], preferred_element_type=jnp.float32)
    acc = jnp.maximum(acc + b_ref[...], 0.0)            # bias + ReLU (f32)

    acc = acc.reshape(1, H // 2, 2, W // 2, 2, Cout)
    acc = jnp.max(jnp.max(acc, axis=4), axis=2)         # 2x2 max pool, stride 2
    return acc.astype(jnp.bfloat16)


def cnn_fused_kernel(x_ref,
                     cw1, cb1, cw2, cb2, cw3, cb3, cw4, cb4,
                     fw1, fb1, fw2, fb2, fw3, fb3,
                     o_ref,
                     pad1, pad2, pad3, pad4):
    h = _conv_relu_pool(x_ref[...], pad1, cw1, cb1)     # (1, H/2,  W/2,  32)
    h = _conv_relu_pool(h, pad2, cw2, cb2)              # (1, H/4,  W/4,  64)
    h = _conv_relu_pool(h, pad3, cw3, cb3)              # (1, H/8,  W/8,  128)
    h = _conv_relu_pool(h, pad4, cw4, cb4)              # (1, H/16, W/16, 256)

    feat = h.reshape(1, -1)                             # NHWC flatten (bf16)

    z = jnp.dot(feat, fw1[...], preferred_element_type=jnp.float32)
    z = jnp.maximum(z + fb1[...], 0.0).astype(jnp.bfloat16)
    # TODO(synk): nn.Dropout(0.5) is identity at inference; no RNG masking applied.
    z = jnp.dot(z, fw2[...], preferred_element_type=jnp.float32)
    z = jnp.maximum(z + fb2[...], 0.0).astype(jnp.bfloat16)
    # TODO(synk): nn.Dropout(0.3) is identity at inference; no RNG masking applied.
    z = jnp.dot(z, fw3[...], preferred_element_type=jnp.float32) + fb3[...]

    o_ref[...] = z.reshape(o_ref.shape).astype(o_ref.dtype)


# -----------------------------------------------------------------------------
# Wrapper
# -----------------------------------------------------------------------------
@functools.partial(jax.jit, static_argnums=(2,))
def cnn_forward(x_nchw, params, num_classes):
    conv_params, fc_params = params
    N, cin0, H, W = x_nchw.shape
    assert H % 16 == 0 and W % 16 == 0, "spatial dims must be divisible by 16"

    # One boundary transpose: NCHW (PyTorch) -> NHWC (kernel layout), bf16.
    x = jnp.transpose(x_nchw, (0, 2, 3, 1)).astype(jnp.bfloat16)

    (cw1, cb1), (cw2, cb2), (cw3, cb3), (cw4, cb4) = conv_params
    (fw1, fb1), (fw2, fb2), (fw3, fb3) = fc_params
    cpad = fw3.shape[-1]

    def resident(a):  # full array, VMEM-resident across the batch grid
        return pl.BlockSpec(a.shape, lambda b, _n=a.ndim: (0,) * _n)

    operands = [x, cw1, cb1, cw2, cb2, cw3, cb3, cw4, cb4,
                fw1, fb1, fw2, fb2, fw3, fb3]
    in_specs = [pl.BlockSpec((1, H, W, cin0), lambda b: (b, 0, 0, 0))]
    in_specs += [resident(a) for a in operands[1:]]

    # Cost estimate (per whole call).
    conv_flops, h, w = 0, H, W
    for ci, co in CONV_CHANNELS:
        conv_flops += 2 * h * w * 9 * ci * co
        h, w = h // 2, w // 2
    fc_flops = 2 * (fw1.shape[0] * fw1.shape[1] + fw2.shape[0] * fw2.shape[1]
                    + fw3.shape[0] * fw3.shape[1])
    flops = N * (conv_flops + fc_flops)
    bytes_accessed = sum(int(a.size) * a.dtype.itemsize for a in operands)
    bytes_accessed += N * cpad * 4

    # VMEM halo scratch buffers (one per conv layer, sized for a batch block of 1).
    scratch, h, w = [], H, W
    for ci, _ in CONV_CHANNELS:
        scratch.append(pltpu.VMEM((1, h + 2, w + 2, ci), jnp.bfloat16))
        h, w = h // 2, w // 2

    out = pl.pallas_call(
        cnn_fused_kernel,
        out_shape=jax.ShapeDtypeStruct((N, 1, cpad), jnp.float32),
        grid_spec=pltpu.PrefetchScalarGridSpec(
            num_scalar_prefetch=0,
            grid=(N,),
            in_specs=in_specs,
            out_specs=pl.BlockSpec((1, 1, cpad), lambda b: (b, 0, 0)),
            scratch_shapes=scratch),
        compiler_params=pltpu.CompilerParams(
            dimension_semantics=("parallel",),
            vmem_limit_bytes=32 * 1024 * 1024),
        cost_estimate=pl.CostEstimate(
            flops=flops, transcendentals=0, bytes_accessed=bytes_accessed),
    )(*operands)

    return out.reshape(N, cpad)[:, :num_classes]


# -----------------------------------------------------------------------------
# Parameter init (PyTorch-default-style uniform(-1/sqrt(fan_in)), pre-packed)
# -----------------------------------------------------------------------------
def _uniform(key, shape, fan_in):
    bound = 1.0 / math.sqrt(fan_in)
    return jax.random.uniform(key, shape, jnp.float32, -bound, bound)


def init_params(key, num_classes, img_h, img_w):
    keys = jax.random.split(key, 2 * len(CONV_CHANNELS) + 6)

    conv_params = []
    for i, (cin, cout) in enumerate(CONV_CHANNELS):
        fan_in = cin * 9
        w = _uniform(keys[2 * i], (3, 3, cin, cout), fan_in)   # (kh, kw, Cin, Cout)
        b = _uniform(keys[2 * i + 1], (cout,), fan_in)
        conv_params.append((w.reshape(9 * cin, cout).astype(jnp.bfloat16),
                            b.reshape(1, cout)))

    h4, w4 = img_h // 16, img_w // 16
    flat_dim = 256 * h4 * w4
    dims = [(flat_dim, 1024), (1024, 512), (512, num_classes)]
    k = 2 * len(CONV_CHANNELS)
    fc = []
    for i, (din, dout) in enumerate(dims):
        w = _uniform(keys[k + 2 * i], (din, dout), din)        # (in, out)
        b = _uniform(keys[k + 2 * i + 1], (dout,), din)
        fc.append([w, b])

    # Fold PyTorch's NCHW flatten order into fc1's rows (kernel flattens NHWC).
    w1, b1 = fc[0]
    w1 = (w1.reshape(256, h4, w4, 1024).transpose(1, 2, 0, 3)
            .reshape(flat_dim, 1024))
    fc[0] = [w1, b1]

    # Pad the final FC to a lane-dense (multiple-of-128) output width.
    w3, b3 = fc[2]
    cpad = max(LANE, -(-num_classes // LANE) * LANE)
    w3 = jnp.pad(w3, ((0, 0), (0, cpad - num_classes)))
    b3 = jnp.pad(b3, ((0, cpad - num_classes),))
    fc[2] = [w3, b3]

    fc_params = tuple((w.astype(jnp.bfloat16), b.reshape(1, -1)) for w, b in fc)
    return tuple(conv_params), fc_params


if __name__ == "__main__":
    img_height = img_width = 16     # divisible by 16 -> 1x1 spatial after 4 pools
    num_classes = 10
    batch = 2

    key = jax.random.PRNGKey(0)
    k_param, k_x = jax.random.split(key)
    params = init_params(k_param, num_classes, img_height, img_width)
    x = jax.random.normal(k_x, (batch, 3, img_height, img_width), jnp.float32)

    out = cnn_forward(x, params, num_classes)
    jax.block_until_ready(out)
    assert out.shape == (batch, num_classes), out.shape
    assert out.dtype == jnp.float32
    assert bool(jnp.all(jnp.isfinite(out)))
    print("KERNEL_OK")
</pallas_src>

<mosaic_0001>
module attributes {stable_mosaic.version = 11 : i64} {
  func.func @cnn_fused_kernel(%arg0: i32, %arg1: memref<1x16x16x3xbf16, #tpu.memory_space<vmem>>, %arg2: memref<27x32xbf16, #tpu.memory_space<vmem>>, %arg3: memref<1x32xf32, #tpu.memory_space<vmem>>, %arg4: memref<288x64xbf16, #tpu.memory_space<vmem>>, %arg5: memref<1x64xf32, #tpu.memory_space<vmem>>, %arg6: memref<576x128xbf16, #tpu.memory_space<vmem>>, %arg7: memref<1x128xf32, #tpu.memory_space<vmem>>, %arg8: memref<1152x256xbf16, #tpu.memory_space<vmem>>, %arg9: memref<1x256xf32, #tpu.memory_space<vmem>>, %arg10: memref<256x1024xbf16, #tpu.memory_space<vmem>>, %arg11: memref<1x1024xf32, #tpu.memory_space<vmem>>, %arg12: memref<1024x512xbf16, #tpu.memory_space<vmem>>, %arg13: memref<1x512xf32, #tpu.memory_space<vmem>>, %arg14: memref<512x128xbf16, #tpu.memory_space<vmem>>, %arg15: memref<1x128xf32, #tpu.memory_space<vmem>>, %arg16: memref<1x1x128xf32, #tpu.memory_space<vmem>>, %arg17: memref<1x18x18x3xbf16, #tpu.memory_space<vmem>>, %arg18: memref<1x10x10x32xbf16, #tpu.memory_space<vmem>>, %arg19: memref<1x6x6x64xbf16, #tpu.memory_space<vmem>>, %arg20: memref<1x4x4x128xbf16, #tpu.memory_space<vmem>>) attributes {dimension_semantics = [#tpu.dimension_semantics<parallel>], iteration_bounds = array<i64: 2>, scalar_prefetch = 0 : i64, scratch_operands = 4 : i64, tpu.core_type = #tpu.core_type<tc>, window_params = [{transform_indices = @transform_0, window_bounds = array<i64: 1, 16, 16, 3>}, {pipeline_mode = #tpu.pipeline_mode<synchronous>, transform_indices = @transform_1, window_bounds = array<i64: 27, 32>}, {pipeline_mode = #tpu.pipeline_mode<synchronous>, transform_indices = @transform_2, window_bounds = array<i64: 1, 32>}, {pipeline_mode = #tpu.pipeline_mode<synchronous>, transform_indices = @transform_3, window_bounds = array<i64: 288, 64>}, {pipeline_mode = #tpu.pipeline_mode<synchronous>, transform_indices = @transform_4, window_bounds = array<i64: 1, 64>}, {pipeline_mode = #tpu.pipeline_mode<synchronous>, transform_indices = @transform_5, window_bounds = array<i64: 576, 128>}, {pipeline_mode = #tpu.pipeline_mode<synchronous>, transform_indices = @transform_6, window_bounds = array<i64: 1, 128>}, {pipeline_mode = #tpu.pipeline_mode<synchronous>, transform_indices = @transform_7, window_bounds = array<i64: 1152, 256>}, {pipeline_mode = #tpu.pipeline_mode<synchronous>, transform_indices = @transform_8, window_bounds = array<i64: 1, 256>}, {pipeline_mode = #tpu.pipeline_mode<synchronous>, transform_indices = @transform_9, window_bounds = array<i64: 256, 1024>}, {pipeline_mode = #tpu.pipeline_mode<synchronous>, transform_indices = @transform_10, window_bounds = array<i64: 1, 1024>}, {pipeline_mode = #tpu.pipeline_mode<synchronous>, transform_indices = @transform_11, window_bounds = array<i64: 1024, 512>}, {pipeline_mode = #tpu.pipeline_mode<synchronous>, transform_indices = @transform_12, window_bounds = array<i64: 1, 512>}, {pipeline_mode = #tpu.pipeline_mode<synchronous>, transform_indices = @transform_13, window_bounds = array<i64: 512, 128>}, {pipeline_mode = #tpu.pipeline_mode<synchronous>, transform_indices = @transform_14, window_bounds = array<i64: 1, 128>}, {transform_indices = @transform_15, window_bounds = array<i64: 1, 1, 128>}]} {
    %c0 = arith.constant 0 : index
    %c0_0 = arith.constant 0 : index
    %c0_1 = arith.constant 0 : index
    %c0_2 = arith.constant 0 : index
    %0 = vector.load %arg1[%c0, %c0_0, %c0_1, %c0_2] : memref<1x16x16x3xbf16, #tpu.memory_space<vmem>>, vector<1x16x16x3xbf16>
    %cst = arith.constant 0.000000e+00 : bf16
    %1 = vector.broadcast %cst : bf16 to vector<1x18x18x3xbf16>
    %c0_3 = arith.constant 0 : index
    %c0_4 = arith.constant 0 : index
    %c0_5 = arith.constant 0 : index
    %c0_6 = arith.constant 0 : index
    %2 = vector.load %arg17[%c0_3, %c0_4, %c0_5, %c0_6] : memref<1x18x18x3xbf16, #tpu.memory_space<vmem>>, vector<1x18x18x3xbf16>
    tpu.vector_store %arg17[%c0_3, %c0_4, %c0_5, %c0_6], %1 {strides = array<i32>} : memref<1x18x18x3xbf16, #tpu.memory_space<vmem>>, vector<1x18x18x3xbf16>,
    %c0_7 = arith.constant 0 : index
    %c1 = arith.constant 1 : index
    %c1_8 = arith.constant 1 : index
    %c0_9 = arith.constant 0 : index
    %3 = vector.load %arg17[%c0_7, %c1, %c1_8, %c0_9] : memref<1x18x18x3xbf16, #tpu.memory_space<vmem>>, vector<1x16x16x3xbf16>
    tpu.vector_store %arg17[%c0_7, %c1, %c1_8, %c0_9], %0 {strides = array<i32>} : memref<1x18x18x3xbf16, #tpu.memory_space<vmem>>, vector<1x16x16x3xbf16>,
    %c0_10 = arith.constant 0 : index
    %c0_11 = arith.constant 0 : index
    %c0_12 = arith.constant 0 : index
    %c0_13 = arith.constant 0 : index
    %4 = vector.load %arg17[%c0_10, %c0_11, %c0_12, %c0_13] : memref<1x18x18x3xbf16, #tpu.memory_space<vmem>>, vector<1x18x18x3xbf16>
    %5 = vector.extract_strided_slice %4 {offsets = [0, 0, 0, 0], sizes = [1, 16, 16, 3], strides = [1, 1, 1, 1]} : vector<1x18x18x3xbf16> to vector<1x16x16x3xbf16>
    %6 = vector.extract_strided_slice %4 {offsets = [0, 0, 1, 0], sizes = [1, 16, 16, 3], strides = [1, 1, 1, 1]} : vector<1x18x18x3xbf16> to vector<1x16x16x3xbf16>
    %7 = vector.extract_strided_slice %4 {offsets = [0, 0, 2, 0], sizes = [1, 16, 16, 3], strides = [1, 1, 1, 1]} : vector<1x18x18x3xbf16> to vector<1x16x16x3xbf16>
    %8 = vector.extract_strided_slice %4 {offsets = [0, 1, 0, 0], sizes = [1, 16, 16, 3], strides = [1, 1, 1, 1]} : vector<1x18x18x3xbf16> to vector<1x16x16x3xbf16>
    %9 = vector.extract_strided_slice %4 {offsets = [0, 1, 1, 0], sizes = [1, 16, 16, 3], strides = [1, 1, 1, 1]} : vector<1x18x18x3xbf16> to vector<1x16x16x3xbf16>
    %10 = vector.extract_strided_slice %4 {offsets = [0, 1, 2, 0], sizes = [1, 16, 16, 3], strides = [1, 1, 1, 1]} : vector<1x18x18x3xbf16> to vector<1x16x16x3xbf16>
    %11 = vector.extract_strided_slice %4 {offsets = [0, 2, 0, 0], sizes = [1, 16, 16, 3], strides = [1, 1, 1, 1]} : vector<1x18x18x3xbf16> to vector<1x16x16x3xbf16>
    %12 = vector.extract_strided_slice %4 {offsets = [0, 2, 1, 0], sizes = [1, 16, 16, 3], strides = [1, 1, 1, 1]} : vector<1x18x18x3xbf16> to vector<1x16x16x3xbf16>
    %13 = vector.extract_strided_slice %4 {offsets = [0, 2, 2, 0], sizes = [1, 16, 16, 3], strides = [1, 1, 1, 1]} : vector<1x18x18x3xbf16> to vector<1x16x16x3xbf16>
    %14 = tpu.concatenate %5, %6, %7, %8, %9, %10, %11, %12, %13 in 3 : vector<1x16x16x3xbf16>, vector<1x16x16x3xbf16>, vector<1x16x16x3xbf16>, vector<1x16x16x3xbf16>, vector<1x16x16x3xbf16>, vector<1x16x16x3xbf16>, vector<1x16x16x3xbf16>, vector<1x16x16x3xbf16>, vector<1x16x16x3xbf16> -> vector<1x16x16x27xbf16>
    %15 = vector.shape_cast %14 : vector<1x16x16x27xbf16> to vector<256x27xbf16>
    %c0_14 = arith.constant 0 : index
    %c0_15 = arith.constant 0 : index
    %16 = vector.load %arg2[%c0_14, %c0_15] : memref<27x32xbf16, #tpu.memory_space<vmem>>, vector<27x32xbf16>
    %cst_16 = arith.constant dense<0.000000e+00> : vector<256x32xf32>
    %17 = tpu.matmul %15, %16, %cst_16 {dimension_numbers = #tpu.dot_dimension_numbers<[1], [0], [0], [1], [0, 0, 1, 1], [], []>} : vector<256x27xbf16>, vector<27x32xbf16>, vector<256x32xf32> -> vector<256x32xf32>
    %c0_17 = arith.constant 0 : index
    %c0_18 = arith.constant 0 : index
    %18 = vector.load %arg3[%c0_17, %c0_18] : memref<1x32xf32, #tpu.memory_space<vmem>>, vector<1x32xf32>
    %19 = vector.broadcast %18 : vector<1x32xf32> to vector<256x32xf32>
    %20 = arith.addf %17, %19 : vector<256x32xf32>
    %cst_19 = arith.constant 0.000000e+00 : f32
    %21 = vector.broadcast %cst_19 : f32 to vector<256x32xf32>
    %22 = arith.maximumf %20, %21 : vector<256x32xf32>
    %23 = vector.shape_cast %22 : vector<256x32xf32> to vector<1x8x2x8x2x32xf32>
    %cst_20 = arith.constant dense<0xFF800000> : vector<1x8x2x8x32xf32>
    %24 = vector.multi_reduction <maximumf>, %23, %cst_20 [4] : vector<1x8x2x8x2x32xf32> to vector<1x8x2x8x32xf32>
    %cst_21 = arith.constant dense<0xFF800000> : vector<1x8x8x32xf32>
    %25 = vector.multi_reduction <maximumf>, %24, %cst_21 [2] : vector<1x8x2x8x32xf32> to vector<1x8x8x32xf32>
    %26 = arith.truncf %25 : vector<1x8x8x32xf32> to vector<1x8x8x32xbf16>
    %cst_22 = arith.constant 0.000000e+00 : bf16
    %27 = vector.broadcast %cst_22 : bf16 to vector<1x10x10x32xbf16>
    %c0_23 = arith.constant 0 : index
    %c0_24 = arith.constant 0 : index
    %c0_25 = arith.constant 0 : index
    %c0_26 = arith.constant 0 : index
    %28 = vector.load %arg18[%c0_23, %c0_24, %c0_25, %c0_26] : memref<1x10x10x32xbf16, #tpu.memory_space<vmem>>, vector<1x10x10x32xbf16>
    tpu.vector_store %arg18[%c0_23, %c0_24, %c0_25, %c0_26], %27 {strides = array<i32>} : memref<1x10x10x32xbf16, #tpu.memory_space<vmem>>, vector<1x10x10x32xbf16>,
    %c0_27 = arith.constant 0 : index
    %c1_28 = arith.constant 1 : index
    %c1_29 = arith.constant 1 : index
    %c0_30 = arith.constant 0 : index
    %29 = vector.load %arg18[%c0_27, %c1_28, %c1_29, %c0_30] : memref<1x10x10x32xbf16, #tpu.memory_space<vmem>>, vector<1x8x8x32xbf16>
    tpu.vector_store %arg18[%c0_27, %c1_28, %c1_29, %c0_30], %26 {strides = array<i32>} : memref<1x10x10x32xbf16, #tpu.memory_space<vmem>>, vector<1x8x8x32xbf16>,
    %c0_31 = arith.constant 0 : index
    %c0_32 = arith.constant 0 : index
    %c0_33 = arith.constant 0 : index
    %c0_34 = arith.constant 0 : index
    %30 = vector.load %arg18[%c0_31, %c0_32, %c0_33, %c0_34] : memref<1x10x10x32xbf16, #tpu.memory_space<vmem>>, vector<1x10x10x32xbf16>
    %31 = vector.extract_strided_slice %30 {offsets = [0, 0, 0, 0], sizes = [1, 8, 8, 32], strides = [1, 1, 1, 1]} : vector<1x10x10x32xbf16> to vector<1x8x8x32xbf16>
    %32 = vector.extract_strided_slice %30 {offsets = [0, 0, 1, 0], sizes = [1, 8, 8, 32], strides = [1, 1, 1, 1]} : vector<1x10x10x32xbf16> to vector<1x8x8x32xbf16>
    %33 = vector.extract_strided_slice %30 {offsets = [0, 0, 2, 0], sizes = [1, 8, 8, 32], strides = [1, 1, 1, 1]} : vector<1x10x10x32xbf16> to vector<1x8x8x32xbf16>
    %34 = vector.extract_strided_slice %30 {offsets = [0, 1, 0, 0], sizes = [1, 8, 8, 32], strides = [1, 1, 1, 1]} : vector<1x10x10x32xbf16> to vector<1x8x8x32xbf16>
    %35 = vector.extract_strided_slice %30 {offsets = [0, 1, 1, 0], sizes = [1, 8, 8, 32], strides = [1, 1, 1, 1]} : vector<1x10x10x32xbf16> to vector<1x8x8x32xbf16>
    %36 = vector.extract_strided_slice %30 {offsets = [0, 1, 2, 0], sizes = [1, 8, 8, 32], strides = [1, 1, 1, 1]} : vector<1x10x10x32xbf16> to vector<1x8x8x32xbf16>
    %37 = vector.extract_strided_slice %30 {offsets = [0, 2, 0, 0], sizes = [1, 8, 8, 32], strides = [1, 1, 1, 1]} : vector<1x10x10x32xbf16> to vector<1x8x8x32xbf16>
    %38 = vector.extract_strided_slice %30 {offsets = [0, 2, 1, 0], sizes = [1, 8, 8, 32], strides = [1, 1, 1, 1]} : vector<1x10x10x32xbf16> to vector<1x8x8x32xbf16>
    %39 = vector.extract_strided_slice %30 {offsets = [0, 2, 2, 0], sizes = [1, 8, 8, 32], strides = [1, 1, 1, 1]} : vector<1x10x10x32xbf16> to vector<1x8x8x32xbf16>
    %40 = tpu.concatenate %31, %32, %33, %34, %35, %36, %37, %38, %39 in 3 : vector<1x8x8x32xbf16>, vector<1x8x8x32xbf16>, vector<1x8x8x32xbf16>, vector<1x8x8x32xbf16>, vector<1x8x8x32xbf16>, vector<1x8x8x32xbf16>, vector<1x8x8x32xbf16>, vector<1x8x8x32xbf16>, vector<1x8x8x32xbf16> -> vector<1x8x8x288xbf16>
    %41 = vector.shape_cast %40 : vector<1x8x8x288xbf16> to vector<64x288xbf16>
    %c0_35 = arith.constant 0 : index
    %c0_36 = arith.constant 0 : index
    %42 = vector.load %arg4[%c0_35, %c0_36] : memref<288x64xbf16, #tpu.memory_space<vmem>>, vector<288x64xbf16>
    %cst_37 = arith.constant dense<0.000000e+00> : vector<64x64xf32>
    %43 = tpu.matmul %41, %42, %cst_37 {dimension_numbers = #tpu.dot_dimension_numbers<[1], [0], [0], [1], [0, 0, 1, 1], [], []>} : vector<64x288xbf16>, vector<288x64xbf16>, vector<64x64xf32> -> vector<64x64xf32>
    %c0_38 = arith.constant 0 : index
    %c0_39 = arith.constant 0 : index
    %44 = vector.load %arg5[%c0_38, %c0_39] : memref<1x64xf32, #tpu.memory_space<vmem>>, vector<1x64xf32>
    %45 = vector.broadcast %44 : vector<1x64xf32> to vector<64x64xf32>
    %46 = arith.addf %43, %45 : vector<64x64xf32>
    %cst_40 = arith.constant 0.000000e+00 : f32
    %47 = vector.broadcast %cst_40 : f32 to vector<64x64xf32>
    %48 = arith.maximumf %46, %47 : vector<64x64xf32>
    %49 = vector.shape_cast %48 : vector<64x64xf32> to vector<1x4x2x4x2x64xf32>
    %cst_41 = arith.constant dense<0xFF800000> : vector<1x4x2x4x64xf32>
    %50 = vector.multi_reduction <maximumf>, %49, %cst_41 [4] : vector<1x4x2x4x2x64xf32> to vector<1x4x2x4x64xf32>
    %cst_42 = arith.constant dense<0xFF800000> : vector<1x4x4x64xf32>
    %51 = vector.multi_reduction <maximumf>, %50, %cst_42 [2] : vector<1x4x2x4x64xf32> to vector<1x4x4x64xf32>
    %52 = arith.truncf %51 : vector<1x4x4x64xf32> to vector<1x4x4x64xbf16>
    %cst_43 = arith.constant 0.000000e+00 : bf16
    %53 = vector.broadcast %cst_43 : bf16 to vector<1x6x6x64xbf16>
    %c0_44 = arith.constant 0 : index
    %c0_45 = arith.constant 0 : index
    %c0_46 = arith.constant 0 : index
    %c0_47 = arith.constant 0 : index
    %54 = vector.load %arg19[%c0_44, %c0_45, %c0_46, %c0_47] : memref<1x6x6x64xbf16, #tpu.memory_space<vmem>>, vector<1x6x6x64xbf16>
    tpu.vector_store %arg19[%c0_44, %c0_45, %c0_46, %c0_47], %53 {strides = array<i32>} : memref<1x6x6x64xbf16, #tpu.memory_space<vmem>>, vector<1x6x6x64xbf16>,
    %c0_48 = arith.constant 0 : index
    %c1_49 = arith.constant 1 : index
    %c1_50 = arith.constant 1 : index
    %c0_51 = arith.constant 0 : index
    %55 = vector.load %arg19[%c0_48, %c1_49, %c1_50, %c0_51] : memref<1x6x6x64xbf16, #tpu.memory_space<vmem>>, vector<1x4x4x64xbf16>
    tpu.vector_store %arg19[%c0_48, %c1_49, %c1_50, %c0_51], %52 {strides = array<i32>} : memref<1x6x6x64xbf16, #tpu.memory_space<vmem>>, vector<1x4x4x64xbf16>,
    %c0_52 = arith.constant 0 : index
    %c0_53 = arith.constant 0 : index
    %c0_54 = arith.constant 0 : index
    %c0_55 = arith.constant 0 : index
    %56 = vector.load %arg19[%c0_52, %c0_53, %c0_54, %c0_55] : memref<1x6x6x64xbf16, #tpu.memory_space<vmem>>, vector<1x6x6x64xbf16>
    %57 = vector.extract_strided_slice %56 {offsets = [0, 0, 0, 0], sizes = [1, 4, 4, 64], strides = [1, 1, 1, 1]} : vector<1x6x6x64xbf16> to vector<1x4x4x64xbf16>
    %58 = vector.extract_strided_slice %56 {offsets = [0, 0, 1, 0], sizes = [1, 4, 4, 64], strides = [1, 1, 1, 1]} : vector<1x6x6x64xbf16> to vector<1x4x4x64xbf16>
    %59 = vector.extract_strided_slice %56 {offsets = [0, 0, 2, 0], sizes = [1, 4, 4, 64], strides = [1, 1, 1, 1]} : vector<1x6x6x64xbf16> to vector<1x4x4x64xbf16>
    %60 = vector.extract_strided_slice %56 {offsets = [0, 1, 0, 0], sizes = [1, 4, 4, 64], strides = [1, 1, 1, 1]} : vector<1x6x6x64xbf16> to vector<1x4x4x64xbf16>
    %61 = vector.extract_strided_slice %56 {offsets = [0, 1, 1, 0], sizes = [1, 4, 4, 64], strides = [1, 1, 1, 1]} : vector<1x6x6x64xbf16> to vector<1x4x4x64xbf16>
    %62 = vector.extract_strided_slice %56 {offsets = [0, 1, 2, 0], sizes = [1, 4, 4, 64], strides = [1, 1, 1, 1]} : vector<1x6x6x64xbf16> to vector<1x4x4x64xbf16>
    %63 = vector.extract_strided_slice %56 {offsets = [0, 2, 0, 0], sizes = [1, 4, 4, 64], strides = [1, 1, 1, 1]} : vector<1x6x6x64xbf16> to vector<1x4x4x64xbf16>
    %64 = vector.extract_strided_slice %56 {offsets = [0, 2, 1, 0], sizes = [1, 4, 4, 64], strides = [1, 1, 1, 1]} : vector<1x6x6x64xbf16> to vector<1x4x4x64xbf16>
    %65 = vector.extract_strided_slice %56 {offsets = [0, 2, 2, 0], sizes = [1, 4, 4, 64], strides = [1, 1, 1, 1]} : vector<1x6x6x64xbf16> to vector<1x4x4x64xbf16>
    %66 = tpu.concatenate %57, %58, %59, %60, %61, %62, %63, %64, %65 in 3 : vector<1x4x4x64xbf16>, vector<1x4x4x64xbf16>, vector<1x4x4x64xbf16>, vector<1x4x4x64xbf16>, vector<1x4x4x64xbf16>, vector<1x4x4x64xbf16>, vector<1x4x4x64xbf16>, vector<1x4x4x64xbf16>, vector<1x4x4x64xbf16> -> vector<1x4x4x576xbf16>
    %67 = vector.shape_cast %66 : vector<1x4x4x576xbf16> to vector<16x576xbf16>
    %c0_56 = arith.constant 0 : index
    %c0_57 = arith.constant 0 : index
    %68 = vector.load %arg6[%c0_56, %c0_57] : memref<576x128xbf16, #tpu.memory_space<vmem>>, vector<576x128xbf16>
    %cst_58 = arith.constant dense<0.000000e+00> : vector<16x128xf32>
    %69 = tpu.matmul %67, %68, %cst_58 {dimension_numbers = #tpu.dot_dimension_numbers<[1], [0], [0], [1], [0, 0, 1, 1], [], []>} : vector<16x576xbf16>, vector<576x128xbf16>, vector<16x128xf32> -> vector<16x128xf32>
    %c0_59 = arith.constant 0 : index
    %c0_60 = arith.constant 0 : index
    %70 = vector.load %arg7[%c0_59, %c0_60] : memref<1x128xf32, #tpu.memory_space<vmem>>, vector<1x128xf32>
    %71 = vector.broadcast %70 : vector<1x128xf32> to vector<16x128xf32>
    %72 = arith.addf %69, %71 : vector<16x128xf32>
    %cst_61 = arith.constant 0.000000e+00 : f32
    %73 = vector.broadcast %cst_61 : f32 to vector<16x128xf32>
    %74 = arith.maximumf %72, %73 : vector<16x128xf32>
    %75 = vector.shape_cast %74 : vector<16x128xf32> to vector<1x2x2x2x2x128xf32>
    %cst_62 = arith.constant dense<0xFF800000> : vector<1x2x2x2x128xf32>
    %76 = vector.multi_reduction <maximumf>, %75, %cst_62 [4] : vector<1x2x2x2x2x128xf32> to vector<1x2x2x2x128xf32>
    %cst_63 = arith.constant dense<0xFF800000> : vector<1x2x2x128xf32>
    %77 = vector.multi_reduction <maximumf>, %76, %cst_63 [2] : vector<1x2x2x2x128xf32> to vector<1x2x2x128xf32>
    %78 = arith.truncf %77 : vector<1x2x2x128xf32> to vector<1x2x2x128xbf16>
    %cst_64 = arith.constant 0.000000e+00 : bf16
    %79 = vector.broadcast %cst_64 : bf16 to vector<1x4x4x128xbf16>
    %c0_65 = arith.constant 0 : index
    %c0_66 = arith.constant 0 : index
    %c0_67 = arith.constant 0 : index
    %c0_68 = arith.constant 0 : index
    %80 = vector.load %arg20[%c0_65, %c0_66, %c0_67, %c0_68] : memref<1x4x4x128xbf16, #tpu.memory_space<vmem>>, vector<1x4x4x128xbf16>
    tpu.vector_store %arg20[%c0_65, %c0_66, %c0_67, %c0_68], %79 {strides = array<i32>} : memref<1x4x4x128xbf16, #tpu.memory_space<vmem>>, vector<1x4x4x128xbf16>,
    %c0_69 = arith.constant 0 : index
    %c1_70 = arith.constant 1 : index
    %c1_71 = arith.constant 1 : index
    %c0_72 = arith.constant 0 : index
    %81 = vector.load %arg20[%c0_69, %c1_70, %c1_71, %c0_72] : memref<1x4x4x128xbf16, #tpu.memory_space<vmem>>, vector<1x2x2x128xbf16>
    tpu.vector_store %arg20[%c0_69, %c1_70, %c1_71, %c0_72], %78 {strides = array<i32>} : memref<1x4x4x128xbf16, #tpu.memory_space<vmem>>, vector<1x2x2x128xbf16>,
    %c0_73 = arith.constant 0 : index
    %c0_74 = arith.constant 0 : index
    %c0_75 = arith.constant 0 : index
    %c0_76 = arith.constant 0 : index
    %82 = vector.load %arg20[%c0_73, %c0_74, %c0_75, %c0_76] : memref<1x4x4x128xbf16, #tpu.memory_space<vmem>>, vector<1x4x4x128xbf16>
    %83 = vector.extract_strided_slice %82 {offsets = [0, 0, 0, 0], sizes = [1, 2, 2, 128], strides = [1, 1, 1, 1]} : vector<1x4x4x128xbf16> to vector<1x2x2x128xbf16>
    %84 = vector.extract_strided_slice %82 {offsets = [0, 0, 1, 0], sizes = [1, 2, 2, 128], strides = [1, 1, 1, 1]} : vector<1x4x4x128xbf16> to vector<1x2x2x128xbf16>
    %85 = vector.extract_strided_slice %82 {offsets = [0, 0, 2, 0], sizes = [1, 2, 2, 128], strides = [1, 1, 1, 1]} : vector<1x4x4x128xbf16> to vector<1x2x2x128xbf16>
    %86 = vector.extract_strided_slice %82 {offsets = [0, 1, 0, 0], sizes = [1, 2, 2, 128], strides = [1, 1, 1, 1]} : vector<1x4x4x128xbf16> to vector<1x2x2x128xbf16>
    %87 = vector.extract_strided_slice %82 {offsets = [0, 1, 1, 0], sizes = [1, 2, 2, 128], strides = [1, 1, 1, 1]} : vector<1x4x4x128xbf16> to vector<1x2x2x128xbf16>
    %88 = vector.extract_strided_slice %82 {offsets = [0, 1, 2, 0], sizes = [1, 2, 2, 128], strides = [1, 1, 1, 1]} : vector<1x4x4x128xbf16> to vector<1x2x2x128xbf16>
    %89 = vector.extract_strided_slice %82 {offsets = [0, 2, 0, 0], sizes = [1, 2, 2, 128], strides = [1, 1, 1, 1]} : vector<1x4x4x128xbf16> to vector<1x2x2x128xbf16>
    %90 = vector.extract_strided_slice %82 {offsets = [0, 2, 1, 0], sizes = [1, 2, 2, 128], strides = [1, 1, 1, 1]} : vector<1x4x4x128xbf16> to vector<1x2x2x128xbf16>
    %91 = vector.extract_strided_slice %82 {offsets = [0, 2, 2, 0], sizes = [1, 2, 2, 128], strides = [1, 1, 1, 1]} : vector<1x4x4x128xbf16> to vector<1x2x2x128xbf16>
    %92 = tpu.concatenate %83, %84, %85, %86, %87, %88, %89, %90, %91 in 3 : vector<1x2x2x128xbf16>, vector<1x2x2x128xbf16>, vector<1x2x2x128xbf16>, vector<1x2x2x128xbf16>, vector<1x2x2x128xbf16>, vector<1x2x2x128xbf16>, vector<1x2x2x128xbf16>, vector<1x2x2x128xbf16>, vector<1x2x2x128xbf16> -> vector<1x2x2x1152xbf16>
    %93 = vector.shape_cast %92 : vector<1x2x2x1152xbf16> to vector<4x1152xbf16>
    %c0_77 = arith.constant 0 : index
    %c0_78 = arith.constant 0 : index
    %94 = vector.load %arg8[%c0_77, %c0_78] : memref<1152x256xbf16, #tpu.memory_space<vmem>>, vector<1152x256xbf16>
    %cst_79 = arith.constant dense<0.000000e+00> : vector<4x256xf32>
    %95 = tpu.matmul %93, %94, %cst_79 {dimension_numbers = #tpu.dot_dimension_numbers<[1], [0], [0], [1], [0, 0, 1, 1], [], []>} : vector<4x1152xbf16>, vector<1152x256xbf16>, vector<4x256xf32> -> vector<4x256xf32>
    %c0_80 = arith.constant 0 : index
    %c0_81 = arith.constant 0 : index
    %96 = vector.load %arg9[%c0_80, %c0_81] : memref<1x256xf32, #tpu.memory_space<vmem>>, vector<1x256xf32>
    %97 = vector.broadcast %96 : vector<1x256xf32> to vector<4x256xf32>
    %98 = arith.addf %95, %97 : vector<4x256xf32>
    %cst_82 = arith.constant 0.000000e+00 : f32
    %99 = vector.broadcast %cst_82 : f32 to vector<4x256xf32>
    %100 = arith.maximumf %98, %99 : vector<4x256xf32>
    %101 = vector.shape_cast %100 : vector<4x256xf32> to vector<1x1x2x1x2x256xf32>
    %cst_83 = arith.constant dense<0xFF800000> : vector<1x1x2x1x256xf32>
    %102 = vector.multi_reduction <maximumf>, %101, %cst_83 [4] : vector<1x1x2x1x2x256xf32> to vector<1x1x2x1x256xf32>
    %cst_84 = arith.constant dense<0xFF800000> : vector<1x1x1x256xf32>
    %103 = vector.multi_reduction <maximumf>, %102, %cst_84 [2] : vector<1x1x2x1x256xf32> to vector<1x1x1x256xf32>
    %104 = arith.truncf %103 : vector<1x1x1x256xf32> to vector<1x1x1x256xbf16>
    %105 = vector.shape_cast %104 : vector<1x1x1x256xbf16> to vector<1x256xbf16>
    %c0_85 = arith.constant 0 : index
    %c0_86 = arith.constant 0 : index
    %106 = vector.load %arg10[%c0_85, %c0_86] : memref<256x1024xbf16, #tpu.memory_space<vmem>>, vector<256x1024xbf16>
    %cst_87 = arith.constant dense<0.000000e+00> : vector<1x1024xf32>
    %107 = tpu.matmul %105, %106, %cst_87 {dimension_numbers = #tpu.dot_dimension_numbers<[1], [0], [0], [1], [0, 0, 1, 1], [], []>} : vector<1x256xbf16>, vector<256x1024xbf16>, vector<1x1024xf32> -> vector<1x1024xf32>
    %c0_88 = arith.constant 0 : index
    %c0_89 = arith.constant 0 : index
    %108 = vector.load %arg11[%c0_88, %c0_89] : memref<1x1024xf32, #tpu.memory_space<vmem>>, vector<1x1024xf32>
    %109 = arith.addf %107, %108 : vector<1x1024xf32>
    %cst_90 = arith.constant 0.000000e+00 : f32
    %110 = vector.broadcast %cst_90 : f32 to vector<1x1024xf32>
    %111 = arith.maximumf %109, %110 : vector<1x1024xf32>
    %112 = arith.truncf %111 : vector<1x1024xf32> to vector<1x1024xbf16>
    %c0_91 = arith.constant 0 : index
    %c0_92 = arith.constant 0 : index
    %113 = vector.load %arg12[%c0_91, %c0_92] : memref<1024x512xbf16, #tpu.memory_space<vmem>>, vector<1024x512xbf16>
    %cst_93 = arith.constant dense<0.000000e+00> : vector<1x512xf32>
    %114 = tpu.matmul %112, %113, %cst_93 {dimension_numbers = #tpu.dot_dimension_numbers<[1], [0], [0], [1], [0, 0, 1, 1], [], []>} : vector<1x1024xbf16>, vector<1024x512xbf16>, vector<1x512xf32> -> vector<1x512xf32>
    %c0_94 = arith.constant 0 : index
    %c0_95 = arith.constant 0 : index
    %115 = vector.load %arg13[%c0_94, %c0_95] : memref<1x512xf32, #tpu.memory_space<vmem>>, vector<1x512xf32>
    %116 = arith.addf %114, %115 : vector<1x512xf32>
    %cst_96 = arith.constant 0.000000e+00 : f32
    %117 = vector.broadcast %cst_96 : f32 to vector<1x512xf32>
    %118 = arith.maximumf %116, %117 : vector<1x512xf32>
    %119 = arith.truncf %118 : vector<1x512xf32> to vector<1x512xbf16>
    %c0_97 = arith.constant 0 : index
    %c0_98 = arith.constant 0 : index
    %120 = vector.load %arg14[%c0_97, %c0_98] : memref<512x128xbf16, #tpu.memory_space<vmem>>, vector<512x128xbf16>
    %cst_99 = arith.constant dense<0.000000e+00> : vector<1x128xf32>
    %121 = tpu.matmul %119, %120, %cst_99 {dimension_numbers = #tpu.dot_dimension_numbers<[1], [0], [0], [1], [0, 0, 1, 1], [], []>} : vector<1x512xbf16>, vector<512x128xbf16>, vector<1x128xf32> -> vector<1x128xf32>
    %c0_100 = arith.constant 0 : index
    %c0_101 = arith.constant 0 : index
    %122 = vector.load %arg15[%c0_100, %c0_101] : memref<1x128xf32, #tpu.memory_space<vmem>>, vector<1x128xf32>
    %123 = arith.addf %121, %122 : vector<1x128xf32>
    %124 = vector.shape_cast %123 : vector<1x128xf32> to vector<1x1x128xf32>
    %c0_102 = arith.constant 0 : index
    %c0_103 = arith.constant 0 : index
    %c0_104 = arith.constant 0 : index
    %125 = vector.load %arg16[%c0_102, %c0_103, %c0_104] : memref<1x1x128xf32, #tpu.memory_space<vmem>>, vector<1x1x128xf32>
    tpu.vector_store %arg16[%c0_102, %c0_103, %c0_104], %124 {strides = array<i32>} : memref<1x1x128xf32, #tpu.memory_space<vmem>>, vector<1x1x128xf32>,
    return
  }
  func.func @transform_0(%arg0: i32) -> (i32, i32, i32, i32) {
    %c0_i32 = arith.constant 0 : i32
    %c0_i32_0 = arith.constant 0 : i32
    %c0_i32_1 = arith.constant 0 : i32
    %c0_i32_2 = arith.constant 0 : i32
    return %arg0, %c0_i32, %c0_i32_0, %c0_i32_1 : i32, i32, i32, i32
  }
  func.func @transform_1(%arg0: i32) -> (i32, i32) {
    %c0_i32 = arith.constant 0 : i32
    %c0_i32_0 = arith.constant 0 : i32
    %c0_i32_1 = arith.constant 0 : i32
    return %c0_i32, %c0_i32_0 : i32, i32
  }
  func.func @transform_2(%arg0: i32) -> (i32, i32) {
    %c0_i32 = arith.constant 0 : i32
    %c0_i32_0 = arith.constant 0 : i32
    %c0_i32_1 = arith.constant 0 : i32
    return %c0_i32, %c0_i32_0 : i32, i32
  }
  func.func @transform_3(%arg0: i32) -> (i32, i32) {
    %c0_i32 = arith.constant 0 : i32
    %c0_i32_0 = arith.constant 0 : i32
    %c0_i32_1 = arith.constant 0 : i32
    return %c0_i32, %c0_i32_0 : i32, i32
  }
  func.func @transform_4(%arg0: i32) -> (i32, i32) {
    %c0_i32 = arith.constant 0 : i32
    %c0_i32_0 = arith.constant 0 : i32
    %c0_i32_1 = arith.constant 0 : i32
    return %c0_i32, %c0_i32_0 : i32, i32
  }
  func.func @transform_5(%arg0: i32) -> (i32, i32) {
    %c0_i32 = arith.constant 0 : i32
    %c0_i32_0 = arith.constant 0 : i32
    %c0_i32_1 = arith.constant 0 : i32
    return %c0_i32, %c0_i32_0 : i32, i32
  }
  func.func @transform_6(%arg0: i32) -> (i32, i32) {
    %c0_i32 = arith.constant 0 : i32
    %c0_i32_0 = arith.constant 0 : i32
    %c0_i32_1 = arith.constant 0 : i32
    return %c0_i32, %c0_i32_0 : i32, i32
  }
  func.func @transform_7(%arg0: i32) -> (i32, i32) {
    %c0_i32 = arith.constant 0 : i32
    %c0_i32_0 = arith.constant 0 : i32
    %c0_i32_1 = arith.constant 0 : i32
    return %c0_i32, %c0_i32_0 : i32, i32
  }
  func.func @transform_8(%arg0: i32) -> (i32, i32) {
    %c0_i32 = arith.constant 0 : i32
    %c0_i32_0 = arith.constant 0 : i32
    %c0_i32_1 = arith.constant 0 : i32
    return %c0_i32, %c0_i32_0 : i32, i32
  }
  func.func @transform_9(%arg0: i32) -> (i32, i32) {
    %c0_i32 = arith.constant 0 : i32
    %c0_i32_0 = arith.constant 0 : i32
    %c0_i32_1 = arith.constant 0 : i32
    return %c0_i32, %c0_i32_0 : i32, i32
  }
  func.func @transform_10(%arg0: i32) -> (i32, i32) {
    %c0_i32 = arith.constant 0 : i32
    %c0_i32_0 = arith.constant 0 : i32
    %c0_i32_1 = arith.constant 0 : i32
    return %c0_i32, %c0_i32_0 : i32, i32
  }
  func.func @transform_11(%arg0: i32) -> (i32, i32) {
    %c0_i32 = arith.constant 0 : i32
    %c0_i32_0 = arith.constant 0 : i32
    %c0_i32_1 = arith.constant 0 : i32
    return %c0_i32, %c0_i32_0 : i32, i32
  }
  func.func @transform_12(%arg0: i32) -> (i32, i32) {
    %c0_i32 = arith.constant 0 : i32
    %c0_i32_0 = arith.constant 0 : i32
    %c0_i32_1 = arith.constant 0 : i32
    return %c0_i32, %c0_i32_0 : i32, i32
  }
  func.func @transform_13(%arg0: i32) -> (i32, i32) {
    %c0_i32 = arith.constant 0 : i32
    %c0_i32_0 = arith.constant 0 : i32
    %c0_i32_1 = arith.constant 0 : i32
    return %c0_i32, %c0_i32_0 : i32, i32
  }
  func.func @transform_14(%arg0: i32) -> (i32, i32) {
    %c0_i32 = arith.constant 0 : i32
    %c0_i32_0 = arith.constant 0 : i32
    %c0_i32_1 = arith.constant 0 : i32
    return %c0_i32, %c0_i32_0 : i32, i32
  }
  func.func @transform_15(%arg0: i32) -> (i32, i32, i32) {
    %c0_i32 = arith.constant 0 : i32
    %c0_i32_0 = arith.constant 0 : i32
    %c0_i32_1 = arith.constant 0 : i32
    return %arg0, %c0_i32, %c0_i32_0 : i32, i32, i32
  }
}

</mosaic_0001>

<bundles_post_ra>
// kernel: cnn_forward.1
= control target key start
LH: loop header
LB: loop body
LE: loop exit
PB: predicated region body
PF: predicated region fallthrough
CT: control target
= control target key end

     0   :  { %s16802_s0 = inlined_call_operand.vmem [shape: bf16[2,16,16,3], index: 0, kind: input, shape index: {}]   ;;  %s16803_s1 = inlined_call_operand.vmem [shape: bf16[27,32], index: 1, kind: input, shape index: {}]   ;;  %s16804_s2 = inlined_call_operand.vmem [shape: f32[1,32], index: 2, kind: input, shape index: {}]   ;;  %s16805_s3 = inlined_call_operand.vmem [shape: bf16[288,64], index: 3, kind: input, shape index: {}]   ;;  %s16806_s4 = inlined_call_operand.vmem [shape: f32[1,64], index: 4, kind: input, shape index: {}]   ;;  %s16807_s5 = inlined_call_operand.vmem [shape: bf16[576,128], index: 5, kind: input, shape index: {}]   ;;  %s16808_s6 = inlined_call_operand.vmem [shape: f32[1,128], index: 6, kind: input, shape index: {}]   ;;  %s16809_s7 = inlined_call_operand.hbm [shape: bf16[1152,256], index: 7, kind: input, shape index: {}]   ;;  %s16810_s8 = inlined_call_operand.vmem [shape: f32[1,256], index: 8, kind: input, shape index: {}]   ;;  %s16811_s9 = inlined_call_operand.hbm [shape: bf16[256,1024], index: 9, kind: input, shape index: {}]   ;;  %s16812_s10 = inlined_call_operand.vmem [shape: f32[1,1024], index: 10, kind: input, shape index: {}]   ;;  %s16813_s11 = inlined_call_operand.hbm [shape: bf16[1024,512], index: 11, kind: input, shape index: {}]   ;;  %s16814_s12 = inlined_call_operand.vmem [shape: f32[1,512], index: 12, kind: input, shape index: {}]   ;;  %s16815_s13 = inlined_call_operand.vmem [shape: bf16[512,128], index: 13, kind: input, shape index: {}]   ;;  %s16816_s14 = inlined_call_operand.vmem [shape: f32[1,128], index: 14, kind: input, shape index: {}]   ;;  %s16817_s15 = inlined_call_operand.hbm [shape: f32[2,1,128], index: 15, kind: output, shape index: {}]  }
   0x1   :  { %16831 = sst [smem:[#allocation24_spill]] %s16811_s9 }
   0x2   :  { %16832 = sst [smem:[#allocation25_spill]] %s16816_s14 }
   0x3   :  { %16833 = sst [smem:[#allocation26_spill]] %s16817_s15 }
   0x4   :  { %20 = vsyncpa [#allocation7], 0 }
   0x5   :  { %21 = vsyncpa [#allocation10], 0 }
   0x6   :  { %22 = vsyncpa [#allocation8], 0 }
   0x7   :  { %24 = vsyncpa [#allocation8 + $0x1], 0  ;;  %s13871_s18 = smov 0   ;;  %s13873_s19 = smov 0  }
   0x8   :  { %s13875_s20 = smov 0   ;;  %s13877_s21 = smov 0  }
   0x9 LB: > { %16834 = sst [smem:[#allocation16_spill]] %s13750_s18  ;;  %s13892_s22 = sadd.s32 4294967295, %s13762_s21   ;;  %s13762_s21 = sphi %s13877_s21, %s16876_s21   ;;  %s13758_s20 = sphi %s13875_s20, %s16879_s20   ;;  %s13754_s19 = sphi %s13873_s19, %s16878_s19   ;;  %s13750_s18 = sphi %s13871_s18, %s16877_s18  }
   0xa   : > { %16835 = sst [smem:[#allocation17_spill]] %s13754_s19  ;;  %s11566_s23 = sadd.s32 4294967294, %s13762_s21  }
   0xb   : > { %16836 = sst [smem:[#allocation18_spill]] %s13758_s20  ;;  %s13896_s24 = sadd.s32 1, %s13762_s21  }
   0xc   : > { %16837 = sst [smem:[#allocation19_spill]] %s13762_s21  ;;  %s357_s25 = sadd.s32 1, %s13758_s20 }
   0xd   : > { %16838 = sst [smem:[#allocation20_spill]] %s13896_s24  ;;  %s354_s26 = ssub.s32 %s13762_s21, %s13896_s24 }
   0xe   : > { %p367_p0 = scmp.ne.s32.totalorder %s13758_s20, %s13754_s19  ;;  %p355_p1 = scmp.eq.s32.totalorder %s354_s26, 0 }
   0xf   : > { %p368_p2 = scmp.eq.s32.totalorder %s13892_s22, 1  ;;  %p373_p3 = scmp.ne.s32.totalorder %s13754_s19, %s13750_s18 }
  0x10   : > { %p374_p4 = scmp.eq.s32.totalorder %s11566_s23, 1  ;;  %p11567_p7 = scmp.ge.s32.totalorder %s13762_s21, 1 }
  0x11   : > { %s13907_s27 = scalar_select %p355_p1, %s13758_s20, %s357_s25  }
  0x12   : > { %p13909_p5 = por %p368_p2, %p367_p0  ;;  %p13913_p6 = por %p374_p4, %p373_p3 }
  0x13   : > { %16839 = sst [smem:[#allocation21_spill]] %s13907_s27  ;;  %p381_p8 = scmp.lt.s32.totalorder %s13762_s21, 3 }
  0x14   : > { %s16840_s28 = scalar_select %p13909_p5, 1, 0 }
  0x15   : > { %s16842_s29 = scalar_select %p13913_p6, 1, 0 }
  0x16   : > { %16841 = sst [smem:[#allocation22_spill]] %s16840_s28  ;;  %p16824_p9 = scmp.eq.s32.totalorder %s13892_s22, 0 }
  0x17   : > { %16843 = sst [smem:[#allocation23_spill]] %s16842_s29  ;;  %p13920_p10 = pnand %p11567_p7, %p381_p8 }
  0x18   : > { %s13764_s16 = smov [#allocation9]   ;;  %s13765_s25 = smov [#allocation6]  }
  0x19   : > { %s16844_s30 = scalar_select %p13920_p10, 1, 0 }
  0x1a   : > { %s427_s17 = sshll.u32 %s13764_s16, 4  ;;  %p12758_p11 = pneg %p13920_p10  ;;  %s428_s17 = int_to_ptr.vmem [resolvable:$true] %s427_s17 }
  0x1b   : > { %s411_s26 = sshll.u32 %s13765_s25, 4  ;;  %s16846_s9 = sld [smem:[#allocation24_spill]]  ;;  %s13932_s26 = int_to_ptr.vmem [resolvable:$true] %s411_s26 }
  0x1c   : > { %p13928_p12 = pnand %p16824_p9, %p12758_p11 }
  0x1e   : > { %p13942_p0 = pneg %p13928_p12 }
  0x21   : > { %s13608_s24 = scalar_lea.hbm %s16846_s9, 16384 }
  0x22   : > { %p13609_p13 = scmp.ne.s32.totalorder %s16846_s9, %s13608_s24  ;;  %p13615_p3 = scmp.lt.u32.totalorder %s13608_s24, %s16846_s9 }
  0x24   : > { %p13611_p1 = pnand %p13942_p0, %p13609_p13 }
  0x26   : > { %p13612_p2 = pneg %p13611_p1 }
  0x28   : > { %p13617_p4 = pnand %p13615_p3, %p13612_p2 }
  0x2a   : > { %13620 = shalt.err (!%p13617_p4)
}
  0x2b   : > { %s13621_s20 = scalar_lea.vmem %s428_s17, 16384  ;;  %p13629_p9 = scmp.lt.s32.totalorder %s428_s17, %s428_s17 }
  0x2c   : > { %p13622_p7 = scmp.ne.s32.totalorder %s428_s17, %s13621_s20  ;;  %p13630_p6 = scmp.lt.s32.totalorder %s13621_s20, %s13621_s20 }
  0x2e   : > { %p13624_p8 = pnand %p13622_p7, %p13942_p0  ;;  %p13631_p5 = por %p13630_p6, %p13629_p9 }
  0x30   : > { %p13625_p11 = pneg %p13624_p8 }
  0x32   : > { %p13632_p10 = pnand %p13631_p5, %p13625_p11 }
  0x34   : > { %13635 = shalt.err (!%p13632_p10)
}
  0x35   : > { %s13766_s18 = smov 512   ;;  %s13767_s27 = smov 32  }
  0x36   : > { %12764 = dma.hbm_to_vmem [thread:$0]  (!%p13928_p12), %s16846_s9, 16384, %s428_s17, [#allocation10], %s13766_s18, %s13766_s18, %s13767_s27  }
  0x37   : > { %s13636_s15 = scalar_lea.hbm %s16809_s7, 18432 }
  0x38   : > { %p13637_p13 = scmp.ne.s32.totalorder %s16809_s7, %s13636_s15  ;;  %p13643_p9 = scmp.lt.u32.totalorder %s13636_s15, %s16809_s7 }
  0x3a   : > { %p13639_p5 = pnand %p13637_p13, %p13942_p0 }
  0x3c   : > { %p13640_p6 = pneg %p13639_p5 }
  0x3e   : > { %p13645_p10 = pnand %p13643_p9, %p13640_p6 }
  0x40   : > { %13648 = shalt.err (!%p13645_p10)
}
  0x41   : > { %s13649_s17 = scalar_lea.vmem %s13932_s26, 18432  ;;  %p13657_p4 = scmp.lt.s32.totalorder %s13932_s26, %s13932_s26 }
  0x42   : > { %p13650_p1 = scmp.ne.s32.totalorder %s13932_s26, %s13649_s17  ;;  %p13658_p7 = scmp.lt.s32.totalorder %s13649_s17, %s13649_s17 }
  0x44   : > { %p13652_p2 = pnand %p13650_p1, %p13942_p0  ;;  %p13659_p8 = por %p13658_p7, %p13657_p4 }
  0x46   : > { %p13653_p3 = pneg %p13652_p2 }
  0x48   : > { %p13660_p11 = pnand %p13659_p8, %p13653_p3 }
  0x4a   : > { %13663 = shalt.err (!%p13660_p11)
}
  0x4b   : > { %s13768_s14 = smov 128   ;;  %s13769_s15 = smov 8  }
  0x4c   : > { %12761 = dma.hbm_to_vmem [thread:$0]  (!%p13928_p12), %s16809_s7, 18432, %s13932_s26, [#allocation7], %s13768_s14, %s13768_s14, %s13769_s15  }
  0x4d   : > { %s13770_s18 = smov [#allocation11]   ;;  %s13664_s29 = scalar_lea.hbm %s16813_s11, 32768 }
  0x4e   : > { %s443_s27 = sshll.u32 %s13770_s18, 4  ;;  %p13665_p13 = scmp.ne.s32.totalorder %s16813_s11, %s13664_s29  ;;  %s444_s27 = int_to_ptr.vmem [resolvable:$true] %s443_s27 }
  0x4f   : > { %p13671_p9 = scmp.lt.u32.totalorder %s13664_s29, %s16813_s11 }
  0x50   : > { %p13667_p5 = pnand %p13665_p13, %p13942_p0 }
  0x52   : > { %p13668_p6 = pneg %p13667_p5 }
  0x54   : > { %p13673_p10 = pnand %p13671_p9, %p13668_p6 }
  0x56   : > { %13676 = shalt.err (!%p13673_p10)
}
  0x57   : > { %s13677_s26 = scalar_lea.vmem %s444_s27, 32768  ;;  %p13685_p4 = scmp.lt.s32.totalorder %s444_s27, %s444_s27 }
  0x58   : > { %p13678_p1 = scmp.ne.s32.totalorder %s444_s27, %s13677_s26  ;;  %p13686_p7 = scmp.lt.s32.totalorder %s13677_s26, %s13677_s26 }
  0x5a   : > { %p13680_p2 = pnand %p13678_p1, %p13942_p0  ;;  %p13687_p8 = por %p13686_p7, %p13685_p4 }
  0x5c   : > { %p13681_p3 = pneg %p13680_p2 }
  0x5e   : > { %p13688_p11 = pnand %p13687_p8, %p13681_p3 }
  0x60   : > { %13691 = shalt.err (!%p13688_p11)
}
  0x61   : > { %s13771_s14 = smov 256   ;;  %s13772_s15 = smov 16  }
  0x62   : > { %12767 = dma.hbm_to_vmem [thread:$0]  (!%p13928_p12), %s16813_s11, 32768, %s444_s27, [#allocation10], %s13771_s14, %s13771_s14, %s13772_s15  }
  0x63   : > { %p16848_p13 = scmp.ne.s32.totalorder %s16844_s30, 0 }
  0x64   : > { %p16849_p5 = scmp.eq.s32.totalorder (!%p16848_p13), %s13892_s22, 0 }
  0x65   : > { %476 = sbr.rel (%p16848_p13) target bundleno = 3204 (0xc84), region = 80 }
  0x6c   : > { %13737 = dma.done.wait (%p16849_p5), [#allocation7], 18432   ;;  %p16850_p0 = pmov %p16849_p5 }
  0x6e   : > { %13739 = vsyncadd (%p16850_p0), [#allocation7], 4294948864  ;;  %p16851_p6 = pmov %p16850_p0 }
  0x6f   : > { %p16852_p9 = pmov %p16850_p0 }
  0x70   : > { %13741 = dma.done.wait (%p16851_p6), [#allocation10], 49152  }
  0x71   : > { %13743 = vsyncadd (%p16852_p9), [#allocation10], 4294918144  ;;  %vm569_vm0 = vcmask 19456   ;;  %vm572_vm1 = vcmask 16384   ;;  %v13773_v0 = vmov 0   ;;  %p531_p12 = scmp.lt.s32.totalorder %s13892_s22, 1 }
  0x72   : > { %570 = vst.msk [vmem:[#allocation2] sm:$0xf] %vm569_vm0, %v13773_v0  ;;  %571 = vst.msk [vmem:[#allocation2 + $0x4] sm:$0xf] %vm569_vm0, %v13773_v0  ;;  %vm1473_vm2 = vcmask 1046528   ;;  %s13774_s27 = smov 6  }
  0x73   : > { %573 = vst.msk [vmem:[#allocation2 + $0x8] sm:$0x1] %vm572_vm1, %v13773_v0  ;;  %576 = vst.msk [vmem:[#allocation2 + $0x14] sm:$0x1] %vm572_vm1, %v13773_v0  ;;  %s532_s30 = scalar_select %p531_p12, %s13892_s22, 1  ;;  %vm2111_vm10 = vcmask 1044480  }
  0x74   : > { %574 = vst.msk [vmem:[#allocation2 + $0xc] sm:$0xf] %vm569_vm0, %v13773_v0  ;;  %575 = vst.msk [vmem:[#allocation2 + $0x10] sm:$0xf] %vm569_vm0, %v13773_v0  ;;  %vm1248_vm3 = vsmask.f32 7424 }
  0x75   : > { %577 = vst.msk [vmem:[#allocation2 + $0x18] sm:$0xf] %vm569_vm0, %v13773_v0  ;;  %578 = vst.msk [vmem:[#allocation2 + $0x1c] sm:$0xf] %vm569_vm0, %v13773_v0  ;;  %s12388_s23 = sshll.u32 %s532_s30, 7  ;;  %s13775_s21 = smov 3  }
  0x76   : > { %579 = vst.msk [vmem:[#allocation2 + $0x20] sm:$0x1] %vm572_vm1, %v13773_v0  ;;  %582 = vst.msk [vmem:[#allocation2 + $0x2c] sm:$0x1] %vm572_vm1, %v13773_v0  ;;  %vm625_vm4 = vsmask.f32 256  ;;  %s14126_s18 = scalar_lea.vmem %s16802_s0, %s12388_s23 }
  0x77   : > { %580 = vst.msk [vmem:[#allocation2 + $0x24] sm:$0xf] %vm569_vm0, %v13773_v0  ;;  %581 = vst.msk [vmem:[#allocation2 + $0x28] sm:$0xf] %vm569_vm0, %v13773_v0  ;;  %vm626_vm5 = vsmask.f32 4368 }
  0x78   : > { %583 = vst.msk [vmem:[#allocation2 + $0x30] sm:$0xf] %vm569_vm0, %v13773_v0  ;;  %584 = vst.msk [vmem:[#allocation2 + $0x34] sm:$0xf] %vm569_vm0, %v13773_v0  ;;  %v539_v3 = vld [vmem:[%s14126_s18 + $0x8] sm:$0xf] }
  0x79   : > { %585 = vst.msk [vmem:[#allocation2 + $0x38] sm:$0x1] %vm572_vm1, %v13773_v0  ;;  %588 = vst.msk [vmem:[#allocation2 + $0x44] sm:$0x1] %vm572_vm1, %v13773_v0  ;;  %v12837_v1 = vld [vmem:[#allocation2] sm:$0xff]   ;;  %v646_v5 = vshrl.u32 %v539_v3, 16 }
  0x7a   : > { %586 = vst.msk [vmem:[#allocation2 + $0x3c] sm:$0xf] %vm569_vm0, %v13773_v0  ;;  %587 = vst.msk [vmem:[#allocation2 + $0x40] sm:$0xf] %vm569_vm0, %v13773_v0  ;;  %v540_v4 = vld [vmem:[%s14126_s18 + $0xc] sm:$0xf] }
  0x7b   : > { %589 = vst.msk [vmem:[#allocation2 + $0x48] sm:$0xf] %vm569_vm0, %v13773_v0  ;;  %590 = vst.msk [vmem:[#allocation2 + $0x4c] sm:$0xf] %vm569_vm0, %v13773_v0  ;;  %v649_v6 = vshll.u32 %v539_v3, 16  ;;  %v1474_v7 = vrot.slane %v12837_v1, 1 }
  0x7c   : > { %591 = vst.msk [vmem:[#allocation2 + $0x50] sm:$0x1] %vm572_vm1, %v13773_v0  ;;  %594 = vst.msk [vmem:[#allocation2 + $0x5c] sm:$0x1] %vm572_vm1, %v13773_v0  ;;  %vm950_vm6 = vsmask.f32 7938 }
  0x7d   : > { %592 = vst.msk [vmem:[#allocation2 + $0x54] sm:$0xf] %vm569_vm0, %v13773_v0  ;;  %593 = vst.msk [vmem:[#allocation2 + $0x58] sm:$0xf] %vm569_vm0, %v13773_v0  ;;  %v1250_v9 = vshrl.u32 %v12837_v1, 16  ;;  %v1252_v10 = vshll.u32 %v12837_v1, 16 }
  0x7e   : > { %595 = vst.msk [vmem:[#allocation2 + $0x60] sm:$0xf] %vm569_vm0, %v13773_v0  ;;  %596 = vst.msk [vmem:[#allocation2 + $0x64] sm:$0xf] %vm569_vm0, %v13773_v0  ;;  %v537_v11 = vld [vmem:[%s14126_s18] sm:$0xf] }
  0x7f   : > { %597 = vst.msk [vmem:[#allocation2 + $0x68] sm:$0x1] %vm572_vm1, %v13773_v0  ;;  %600 = vst.msk [vmem:[#allocation2 + $0x74] sm:$0x1] %vm572_vm1, %v13773_v0  ;;  %v648_v13 = vrot.slane %v646_v5, 7  ;;  %v654_v14 = vshrl.u32 %v540_v4, 16 }
  0x80   : > { %598 = vst.msk [vmem:[#allocation2 + $0x6c] sm:$0xf] %vm569_vm0, %v13773_v0  ;;  %599 = vst.msk [vmem:[#allocation2 + $0x70] sm:$0xf] %vm569_vm0, %v13773_v0  ;;  %v657_v15 = vshll.u32 %v540_v4, 16  ;;  %v1254_v18 = vrot.slane %v1252_v10, 1 }
  0x81   : > { %601 = vst.msk [vmem:[#allocation2 + $0x78] sm:$0xf] %vm569_vm0, %v13773_v0  ;;  %602 = vst.msk [vmem:[#allocation2 + $0x7c] sm:$0xf] %vm569_vm0, %v13773_v0  ;;  %v538_v16 = vld [vmem:[%s14126_s18 + $0x4] sm:$0xf]  ;;  %v651_v24 = vor.u32 %v649_v6, %v648_v13 }
  0x82   : > { %603 = vst.msk [vmem:[#allocation2 + $0x80] sm:$0x1] %vm572_vm1, %v13773_v0  ;;  %606 = vst.msk [vmem:[#allocation2 + $0x8c] sm:$0x1] %vm572_vm1, %v13773_v0  ;;  %v961_v20 = vld [vmem:[#allocation2 + $0x18] sm:$0xf]  ;;  %v1255_v28 = vor.u32 %v1254_v18, %v1250_v9 }
  0x83   : > { %604 = vst.msk [vmem:[#allocation2 + $0x84] sm:$0xf] %vm569_vm0, %v13773_v0  ;;  %605 = vst.msk [vmem:[#allocation2 + $0x88] sm:$0xf] %vm569_vm0, %v13773_v0  ;;  %v629_v21 = vshrl.u32 %v537_v11, 16  ;;  %v632_v22 = vshll.u32 %v537_v11, 16 }
  0x84   : > { %607 = vst.msk [vmem:[#allocation2 + $0x90] sm:$0xf] %vm569_vm0, %v13773_v0  ;;  %608 = vst.msk [vmem:[#allocation2 + $0x94] sm:$0xf] %vm569_vm0, %v13773_v0  ;;  %v652_v25 = vrot.slane %v648_v13, 4  ;;  %v656_v26 = vrot.slane %v654_v14, 7 }
  0x85   : > { %609 = vst.msk [vmem:[#allocation2 + $0x98] sm:$0x1] %vm572_vm1, %v13773_v0  ;;  %612 = vst.msk [vmem:[#allocation2 + $0xa4] sm:$0x1] %vm572_vm1, %v13773_v0  ;;  %v541_v27 = vld [vmem:[%s14126_s18 + $0x10] sm:$0xf] }
  0x86   : > { %610 = vst.msk [vmem:[#allocation2 + $0x9c] sm:$0xf] %vm569_vm0, %v13773_v0  ;;  %611 = vst.msk [vmem:[#allocation2 + $0xa0] sm:$0xf] %vm569_vm0, %v13773_v0  ;;  %v631_v30 = vrot.slane %v629_v21, 7  ;;  %v637_v31 = vshrl.u32 %v538_v16, 16  ;;  %v659_v34 = vor.u32 %v657_v15, %v656_v26 }
  0x87   : > { %613 = vst.msk [vmem:[#allocation2 + $0xa8] sm:$0xf] %vm569_vm0, %v13773_v0  ;;  %614 = vst.msk [vmem:[#allocation2 + $0xac] sm:$0xf] %vm569_vm0, %v13773_v0  ;;  %v640_v32 = vshll.u32 %v538_v16, 16  ;;  %v663_v37 = vshrl.u32 %v541_v27, 16 }
  0x88   : > { %615 = vst.msk [vmem:[#allocation2 + $0xb0] sm:$0x1] %vm572_vm1, %v13773_v0  ;;  %618 = vst.msk [vmem:[#allocation2 + $0xbc] sm:$0x1] %vm572_vm1, %v13773_v0  ;;  %v542_v33 = vld [vmem:[%s14126_s18 + $0x14] sm:$0xf]  ;;  %v634_v40 = vor.u32 %v632_v22, %v631_v30 }
  0x89   : > { %616 = vst.msk [vmem:[#allocation2 + $0xb4] sm:$0xf] %vm569_vm0, %v13773_v0  ;;  %617 = vst.msk [vmem:[#allocation2 + $0xb8] sm:$0xf] %vm569_vm0, %v13773_v0  ;;  %v952_v36 = vld [vmem:[#allocation2 + $0xc] sm:$0xf] }
  0x8a   : > { %619 = vst.msk [vmem:[#allocation2 + $0xc0] sm:$0xf] %vm569_vm0, %v13773_v0  ;;  %620 = vst.msk [vmem:[#allocation2 + $0xc4] sm:$0xf] %vm569_vm0, %v13773_v0  ;;  %v666_v38 = vshll.u32 %v541_v27, 16  ;;  %v635_v41 = vrot.slane %v631_v30, 4 }
  0x8b   : > { %621 = vst.msk [vmem:[#allocation2 + $0xc8] sm:$0x1] %vm572_vm1, %v13773_v0  ;;  %624 = vst.msk [vmem:[#allocation2 + $0xd4] sm:$0x1] %vm572_vm1, %v13773_v0  ;;  %v639_v42 = vrot.slane %v637_v31, 7  ;;  %v665_v46 = vrot.slane %v663_v37, 7 }
  0x8c   : > { %622 = vst.msk [vmem:[#allocation2 + $0xcc] sm:$0xf] %vm569_vm0, %v13773_v0  ;;  %623 = vst.msk [vmem:[#allocation2 + $0xd0] sm:$0xf] %vm569_vm0, %v13773_v0  ;;  %v958_v43 = vld [vmem:[#allocation2 + $0x14] sm:$0x1] }
  0x8d   : > { %6729 = vst [vmem:[#allocation5] sm:$0x3] %v13773_v0  ;;  %6730 = vst [vmem:[#allocation5 + $0x2] sm:$0x3] %v13773_v0  ;;  %v965_v44 = vld [vmem:[#allocation2 + $0x20] sm:$0x1]  ;;  %v642_v51 = vor.u32 %v640_v32, %v639_v42  ;;  %v668_v56 = vor.u32 %v666_v38, %v665_v46 }
  0x8e   : > { %6731 = vst [vmem:[#allocation5 + $0x4] sm:$0x3] %v13773_v0  ;;  %6732 = vst [vmem:[#allocation5 + $0x6] sm:$0x3] %v13773_v0  ;;  %v671_v47 = vshrl.u32 %v542_v33, 16  ;;  %v674_v48 = vshll.u32 %v542_v33, 16 }
  0x8f   : > { %v12838_v2 = vld [vmem:[#allocation2 + $0x8] ss:$0 sps:$4 sm:$0x11]   ;;  %vm14135_vm7 = vmand %vm569_vm0, %vm950_vm6  ;;  %v543_v50 = vld [vmem:[%s14126_s18 + $0x18] sm:$0xf]  ;;  %v644_v54 = vrot.slane %v639_v42, 4 }
  0x90   : > { %v1475_v8 = vrot.slane %v12838_v2, 1  ;;  %v1257_v12 = vshll.u32 %v12838_v2, 16  ;;  %vm14143_vm8 = vmor %vm625_vm4, %vm626_vm5  ;;  %v962_v35 = vsel %vm14135_vm7, %v651_v24, %v961_v20  ;;  %v953_v52 = vsel %vm14135_vm7, %v634_v40, %v952_v36  ;;  %v968_v53 = vld [vmem:[#allocation2 + $0x24] sm:$0xf]  ;;  %v544_v59 = vld [vmem:[%s14126_s18 + $0x1c] sm:$0xf] }
  0x91   : > { %963 = vst [vmem:[#allocation2 + $0x18] sm:$0xf] %v962_v35  ;;  %v660_v45 = vsel %vm14143_vm8, %v652_v25, %v659_v34  ;;  %vm14156_vm9 = vmand %vm572_vm1, %vm625_vm4  ;;  %v661_v55 = vrot.slane %v656_v26, 4  ;;  %v669_v57 = vrot.slane %v665_v46, 4  ;;  %v673_v58 = vrot.slane %v671_v47, 7  ;;  %s13776_s24 = smov 9  }
  0x92   : > { %v1476_v17 = vsel %vm1473_vm2, %v1474_v7, %v1475_v8  ;;  %v1259_v23 = vrot.slane %v1257_v12, 1  ;;  %964 = vst.msk [vmem:[#allocation2 + $0x1c] sm:$0xf] %vm569_vm0, %v660_v45  ;;  %954 = vst [vmem:[#allocation2 + $0xc] sm:$0xf] %v953_v52  ;;  %v680_v60 = vshrl.u32 %v543_v50, 16  ;;  %v643_v61 = vsel %vm14143_vm8, %v635_v41, %v642_v51 }
  0x93   : > { %1522 = vrot.lane.b32.xlu1 %v1476_v17, %s13774_s27  ;;  %v959_v62 = vsel %vm14156_vm9, %v644_v54, %v958_v43  ;;  %v966_v63 = vsel %vm14156_vm9, %v661_v55, %v965_v44  ;;  %v972_v1 = vld [vmem:[#allocation2 + $0x2c] sm:$0x1]  ;;  %v683_v2 = vshll.u32 %v543_v50, 16  ;;  %v545_v3 = vld [vmem:[%s14126_s18 + $0x20] sm:$0xf]  ;;  %v676_v4 = vor.u32 %v674_v48, %v673_v58  ;;  %s13777_s29 = smov 18  }
  0x94   : > { %v1260_v39 = vsel %vm1248_vm3, %v1255_v28, %v1259_v23  ;;  %955 = vst.msk [vmem:[#allocation2 + $0x10] sm:$0xf] %vm569_vm0, %v643_v61  ;;  %v969_v5 = vsel %vm14135_vm7, %v668_v56, %v968_v53  ;;  %960 = vst [vmem:[#allocation2 + $0x14] sm:$0x1] %v959_v62  ;;  %v678_v6 = vrot.slane %v673_v58, 4  ;;  %v682_v7 = vrot.slane %v680_v60, 7 }
  0x95   : > { %1441 = vrot.lane.b32.xlu0 %v1260_v39, %s13775_s21  ;;  %967 = vst [vmem:[#allocation2 + $0x20] sm:$0x1] %v966_v63  ;;  %v975_v8 = vld [vmem:[#allocation2 + $0x30] sm:$0xf]  ;;  %v546_v9 = vld [vmem:[%s14126_s18 + $0x24] sm:$0xf]  ;;  %v677_v15 = vsel %vm14143_vm8, %v669_v57, %v676_v4 }
  0x96   : > { %970 = vst [vmem:[#allocation2 + $0x24] sm:$0xf] %v969_v5  ;;  %v688_v10 = vshrl.u32 %v544_v59, 16  ;;  %v691_v11 = vshll.u32 %v544_v59, 16  ;;  %v697_v12 = vshrl.u32 %v545_v3, 16  ;;  %v700_v13 = vshll.u32 %v545_v3, 16 }
  0x97   : > { %v551_v14 = vld [vmem:[%s14126_s18 + $0x38] sm:$0xf]  ;;  %v973_v16 = vsel %vm14156_vm9, %v678_v6, %v972_v1  ;;  %v685_v17 = vor.u32 %v683_v2, %v682_v7  ;;  %971 = vst.msk [vmem:[#allocation2 + $0x28] sm:$0xf] %vm569_vm0, %v677_v15  ;;  %v686_v20 = vrot.slane %v682_v7, 4  ;;  %v705_v23 = vshrl.u32 %v546_v9, 16 }
  0x98   : > { %v979_v18 = vld [vmem:[#allocation2 + $0x38] sm:$0x1]  ;;  %974 = vst [vmem:[#allocation2 + $0x2c] sm:$0x1] %v973_v16  ;;  %v690_v21 = vrot.slane %v688_v10, 7  ;;  %v699_v22 = vrot.slane %v697_v12, 7 }
  0x99   : > { %v982_v24 = vld [vmem:[#allocation2 + $0x3c] sm:$0xf]  ;;  %v976_v26 = vsel %vm14135_vm7, %v685_v17, %v975_v8  ;;  %v708_v27 = vshll.u32 %v546_v9, 16  ;;  %v748_v28 = vshrl.u32 %v551_v14, 16  ;;  %v751_v33 = vshll.u32 %v551_v14, 16  ;;  %s13778_s25 = smov 15  }
  0x9a   : > { %v14182_v25 = vld [vmem:[#allocation2 + $0x18] sm:$0xff]   ;;  %v693_v30 = vor.u32 %v691_v11, %v690_v21  ;;  %977 = vst [vmem:[#allocation2 + $0x30] sm:$0xf] %v976_v26  ;;  %v695_v31 = vrot.slane %v690_v21, 4  ;;  %v702_v32 = vor.u32 %v700_v13, %v699_v22  ;;  %v703_v35 = vrot.slane %v699_v22, 4  ;;  %v12861_v17 = vld [vmem:[%s16803_s1] sm:$0xff]  }
  0x9b   : > { %1561 = vrot.lane.b32.xlu1 %v14182_v25, %s13776_s24  ;;  %v1276_v34 = vshll.u32 %v14182_v25, 16  ;;  %v707_v36 = vrot.slane %v705_v23, 7  ;;  %v1003_v37 = vld [vmem:[#allocation2 + $0x60] sm:$0xf]  ;;  %v14189_v38 = vld [vmem:[#allocation2 + $0xc] sm:$0xff]   ;;  %v14197_v42 = vrot.slane %v748_v28, 7  ;;  %12634 = vmatprep.subr.bf16.mxu0 %v12861_v17 }
  0x9c   : > { %v694_v39 = vsel %vm14143_vm8, %v686_v20, %v693_v30  ;;  %v980_v40 = vsel %vm14156_vm9, %v695_v31, %v979_v18  ;;  %v983_v41 = vsel %vm14135_vm7, %v702_v32, %v982_v24  ;;  %v14199_v43 = vld [vmem:[#allocation2 + $0x14] ss:$0 sps:$4 sm:$0x11]   ;;  %1559 = vrot.lane.b32.xlu0 %v14189_v38, %s13776_s24  ;;  %v1477_v45 = vrot.slane %v14189_v38, 1  ;;  %v552_v47 = vld [vmem:[%s14126_s18 + $0x3c] sm:$0xf]  ;;  %12635 = vmatpush3.bf16.msra.mxu0 %v12861_v17 }
  0x9d   : > { %978 = vst.msk [vmem:[#allocation2 + $0x34] sm:$0xf] %vm569_vm0, %v694_v39  ;;  %981 = vst [vmem:[#allocation2 + $0x38] sm:$0x1] %v980_v40  ;;  %v710_v44 = vor.u32 %v708_v27, %v707_v36  ;;  %v753_v48 = vor.u32 %v751_v33, %v14197_v42  ;;  %v1478_v51 = vrot.slane %v14199_v43, 1  ;;  %v1274_v54 = vshrl.u32 %v14182_v25, 16  ;;  %12694 = vmatprep.subr.bf16.mxu1 %v12861_v17 }
  0x9e   : > { %984 = vst [vmem:[#allocation2 + $0x3c] sm:$0xf] %v983_v41  ;;  %v12843_v46 = vld [vmem:[#allocation2 + $0x20] ss:$0 sps:$4 sm:$0x11]   ;;  %v14207_v50 = vld [vmem:[#allocation2 + $0x24] sm:$0xff]   ;;  %12696 = vmatpush3.bf16.msra.mxu1 %v12861_v17 }
  0x9f   : > { %v711_v52 = vsel %vm14143_vm8, %v703_v35, %v710_v44  ;;  %v12844_v53 = vld [vmem:[#allocation2 + $0x2c] ss:$0 sps:$4 sm:$0x11]   ;;  %v1278_v55 = vrot.slane %v1276_v34, 1  ;;  %v1004_v56 = vsel %vm14135_vm7, %v753_v48, %v1003_v37  ;;  %1680 = vrot.lane.b32.xlu1 %v14207_v50, %s13777_s29  ;;  %v1288_v57 = vshll.u32 %v14207_v50, 16  ;;  %s13779_s26 = smov 24  }
  0xa0   : > { %985 = vst.msk [vmem:[#allocation2 + $0x40] sm:$0xf] %vm569_vm0, %v711_v52  ;;  %1005 = vst [vmem:[#allocation2 + $0x60] sm:$0xf] %v1004_v56  ;;  %1678 = vrot.lane.b32.xlu0 %v14182_v25, %s13777_s29  ;;  %v1479_v58 = vsel %vm1473_vm2, %v1477_v45, %v1478_v51  ;;  %v1480_v59 = vrot.slane %v14182_v25, 1  ;;  %v1481_v60 = vrot.slane %v12843_v46, 1 }
  0xa1   : > { %v1281_v61 = vshll.u32 %v12843_v46, 16  ;;  %v986_v62 = vld [vmem:[#allocation2 + $0x44] sm:$0x1]  ;;  %v1262_v63 = vshrl.u32 %v14189_v38, 16  ;;  %v1264_v1 = vshll.u32 %v14189_v38, 16  ;;  %v712_v2 = vrot.slane %v707_v36, 4 }
  0xa2   : > { %v756_v3 = vshrl.u32 %v552_v47, 16  ;;  %v1483_v4 = vrot.slane %v14207_v50, 1  ;;  %v1279_v5 = vor.u32 %v1278_v55, %v1274_v54  ;;  %v1286_v6 = vshrl.u32 %v14207_v50, 16  ;;  %v553_v11 = vld [vmem:[%s14126_s18 + $0x40] sm:$0xf]  ;;  %s13780_s14 = smov 12  }
  0xa3   : > { %1524 = vrot.lane.b32.xlu1 %v1479_v58, %s13774_s27  ;;  %v1484_v7 = vrot.slane %v12844_v53, 1  ;;  %v1290_v8 = vrot.slane %v1288_v57, 1  ;;  %v1293_v9 = vshll.u32 %v12844_v53, 16  ;;  %v987_v10 = vsel %vm14156_vm9, %v712_v2, %v986_v62  ;;  %v554_v16 = vld [vmem:[%s14126_s18 + $0x44] sm:$0xf]  ;;  %s13781_s15 = smov 21  }
  0xa4   : > { %1641 = vrot.lane.b32.xlu0 %v1479_v58, %s13778_s25  ;;  %v14233_v12 = vsel %vm1473_vm2, %v1480_v59, %v1481_v60  ;;  %v1283_v13 = vrot.slane %v1281_v61, 1  ;;  %v1266_v14 = vrot.slane %v1264_v1, 1  ;;  %v1269_v15 = vshll.u32 %v14199_v43, 16  ;;  %988 = vst [vmem:[#allocation2 + $0x44] sm:$0x1] %v987_v10  ;;  %s13783_s30 = smov 32  }
  0xa5   : > { %v754_v18 = vrot.slane %v14197_v42, 4  ;;  %v758_v20 = vrot.slane %v756_v3, 7  ;;  %v759_v21 = vshll.u32 %v552_v47, 16  ;;  %v765_v22 = vshrl.u32 %v553_v11, 16  ;;  %v1007_v31 = vld [vmem:[#allocation2 + $0x68] sm:$0x1] }
  0xa6   : > { %v14244_v23 = vsel %vm1473_vm2, %v1483_v4, %v1484_v7  ;;  %v1291_v24 = vor.u32 %v1290_v8, %v1286_v6  ;;  %v1295_v25 = vrot.slane %v1293_v9, 1  ;;  %v14249_v26 = vsel %vm1248_vm3, %v1279_v5, %v1283_v13  ;;  %v555_v36 = vld [vmem:[%s14126_s18 + $0x48] sm:$0xf]  ;;  %v1010_v39 = vld [vmem:[#allocation2 + $0x6c] sm:$0xf]  ;;  %s13784_s23 = smov 64  }
  0xa7   : > { %1643 = vrot.lane.b32.xlu1 %v14233_v12, %s13778_s25  ;;  %v1267_v27 = vor.u32 %v1266_v14, %v1262_v63  ;;  %v1271_v28 = vrot.slane %v1269_v15, 1  ;;  %v761_v30 = vor.u32 %v759_v21, %v758_v20  ;;  %v763_v32 = vrot.slane %v758_v20, 4  ;;  %v556_v40 = vld [vmem:[%s14126_s18 + $0x4c] sm:$0xf]  ;;  %v547_v44 = vld [vmem:[%s14126_s18 + $0x28] sm:$0xf] }
  0xa8   : > { %1760 = vrot.lane.b32.xlu0 %v14233_v12, %s13779_s26  ;;  %v767_v33 = vrot.slane %v765_v22, 7  ;;  %v768_v34 = vshll.u32 %v553_v11, 16  ;;  %v773_v35 = vshrl.u32 %v554_v16, 16  ;;  %v776_v38 = vshll.u32 %v554_v16, 16  ;;  %v1014_v53 = vld [vmem:[#allocation2 + $0x74] sm:$0x1] }
  0xa9   : > { %v762_v37 = vsel %vm14143_vm8, %v754_v18, %v761_v30  ;;  %v14258_v41 = vsel %vm1248_vm3, %v1291_v24, %v1295_v25  ;;  %v1008_v42 = vsel %vm14156_vm9, %v763_v32, %v1007_v31  ;;  %v782_v47 = vshrl.u32 %v555_v36, 16  ;;  %v1017_v59 = vld [vmem:[#allocation2 + $0x78] sm:$0xf]  ;;  %v548_v61 = vld [vmem:[%s14126_s18 + $0x2c] sm:$0xf]  ;;  %v14273_v63 = vld [vmem:[#allocation2 + $0x30] sm:$0xff]  }
  0xaa   : > { %1006 = vst.msk [vmem:[#allocation2 + $0x64] sm:$0xf] %vm569_vm0, %v762_v37  ;;  %v770_v43 = vor.u32 %v768_v34, %v767_v33  ;;  %1009 = vst [vmem:[#allocation2 + $0x68] sm:$0x1] %v1008_v42  ;;  %v771_v45 = vrot.slane %v767_v33, 4  ;;  %v775_v46 = vrot.slane %v773_v35, 7  ;;  %v1272_v51 = vsel %vm1248_vm3, %v1267_v27, %v1271_v28 }
  0xab   : > { %1608 = vrot.lane.b32.xlu1 %v14249_v26, %s13780_s14  ;;  %v785_v48 = vshll.u32 %v555_v36, 16  ;;  %v790_v54 = vshrl.u32 %v556_v40, 16  ;;  %v784_v57 = vrot.slane %v782_v47, 7  ;;  %v793_v58 = vshll.u32 %v556_v40, 16  ;;  %v989_v9 = vld [vmem:[#allocation2 + $0x48] sm:$0xf] }
  0xac   : > { %1762 = vrot.lane.b32.xlu0 %v14244_v23, %s13779_s26  ;;  %v1011_v52 = vsel %vm14135_vm7, %v770_v43, %v1010_v39  ;;  %v778_v55 = vor.u32 %v776_v38, %v775_v46  ;;  %v780_v56 = vrot.slane %v775_v46, 4  ;;  %v714_v62 = vshrl.u32 %v547_v44, 16  ;;  %v14279_v5 = vld [vmem:[#allocation2 + $0x38] ss:$0 sps:$4 sm:$0x11]   ;;  %s16868_s9 = sld [smem:[#allocation25_spill]] }
  0xad   : > { %1012 = vst [vmem:[#allocation2 + $0x6c] sm:$0xf] %v1011_v52  ;;  %v792_v60 = vrot.slane %v790_v54, 7  ;;  %v787_v3 = vor.u32 %v785_v48, %v784_v57  ;;  %v788_v4 = vrot.slane %v784_v57, 4  ;;  %v717_v8 = vshll.u32 %v547_v44, 16  ;;  %v14313_v52 = vld [vmem:[#allocation2 + $0x3c] sm:$0xff]  }
  0xae   : > { %v779_v1 = vsel %vm14143_vm8, %v771_v45, %v778_v55  ;;  %v1015_v2 = vsel %vm14156_vm9, %v780_v56, %v1014_v53  ;;  %v716_v7 = vrot.slane %v714_v62, 7  ;;  %v1021_v10 = vld [vmem:[#allocation2 + $0x80] sm:$0x1]  ;;  %v722_v13 = vshrl.u32 %v548_v61, 16  ;;  %v557_v18 = vld [vmem:[%s14126_s18 + $0x50] sm:$0xf] }
  0xaf   : > { %1727 = vrot.lane.b32.xlu1 %v14258_v41, %s13781_s15  ;;  %1013 = vst.msk [vmem:[#allocation2 + $0x70] sm:$0xf] %vm569_vm0, %v779_v1  ;;  %1016 = vst [vmem:[#allocation2 + $0x74] sm:$0x1] %v1015_v2  ;;  %v795_v6 = vor.u32 %v793_v58, %v792_v60  ;;  %v1018_v11 = vsel %vm14135_vm7, %v787_v3, %v1017_v59  ;;  %v725_v14 = vshll.u32 %v548_v61, 16  ;;  %v797_v15 = vrot.slane %v792_v60, 4 }
  0xb0   : > { %1443 = vrot.lane.b32.xlu0 %v1272_v51, %s13775_s21  ;;  %1019 = vst [vmem:[#allocation2 + $0x78] sm:$0xf] %v1018_v11  ;;  %v719_v17 = vor.u32 %v717_v8, %v716_v7  ;;  %v1300_v20 = vshll.u32 %v14273_v63, 16  ;;  %v720_v21 = vrot.slane %v716_v7, 4  ;;  %v724_v22 = vrot.slane %v722_v13, 7  ;;  %s12385_s16 = sshll.u32 %s13892_s22, 4 }
  0xb1   : > { %v796_v16 = vsel %vm14143_vm8, %v788_v4, %v795_v6  ;;  %v558_v24 = vld [vmem:[%s14126_s18 + $0x54] sm:$0xf]  ;;  %v1022_v27 = vsel %vm14156_vm9, %v797_v15, %v1021_v10  ;;  %v993_v28 = vld [vmem:[#allocation2 + $0x50] sm:$0x1]  ;;  %v799_v33 = vshrl.u32 %v557_v18, 16  ;;  %v1298_v34 = vshrl.u32 %v14273_v63, 16 }
  0xb2   : > { %1020 = vst.msk [vmem:[#allocation2 + $0x7c] sm:$0xf] %vm569_vm0, %v796_v16  ;;  %v990_v25 = vsel %vm14135_vm7, %v719_v17, %v989_v9  ;;  %v549_v30 = vld [vmem:[%s14126_s18 + $0x30] sm:$0xf]  ;;  %v727_v31 = vor.u32 %v725_v14, %v724_v22  ;;  %1023 = vst [vmem:[#allocation2 + $0x80] sm:$0x1] %v1022_v27 }
  0xb3   : > { %1445 = vrot.lane.b32.xlu1 %v14249_v26, %s13775_s21  ;;  %991 = vst [vmem:[#allocation2 + $0x48] sm:$0xf] %v990_v25  ;;  %v729_v32 = vrot.slane %v724_v22, 4  ;;  %v1305_v35 = vshll.u32 %v14279_v5, 16  ;;  %v802_v36 = vshll.u32 %v557_v18, 16  ;;  %v807_v37 = vshrl.u32 %v558_v24, 16 }
  0xb4   : > { %1606 = vrot.lane.b32.xlu0 %v1272_v51, %s13780_s14  ;;  %v1302_v38 = vrot.slane %v1300_v20, 1  ;;  %v728_v39 = vsel %vm14143_vm8, %v720_v21, %v727_v31  ;;  %v801_v42 = vrot.slane %v799_v33, 7  ;;  %v810_v44 = vshll.u32 %v558_v24, 16  ;;  %v1024_v46 = vld [vmem:[#allocation2 + $0x84] sm:$0xf]  ;;  %s13790_s22 = smov [#allocation12]  }
  0xb5   : > { %v994_v40 = vsel %vm14156_vm9, %v729_v32, %v993_v28  ;;  %992 = vst.msk [vmem:[#allocation2 + $0x4c] sm:$0xf] %vm569_vm0, %v728_v39  ;;  %v809_v43 = vrot.slane %v807_v37, 7  ;;  %v731_v45 = vshrl.u32 %v549_v30, 16  ;;  %v550_v54 = vld [vmem:[%s14126_s18 + $0x34] sm:$0xf] }
  0xb6   : > { %995 = vst [vmem:[#allocation2 + $0x50] sm:$0x1] %v994_v40  ;;  %v804_v47 = vor.u32 %v802_v36, %v801_v42  ;;  %v805_v48 = vrot.slane %v801_v42, 4  ;;  %v1303_v51 = vor.u32 %v1302_v38, %v1298_v34  ;;  %v734_v56 = vshll.u32 %v549_v30, 16  ;;  %v996_v59 = vld [vmem:[#allocation2 + $0x54] sm:$0xf] }
  0xb7   : > { %1447 = vrot.lane.b32.xlu1 %v14258_v41, %s13775_s21  ;;  %v812_v53 = vor.u32 %v810_v44, %v809_v43  ;;  %v733_v55 = vrot.slane %v731_v45, 7  ;;  %v14323_v60 = vld [vmem:[#allocation2 + $0x44] ss:$0 sps:$4 sm:$0x11]   ;;  %v739_v62 = vshrl.u32 %v550_v54, 16  ;;  %v1487_v2 = vrot.slane %v14279_v5, 1 }
  0xb8   : > { %1725 = vrot.lane.b32.xlu0 %v14249_v26, %s13781_s15  ;;  %v1307_v26 = vrot.slane %v1305_v35, 1  ;;  %v1025_v57 = vsel %vm14135_vm7, %v804_v47, %v1024_v46  ;;  %v1312_v3 = vshll.u32 %v14313_v52, 16  ;;  %v742_v4 = vshll.u32 %v550_v54, 16  ;;  %v14344_v11 = vld [vmem:[#allocation2 + $0x60] sm:$0xff]   ;;  %v1028_v15 = vld [vmem:[#allocation2 + $0x8c] sm:$0x1] }
  0xb9   : > { %v813_v58 = vsel %vm14143_vm8, %v805_v48, %v812_v53  ;;  %1026 = vst [vmem:[#allocation2 + $0x84] sm:$0xf] %v1025_v57  ;;  %v736_v61 = vor.u32 %v734_v56, %v733_v55  ;;  %v741_v6 = vrot.slane %v739_v62, 7  ;;  %v737_v8 = vrot.slane %v733_v55, 4  ;;  %v1000_v16 = vld [vmem:[#allocation2 + $0x5c] sm:$0x1] }
  0xba   : > { %1027 = vst.msk [vmem:[#allocation2 + $0x88] sm:$0xf] %vm569_vm0, %v813_v58  ;;  %v14329_v1 = vsel %vm1248_vm3, %v1303_v51, %v1307_v26  ;;  %v1310_v9 = vshrl.u32 %v14313_v52, 16  ;;  %v1314_v10 = vrot.slane %v1312_v3, 1  ;;  %v814_v17 = vrot.slane %v809_v43, 4  ;;  %v14348_v20 = vld [vmem:[#allocation2 + $0x6c] sm:$0xff]  }
  0xbb   : > { %1528 = vrot.lane.b32.xlu1 %v14244_v23, %s13774_s27  ;;  %v997_v7 = vsel %vm14135_vm7, %v736_v61, %v996_v59  ;;  %v14346_v13 = vld [vmem:[#allocation2 + $0x68] ss:$0 sps:$4 sm:$0x11]   ;;  %v744_v14 = vor.u32 %v742_v4, %v741_v6  ;;  %v746_v18 = vrot.slane %v741_v6, 4  ;;  %v1489_v22 = vrot.slane %v14313_v52, 1 }
  0xbc   : > { %1526 = vrot.lane.b32.xlu0 %v14233_v12, %s13774_s27  ;;  %v1486_v12 = vrot.slane %v14273_v63, 1  ;;  %998 = vst [vmem:[#allocation2 + $0x54] sm:$0xf] %v997_v7  ;;  %v1029_v24 = vsel %vm14156_vm9, %v814_v17, %v1028_v15  ;;  %v12862_v27 = vld [vmem:[%s16803_s1 + $0x8] sm:$0x3f]   ;;  %v1315_v30 = vor.u32 %v1314_v10, %v1310_v9  ;;  %v1348_v31 = vshll.u32 %v14344_v11, 16 }
  0xbd   : > { %v1001_v25 = vsel %vm14156_vm9, %v746_v18, %v1000_v16  ;;  %v559_v28 = vld [vmem:[%s14126_s18 + $0x58] sm:$0xf]  ;;  %v14367_v32 = vld [vmem:[#allocation2 + $0x74] ss:$0 sps:$4 sm:$0x11]   ;;  %v1346_v34 = vshrl.u32 %v14344_v11, 16 }
  0xbe   : > { %v14342_v5 = vsel %vm1473_vm2, %v1486_v12, %v1487_v2  ;;  %1030 = vst [vmem:[#allocation2 + $0x8c] sm:$0x1] %v1029_v24  ;;  %1002 = vst [vmem:[#allocation2 + $0x5c] sm:$0x1] %v1001_v25  ;;  %v560_v33 = vld [vmem:[%s14126_s18 + $0x5c] sm:$0xf] }
  0xbf   : > { %1565 = vrot.lane.b32.xlu1 %v14273_v63, %s13776_s24  ;;  %vm2112_vm11 = vcmask 1045504   ;;  %v1353_v35 = vshll.u32 %v14346_v13, 16  ;;  %v1360_v36 = vshll.u32 %v14348_v20, 16  ;;  %v13782_v37 = vmov 65535   ;;  %v1031_v47 = vld [vmem:[#allocation2 + $0x90] sm:$0xf] }
  0xc0   : > { %1563 = vrot.lane.b32.xlu0 %v14207_v50, %s13776_s24  ;;  %v1317_v50 = vshll.u32 %v14323_v60, 16  ;;  %v2113_v38 = vsel %vm2111_vm10, 4294967295, %v13782_v37  ;;  %v819_v40 = vshll.u32 %v559_v28, 16  ;;  %v824_v42 = vshrl.u32 %v560_v33, 16  ;;  %v561_v48 = vld [vmem:[%s14126_s18 + $0x60] sm:$0xf] }
  0xc1   : > { %v2114_v39 = vsel %vm2112_vm11, %v2113_v38, 0  ;;  %v827_v43 = vshll.u32 %v560_v33, 16  ;;  %v1350_v45 = vrot.slane %v1348_v31, 1  ;;  %v1358_v51 = vshrl.u32 %v14348_v20, 16  ;;  %v562_v54 = vld [vmem:[%s14126_s18 + $0x64] sm:$0xf] }
  0xc2   : > { %v1319_v21 = vrot.slane %v1317_v50, 1  ;;  %v2116_v46 = vand.u32 %v12862_v27, %v2114_v39  ;;  %v826_v53 = vrot.slane %v824_v42, 7  ;;  %v1362_v55 = vrot.slane %v1360_v36, 1  ;;  %v1035_v12 = vld [vmem:[#allocation2 + $0x98] sm:$0x1] }
  0xc3   : > { %1612 = vrot.lane.b32.xlu1 %v14329_v1, %s13780_s14  ;;  %v1365_v56 = vshll.u32 %v14367_v32, 16  ;;  %v833_v61 = vshrl.u32 %v561_v48, 16  ;;  %v1490_v62 = vrot.slane %v14323_v60, 1  ;;  %v1498_v2 = vrot.slane %v14344_v11, 1  ;;  %v563_v9 = vld [vmem:[%s14126_s18 + $0x68] sm:$0xf] }
  0xc4   : > { %1610 = vrot.lane.b32.xlu0 %v14258_v41, %s13780_s14  ;;  %v745_v41 = vsel %vm14143_vm8, %v737_v8, %v744_v14  ;;  %v14378_v44 = vsel %vm1248_vm3, %v1315_v30, %v1319_v21  ;;  %12636 = vmatprep.subr.bf16.mxu0 %v2116_v46  ;;  %v831_v59 = vrot.slane %v826_v53, 4  ;;  %v841_v4 = vshrl.u32 %v562_v54, 16  ;;  %v1038_v11 = vld [vmem:[#allocation2 + $0x9c] sm:$0xf]  ;;  %v1042_v17 = vld [vmem:[#allocation2 + $0xa4] sm:$0x1] }
  0xc5   : > { %999 = vst.msk [vmem:[#allocation2 + $0x58] sm:$0xf] %vm569_vm0, %v745_v41  ;;  %12695 = vmatprep.subr.bf16.mxu1 %v2116_v46  ;;  %12637 = vmatpush3.bf16.msra.mxu0 %v2116_v46  ;;  %v1351_v6 = vor.u32 %v1350_v45, %v1346_v34  ;;  %v1355_v7 = vrot.slane %v1353_v35, 1  ;;  %v836_v8 = vshll.u32 %v561_v48, 16  ;;  %v1367_v50 = vrot.slane %v1365_v56, 1 }
  0xc6   : > { %12697 = vmatpush3.bf16.msra.mxu1 %v2116_v46  ;;  %v1036_v60 = vsel %vm14156_vm9, %v831_v59, %v1035_v12  ;;  %v844_v14 = vshll.u32 %v562_v54, 16  ;;  %v1363_v15 = vor.u32 %v1362_v55, %v1358_v51  ;;  %v835_v16 = vrot.slane %v833_v61, 7  ;;  %v564_v24 = vld [vmem:[%s14126_s18 + $0x6c] sm:$0xf]  ;;  %v1045_v30 = vld [vmem:[#allocation2 + $0xa8] sm:$0xf] }
  0xc7   : > { %1647 = vrot.lane.b32.xlu1 %v14342_v5, %s13778_s25  ;;  %1037 = vst [vmem:[#allocation2 + $0x98] sm:$0x1] %v1036_v60  ;;  %v14405_v18 = vsel %vm1473_vm2, %v1489_v22, %v1490_v62  ;;  %v1499_v41 = vrot.slane %v14346_v13, 1  ;;  %v843_v21 = vrot.slane %v841_v4, 7  ;;  %v850_v25 = vshrl.u32 %v563_v9, 16  ;;  %v14443_v61 = vld [vmem:[#allocation2 + $0x78] sm:$0xff]  }
  0xc8   : > { %1645 = vrot.lane.b32.xlu0 %v14244_v23, %s13778_s25  ;;  %v816_v23 = vshrl.u32 %v559_v28, 16  ;;  %v838_v27 = vor.u32 %v836_v8, %v835_v16  ;;  %v839_v28 = vrot.slane %v835_v16, 4  ;;  %v853_v35 = vshll.u32 %v563_v9, 16  ;;  %v1049_v42 = vld [vmem:[#allocation2 + $0xb0] sm:$0x1]  ;;  %v14455_v9 = vld [vmem:[#allocation2 + $0x48] sm:$0xff]  }
  0xc9   : > { %v846_v31 = vor.u32 %v844_v14, %v843_v21  ;;  %v848_v33 = vrot.slane %v843_v21, 4  ;;  %v852_v34 = vrot.slane %v850_v25, 7  ;;  %v14415_v13 = vsel %vm1248_vm3, %v1363_v15, %v1367_v50  ;;  %v566_v46 = vld [vmem:[%s14126_s18 + $0x74] sm:$0xf] }
  0xca   : > { %v818_v26 = vrot.slane %v816_v23, 7  ;;  %v1039_v22 = vsel %vm14135_vm7, %v838_v27, %v1038_v11  ;;  %v858_v36 = vshrl.u32 %v564_v24, 16  ;;  %v861_v37 = vshll.u32 %v564_v24, 16  ;;  %v14457_v50 = vld [vmem:[#allocation2 + $0x80] ss:$0 sps:$4 sm:$0x11]  }
  0xcb   : > { %1684 = vrot.lane.b32.xlu1 %v14313_v52, %s13777_s29  ;;  %v847_v38 = vsel %vm14143_vm8, %v839_v28, %v846_v31  ;;  %1040 = vst [vmem:[#allocation2 + $0x9c] sm:$0xf] %v1039_v22  ;;  %v1043_v23 = vsel %vm14156_vm9, %v848_v33, %v1042_v17  ;;  %v855_v39 = vor.u32 %v853_v35, %v852_v34  ;;  %v875_v48 = vshrl.u32 %v566_v46, 16  ;;  %v12856_v60 = vld [vmem:[#allocation2 + $0x50] ss:$0 sps:$4 sm:$0x11]  }
  0xcc   : > { %1682 = vrot.lane.b32.xlu0 %v14273_v63, %s13777_s29  ;;  %v821_v57 = vor.u32 %v819_v40, %v818_v26  ;;  %v822_v58 = vrot.slane %v818_v26, 4  ;;  %v829_v63 = vor.u32 %v827_v43, %v826_v53  ;;  %v856_v40 = vrot.slane %v852_v34, 4  ;;  %v565_v43 = vld [vmem:[%s14126_s18 + $0x70] sm:$0xf]  ;;  %1041 = vst.msk [vmem:[#allocation2 + $0xa0] sm:$0xf] %vm569_vm0, %v847_v38 }
  0xcd   : > { %1044 = vst [vmem:[#allocation2 + $0xa4] sm:$0x1] %v1043_v23  ;;  %v860_v45 = vrot.slane %v858_v36, 7  ;;  %v867_v26 = vshrl.u32 %v565_v43, 16  ;;  %v870_v55 = vshll.u32 %v565_v43, 16  ;;  %v14435_v56 = vsel %vm1473_vm2, %v1498_v2, %v1499_v41  ;;  %v14506_v19 = vld [vmem:[#allocation2 + $0x54] sm:$0xff]  }
  0xce   : > { %v1032_v3 = vsel %vm14135_vm7, %v821_v57, %v1031_v47  ;;  %v830_v10 = vsel %vm14143_vm8, %v822_v58, %v829_v63  ;;  %v1046_v47 = vsel %vm14135_vm7, %v855_v39, %v1045_v30  ;;  %v1501_v57 = vrot.slane %v14348_v20, 1  ;;  %v1052_v2 = vld [vmem:[#allocation2 + $0xb4] sm:$0xf]  ;;  %v567_v28 = vld [vmem:[%s14126_s18 + $0x78] sm:$0xf] }
  0xcf   : > { %1731 = vrot.lane.b32.xlu1 %v14378_v44, %s13781_s15  ;;  %1033 = vst [vmem:[#allocation2 + $0x90] sm:$0xf] %v1032_v3  ;;  %1034 = vst.msk [vmem:[#allocation2 + $0x94] sm:$0xf] %vm569_vm0, %v830_v10  ;;  %v863_v51 = vor.u32 %v861_v37, %v860_v45  ;;  %v865_v53 = vrot.slane %v860_v45, 4  ;;  %v869_v54 = vrot.slane %v867_v26, 7 }
  0xd0   : > { %1729 = vrot.lane.b32.xlu0 %v14329_v1, %s13781_s15  ;;  %1047 = vst [vmem:[#allocation2 + $0xa8] sm:$0xf] %v1046_v47  ;;  %v1502_v58 = vrot.slane %v14367_v32, 1  ;;  %v877_v63 = vrot.slane %v875_v48, 7  ;;  %v878_v3 = vshll.u32 %v566_v46, 16  ;;  %v1372_v14 = vshll.u32 %v14443_v61, 16 }
  0xd1   : > { %v864_v59 = vsel %vm14143_vm8, %v856_v40, %v863_v51  ;;  %v1050_v12 = vsel %vm14156_vm9, %v865_v53, %v1049_v42  ;;  %v872_v62 = vor.u32 %v870_v55, %v869_v54  ;;  %v873_v4 = vrot.slane %v869_v54, 4  ;;  %v1056_v10 = vld [vmem:[#allocation2 + $0xbc] sm:$0x1]  ;;  %v14491_v40 = vld [vmem:[#allocation2 + $0x84] sm:$0xff]   ;;  %v1059_v47 = vld [vmem:[#allocation2 + $0xc0] sm:$0xf] }
  0xd2   : > { %1048 = vst.msk [vmem:[#allocation2 + $0xac] sm:$0xf] %vm569_vm0, %v864_v59  ;;  %1051 = vst [vmem:[#allocation2 + $0xb0] sm:$0x1] %v1050_v12  ;;  %v882_v32 = vrot.slane %v877_v63, 4  ;;  %v1324_v15 = vshll.u32 %v14455_v9, 16 }
  0xd3   : > { %1449 = vrot.lane.b32.xlu1 %v14329_v1, %s13775_s21  ;;  %v14410_v1 = vsel %vm1248_vm3, %v1351_v6, %v1355_v7  ;;  %v14451_v6 = vsel %vm1473_vm2, %v1501_v57, %v1502_v58  ;;  %v880_v7 = vor.u32 %v878_v3, %v877_v63  ;;  %v1053_v8 = vsel %vm14135_vm7, %v872_v62, %v1052_v2  ;;  %v568_v34 = vld [vmem:[%s14126_s18 + $0x7c] sm:$0xf]  ;;  %v1063_v53 = vld [vmem:[#allocation2 + $0xc8] sm:$0x1]  ;;  %s13786_s18 = smov 96  }
  0xd4   : > { %1764 = vrot.lane.b32.xlu0 %v14342_v5, %s13779_s26  ;;  %1054 = vst [vmem:[#allocation2 + $0xb4] sm:$0xf] %v1053_v8  ;;  %v1057_v11 = vsel %vm14156_vm9, %v882_v32, %v1056_v10  ;;  %v1370_v16 = vshrl.u32 %v14443_v61, 16  ;;  %v1374_v17 = vrot.slane %v1372_v14, 1  ;;  %v1377_v41 = vshll.u32 %v14457_v50, 16 }
  0xd5   : > { %1058 = vst [vmem:[#allocation2 + $0xbc] sm:$0x1] %v1057_v11  ;;  %v1322_v21 = vshrl.u32 %v14455_v9, 16  ;;  %v1329_v24 = vshll.u32 %v12856_v60, 16  ;;  %v1326_v25 = vrot.slane %v1324_v15, 1  ;;  %v1504_v33 = vrot.slane %v14443_v61, 1 }
  0xd6   : > { %v1379_v27 = vrot.slane %v1377_v41, 1  ;;  %v884_v35 = vshrl.u32 %v567_v28, 16  ;;  %v892_v22 = vshrl.u32 %v568_v34, 16  ;;  %v1492_v36 = vrot.slane %v14455_v9, 1 }
  0xd7   : > { %1766 = vrot.lane.b32.xlu1 %v14405_v18, %s13779_s26  ;;  %v1327_v30 = vor.u32 %v1326_v25, %v1322_v21  ;;  %v1331_v31 = vrot.slane %v1329_v24, 1  ;;  %v887_v38 = vshll.u32 %v567_v28, 16  ;;  %v895_v23 = vshll.u32 %v568_v34, 16  ;;  %v12859_v58 = vld [vmem:[#allocation2 + $0x8c] ss:$0 sps:$4 sm:$0x11]  }
  0xd8   : > { %1457 = vrot.lane.b32.xlu0 %v14410_v1, %s13775_s21  ;;  %v886_v37 = vrot.slane %v884_v35, 7  ;;  %v894_v42 = vrot.slane %v892_v22, 7  ;;  %v1493_v54 = vrot.slane %v12856_v60, 1  ;;  %v1384_v55 = vshll.u32 %v14491_v40, 16  ;;  %v14557_v34 = vld [vmem:[#allocation2 + $0x90] sm:$0xff]  }
  0xd9   : > { %v1332_v43 = vsel %vm1248_vm3, %v1327_v30, %v1331_v31  ;;  %v12860_v59 = vld [vmem:[#allocation2 + $0x5c] ss:$0 sps:$4 sm:$0x11]   ;;  %v1389_v49 = vshll.u32 %v12859_v58, 16  ;;  %v1382_v12 = vshrl.u32 %v14491_v40, 16  ;;  %v1336_v62 = vshll.u32 %v14506_v19, 16 }
  0xda   : > { %v889_v45 = vor.u32 %v887_v38, %v886_v37  ;;  %v890_v46 = vrot.slane %v886_v37, 4  ;;  %v897_v26 = vor.u32 %v895_v23, %v894_v42  ;;  %v899_v51 = vrot.slane %v894_v42, 4  ;;  %v12864_v37 = vld [vmem:[#allocation2 + $0x98] ss:$0 sps:$4 sm:$0x11]   ;;  %v13587_v38 = vld [vmem:[#allocation2 + $0xc] sm:$0xff]  }
  0xdb   : > { %1459 = vrot.lane.b32.xlu1 %v14415_v13, %s13775_s21  ;;  %v1494_v63 = vsel %vm1473_vm2, %v1492_v36, %v1493_v54  ;;  %v1386_v3 = vrot.slane %v1384_v55, 1  ;;  %v1341_v2 = vshll.u32 %v12860_v59, 16  ;;  %v1338_v32 = vrot.slane %v1336_v62, 1 }
  0xdc   : > { %1451 = vrot.lane.b32.xlu0 %v14378_v44, %s13775_s21  ;;  %v1060_v48 = vsel %vm14135_vm7, %v889_v45, %v1059_v47  ;;  %v1064_v57 = vsel %vm14156_vm9, %v899_v51, %v1063_v53  ;;  %v1508_v11 = vrot.slane %v12859_v58, 1  ;;  %v1496_v41 = vrot.slane %v12860_v59, 1 }
  0xdd   : > { %1061 = vst [vmem:[#allocation2 + $0xc0] sm:$0xf] %v1060_v48  ;;  %1065 = vst [vmem:[#allocation2 + $0xc8] sm:$0x1] %v1064_v57  ;;  %v1343_v10 = vrot.slane %v1341_v2, 1  ;;  %vm1792_vm12 = vcmask 23552  }
  0xde   : > { %vm1825_vm13 = vcmask 48128   ;;  %vm1858_vm14 = vcmask 72704   ;;  %vm1891_vm15 = vcmask 97280   ;;  %v1396_v42 = vshll.u32 %v14557_v34, 16 }
  0xdf   : > { %1538 = vrot.lane.b32.xlu1 %v14435_v56, %s13774_s27  ;;  %vm1957_vm1 = vcmask 146432   ;;  %vm1990_vm5 = vcmask 171008   ;;  %v1394_v53 = vshrl.u32 %v14557_v34, 16  ;;  %v1401_v58 = vshll.u32 %v12864_v37, 16 }
  0xe0   : > { %1530 = vrot.lane.b32.xlu0 %v14342_v5, %s13774_s27  ;;  %v881_v5 = vsel %vm14143_vm8, %v873_v4, %v880_v7  ;;  %v1391_v4 = vrot.slane %v1389_v49, 1  ;;  %v1387_v7 = vor.u32 %v1386_v3, %v1382_v12  ;;  %v1398_v57 = vrot.slane %v1396_v42, 1  ;;  %v14587_v12 = vld [vmem:[#allocation2 + $0x60] sm:$0xff]  }
  0xe1   : > { %1055 = vst.msk [vmem:[#allocation2 + $0xb8] sm:$0xf] %vm569_vm0, %v881_v5  ;;  %v1507_v5 = vrot.slane %v14491_v40, 1  ;;  %vm2023_vm7 = vcmask 195584   ;;  %v1403_v3 = vrot.slane %v1401_v58, 1  ;;  %vm3015_vm9 = vcmask 254976  }
  0xe2   : > { %v14528_v60 = vsel %vm1248_vm3, %v1387_v7, %v1391_v4  ;;  %v1399_v62 = vor.u32 %v1398_v57, %v1394_v53  ;;  %vm3912_vm10 = vcmask 261120   ;;  %vm4447_vm11 = vcmask 1042434  }
  0xe3   : > { %1540 = vrot.lane.b32.xlu1 %v14451_v6, %s13774_s27  ;;  %v14544_v24 = vsel %vm1473_vm2, %v1507_v5, %v1508_v11 }
  0xe4   : > { %1532 = vrot.lane.b32.xlu0 %v14405_v18, %s13774_s27 }
  0xe7   : > { %1575 = vrot.lane.b32.xlu1 %v14348_v20, %s13776_s24  ;;  %v1375_v20 = vor.u32 %v1374_v17, %v1370_v16  ;;  %v1495_v17 = vrot.slane %v14506_v19, 1 }
  0xe8   : > { %1567 = vrot.lane.b32.xlu0 %v14313_v52, %s13776_s24  ;;  %v1505_v52 = vrot.slane %v14457_v50, 1 }
  0xe9   : > { %v1380_v39 = vsel %vm1248_vm3, %v1375_v20, %v1379_v27  ;;  %v14547_v20 = vsel %vm1473_vm2, %v1495_v17, %v1496_v41 }
  0xea   : > { %v1506_v29 = vsel %vm1473_vm2, %v1504_v33, %v1505_v52  ;;  %v13586_v52 = vld [vmem:[#allocation2] sm:$0xff]  }
  0xeb   : > { %1577 = vrot.lane.b32.xlu1 %v14443_v61, %s13776_s24 }
  0xec   : > { %1569 = vrot.lane.b32.xlu0 %v14455_v9, %s13776_s24 }
  0xef   : > { %1622 = vrot.lane.b32.xlu1 %v14415_v13, %s13780_s14 }
  0xf0   : > { %1614 = vrot.lane.b32.xlu0 %v14378_v44, %s13780_s14  ;;  %v898_v44 = vsel %vm14143_vm8, %v890_v46, %v897_v26  ;;  %vm2078_vm8 = vcmask 220160  }
  0xf1   : > { %1062 = vst.msk [vmem:[#allocation2 + $0xc4] sm:$0xf] %vm569_vm0, %v898_v44  ;;  %vm1924_vm0 = vcmask 121856  }
  0xf3   : > { %1624 = vrot.lane.b32.xlu1 %v1380_v39, %s13780_s14 }
  0xf4   : > { %1616 = vrot.lane.b32.xlu0 %v1332_v43, %s13780_s14 }
  0xf7   : > { %1657 = vrot.lane.b32.xlu1 %v14451_v6, %s13778_s25 }
  0xf8   : > { %1649 = vrot.lane.b32.xlu0 %v14405_v18, %s13778_s25  ;;  %v1334_v18 = vshrl.u32 %v14506_v19, 16 }
  0xfa   : > { %v1339_v50 = vor.u32 %v1338_v32, %v1334_v18  ;;  %v14600_v32 = vsel %vm1248_vm3, %v1399_v62, %v1403_v3 }
  0xfb   : > { %1659 = vrot.lane.b32.xlu1 %v1506_v29, %s13778_s25 }
  0xfc   : > { %1651 = vrot.lane.b32.xlu0 %v1494_v63, %s13778_s25 }
  0xff   : > { %1694 = vrot.lane.b32.xlu1 %v14443_v61, %s13777_s29 }
 0x100   : > { %1686 = vrot.lane.b32.xlu0 %v14455_v9, %s13777_s29  ;;  %v14531_v9 = vsel %vm1248_vm3, %v1339_v50, %v1343_v10  ;;  %v1510_v50 = vrot.slane %v14557_v34, 1  ;;  %v1511_v10 = vrot.slane %v12864_v37, 1  ;;  %v14638_v37 = vld [vmem:[#allocation2 + $0x6c] sm:$0xff]  }
 0x103   : > { %1696 = vrot.lane.b32.xlu1 %v14491_v40, %s13777_s29 }
 0x104   : > { %1688 = vrot.lane.b32.xlu0 %v14506_v19, %s13777_s29 }
 0x105   : > { %v1523_v8 = vpop.permute.xlu1 %1522 }
 0x107   : > { %1741 = vrot.lane.b32.xlu1 %v1380_v39, %s13781_s15  ;;  %v1442_v61 = vpop.permute.xlu0 %1441 }
 0x108   : > { %1733 = vrot.lane.b32.xlu0 %v1332_v43, %s13781_s15  ;;  %v1794_v22 = vsel %vm1792_vm12, %v13586_v52, %v1442_v61 }
 0x10b   : > { %1743 = vrot.lane.b32.xlu1 %v14528_v60, %s13781_s15 }
 0x10c   : > { %1735 = vrot.lane.b32.xlu0 %v14531_v9, %s13781_s15 }
 0x10d   : > { %v1562_v14 = vpop.permute.xlu1 %1561 }
 0x10e   : > { %v1560_v15 = vpop.permute.xlu0 %1559 }
 0x10f   : > { %1776 = vrot.lane.b32.xlu1 %v1506_v29, %s13779_s26 }
 0x110   : > { %1768 = vrot.lane.b32.xlu0 %v1494_v63, %s13779_s26 }
 0x111   : > { %v1681_v16 = vpop.permute.xlu1 %1680 }
 0x112   : > { %v1679_v21 = vpop.permute.xlu0 %1678 }
 0x113   : > { %1461 = vrot.lane.b32.xlu1 %v1380_v39, %s13775_s21 }
 0x114   : > { %1453 = vrot.lane.b32.xlu0 %v1332_v43, %s13775_s21  ;;  %v1827_v43 = vsel %vm1825_vm13, %v1794_v22, %v1523_v8 }
 0x115   : > { %v1525_v25 = vpop.permute.xlu1 %1524  ;;  %v1860_v26 = vsel %vm1858_vm14, %v1827_v43, %v1560_v15  ;;  %v14616_v15 = vld [vmem:[#allocation2 + $0xa4] ss:$0 sps:$4 sm:$0x11]  }
 0x116   : > { %v1642_v27 = vpop.permute.xlu0 %1641 }
 0x117   : > { %1778 = vrot.lane.b32.xlu1 %v14544_v24, %s13779_s26 }
 0x118   : > { %1770 = vrot.lane.b32.xlu0 %v14547_v20, %s13779_s26 }
 0x119   : > { %v1644_v28 = vpop.permute.xlu1 %1643 }
 0x11a   : > { %v1761_v30 = vpop.permute.xlu0 %1760 }
 0x11b   : > { %1463 = vrot.lane.b32.xlu1 %v14528_v60, %s13775_s21 }
 0x11c   : > { %1455 = vrot.lane.b32.xlu0 %v14531_v9, %s13775_s21 }
 0x11d   : > { %v1609_v31 = vpop.permute.xlu1 %1608 }
 0x11e   : > { %v1763_v33 = vpop.permute.xlu0 %1762 }
 0x11f   : > { %1542 = vrot.lane.b32.xlu1 %v1506_v29, %s13774_s27 }
 0x120   : > { %1534 = vrot.lane.b32.xlu0 %v1494_v63, %s13774_s27 }
 0x121   : > { %v1728_v35 = vpop.permute.xlu1 %1727 }
 0x122   : > { %v1444_v36 = vpop.permute.xlu0 %1443 }
 0x123   : > { %v1796_v23 = vsel %vm1792_vm12, %v13587_v38, %v1444_v36  ;;  %1544 = vrot.lane.b32.xlu1 %v14544_v24, %s13774_s27 }
 0x124   : > { %v1829_v39 = vsel %vm1825_vm13, %v1796_v23, %v1525_v25  ;;  %1536 = vrot.lane.b32.xlu0 %v14547_v20, %s13774_s27 }
 0x125   : > { %v1862_v45 = vsel %vm1858_vm14, %v1829_v39, %v1562_v14  ;;  %v1446_v46 = vpop.permute.xlu1 %1445 }
 0x126   : > { %v1895_v47 = vsel %vm1891_vm15, %v1862_v45, %v1609_v31  ;;  %v1607_v48 = vpop.permute.xlu0 %1606 }
 0x127   : > { %v1893_v51 = vsel %vm1891_vm15, %v1860_v26, %v1607_v48  ;;  %1579 = vrot.lane.b32.xlu1 %v14491_v40, %s13776_s24  ;;  %v1928_v44 = vsel %vm1924_vm0, %v1895_v47, %v1644_v28  ;;  %v13590_v28 = vld [vmem:[#allocation2 + $0x24] sm:$0xff]  }
 0x128   : > { %v1926_v54 = vsel %vm1924_vm0, %v1893_v51, %v1642_v27  ;;  %1571 = vrot.lane.b32.xlu0 %v14506_v19, %s13776_s24  ;;  %v1961_v55 = vsel %vm1957_vm1, %v1928_v44, %v1681_v16  ;;  %v1413_v27 = vshll.u32 %v14616_v15, 16 }
 0x129   : > { %v1448_v29 = vpop.permute.xlu1 %1447  ;;  %v1959_v63 = vsel %vm1957_vm1, %v1926_v54, %v1679_v21  ;;  %v1994_v40 = vsel %vm1990_vm5, %v1961_v55, %v1728_v35  ;;  %v13589_v21 = vld [vmem:[#allocation2 + $0x18] sm:$0xff]  }
 0x12a   : > { %v1726_v59 = vpop.permute.xlu0 %1725  ;;  %v2027_v2 = vsel %vm2023_vm7, %v1994_v40, %v1763_v33  ;;  %v1415_v23 = vrot.slane %v1413_v27, 1  ;;  %v1514_v40 = vrot.slane %v14616_v15, 1 }
 0x12b   : > { %v1992_v49 = vsel %vm1990_vm5, %v1959_v63, %v1726_v59  ;;  %1581 = vrot.lane.b32.xlu1 %v14557_v34, %s13776_s24 }
 0x12c   : > { %1573 = vrot.lane.b32.xlu0 %v14587_v12, %s13776_s24  ;;  %v2025_v19 = vsel %vm2023_vm7, %v1992_v49, %v1761_v30  ;;  %v1800_v30 = vsel %vm1792_vm12, %v13590_v28, %v1448_v29  ;;  %v12867_v29 = vld [vmem:[#allocation2 + $0xa8] sm:$0xff]  }
 0x12d   : > { %12638 = vmatprep.mubr.msk.bf16.mxu0 %vm2078_vm8, %v2025_v19  ;;  %v1529_v18 = vpop.permute.xlu1 %1528  ;;  %v1420_v19 = vshll.u32 %v12867_v29, 16 }
 0x12e   : > { %12639 = vmatmul.mubr.msk.bf16.vlgmr.msra.gmra.mrb[0].mxu0 %vm2078_vm8, %v2027_v2  ;;  %v1527_v4 = vpop.permute.xlu0 %1526  ;;  %v1833_v22 = vsel %vm1825_vm13, %v1800_v30, %v1529_v18  ;;  %v1418_v18 = vshrl.u32 %v12867_v29, 16 }
 0x12f   : > { %1626 = vrot.lane.b32.xlu1 %v14528_v60, %s13780_s14  ;;  %v14607_v60 = vld [vmem:[#allocation2 + $0x9c] sm:$0xff]   ;;  %v1422_v2 = vrot.slane %v1420_v19, 1 }
 0x130   : > { %1618 = vrot.lane.b32.xlu0 %v14531_v9, %s13780_s14  ;;  %v14614_v9 = vsel %vm1473_vm2, %v1510_v50, %v1511_v10  ;;  %v1408_v16 = vshll.u32 %v14607_v60, 16  ;;  %v1406_v25 = vshrl.u32 %v14607_v60, 16  ;;  %v1513_v59 = vrot.slane %v14607_v60, 1 }
 0x131   : > { %v1566_v7 = vpop.permute.xlu1 %1565 }
 0x132   : > { %v1564_v8 = vpop.permute.xlu0 %1563  ;;  %v1866_v39 = vsel %vm1858_vm14, %v1833_v22, %v1566_v7 }
 0x133   : > { %1628 = vrot.lane.b32.xlu1 %v14600_v32, %s13780_s14 }
 0x134   : > { %1620 = vrot.lane.b32.xlu0 %v14410_v1, %s13780_s14 }
 0x135   : > { %v1613_v61 = vpop.permute.xlu1 %1612 }
 0x136   : > { %v1611_v14 = vpop.permute.xlu0 %1610  ;;  %v1899_v45 = vsel %vm1891_vm15, %v1866_v39, %v1613_v61  ;;  %v12872_v39 = vld [vmem:[#allocation2 + $0xc8] ss:$0 sps:$4 sm:$0x11]  }
 0x137   : > { %1661 = vrot.lane.b32.xlu1 %v14544_v24, %s13778_s25  ;;  %v1798_v24 = vsel %vm1792_vm12, %v13589_v21, %v1446_v46 }
 0x138   : > { %1653 = vrot.lane.b32.xlu0 %v14547_v20, %s13778_s25  ;;  %v1410_v20 = vrot.slane %v1408_v16, 1  ;;  %v1831_v31 = vsel %vm1825_vm13, %v1798_v24, %v1527_v4 }
 0x139   : > { %v1648_v5 = vpop.permute.xlu1 %1647  ;;  %v1864_v35 = vsel %vm1858_vm14, %v1831_v31, %v1564_v8  ;;  %v14694_v8 = vld [vmem:[#allocation2 + $0xb4] sm:$0xff]  }
 0x13a   : > { %v1646_v11 = vpop.permute.xlu0 %1645  ;;  %v1897_v52 = vsel %vm1891_vm15, %v1864_v35, %v1611_v14  ;;  %v1411_v38 = vor.u32 %v1410_v20, %v1406_v25  ;;  %v1932_v47 = vsel %vm1924_vm0, %v1899_v45, %v1648_v5  ;;  %v12870_v14 = vld [vmem:[#allocation2 + $0xbc] ss:$0 sps:$4 sm:$0x11]   ;;  %v1432_v16 = vshll.u32 %v14694_v8, 16 }
 0x13b   : > { %1663 = vrot.lane.b32.xlu1 %v14614_v9, %s13778_s25  ;;  %v1930_v36 = vsel %vm1924_vm0, %v1897_v52, %v1646_v11  ;;  %v1516_v11 = vrot.slane %v12867_v29, 1  ;;  %v1430_v21 = vshrl.u32 %v14694_v8, 16  ;;  %v1437_v25 = vshll.u32 %v12870_v14, 16  ;;  %v14728_v52 = vld [vmem:[#allocation2 + $0xc0] sm:$0xff]  }
 0x13c   : > { %1655 = vrot.lane.b32.xlu0 %v14435_v56, %s13778_s25  ;;  %v1416_v44 = vsel %vm1248_vm3, %v1411_v38, %v1415_v23  ;;  %v1434_v24 = vrot.slane %v1432_v16, 1  ;;  %v1520_v38 = vrot.slane %v12870_v14, 1 }
 0x13d   : > { %v1685_v17 = vpop.permute.xlu1 %1684  ;;  %v1439_v28 = vrot.slane %v1437_v25, 1 }
 0x13e   : > { %v1683_v41 = vpop.permute.xlu0 %1682  ;;  %v1965_v51 = vsel %vm1957_vm1, %v1932_v47, %v1685_v17  ;;  %v1435_v27 = vor.u32 %v1434_v24, %v1430_v21  ;;  %v1595_v47 = vshrl.u32 %v14728_v52, 16 }
 0x13f   : > { %1698 = vrot.lane.b32.xlu1 %v14557_v34, %s13777_s29  ;;  %v1963_v42 = vsel %vm1957_vm1, %v1930_v36, %v1683_v41  ;;  %v1519_v36 = vrot.slane %v14694_v8, 1 }
 0x140   : > { %1690 = vrot.lane.b32.xlu0 %v14587_v12, %s13777_s29 }
 0x141   : > { %v1732_v33 = vpop.permute.xlu1 %1731 }
 0x142   : > { %v1730_v34 = vpop.permute.xlu0 %1729  ;;  %v1998_v53 = vsel %vm1990_vm5, %v1965_v51, %v1732_v33  ;;  %v14722_v33 = vsel %vm1248_vm3, %v1435_v27, %v1439_v28  ;;  %v1602_v51 = vshll.u32 %v12872_v39, 16  ;;  %v13593_v28 = vld [vmem:[#allocation2 + $0x3c] sm:$0xff]  }
 0x143   : > { %1700 = vrot.lane.b32.xlu1 %v14607_v60, %s13777_s29  ;;  %v1996_v46 = vsel %vm1990_vm5, %v1963_v42, %v1730_v34  ;;  %v1597_v42 = vshll.u32 %v14728_v52, 16 }
 0x144   : > { %1692 = vrot.lane.b32.xlu0 %v14638_v37, %s13777_s29  ;;  %v1604_v19 = vrot.slane %v1602_v51, 1 }
 0x145   : > { %v14644_v43 = vpop.permute.xlu1 %1449 }
 0x146   : > { %v1765_v26 = vpop.permute.xlu0 %1764 }
 0x147   : > { %v2029_v48 = vsel %vm2023_vm7, %v1996_v46, %v1765_v26  ;;  %1745 = vrot.lane.b32.xlu1 %v14600_v32, %s13781_s15  ;;  %v14740_v46 = vsel %vm1473_vm2, %v1519_v36, %v1520_v38 }
 0x148   : > { %1737 = vrot.lane.b32.xlu0 %v14410_v1, %s13781_s15  ;;  %12642 = vmatprep.mubr.msk.bf16.mxu0 %vm2078_vm8, %v2029_v48  ;;  %v1599_v48 = vrot.slane %v1597_v42, 1 }
 0x149   : > { %v1767_v54 = vpop.permute.xlu1 %1766 }
 0x14a   : > { %v2031_v55 = vsel %vm2023_vm7, %v1998_v53, %v1767_v54  ;;  %v14659_v57 = vpop.permute.xlu0 %1457  ;;  %v14749_v54 = vld [vmem:[#allocation2 + $0xcc] sm:$0xff]  }
 0x14b   : > { %1747 = vrot.lane.b32.xlu1 %v1416_v44, %s13781_s15  ;;  %12643 = vmatmul.mubr.msk.bf16.gmra.mrb[4].mxu0 %vm2078_vm8, %v2031_v55  ;;  %v1810_v55 = vsel %vm1792_vm12, %v14587_v12, %v14659_v57 }
 0x14c   : > { %1739 = vrot.lane.b32.xlu0 %v14415_v13, %s13781_s15  ;;  %v12868_v13 = vld [vmem:[#allocation2 + $0xb0] ss:$0 sps:$4 sm:$0x11]  }
 0x14d   : > { %v14665_v58 = vpop.permute.xlu1 %1459  ;;  %v1425_v4 = vshll.u32 %v12868_v13, 16  ;;  %v1517_v15 = vrot.slane %v12868_v13, 1  ;;  %v1600_v13 = vor.u32 %v1599_v48, %v1595_v47 }
 0x14e   : > { %v14667_v1 = vpop.permute.xlu0 %1451  ;;  %v1812_v24 = vsel %vm1792_vm12, %v14638_v37, %v14665_v58  ;;  %v1714_v37 = vshrl.u32 %v14749_v54, 16 }
 0x14f   : > { %1780 = vrot.lane.b32.xlu1 %v14614_v9, %s13779_s26  ;;  %v1427_v50 = vrot.slane %v1425_v4, 1  ;;  %v1518_v41 = vsel %vm1473_vm2, %v1516_v11, %v1517_v15 }
 0x150   : > { %1772 = vrot.lane.b32.xlu0 %v14435_v56, %s13779_s26  ;;  %v1515_v56 = vsel %vm1473_vm2, %v1513_v59, %v1514_v40 }
 0x151   : > { %v14673_v63 = vpop.permute.xlu1 %1538 }
 0x152   : > { %v14677_v49 = vpop.permute.xlu0 %1530  ;;  %v1843_v40 = vsel %vm1825_vm13, %v1810_v55, %v14673_v63 }
 0x153   : > { %1774 = vrot.lane.b32.xlu1 %v14451_v6, %s13779_s26 }
 0x154   : > { %1465 = vrot.lane.b32.xlu0 %v14600_v32, %s13775_s21  ;;  %v1423_v32 = vor.u32 %v1422_v2, %v1418_v18 }
 0x155   : > { %v14683_v62 = vpop.permute.xlu1 %1540 }
 0x156   : > { %v14686_v3 = vpop.permute.xlu0 %1532  ;;  %v1428_v5 = vsel %vm1248_vm3, %v1423_v32, %v1427_v50  ;;  %v1638_v50 = vrot.slane %v14728_v52, 1 }
 0x157   : > { %1467 = vrot.lane.b32.xlu1 %v1416_v44, %s13775_s21 }
 0x158   : > { %1782 = vrot.lane.b32.xlu0 %v1515_v56, %s13779_s26 }
 0x159   : > { %v14690_v7 = vpop.permute.xlu1 %1575 }
 0x15a   : > { %v14692_v6 = vpop.permute.xlu0 %1567  ;;  %v1876_v12 = vsel %vm1858_vm14, %v1843_v40, %v14690_v7 }
 0x15b   : > { %1548 = vrot.lane.b32.xlu1 %v1515_v56, %s13774_s27 }
 0x15c   : > { %1546 = vrot.lane.b32.xlu0 %v14614_v9, %s13774_s27 }
 0x15d   : > { %v14699_v10 = vpop.permute.xlu1 %1577 }
 0x15e   : > { %v14701_v61 = vpop.permute.xlu0 %1569 }
 0x15f   : > { %1585 = vrot.lane.b32.xlu1 %v12867_v29, %s13776_s24 }
 0x160   : > { %1583 = vrot.lane.b32.xlu0 %v14607_v60, %s13776_s24 }
 0x161   : > { %v1623_v17 = vpop.permute.xlu1 %1622 }
 0x162   : > { %v1615_v9 = vpop.permute.xlu0 %1614 }
 0x163   : > { %1632 = vrot.lane.b32.xlu1 %v1428_v5, %s13780_s14 }
 0x164   : > { %1630 = vrot.lane.b32.xlu0 %v1416_v44, %s13780_s14 }
 0x165   : > { %v14712_v20 = vpop.permute.xlu1 %1624 }
 0x166   : > { %v14714_v60 = vpop.permute.xlu0 %1616 }
 0x167   : > { %1667 = vrot.lane.b32.xlu1 %v1518_v41, %s13778_s25 }
 0x168   : > { %1665 = vrot.lane.b32.xlu0 %v1515_v56, %s13778_s25  ;;  %v14761_v56 = vld [vmem:[#allocation2 + $0xd4] ss:$0 sps:$4 sm:$0x11]  }
 0x169   : > { %v1658_v30 = vpop.permute.xlu1 %1657  ;;  %v1721_v21 = vshll.u32 %v14761_v56, 16  ;;  %v1758_v42 = vrot.slane %v14761_v56, 1 }
 0x16a   : > { %v1650_v31 = vpop.permute.xlu0 %1649 }
 0x16b   : > { %1704 = vrot.lane.b32.xlu1 %v14694_v8, %s13777_s29 }
 0x16c   : > { %1702 = vrot.lane.b32.xlu0 %v12867_v29, %s13777_s29  ;;  %v13592_v29 = vld [vmem:[#allocation2 + $0x30] sm:$0xff]  }
 0x16d   : > { %v14724_v35 = vpop.permute.xlu1 %1659  ;;  %v1802_v59 = vsel %vm1792_vm12, %v13592_v29, %v14644_v43  ;;  %v1909_v43 = vsel %vm1891_vm15, %v1876_v12, %v1623_v17 }
 0x16e   : > { %v14726_v34 = vpop.permute.xlu0 %1651  ;;  %v1835_v18 = vsel %vm1825_vm13, %v1802_v59, %v14677_v49  ;;  %v1942_v32 = vsel %vm1924_vm0, %v1909_v43, %v1658_v30  ;;  %v1639_v49 = vrot.slane %v12872_v39, 1  ;;  %v1804_v30 = vsel %vm1792_vm12, %v13593_v28, %v14667_v1 }
 0x16f   : > { %1751 = vrot.lane.b32.xlu1 %v14722_v33, %s13781_s15  ;;  %v1868_v2 = vsel %vm1858_vm14, %v1835_v18, %v14692_v6  ;;  %v1605_v6 = vsel %vm1248_vm3, %v1600_v13, %v1604_v19 }
 0x170   : > { %1749 = vrot.lane.b32.xlu0 %v1428_v5, %s13781_s15  ;;  %v1901_v63 = vsel %vm1891_vm15, %v1868_v2, %v1615_v9  ;;  %v1640_v27 = vsel %vm1473_vm2, %v1638_v50, %v1639_v49 }
 0x171   : > { %v1695_v22 = vpop.permute.xlu1 %1694  ;;  %v1934_v14 = vsel %vm1924_vm0, %v1901_v63, %v1650_v31  ;;  %v1845_v31 = vsel %vm1825_vm13, %v1812_v24, %v14683_v62 }
 0x172   : > { %v1687_v23 = vpop.permute.xlu0 %1686  ;;  %v1975_v7 = vsel %vm1957_vm1, %v1942_v32, %v1695_v22  ;;  %v1837_v22 = vsel %vm1825_vm13, %v1804_v30, %v14686_v3  ;;  %v1878_v36 = vsel %vm1858_vm14, %v1845_v31, %v14699_v10  ;;  %v1757_v10 = vrot.slane %v14749_v54, 1  ;;  %v13596_v30 = vld [vmem:[#allocation2 + $0x54] sm:$0xff]  }
 0x173   : > { %1469 = vrot.lane.b32.xlu1 %v1428_v5, %s13775_s21  ;;  %v1716_v5 = vshll.u32 %v14749_v54, 16  ;;  %v1967_v11 = vsel %vm1957_vm1, %v1934_v14, %v1687_v23  ;;  %v1870_v1 = vsel %vm1858_vm14, %v1837_v22, %v14701_v61  ;;  %v1911_v62 = vsel %vm1891_vm15, %v1878_v36, %v14712_v20 }
 0x174   : > { %1784 = vrot.lane.b32.xlu0 %v1518_v41, %s13779_s26  ;;  %v1723_v23 = vrot.slane %v1721_v21, 1  ;;  %v1903_v39 = vsel %vm1891_vm15, %v1870_v1, %v14714_v60  ;;  %v1944_v3 = vsel %vm1924_vm0, %v1911_v62, %v14724_v35  ;;  %v1759_v55 = vsel %vm1473_vm2, %v1757_v10, %v1758_v42 }
 0x175   : > { %v14737_v45 = vpop.permute.xlu1 %1696  ;;  %v1718_v58 = vrot.slane %v1716_v5, 1  ;;  %v1936_v61 = vsel %vm1924_vm0, %v1903_v39, %v14726_v34  ;;  %vm4171_vm2 = vcmask 253952  }
 0x176   : > { %v14742_v26 = vpop.permute.xlu0 %1688  ;;  %v1977_v20 = vsel %vm1957_vm1, %v1944_v3, %v14737_v45  ;;  %4174 = vst.msk [vmem:[#allocation3 + $0xc] sm:$0x1] %vm4171_vm2, %v13773_v0  ;;  %4172 = vst.msk [vmem:[#allocation3 + $0x4] sm:$0x1] %vm4171_vm2, %v13773_v0 }
 0x177   : > { %1471 = vrot.lane.b32.xlu1 %v14722_v33, %s13775_s21  ;;  %v1719_v47 = vor.u32 %v1718_v58, %v1714_v37  ;;  %v1969_v60 = vsel %vm1957_vm1, %v1936_v61, %v14742_v26  ;;  %4176 = vst.msk [vmem:[#allocation3 + $0x14] sm:$0x1] %vm4171_vm2, %v13773_v0  ;;  %4178 = vst.msk [vmem:[#allocation3 + $0x1c] sm:$0x1] %vm4171_vm2, %v13773_v0 }
 0x178   : > { %1786 = vrot.lane.b32.xlu0 %v14740_v46, %s13779_s26  ;;  %4180 = vst.msk [vmem:[#allocation3 + $0x24] sm:$0x1] %vm4171_vm2, %v13773_v0  ;;  %4182 = vst.msk [vmem:[#allocation3 + $0x2c] sm:$0x1] %vm4171_vm2, %v13773_v0 }
 0x179   : > { %v1742_v44 = vpop.permute.xlu1 %1741  ;;  %v1724_v45 = vsel %vm1248_vm3, %v1719_v47, %v1723_v23  ;;  %vm4169_vm3 = vcmask 257024   ;;  %4184 = vst.msk [vmem:[#allocation3 + $0x34] sm:$0x1] %vm4171_vm2, %v13773_v0  ;;  %4186 = vst.msk [vmem:[#allocation3 + $0x3c] sm:$0x1] %vm4171_vm2, %v13773_v0  ;;  %v13597_v47 = vld [vmem:[#allocation2 + $0x84] sm:$0xff]  }
 0x17a   : > { %v1734_v53 = vpop.permute.xlu0 %1733  ;;  %v2008_v15 = vsel %vm1990_vm5, %v1975_v7, %v1742_v44  ;;  %4188 = vst.msk [vmem:[#allocation3 + $0x44] sm:$0x1] %vm4171_vm2, %v13773_v0  ;;  %4190 = vst.msk [vmem:[#allocation3 + $0x4c] sm:$0x1] %vm4171_vm2, %v13773_v0 }
 0x17b   : > { %1552 = vrot.lane.b32.xlu1 %v14740_v46, %s13774_s27  ;;  %v2000_v17 = vsel %vm1990_vm5, %v1967_v11, %v1734_v53  ;;  %4173 = vst.msk [vmem:[#allocation3 + $0x8] sm:$0xf] %vm4169_vm3, %v13773_v0  ;;  %4170 = vst.msk [vmem:[#allocation3] sm:$0xf] %vm4169_vm3, %v13773_v0  ;;  %v13594_v11 = vld [vmem:[#allocation2 + $0x78] sm:$0xff]  }
 0x17c   : > { %1550 = vrot.lane.b32.xlu0 %v1518_v41, %s13774_s27  ;;  %4175 = vst.msk [vmem:[#allocation3 + $0x10] sm:$0xf] %vm4169_vm3, %v13773_v0  ;;  %4177 = vst.msk [vmem:[#allocation3 + $0x18] sm:$0xf] %vm4169_vm3, %v13773_v0 }
 0x17d   : > { %v1744_v57 = vpop.permute.xlu1 %1743  ;;  %4179 = vst.msk [vmem:[#allocation3 + $0x20] sm:$0xf] %vm4169_vm3, %v13773_v0  ;;  %4181 = vst.msk [vmem:[#allocation3 + $0x28] sm:$0xf] %vm4169_vm3, %v13773_v0 }
 0x17e   : > { %v1736_v4 = vpop.permute.xlu0 %1735  ;;  %v2010_v35 = vsel %vm1990_vm5, %v1977_v20, %v1744_v57  ;;  %4183 = vst.msk [vmem:[#allocation3 + $0x30] sm:$0xf] %vm4169_vm3, %v13773_v0  ;;  %4185 = vst.msk [vmem:[#allocation3 + $0x38] sm:$0xf] %vm4169_vm3, %v13773_v0 }
 0x17f   : > { %1589 = vrot.lane.b32.xlu1 %v14728_v52, %s13776_s24  ;;  %v2002_v51 = vsel %vm1990_vm5, %v1969_v60, %v1736_v4  ;;  %4187 = vst.msk [vmem:[#allocation3 + $0x40] sm:$0xf] %vm4169_vm3, %v13773_v0  ;;  %4189 = vst.msk [vmem:[#allocation3 + $0x48] sm:$0xf] %vm4169_vm3, %v13773_v0 }
 0x180   : > { %1587 = vrot.lane.b32.xlu0 %v14694_v8, %s13776_s24 }
 0x181   : > { %v1777_v16 = vpop.permute.xlu1 %1776 }
 0x182   : > { %v1769_v9 = vpop.permute.xlu0 %1768  ;;  %v2041_v41 = vsel %vm2023_vm7, %v2008_v15, %v1777_v16  ;;  %v13595_v16 = vld [vmem:[#allocation2 + $0x48] sm:$0xff]  }
 0x183   : > { %v2033_v25 = vsel %vm2023_vm7, %v2000_v17, %v1769_v9  ;;  %1636 = vrot.lane.b32.xlu1 %v1605_v6, %s13780_s14  ;;  %12654 = vmatprep.mubr.msk.bf16.mxu1 %vm2078_vm8, %v2041_v41 }
 0x184   : > { %1634 = vrot.lane.b32.xlu0 %v14722_v33, %s13780_s14  ;;  %12646 = vmatprep.mubr.msk.bf16.mxu0 %vm2078_vm8, %v2033_v25 }
 0x185   : > { %v14805_v38 = vpop.permute.xlu1 %1461 }
 0x186   : > { %v14811_v33 = vpop.permute.xlu0 %1453  ;;  %v1814_v15 = vsel %vm1792_vm12, %v13594_v11, %v14805_v38  ;;  %v13598_v11 = vld [vmem:[#allocation2 + $0x90] sm:$0xff]  }
 0x187   : > { %1671 = vrot.lane.b32.xlu1 %v1640_v27, %s13778_s25  ;;  %v1806_v17 = vsel %vm1792_vm12, %v13595_v16, %v14811_v33 }
 0x188   : > { %1669 = vrot.lane.b32.xlu0 %v14740_v46, %s13778_s25 }
 0x189   : > { %v1779_v48 = vpop.permute.xlu1 %1778 }
 0x18a   : > { %v2043_v44 = vsel %vm2023_vm7, %v2010_v35, %v1779_v48  ;;  %v1771_v53 = vpop.permute.xlu0 %1770 }
 0x18b   : > { %v2035_v34 = vsel %vm2023_vm7, %v2002_v51, %v1771_v53  ;;  %1708 = vrot.lane.b32.xlu1 %v14749_v54, %s13777_s29  ;;  %12655 = vmatmul.mubr.msk.bf16.vlgmr.msra.gmra.mrb[0].mxu1 %vm2078_vm8, %v2043_v44 }
 0x18c   : > { %1706 = vrot.lane.b32.xlu0 %v14728_v52, %s13777_s29  ;;  %12647 = vmatmul.mubr.msk.bf16.gmra.mrb[8].mxu0 %vm2078_vm8, %v2035_v34  ;;  %s16870_s29 = sld [smem:[#allocation26_spill]] }
 0x18d   : > { %v14839_v46 = vpop.permute.xlu1 %1463 }
 0x18e   : > { %v14841_v26 = vpop.permute.xlu0 %1455  ;;  %v1816_v60 = vsel %vm1792_vm12, %v13597_v47, %v14839_v46 }
 0x18f   : > { %1755 = vrot.lane.b32.xlu1 %v1724_v45, %s13781_s15  ;;  %v1808_v31 = vsel %vm1792_vm12, %v13596_v30, %v14841_v26 }
 0x190   : > { %1753 = vrot.lane.b32.xlu0 %v1605_v6, %s13781_s15  ;;  %s16867_s15 = sld [smem:[#allocation17_spill]] }
 0x191   : > { %v1543_v54 = vpop.permute.xlu1 %1542 }
 0x192   : > { %v1535_v29 = vpop.permute.xlu0 %1534  ;;  %v1847_v9 = vsel %vm1825_vm13, %v1814_v15, %v1543_v54  ;;  %s16760_s25 = scalar_lea.hbm %s16870_s29, %s12385_s16 }
 0x193   : > { %1790 = vrot.lane.b32.xlu1 %v1759_v55, %s13779_s26  ;;  %v1839_v41 = vsel %vm1825_vm13, %v1806_v17, %v1535_v29 }
 0x194   : > { %1788 = vrot.lane.b32.xlu0 %v1640_v27, %s13779_s26  ;;  %s13696_s26 = sshll.u32 %s13790_s22, 4  ;;  %s13697_s26 = int_to_ptr.vmem [resolvable:$false] %s13696_s26 }
 0x195   : > { %v14848_v52 = vpop.permute.xlu1 %1544  ;;  %s13698_s14 = scalar_lea.vmem %s13697_s26, 32 }
 0x196   : > { %v1537_v59 = vpop.permute.xlu0 %1536  ;;  %v1849_v48 = vsel %vm1825_vm13, %v1816_v60, %v14848_v52 }
 0x197   : > { %v1841_v22 = vsel %vm1825_vm13, %v1808_v31, %v1537_v59 }
 0x199   : > { %v1580_v40 = vpop.permute.xlu1 %1579 }
 0x19a   : > { %v1572_v13 = vpop.permute.xlu0 %1571  ;;  %v1880_v21 = vsel %vm1858_vm14, %v1847_v9, %v1580_v40  ;;  %v13599_v9 = vld [vmem:[#allocation2 + $0x9c] sm:$0xff]  }
 0x19b   : > { %v1872_v25 = vsel %vm1858_vm14, %v1839_v41, %v1572_v13 }
 0x19d   : > { %v14850_v19 = vpop.permute.xlu1 %1581 }
 0x19e   : > { %v1574_v56 = vpop.permute.xlu0 %1573  ;;  %v1882_v53 = vsel %vm1858_vm14, %v1849_v48, %v14850_v19  ;;  %v4586_v19 = vld [vmem:[#allocation3] sm:$0xf] }
 0x19f   : > { %v1874_v1 = vsel %vm1858_vm14, %v1841_v22, %v1574_v56  ;;  %v4587_v56 = vld [vmem:[#allocation3 + $0x4] sm:$0x1] }
 0x1a1   : > { %v1627_v18 = vpop.permute.xlu1 %1626 }
 0x1a2   : > { %v1619_v12 = vpop.permute.xlu0 %1618  ;;  %v1913_v27 = vsel %vm1891_vm15, %v1880_v21, %v1627_v18  ;;  %v11705_v18 = vcombine.low %v4586_v19, %v4587_v56 }
 0x1a3   : > { %v1905_v37 = vsel %vm1891_vm15, %v1872_v25, %v1619_v12 }
 0x1a5   : > { %v14852_v57 = vpop.permute.xlu1 %1628 }
 0x1a6   : > { %v1621_v2 = vpop.permute.xlu0 %1620  ;;  %v1915_v26 = vsel %vm1891_vm15, %v1882_v53, %v14852_v57  ;;  %v4649_v57 = vshll.u32 %v11705_v18, 16  ;;  %v2347_v53 = vlaneseq }
 0x1a7   : > { %v1907_v39 = vsel %vm1891_vm15, %v1874_v1, %v1621_v2 }
 0x1a9   : > { %v1662_v43 = vpop.permute.xlu1 %1661 }
 0x1aa   : > { %v1654_v4 = vpop.permute.xlu0 %1653  ;;  %v1946_v58 = vsel %vm1924_vm0, %v1913_v27, %v1662_v43  ;;  %v4647_v43 = vshrl.u32 %v11705_v18, 16 }
 0x1ab   : > { %v1938_v36 = vsel %vm1924_vm0, %v1905_v37, %v1654_v4  ;;  %v4651_v4 = vrot.slane %v4649_v57, 1 }
 0x1ad   : > { %v14854_v63 = vpop.permute.xlu1 %1663 }
 0x1ae   : > { %v1656_v32 = vpop.permute.xlu0 %1655  ;;  %v1948_v46 = vsel %vm1924_vm0, %v1915_v26, %v14854_v63 }
 0x1af   : > { %v1940_v61 = vsel %vm1924_vm0, %v1907_v39, %v1656_v32  ;;  %v4652_v32 = vor.u32 %v4651_v4, %v4647_v43 }
 0x1b1   : > { %v1699_v50 = vpop.permute.xlu1 %1698  ;;  %4702 = vrot.lane.b32.xlu0 %v4652_v32, %s13783_s30 }
 0x1b2   : > { %v1691_v49 = vpop.permute.xlu0 %1690  ;;  %v1979_v38 = vsel %vm1957_vm1, %v1946_v58, %v1699_v50 }
 0x1b3   : > { %v1971_v62 = vsel %vm1957_vm1, %v1938_v36, %v1691_v49 }
 0x1b5   : > { %v1701_v14 = vpop.permute.xlu1 %1700 }
 0x1b6   : > { %v1693_v7 = vpop.permute.xlu0 %1692  ;;  %v1981_v55 = vsel %vm1957_vm1, %v1948_v46, %v1701_v14  ;;  %v4718_v14 = vrot.slane %v11705_v18, 1 }
 0x1b7   : > { %v1973_v35 = vsel %vm1957_vm1, %v1940_v61, %v1693_v7 }
 0x1b8   : > { %4726 = vrot.lane.b32.xlu0 %v4718_v14, %s13784_s23 }
 0x1b9   : > { %v1746_v6 = vpop.permute.xlu1 %1745 }
 0x1ba   : > { %v1738_v5 = vpop.permute.xlu0 %1737  ;;  %v2012_v33 = vsel %vm1990_vm5, %v1979_v38, %v1746_v6 }
 0x1bb   : > { %v2004_v3 = vsel %vm1990_vm5, %v1971_v62, %v1738_v5 }
 0x1bd   : > { %v1748_v24 = vpop.permute.xlu1 %1747 }
 0x1be   : > { %v1740_v28 = vpop.permute.xlu0 %1739  ;;  %v2014_v29 = vsel %vm1990_vm5, %v1981_v55, %v1748_v24  ;;  %v14962_v55 = vshrl.u32 %v2347_v53, 7 }
 0x1bf   : > { %v2006_v51 = vsel %vm1990_vm5, %v1973_v35, %v1740_v28 }
 0x1c1   : > { %v1781_v23 = vpop.permute.xlu1 %1780 }
 0x1c2   : > { %v2045_v10 = vsel %vm2023_vm7, %v2012_v33, %v1781_v23  ;;  %v1773_v42 = vpop.permute.xlu0 %1772 }
 0x1c3   : > { %v2037_v20 = vsel %vm2023_vm7, %v2004_v3, %v1773_v42  ;;  %12658 = vmatprep.mubr.msk.bf16.mxu1 %vm2078_vm8, %v2045_v10 }
 0x1c4   : > { %12650 = vmatprep.mubr.msk.bf16.mxu0 %vm2078_vm8, %v2037_v20 }
 0x1c5   : > { %v1775_v44 = vpop.permute.xlu1 %1774 }
 0x1c6   : > { %v2039_v34 = vsel %vm2023_vm7, %v2006_v51, %v1775_v44  ;;  %v1466_v45 = vpop.permute.xlu0 %1465  ;;  %v13785_v51 = vmov 1983009808  }
 0x1c7   : > { %12651 = vmatmul.mubr.msk.bf16.gmra.mrb[12].mxu0 %vm2078_vm8, %v2039_v34  ;;  %v1818_v15 = vsel %vm1792_vm12, %v13598_v11, %v1466_v45  ;;  %v2345_v44 = vunpack.c.l.s4 %v13785_v51 }
 0x1c9   : > { %v1468_v54 = vpop.permute.xlu1 %1467  ;;  %v2346_v46 = vunpack.c.0.s8 %v2345_v44 }
 0x1ca   : > { %v1783_v52 = vpop.permute.xlu0 %1782  ;;  %v1820_v41 = vsel %vm1792_vm12, %v13599_v9, %v1468_v54  ;;  %v13600_v54 = vld [vmem:[#allocation2 + $0xa8] sm:$0xff]  }
 0x1cb   : > { %v2047_v59 = vsel %vm2023_vm7, %v2014_v29, %v1783_v52  ;;  %v14968_v52 = vld [vmem:[%s16804_s2] ss:$0 sm:$0xff] }
 0x1cc   : > { %12659 = vmatmul.mubr.msk.bf16.gmra.mrb[4].mxu1 %vm2078_vm8, %v2047_v59 }
 0x1cd   : > { %v1549_v40 = vpop.permute.xlu1 %1548 }
 0x1ce   : > { %v1547_v13 = vpop.permute.xlu0 %1546  ;;  %v1853_v28 = vsel %vm1825_vm13, %v1820_v41, %v1549_v40 }
 0x1cf   : > { %v1851_v16 = vsel %vm1825_vm13, %v1818_v15, %v1547_v13 }
 0x1d1   : > { %v1586_v12 = vpop.permute.xlu1 %1585 }
 0x1d2   : > { %v1584_v2 = vpop.permute.xlu0 %1583  ;;  %v1886_v37 = vsel %vm1858_vm14, %v1853_v28, %v1586_v12 }
 0x1d3   : > { %v1884_v21 = vsel %vm1858_vm14, %v1851_v16, %v1584_v2  ;;  %v14978_v2 = vsub.s32 %v2346_v46, %v14962_v55 }
 0x1d5   : > { %v1633_v63 = vpop.permute.xlu1 %1632 }
 0x1d6   : > { %v1631_v50 = vpop.permute.xlu0 %1630  ;;  %v1919_v36 = vsel %vm1891_vm15, %v1886_v37, %v1633_v63 }
 0x1d7   : > { %v1917_v25 = vsel %vm1891_vm15, %v1884_v21, %v1631_v50 }
 0x1d9   : > { %v1668_v49 = vpop.permute.xlu1 %1667 }
 0x1da   : > { %v1666_v7 = vpop.permute.xlu0 %1665  ;;  %v1952_v1 = vsel %vm1924_vm0, %v1919_v36, %v1668_v49 }
 0x1db   : > { %v1950_v27 = vsel %vm1924_vm0, %v1917_v25, %v1666_v7 }
 0x1dd   : > { %v1705_v6 = vpop.permute.xlu1 %1704 }
 0x1de   : > { %v1703_v5 = vpop.permute.xlu0 %1702  ;;  %v1985_v62 = vsel %vm1957_vm1, %v1952_v1, %v1705_v6 }
 0x1df   : > { %v1983_v30 = vsel %vm1957_vm1, %v1950_v27, %v1703_v5 }
 0x1e1   : > { %v1752_v17 = vpop.permute.xlu1 %1751 }
 0x1e2   : > { %v1750_v24 = vpop.permute.xlu0 %1749  ;;  %v2018_v23 = vsel %vm1990_vm5, %v1985_v62, %v1752_v17 }
 0x1e3   : > { %v2016_v58 = vsel %vm1990_vm5, %v1983_v30, %v1750_v24 }
 0x1e5   : > { %v1470_v31 = vpop.permute.xlu1 %1469 }
 0x1e6   : > { %v1785_v22 = vpop.permute.xlu0 %1784  ;;  %v1822_v29 = vsel %vm1792_vm12, %v13600_v54, %v1470_v31 }
 0x1e7   : > { %v2049_v38 = vsel %vm2023_vm7, %v2016_v58, %v1785_v22 }
 0x1e8   : > { %12662 = vmatprep.mubr.msk.bf16.mxu1 %vm2078_vm8, %v2049_v38 }
 0x1e9   : > { %v1472_v33 = vpop.permute.xlu1 %1471 }
 0x1ea   : > { %v1787_v39 = vpop.permute.xlu0 %1786  ;;  %v1824_v34 = vsel %vm1792_vm12, %v14694_v8, %v1472_v33  ;;  %vm4449_vm12 = vcmask 1043459  }
 0x1eb   : > { %v2051_v3 = vsel %vm2023_vm7, %v2018_v23, %v1787_v39 }
 0x1ec   : > { %12663 = vmatmul.mubr.msk.bf16.gmra.mrb[8].mxu1 %vm2078_vm8, %v2051_v3 }
 0x1ed   : > { %v1553_v10 = vpop.permute.xlu1 %1552 }
 0x1ee   : > { %v1551_v42 = vpop.permute.xlu0 %1550  ;;  %v1857_v59 = vsel %vm1825_vm13, %v1824_v34, %v1553_v10 }
 0x1ef   : > { %v1855_v40 = vsel %vm1825_vm13, %v1822_v29, %v1551_v42  ;;  %vm4451_vm13 = vcmask 1044484  }
 0x1f1   : > { %v1590_v61 = vpop.permute.xlu1 %1589 }
 0x1f2   : > { %v1588_v20 = vpop.permute.xlu0 %1587  ;;  %v1890_v13 = vsel %vm1858_vm14, %v1857_v59, %v1590_v61 }
 0x1f3   : > { %v1888_v8 = vsel %vm1858_vm14, %v1855_v40, %v1588_v20  ;;  %vm4453_vm14 = vcmask 1045509  }
 0x1f5   : > { %v1637_v47 = vpop.permute.xlu1 %1636 }
 0x1f6   : > { %v1635_v60 = vpop.permute.xlu0 %1634  ;;  %v1923_v18 = vsel %vm1891_vm15, %v1890_v13, %v1637_v47 }
 0x1f7   : > { %v1921_v12 = vsel %vm1891_vm15, %v1888_v8, %v1635_v60  ;;  %vm4455_vm15 = vcmask 1046534  }
 0x1f9   : > { %v1672_v35 = vpop.permute.xlu1 %1671 }
 0x1fa   : > { %v1670_v48 = vpop.permute.xlu0 %1669  ;;  %v1956_v63 = vsel %vm1924_vm0, %v1923_v18, %v1672_v35 }
 0x1fb   : > { %v1954_v32 = vsel %vm1924_vm0, %v1921_v12, %v1670_v48  ;;  %vm4457_vm0 = vcmask 1047559  }
 0x1fd   : > { %v1709_v45 = vpop.permute.xlu1 %1708 }
 0x1fe   : > { %v1707_v26 = vpop.permute.xlu0 %1706  ;;  %v1989_v14 = vsel %vm1957_vm1, %v1956_v63, %v1709_v45 }
 0x1ff   : > { %v1987_v7 = vsel %vm1957_vm1, %v1954_v32, %v1707_v26  ;;  %vm15060_vm1 = vmand %vm4171_vm2, %vm625_vm4  ;;  %vm5874_vm2 = vsmask.f32 2306 }
 0x200   : > { %vm15075_vm4 = vmand %vm4169_vm3, %vm950_vm6  ;;  %vm4865_vm6 = vcmask 523264  }
 0x201   : > { %v12640_v19 = vpop.f32.mrb[0].mxu0  ;;  %v1756_v56 = vpop.permute.xlu1 %1755 }
 0x202   : > { %v2161_v57 = vadd.f32 %v12640_v19, %v14968_v52  ;;  %v2152_v43 = vpop.f32.mrb[1].mxu0  ;;  %v1754_v4 = vpop.permute.xlu0 %1753  ;;  %v2022_v15 = vsel %vm1990_vm5, %v1989_v14, %v1756_v56 }
 0x203   : > { %v2153_v50 = vadd.f32 %v14968_v52, %v2152_v43  ;;  %v12641_v49 = vpop.f32.mrb[2].mxu0  ;;  %v2020_v17 = vsel %vm1990_vm5, %v1987_v7, %v1754_v4  ;;  %vm4882_vm5 = vcmask 785408  }
 0x204   : > { %v2281_v6 = vmax.f32 %v2161_v57, 0.0  ;;  %v2164_v5 = vadd.f32 %v12641_v49, %v14968_v52  ;;  %v2155_v11 = vpop.f32.mrb[3].mxu0 }
 0x205   : > { %v2279_v16 = vmax.f32 %v2153_v50, 0.0  ;;  %v2156_v9 = vadd.f32 %v14968_v52, %v2155_v11  ;;  %v1791_v41 = vpop.permute.xlu1 %1790 }
 0x206   : > { %v2377_v21 = vcombine.high %v2281_v6, %v2281_v6  ;;  %v2384_v24 = vrot.slane %v2281_v6, %v14978_v2  ;;  %v14990_v25 = vmax.f32 %v2164_v5, 0.0  ;;  %v2055_v27 = vsel %vm2023_vm7, %v2022_v15, %v1791_v41  ;;  %v1789_v28 = vpop.permute.xlu0 %1788 }
 0x207   : > { %v2343_v30 = vcombine.high %v2279_v16, %v2279_v16  ;;  %v2350_v31 = vrot.slane %v2279_v16, %v14978_v2  ;;  %v14994_v37 = vmax.f32 %v2156_v9, 0.0  ;;  %v2053_v58 = vsel %vm2023_vm7, %v2020_v17, %v1789_v28 }
 0x208   : > { %v2391_v22 = vrot.slane %v2377_v21, %v14978_v2  ;;  %v2392_v36 = vcombine.high %v2384_v24, %v2384_v24  ;;  %v3072_v38 = vsel %vm3015_vm9, %v2384_v24, -inf  ;;  %v2394_v1 = vcombine.high %v14990_v25, %v14990_v25  ;;  %12666 = vmatprep.mubr.msk.bf16.mxu1 %vm2078_vm8, %v2053_v58 }
 0x209   : > { %v3073_v62 = vrot.slane %v3072_v38, 4  ;;  %v2357_v33 = vrot.slane %v2343_v30, %v14978_v2  ;;  %v2358_v23 = vcombine.high %v2350_v31, %v2350_v31  ;;  %v3016_v39 = vsel %vm3015_vm9, %v2350_v31, -inf  ;;  %12667 = vmatmul.mubr.msk.bf16.gmra.mrb[12].mxu1 %vm2078_vm8, %v2055_v27 }
 0x20a   : > { %v2393_v3 = vcombine.high %v2391_v22, %v2391_v22  ;;  %v3079_v10 = vsel %vm3015_vm9, %v2392_v36, -inf  ;;  %v3086_v42 = vsel %vm3015_vm9, %v2391_v22, -inf  ;;  %v3017_v61 = vrot.slane %v3016_v39, 4 }
 0x20b   : > { %v3074_v20 = vmax.f32 %v3072_v38, %v3073_v62  ;;  %v3080_v47 = vrot.slane %v3079_v10, 4  ;;  %v3087_v60 = vrot.slane %v3086_v42, 4  ;;  %v2359_v35 = vcombine.high %v2357_v33, %v2357_v33 }
 0x20c   : > { %v3093_v48 = vsel %vm3015_vm9, %v2393_v3, -inf  ;;  %v3018_v51 = vmax.f32 %v3016_v39, %v3017_v61  ;;  %v3023_v44 = vsel %vm3015_vm9, %v2358_v23, -inf  ;;  %v3030_v53 = vsel %vm3015_vm9, %v2357_v33, -inf }
 0x20d   : > { %v3075_v34 = vrot.slane %v3074_v20, 2  ;;  %v3081_v45 = vmax.f32 %v3079_v10, %v3080_v47  ;;  %v3088_v26 = vmax.f32 %v3086_v42, %v3087_v60  ;;  %v3094_v46 = vrot.slane %v3093_v48, 4 }
 0x20e   : > { %v3019_v54 = vrot.slane %v3018_v51, 2  ;;  %v3024_v29 = vrot.slane %v3023_v44, 4  ;;  %v3031_v59 = vrot.slane %v3030_v53, 4  ;;  %v3037_v40 = vsel %vm3015_vm9, %v2359_v35, -inf }
 0x20f   : > { %v3076_v13 = vmax.f32 %v3074_v20, %v3075_v34  ;;  %v3082_v8 = vrot.slane %v3081_v45, 2  ;;  %v3089_v19 = vrot.slane %v3088_v26, 2  ;;  %v3095_v56 = vmax.f32 %v3093_v48, %v3094_v46 }
 0x210   : > { %v3020_v18 = vmax.f32 %v3018_v51, %v3019_v54  ;;  %v3025_v12 = vmax.f32 %v3023_v44, %v3024_v29  ;;  %v3032_v57 = vmax.f32 %v3030_v53, %v3031_v59  ;;  %v3038_v43 = vrot.slane %v3037_v40, 4 }
 0x211   : > { %v3077_v4 = vrot.slane %v3076_v13, 1  ;;  %v3083_v63 = vmax.f32 %v3081_v45, %v3082_v8  ;;  %v3090_v32 = vmax.f32 %v3088_v26, %v3089_v19  ;;  %v3096_v50 = vrot.slane %v3095_v56, 2 }
 0x212   : > { %v3021_v49 = vrot.slane %v3020_v18, 1  ;;  %v3026_v14 = vrot.slane %v3025_v12, 2  ;;  %v3033_v7 = vrot.slane %v3032_v57, 2  ;;  %v3039_v6 = vmax.f32 %v3037_v40, %v3038_v43 }
 0x213   : > { %v3078_v5 = vmax.f32 %v3076_v13, %v3077_v4  ;;  %v3084_v11 = vrot.slane %v3083_v63, 1  ;;  %v3091_v15 = vrot.slane %v3090_v32, 1  ;;  %v3097_v16 = vmax.f32 %v3095_v56, %v3096_v50 }
 0x214   : > { %v3022_v17 = vmax.f32 %v3020_v18, %v3021_v49  ;;  %v3027_v9 = vmax.f32 %v3025_v12, %v3026_v14  ;;  %v3034_v41 = vmax.f32 %v3032_v57, %v3033_v7  ;;  %v3040_v21 = vrot.slane %v3039_v6, 2 }
 0x215   : > { %v3085_v24 = vmax.f32 %v3083_v63, %v3084_v11  ;;  %v3092_v27 = vmax.f32 %v3090_v32, %v3091_v15  ;;  %v3098_v28 = vrot.slane %v3097_v16, 1  ;;  %v3914_v30 = vsel %vm3912_vm10, %v3078_v5, -inf }
 0x216   : > { %v3028_v31 = vrot.slane %v3027_v9, 1  ;;  %v3035_v58 = vrot.slane %v3034_v41, 1  ;;  %v3041_v22 = vmax.f32 %v3039_v6, %v3040_v21  ;;  %v3913_v36 = vsel %vm3912_vm10, %v3022_v17, -inf }
 0x217   : > { %v3099_v38 = vmax.f32 %v3097_v16, %v3098_v28  ;;  %v3917_v62 = vsel %vm3912_vm10, %v3085_v24, -inf  ;;  %v3920_v33 = vsel %vm3912_vm10, %v3092_v27, -inf  ;;  %v3915_v23 = vmax.f32 %v3913_v36, %v3914_v30 }
 0x218   : > { %v3029_v39 = vmax.f32 %v3027_v9, %v3028_v31  ;;  %v3036_v3 = vmax.f32 %v3034_v41, %v3035_v58  ;;  %v3042_v10 = vrot.slane %v3041_v22, 1  ;;  %v2401_v42 = vrot.slane %v14990_v25, %v14978_v2 }
 0x219   : > { %v3923_v61 = vsel %vm3912_vm10, %v3099_v38, -inf  ;;  %v12389_v20 = vpack.c.bf16 %v3915_v23, %v3915_v23  ;;  %v2408_v47 = vrot.slane %v2394_v1, %v14978_v2  ;;  %v2360_v60 = vcombine.high %v14994_v37, %v14994_v37 }
 0x21a   : > { %v3043_v35 = vmax.f32 %v3041_v22, %v3042_v10  ;;  %v3916_v48 = vsel %vm3912_vm10, %v3029_v39, -inf  ;;  %v3919_v51 = vsel %vm3912_vm10, %v3036_v3, -inf  ;;  %v2409_v44 = vcombine.high %v2401_v42, %v2401_v42 }
 0x21b   : > { %v3918_v53 = vmax.f32 %v3916_v48, %v3917_v62  ;;  %v3921_v34 = vmax.f32 %v3919_v51, %v3920_v33  ;;  %v4383_v45 = vunpack.c.l.b16 %v12389_v20  ;;  %v2410_v26 = vcombine.high %v2408_v47, %v2408_v47 }
 0x21c   : > { %v3922_v46 = vsel %vm3912_vm10, %v3043_v35, -inf  ;;  %v3100_v54 = vsel %vm3015_vm9, %v2401_v42, -inf  ;;  %v3107_v25 = vsel %vm3015_vm9, %v2409_v44, -inf  ;;  %v3114_v1 = vsel %vm3015_vm9, %v2408_v47, -inf }
 0x21d   : > { %v3924_v29 = vmax.f32 %v3922_v46, %v3923_v61  ;;  %v12390_v59 = vpack.c.bf16 %v3918_v53, %v3918_v53  ;;  %v12391_v40 = vpack.c.bf16 %v3921_v34, %v3921_v34  ;;  %v3101_v13 = vrot.slane %v3100_v54, 4 }
 0x21e   : > { %v3108_v8 = vrot.slane %v3107_v25, 4  ;;  %v3115_v19 = vrot.slane %v3114_v1, 4  ;;  %v3121_v56 = vsel %vm3015_vm9, %v2410_v26, -inf  ;;  %v2367_v18 = vrot.slane %v14994_v37, %v14978_v2  ;;  %v12644_v12 = vpop.f32.mrb[4].mxu0 }
 0x21f   : > { %v12392_v57 = vpack.c.bf16 %v3924_v29, %v3924_v29  ;;  %v4384_v43 = vunpack.c.l.b16 %v12390_v59  ;;  %v4385_v4 = vunpack.c.l.b16 %v12391_v40  ;;  %v3102_v63 = vmax.f32 %v3100_v54, %v3101_v13  ;;  %v2168_v32 = vpop.f32.mrb[5].mxu0 }
 0x220   : > { %v3109_v50 = vmax.f32 %v3107_v25, %v3108_v8  ;;  %v3116_v49 = vmax.f32 %v3114_v1, %v3115_v19  ;;  %v3122_v14 = vrot.slane %v3121_v56, 4  ;;  %v2374_v7 = vrot.slane %v2360_v60, %v14978_v2  ;;  %v12645_v6 = vpop.f32.mrb[6].mxu0 }
 0x221   : > { %v4386_v5 = vunpack.c.l.b16 %v12392_v57  ;;  %v4448_v11 = vsel %vm4447_vm11, %v4384_v43, %v4383_v45  ;;  %v3103_v15 = vrot.slane %v3102_v63, 2  ;;  %v2375_v16 = vcombine.high %v2367_v18, %v2367_v18  ;;  %v2171_v17 = vpop.f32.mrb[7].mxu0 }
 0x222   : > { %v4450_v37 = vsel %vm4449_vm12, %v4385_v4, %v4448_v11  ;;  %v3110_v9 = vrot.slane %v3109_v50, 2  ;;  %v3117_v41 = vrot.slane %v3116_v49, 2  ;;  %v3123_v21 = vmax.f32 %v3121_v56, %v3122_v14 }
 0x223   : > { %v3104_v24 = vmax.f32 %v3102_v63, %v3103_v15  ;;  %v2376_v27 = vcombine.high %v2374_v7, %v2374_v7  ;;  %v3044_v28 = vsel %vm3015_vm9, %v2367_v18, -inf  ;;  %v3051_v30 = vsel %vm3015_vm9, %v2375_v16, -inf }
 0x224   : > { %v3111_v31 = vmax.f32 %v3109_v50, %v3110_v9  ;;  %v3118_v58 = vmax.f32 %v3116_v49, %v3117_v41  ;;  %v3124_v22 = vrot.slane %v3123_v21, 2  ;;  %v3045_v36 = vrot.slane %v3044_v28, 4 }
 0x225   : > { %v3105_v38 = vrot.slane %v3104_v24, 1  ;;  %v3052_v62 = vrot.slane %v3051_v30, 4  ;;  %v3058_v33 = vsel %vm3015_vm9, %v2374_v7, -inf  ;;  %v3065_v23 = vsel %vm3015_vm9, %v2376_v27, -inf }
 0x226   : > { %v3112_v39 = vrot.slane %v3111_v31, 1  ;;  %v3119_v3 = vrot.slane %v3118_v58, 1  ;;  %v3125_v10 = vmax.f32 %v3123_v21, %v3124_v22  ;;  %v3046_v42 = vmax.f32 %v3044_v28, %v3045_v36 }
 0x227   : > { %v3106_v61 = vmax.f32 %v3104_v24, %v3105_v38  ;;  %v3053_v20 = vmax.f32 %v3051_v30, %v3052_v62  ;;  %v3059_v47 = vrot.slane %v3058_v33, 4  ;;  %v3066_v60 = vrot.slane %v3065_v23, 4 }
 0x228   : > { %v3113_v35 = vmax.f32 %v3111_v31, %v3112_v39  ;;  %v3120_v48 = vmax.f32 %v3118_v58, %v3119_v3  ;;  %v3126_v51 = vrot.slane %v3125_v10, 1  ;;  %v3047_v44 = vrot.slane %v3046_v42, 2  ;;  %v4541_v3 = vld [vmem:[#allocation3 + $0xc] sm:$0x1] }
 0x229   : > { %v3054_v53 = vrot.slane %v3053_v20, 2  ;;  %v3060_v34 = vmax.f32 %v3058_v33, %v3059_v47  ;;  %v3067_v45 = vmax.f32 %v3065_v23, %v3066_v60  ;;  %v3926_v46 = vsel %vm3912_vm10, %v3106_v61, -inf }
 0x22a   : > { %v3127_v26 = vmax.f32 %v3125_v10, %v3126_v51  ;;  %v3929_v54 = vsel %vm3912_vm10, %v3113_v35, -inf  ;;  %v3048_v25 = vmax.f32 %v3046_v42, %v3047_v44  ;;  %v4452_v40 = vsel %vm4451_vm13, %v4386_v5, %v4450_v37 }
 0x22b   : > { %v3055_v1 = vmax.f32 %v3053_v20, %v3054_v53  ;;  %v3061_v29 = vrot.slane %v3060_v34, 2  ;;  %v3068_v59 = vrot.slane %v3067_v45, 2  ;;  %v3932_v13 = vsel %vm3912_vm10, %v3120_v48, -inf }
 0x22c   : > { %v3049_v8 = vrot.slane %v3048_v25, 1  ;;  %v2177_v19 = vadd.f32 %v12644_v12, %v14968_v52  ;;  %v2169_v56 = vadd.f32 %v14968_v52, %v2168_v32  ;;  %v3935_v18 = vsel %vm3912_vm10, %v3127_v26, -inf }
 0x22d   : > { %v3056_v57 = vrot.slane %v3055_v1, 1  ;;  %v3062_v43 = vmax.f32 %v3060_v34, %v3061_v29  ;;  %v3069_v4 = vmax.f32 %v3067_v45, %v3068_v59  ;;  %v2180_v14 = vadd.f32 %v12645_v6, %v14968_v52 }
 0x22e   : > { %v3050_v63 = vmax.f32 %v3048_v25, %v3049_v8  ;;  %v2285_v50 = vmax.f32 %v2177_v19, 0.0  ;;  %v2283_v49 = vmax.f32 %v2169_v56, 0.0  ;;  %v15049_v15 = vadd.f32 %v14968_v52, %v2171_v17 }
 0x22f   : > { %v3057_v7 = vmax.f32 %v3055_v1, %v3056_v57  ;;  %v3063_v5 = vrot.slane %v3062_v43, 1  ;;  %v3070_v11 = vrot.slane %v3069_v4, 1  ;;  %v2286_v56 = vmax.f32 %v2180_v14, 0.0 }
 0x230   : > { %v3925_v12 = vsel %vm3912_vm10, %v3050_v63, -inf  ;;  %v2445_v32 = vcombine.high %v2285_v50, %v2285_v50  ;;  %v2452_v16 = vrot.slane %v2285_v50, %v14978_v2  ;;  %v2411_v37 = vcombine.high %v2283_v49, %v2283_v49 }
 0x231   : > { %v3064_v9 = vmax.f32 %v3062_v43, %v3063_v5  ;;  %v3071_v41 = vmax.f32 %v3069_v4, %v3070_v11  ;;  %v3927_v21 = vmax.f32 %v3925_v12, %v3926_v46  ;;  %v3928_v24 = vsel %vm3912_vm10, %v3057_v7, -inf }
 0x232   : > { %v3930_v27 = vmax.f32 %v3928_v24, %v3929_v54  ;;  %v2459_v6 = vrot.slane %v2445_v32, %v14978_v2  ;;  %v2460_v28 = vcombine.high %v2452_v16, %v2452_v16  ;;  %v3184_v30 = vsel %vm3015_vm9, %v2452_v16, -inf }
 0x233   : > { %v3931_v17 = vsel %vm3912_vm10, %v3064_v9, -inf  ;;  %v3934_v31 = vsel %vm3912_vm10, %v3071_v41, -inf  ;;  %v12393_v58 = vpack.c.bf16 %v3927_v21, %v3927_v21  ;;  %v3185_v22 = vrot.slane %v3184_v30, 4 }
 0x234   : > { %v3933_v36 = vmax.f32 %v3931_v17, %v3932_v13  ;;  %v3936_v38 = vmax.f32 %v3934_v31, %v3935_v18  ;;  %v12394_v62 = vpack.c.bf16 %v3930_v27, %v3930_v27  ;;  %v2461_v33 = vcombine.high %v2459_v6, %v2459_v6  ;;  %v4536_v13 = vld [vmem:[#allocation3 + $0x8] sm:$0xf] }
 0x235   : > { %v4387_v23 = vunpack.c.l.b16 %v12393_v58  ;;  %v3186_v10 = vmax.f32 %v3184_v30, %v3185_v22  ;;  %v3191_v42 = vsel %vm3015_vm9, %v2460_v28, -inf  ;;  %v3198_v61 = vsel %vm3015_vm9, %v2459_v6, -inf }
 0x236   : > { %v12395_v20 = vpack.c.bf16 %v3933_v36, %v3933_v36  ;;  %v4388_v47 = vunpack.c.l.b16 %v12394_v62  ;;  %v12453_v60 = vpack.c.bf16 %v3936_v38, %v3936_v38  ;;  %v3192_v35 = vrot.slane %v3191_v42, 4 }
 0x237   : > { %v4454_v48 = vsel %vm4453_vm14, %v4387_v23, %v4452_v40  ;;  %v3187_v51 = vrot.slane %v3186_v10, 2  ;;  %v3199_v44 = vrot.slane %v3198_v61, 4  ;;  %v3205_v53 = vsel %vm3015_vm9, %v2461_v33, -inf }
 0x238   : > { %v4389_v34 = vunpack.c.l.b16 %v12395_v20  ;;  %v4456_v45 = vsel %vm4455_vm15, %v4388_v47, %v4454_v48  ;;  %v4542_v26 = vsel %vm15060_vm1, %v12453_v60, %v4541_v3  ;;  %v3193_v46 = vmax.f32 %v3191_v42, %v3192_v35 }
 0x239   : > { %4543 = vst [vmem:[#allocation3 + $0xc] sm:$0x1] %v4542_v26  ;;  %v3188_v54 = vmax.f32 %v3186_v10, %v3187_v51  ;;  %v3200_v25 = vmax.f32 %v3198_v61, %v3199_v44  ;;  %v3206_v1 = vrot.slane %v3205_v53, 4  ;;  %v2418_v29 = vrot.slane %v2283_v49, %v14978_v2 }
 0x23a   : > { %v4458_v59 = vsel %vm4457_vm0, %v4389_v34, %v4456_v45  ;;  %v3194_v8 = vrot.slane %v3193_v46, 2  ;;  %v2425_v19 = vrot.slane %v2411_v37, %v14978_v2  ;;  %v2462_v27 = vcombine.high %v2286_v56, %v2286_v56 }
 0x23b   : > { %v4501_v18 = vpack.c.b16 %v4458_v59, %v4458_v59  ;;  %v3189_v57 = vrot.slane %v3188_v54, 1  ;;  %v3201_v43 = vrot.slane %v3200_v25, 2  ;;  %v3207_v4 = vmax.f32 %v3205_v53, %v3206_v1 }
 0x23c   : > { %v3195_v63 = vmax.f32 %v3193_v46, %v3194_v8  ;;  %v2426_v50 = vcombine.high %v2418_v29, %v2418_v29  ;;  %v2427_v49 = vcombine.high %v2425_v19, %v2425_v19  ;;  %v3128_v7 = vsel %vm3015_vm9, %v2418_v29, -inf }
 0x23d   : > { %v4537_v5 = vsel %vm15075_vm4, %v4501_v18, %v4536_v13  ;;  %v3190_v11 = vmax.f32 %v3188_v54, %v3189_v57  ;;  %v3202_v12 = vmax.f32 %v3200_v25, %v3201_v43  ;;  %v3208_v32 = vrot.slane %v3207_v4, 2 }
 0x23e   : > { %4538 = vst [vmem:[#allocation3 + $0x8] sm:$0xf] %v4537_v5  ;;  %v3196_v16 = vrot.slane %v3195_v63, 1  ;;  %v3129_v9 = vrot.slane %v3128_v7, 4  ;;  %v3135_v14 = vsel %vm3015_vm9, %v2426_v50, -inf  ;;  %v3142_v37 = vsel %vm3015_vm9, %v2425_v19, -inf }
 0x23f   : > { %v3203_v41 = vrot.slane %v3202_v12, 1  ;;  %v3209_v21 = vmax.f32 %v3207_v4, %v3208_v32  ;;  %v3136_v24 = vrot.slane %v3135_v14, 4  ;;  %v3143_v30 = vrot.slane %v3142_v37, 4 }
 0x240   : > { %v3197_v6 = vmax.f32 %v3195_v63, %v3196_v16  ;;  %v3130_v28 = vmax.f32 %v3128_v7, %v3129_v9  ;;  %v3149_v17 = vsel %vm3015_vm9, %v2427_v49, -inf  ;;  %v3938_v38 = vsel %vm3912_vm10, %v3190_v11, -inf }
 0x241   : > { %v3204_v31 = vmax.f32 %v3202_v12, %v3203_v41  ;;  %v3210_v58 = vrot.slane %v3209_v21, 1  ;;  %v3137_v22 = vmax.f32 %v3135_v14, %v3136_v24  ;;  %v3150_v36 = vrot.slane %v3149_v17, 4 }
 0x242   : > { %v3131_v62 = vrot.slane %v3130_v28, 2  ;;  %v3144_v33 = vmax.f32 %v3142_v37, %v3143_v30  ;;  %v2469_v23 = vrot.slane %v2286_v56, %v14978_v2  ;;  %v3941_v10 = vsel %vm3912_vm10, %v3197_v6, -inf }
 0x243   : > { %v3211_v3 = vmax.f32 %v3209_v21, %v3210_v58  ;;  %v3138_v42 = vrot.slane %v3137_v22, 2  ;;  %v3151_v61 = vmax.f32 %v3149_v17, %v3150_v36  ;;  %v2476_v60 = vrot.slane %v2462_v27, %v14978_v2 }
 0x244   : > { %v3132_v20 = vmax.f32 %v3130_v28, %v3131_v62  ;;  %v3145_v47 = vrot.slane %v3144_v33, 2  ;;  %v2477_v35 = vcombine.high %v2469_v23, %v2469_v23  ;;  %v3944_v48 = vsel %vm3912_vm10, %v3204_v31, -inf }
 0x245   : > { %v3139_v51 = vmax.f32 %v3137_v22, %v3138_v42  ;;  %v3152_v44 = vrot.slane %v3151_v61, 2  ;;  %v3212_v53 = vsel %vm3015_vm9, %v2469_v23, -inf  ;;  %v2478_v26 = vcombine.high %v2476_v60, %v2476_v60 }
 0x246   : > { %v3133_v34 = vrot.slane %v3132_v20, 1  ;;  %v3146_v45 = vmax.f32 %v3144_v33, %v3145_v47  ;;  %v3213_v46 = vrot.slane %v3212_v53, 4  ;;  %v3219_v1 = vsel %vm3015_vm9, %v2477_v35, -inf }
 0x247   : > { %v3140_v54 = vrot.slane %v3139_v51, 1  ;;  %v3153_v25 = vmax.f32 %v3151_v61, %v3152_v44  ;;  %v3226_v29 = vsel %vm3015_vm9, %v2476_v60, -inf  ;;  %v3220_v19 = vrot.slane %v3219_v1, 4 }
 0x248   : > { %v3134_v59 = vmax.f32 %v3132_v20, %v3133_v34  ;;  %v3147_v13 = vrot.slane %v3146_v45, 1  ;;  %v3214_v8 = vmax.f32 %v3212_v53, %v3213_v46  ;;  %v3947_v56 = vsel %vm3912_vm10, %v3211_v3, -inf  ;;  %v4588_v3 = vld [vmem:[#allocation3 + $0x8] sm:$0xf] }
 0x249   : > { %v3141_v18 = vmax.f32 %v3139_v51, %v3140_v54  ;;  %v3154_v57 = vrot.slane %v3153_v25, 1  ;;  %v3227_v43 = vrot.slane %v3226_v29, 4  ;;  %v3221_v49 = vmax.f32 %v3219_v1, %v3220_v19 }
 0x24a   : > { %v3148_v4 = vmax.f32 %v3146_v45, %v3147_v13  ;;  %v3937_v63 = vsel %vm3912_vm10, %v3134_v59, -inf  ;;  %v3215_v50 = vrot.slane %v3214_v8, 2  ;;  %v3233_v14 = vsel %vm3015_vm9, %v2478_v26, -inf  ;;  %v4589_v45 = vld [vmem:[#allocation3 + $0xc] sm:$0x1] }
 0x24b   : > { %v3155_v7 = vmax.f32 %v3153_v25, %v3154_v57  ;;  %v3939_v5 = vmax.f32 %v3937_v63, %v3938_v38  ;;  %v3940_v11 = vsel %vm3912_vm10, %v3141_v18, -inf  ;;  %v3228_v12 = vmax.f32 %v3226_v29, %v3227_v43 }
 0x24c   : > { %v3942_v32 = vmax.f32 %v3940_v11, %v3941_v10  ;;  %v3943_v16 = vsel %vm3912_vm10, %v3148_v4, -inf  ;;  %v3222_v9 = vrot.slane %v3221_v49, 2  ;;  %v3216_v30 = vmax.f32 %v3214_v8, %v3215_v50 }
 0x24d   : > { %v3945_v37 = vmax.f32 %v3943_v16, %v3944_v48  ;;  %v3946_v41 = vsel %vm3912_vm10, %v3155_v7, -inf  ;;  %v12397_v21 = vpack.c.bf16 %v3939_v5, %v3939_v5  ;;  %v3229_v24 = vrot.slane %v3228_v12, 2 }
 0x24e   : > { %v3948_v27 = vmax.f32 %v3946_v41, %v3947_v56  ;;  %v12398_v6 = vpack.c.bf16 %v3942_v32, %v3942_v32  ;;  %v3234_v17 = vrot.slane %v3233_v14, 4  ;;  %v3223_v36 = vmax.f32 %v3221_v49, %v3222_v9 }
 0x24f   : > { %v12399_v28 = vpack.c.bf16 %v3945_v37, %v3945_v37  ;;  %v4391_v58 = vunpack.c.l.b16 %v12397_v21  ;;  %v3230_v62 = vmax.f32 %v3228_v12, %v3229_v24  ;;  %v2284_v23 = vmax.f32 %v15049_v15, 0.0 }
 0x250   : > { %v12400_v31 = vpack.c.bf16 %v3948_v27, %v3948_v27  ;;  %v4392_v22 = vunpack.c.l.b16 %v12398_v6  ;;  %v3235_v33 = vmax.f32 %v3233_v14, %v3234_v17  ;;  %v3217_v20 = vrot.slane %v3216_v30, 1 }
 0x251   : > { %v4393_v38 = vunpack.c.l.b16 %v12399_v28  ;;  %v2428_v60 = vcombine.high %v2284_v23, %v2284_v23  ;;  %v3224_v35 = vrot.slane %v3223_v36, 1  ;;  %v2435_v48 = vrot.slane %v2284_v23, %v14978_v2 }
 0x252   : > { %v4394_v10 = vunpack.c.l.b16 %v12400_v31  ;;  %v4459_v42 = vsel %vm4447_vm11, %v4392_v22, %v4391_v58  ;;  %v3236_v47 = vrot.slane %v3235_v33, 2  ;;  %v11713_v44 = vcombine.low %v4588_v3, %v4588_v3 }
 0x253   : > { %v4460_v61 = vsel %vm4449_vm12, %v4393_v38, %v4459_v42  ;;  %v3231_v53 = vrot.slane %v3230_v62, 1  ;;  %v2442_v15 = vrot.slane %v2428_v60, %v14978_v2  ;;  %v2443_v26 = vcombine.high %v2435_v48, %v2435_v48 }
 0x254   : > { %v15105_v51 = vsel %vm4451_vm13, %v4394_v10, %v4460_v61  ;;  %v3237_v34 = vmax.f32 %v3235_v33, %v3236_v47  ;;  %v3156_v46 = vsel %vm3015_vm9, %v2435_v48, -inf  ;;  %4752 = vrot.lane.b32.xlu0 %v11713_v44, %s13786_s18  ;;  %v15110_v54 = vcombine.low %v4588_v3, %v4589_v45 }
 0x255   : > { %v2444_v1 = vcombine.high %v2442_v15, %v2442_v15  ;;  %v3157_v29 = vrot.slane %v3156_v46, 4  ;;  %v3170_v59 = vsel %vm3015_vm9, %v2442_v15, -inf  ;;  %v3218_v13 = vmax.f32 %v3216_v30, %v3217_v20 }
 0x256   : > { %v3238_v25 = vrot.slane %v3237_v34, 1  ;;  %v3225_v8 = vmax.f32 %v3223_v36, %v3224_v35  ;;  %v3163_v19 = vsel %vm3015_vm9, %v2443_v26, -inf  ;;  %v3171_v56 = vrot.slane %v3170_v59, 4 }
 0x257   : > { %v3232_v18 = vmax.f32 %v3230_v62, %v3231_v53  ;;  %v3158_v57 = vmax.f32 %v3156_v46, %v3157_v29  ;;  %v3164_v43 = vrot.slane %v3163_v19, 4  ;;  %v3177_v4 = vsel %vm3015_vm9, %v2444_v1, -inf }
 0x258   : > { %v3172_v63 = vmax.f32 %v3170_v59, %v3171_v56  ;;  %v3178_v50 = vrot.slane %v3177_v4, 4  ;;  %v4656_v49 = vshll.u32 %v15110_v54, 16  ;;  %v3239_v7 = vmax.f32 %v3237_v34, %v3238_v25 }
 0x259   : > { %v3159_v5 = vrot.slane %v3158_v57, 2  ;;  %v3165_v11 = vmax.f32 %v3163_v19, %v3164_v43  ;;  %v3950_v12 = vsel %vm3912_vm10, %v3218_v13, -inf  ;;  %v3953_v14 = vsel %vm3912_vm10, %v3225_v8, -inf }
 0x25a   : > { %v3173_v32 = vrot.slane %v3172_v63, 2  ;;  %v3179_v16 = vmax.f32 %v3177_v4, %v3178_v50  ;;  %v4658_v9 = vrot.slane %v4656_v49, 1  ;;  %v3956_v37 = vsel %vm3912_vm10, %v3232_v18, -inf }
 0x25b   : > { %v3160_v41 = vmax.f32 %v3158_v57, %v3159_v5  ;;  %v3166_v21 = vrot.slane %v3165_v11, 2  ;;  %v4719_v28 = vrot.slane %v15110_v54, 1  ;;  %v4654_v30 = vshrl.u32 %v15110_v54, 16 }
 0x25c   : > { %v3174_v24 = vmax.f32 %v3172_v63, %v3173_v32  ;;  %v3180_v27 = vrot.slane %v3179_v16, 2  ;;  %v3959_v17 = vsel %vm3912_vm10, %v3239_v7, -inf  ;;  %v4547_v32 = vld [vmem:[#allocation3 + $0x14] sm:$0x1]  ;;  %vm5781_vm7 = vcmask 518144  }
 0x25d   : > { %v3161_v31 = vrot.slane %v3160_v41, 1  ;;  %v3167_v58 = vmax.f32 %v3165_v11, %v3166_v21  ;;  %v15126_v42 = vor.u32 %v4658_v9, %v4654_v30  ;;  %5784 = vst.msk [vmem:[#allocation4 + $0x8] sm:$0x7] %vm5781_vm7, %v13773_v0  ;;  %5782 = vst.msk [vmem:[#allocation4] sm:$0x7] %vm5781_vm7, %v13773_v0  ;;  %vm5492_vm8 = vcmask 517120  }
 0x25e   : > { %v12656_v6 = vpop.f32.mrb[0].mxu1  ;;  %v3175_v62 = vrot.slane %v3174_v24, 1  ;;  %v3181_v33 = vmax.f32 %v3179_v16, %v3180_v27  ;;  %5783 = vst.msk [vmem:[#allocation4 + $0x4] sm:$0x7] %vm5781_vm7, %v13773_v0  ;;  %5785 = vst.msk [vmem:[#allocation4 + $0xc] sm:$0x7] %vm5781_vm7, %v13773_v0 }
 0x25f   : > { %v12648_v22 = vpop.f32.mrb[8].mxu0  ;;  %v2225_v36 = vadd.f32 %v12656_v6, %v14968_v52  ;;  %v2216_v38 = vpop.f32.mrb[1].mxu1  ;;  %v3162_v61 = vmax.f32 %v3160_v41, %v3161_v31  ;;  %v3168_v20 = vrot.slane %v3167_v58, 1  ;;  %5786 = vst.msk [vmem:[#allocation4 + $0x10] sm:$0x7] %vm5781_vm7, %v13773_v0  ;;  %vm16121_vm3 = vmand %vm5781_vm7, %vm5874_vm2 }
 0x260   : > { %v2193_v23 = vadd.f32 %v12648_v22, %v14968_v52  ;;  %v2184_v3 = vpop.f32.mrb[9].mxu0  ;;  %v15124_v10 = vpop.f32.mrb[2].mxu1  ;;  %v15129_v60 = vadd.f32 %v14968_v52, %v2216_v38  ;;  %v3176_v44 = vmax.f32 %v3174_v24, %v3175_v62  ;;  %v3182_v53 = vrot.slane %v3181_v33, 1  ;;  %5787 = vst.msk [vmem:[#allocation4 + $0x14] sm:$0x7] %vm5781_vm7, %v13773_v0 }
 0x261   : > { %v2297_v47 = vmax.f32 %v2225_v36, 0.0  ;;  %v15131_v35 = vpop.f32.mrb[10].mxu0  ;;  %v15133_v48 = vpop.f32.mrb[3].mxu1  ;;  %v15136_v15 = vadd.f32 %v14968_v52, %v2184_v3  ;;  %v3169_v26 = vmax.f32 %v3167_v58, %v3168_v20  ;;  %v3949_v46 = vsel %vm3912_vm10, %v3162_v61, -inf  ;;  %v4544_v3 = vld [vmem:[#allocation3 + $0x10] sm:$0xf] }
 0x262   : > { %v2289_v34 = vmax.f32 %v2193_v23, 0.0  ;;  %v15138_v45 = vpop.f32.mrb[11].mxu0  ;;  %v3183_v29 = vmax.f32 %v3181_v33, %v3182_v53  ;;  %v3951_v59 = vmax.f32 %v3949_v46, %v3950_v12  ;;  %v3955_v13 = vsel %vm3912_vm10, %v3176_v44, -inf }
 0x263   : > { %v2649_v25 = vcombine.high %v2297_v47, %v2297_v47  ;;  %v2656_v1 = vrot.slane %v2297_v47, %v14978_v2  ;;  %v3952_v19 = vsel %vm3912_vm10, %v3169_v26, -inf  ;;  %v3957_v56 = vmax.f32 %v3955_v13, %v3956_v37 }
 0x264   : > { %v2513_v8 = vcombine.high %v2289_v34, %v2289_v34  ;;  %v2520_v18 = vrot.slane %v2289_v34, %v14978_v2  ;;  %v3954_v57 = vmax.f32 %v3952_v19, %v3953_v14  ;;  %v3958_v43 = vsel %vm3912_vm10, %v3183_v29, -inf }
 0x265   : > { %v2663_v52 = vrot.slane %v2649_v25, %v14978_v2  ;;  %v12401_v4 = vpack.c.bf16 %v3951_v59, %v3951_v59  ;;  %v3960_v50 = vmax.f32 %v3958_v43, %v3959_v17  ;;  %v12403_v49 = vpack.c.bf16 %v3957_v56, %v3957_v56 }
 0x266   : > { %v2527_v63 = vrot.slane %v2513_v8, %v14978_v2  ;;  %v2528_v7 = vcombine.high %v2520_v18, %v2520_v18  ;;  %v3296_v5 = vsel %vm3015_vm9, %v2520_v18, -inf  ;;  %v12402_v11 = vpack.c.bf16 %v3954_v57, %v3954_v57 }
 0x267   : > { %v4395_v12 = vunpack.c.l.b16 %v12401_v4  ;;  %v3297_v9 = vrot.slane %v3296_v5, 4  ;;  %v4397_v37 = vunpack.c.l.b16 %v12403_v49  ;;  %v12454_v41 = vpack.c.bf16 %v3960_v50, %v3960_v50 }
 0x268   : > { %v2529_v16 = vcombine.high %v2527_v63, %v2527_v63  ;;  %v3303_v21 = vsel %vm3015_vm9, %v2528_v7, -inf  ;;  %v3310_v14 = vsel %vm3015_vm9, %v2527_v63, -inf  ;;  %v4396_v24 = vunpack.c.l.b16 %v12402_v11 }
 0x269   : > { %v4462_v27 = vsel %vm4453_vm14, %v4395_v12, %v15105_v51  ;;  %v3298_v6 = vmax.f32 %v3296_v5, %v3297_v9  ;;  %v3304_v30 = vrot.slane %v3303_v21, 4  ;;  %v4548_v17 = vsel %vm15060_vm1, %v12454_v41, %v4547_v32 }
 0x26a   : > { %v3311_v31 = vrot.slane %v3310_v14, 4  ;;  %v3317_v58 = vsel %vm3015_vm9, %v2529_v16, -inf  ;;  %v2664_v22 = vcombine.high %v2656_v1, %v2656_v1  ;;  %v4463_v36 = vsel %vm4455_vm15, %v4396_v24, %v4462_v27  ;;  %4549 = vst [vmem:[#allocation3 + $0x14] sm:$0x1] %v4548_v17 }
 0x26b   : > { %v3299_v38 = vrot.slane %v3298_v6, 2  ;;  %v3305_v62 = vmax.f32 %v3303_v21, %v3304_v30  ;;  %v3318_v33 = vrot.slane %v3317_v58, 4  ;;  %v4464_v23 = vsel %vm4457_vm0, %v4397_v37, %v4463_v36 }
 0x26c   : > { %v3312_v61 = vmax.f32 %v3310_v14, %v3311_v31  ;;  %v2665_v51 = vcombine.high %v2663_v52, %v2663_v52  ;;  %v3520_v20 = vsel %vm3015_vm9, %v2656_v1, -inf  ;;  %v4503_v47 = vpack.c.b16 %v4464_v23, %v4464_v23 }
 0x26d   : > { %v3300_v44 = vmax.f32 %v3298_v6, %v3299_v38  ;;  %v3306_v53 = vrot.slane %v3305_v62, 2  ;;  %v3319_v34 = vmax.f32 %v3317_v58, %v3318_v33  ;;  %v3521_v46 = vrot.slane %v3520_v20, 4 }
 0x26e   : > { %v3313_v26 = vrot.slane %v3312_v61, 2  ;;  %v3527_v25 = vsel %vm3015_vm9, %v2664_v22, -inf  ;;  %v3534_v29 = vsel %vm3015_vm9, %v2663_v52, -inf  ;;  %v4545_v59 = vsel %vm15075_vm4, %v4503_v47, %v4544_v3 }
 0x26f   : > { %v3301_v13 = vrot.slane %v3300_v44, 1  ;;  %v3307_v8 = vmax.f32 %v3305_v62, %v3306_v53  ;;  %v3320_v19 = vrot.slane %v3319_v34, 2  ;;  %4546 = vst [vmem:[#allocation3 + $0x10] sm:$0xf] %v4545_v59  ;;  %v3522_v18 = vmax.f32 %v3520_v20, %v3521_v46 }
 0x270   : > { %v3314_v56 = vmax.f32 %v3312_v61, %v3313_v26  ;;  %v3528_v1 = vrot.slane %v3527_v25, 4  ;;  %v3535_v57 = vrot.slane %v3534_v29, 4  ;;  %v3541_v50 = vsel %vm3015_vm9, %v2665_v51, -inf }
 0x271   : > { %v3302_v43 = vmax.f32 %v3300_v44, %v3301_v13  ;;  %v3308_v4 = vrot.slane %v3307_v8, 1  ;;  %v3321_v63 = vmax.f32 %v3319_v34, %v3320_v19  ;;  %v3523_v7 = vrot.slane %v3522_v18, 2 }
 0x272   : > { %v3315_v49 = vrot.slane %v3314_v56, 1  ;;  %v3529_v5 = vmax.f32 %v3527_v25, %v3528_v1  ;;  %v3536_v52 = vmax.f32 %v3534_v29, %v3535_v57  ;;  %v3542_v32 = vrot.slane %v3541_v50, 4 }
 0x273   : > { %v3309_v11 = vmax.f32 %v3307_v8, %v3308_v4  ;;  %v3322_v12 = vrot.slane %v3321_v63, 1  ;;  %v2295_v16 = vmax.f32 %v15129_v60, 0.0  ;;  %v3524_v37 = vmax.f32 %v3522_v18, %v3523_v7 }
 0x274   : > { %v3316_v9 = vmax.f32 %v3314_v56, %v3315_v49  ;;  %v3530_v41 = vrot.slane %v3529_v5, 2  ;;  %v3537_v21 = vrot.slane %v3536_v52, 2  ;;  %v15166_v24 = vsel %vm3912_vm10, %v3302_v43, -inf }
 0x275   : > { %v3323_v14 = vmax.f32 %v3321_v63, %v3322_v12  ;;  %v3543_v27 = vmax.f32 %v3541_v50, %v3542_v32  ;;  %v2287_v6 = vmax.f32 %v15136_v15, 0.0  ;;  %v15170_v30 = vsel %vm3912_vm10, %v3309_v11, -inf }
 0x276   : > { %v3525_v17 = vrot.slane %v3524_v37, 1  ;;  %v3531_v31 = vmax.f32 %v3529_v5, %v3530_v41  ;;  %v3538_v58 = vmax.f32 %v3536_v52, %v3537_v21  ;;  %v15173_v22 = vsel %vm3912_vm10, %v3316_v9, -inf }
 0x277   : > { %v3544_v60 = vrot.slane %v3543_v27, 2  ;;  %v2479_v36 = vcombine.high %v2287_v6, %v2287_v6  ;;  %v2486_v38 = vrot.slane %v2287_v6, %v14978_v2  ;;  %v15177_v62 = vsel %vm3912_vm10, %v3323_v14, -inf }
 0x278   : > { %v3526_v33 = vmax.f32 %v3524_v37, %v3525_v17  ;;  %v3532_v23 = vrot.slane %v3531_v31, 1  ;;  %v3539_v3 = vrot.slane %v3538_v58, 1  ;;  %v2615_v34 = vcombine.high %v2295_v16, %v2295_v16 }
 0x279   : > { %v3545_v15 = vmax.f32 %v3543_v27, %v3544_v60  ;;  %v2493_v61 = vrot.slane %v2479_v36, %v14978_v2  ;;  %v2494_v51 = vcombine.high %v2486_v38, %v2486_v38  ;;  %v3240_v20 = vsel %vm3015_vm9, %v2486_v38, -inf }
 0x27a   : > { %v3533_v47 = vmax.f32 %v3531_v31, %v3532_v23  ;;  %v3540_v44 = vmax.f32 %v3538_v58, %v3539_v3  ;;  %v3241_v53 = vrot.slane %v3240_v20, 4  ;;  %v15184_v59 = vsel %vm3912_vm10, %v3526_v33, -inf }
 0x27b   : > { %v3546_v26 = vrot.slane %v3545_v15, 1  ;;  %v2495_v46 = vcombine.high %v2493_v61, %v2493_v61  ;;  %v3247_v25 = vsel %vm3015_vm9, %v2494_v51, -inf  ;;  %v3254_v29 = vsel %vm3015_vm9, %v2493_v61, -inf }
 0x27c   : > { %v15187_v13 = vsel %vm3912_vm10, %v3533_v47, -inf  ;;  %v3242_v8 = vmax.f32 %v3240_v20, %v3241_v53  ;;  %v3248_v19 = vrot.slane %v3247_v25, 4  ;;  %v15190_v56 = vsel %vm3912_vm10, %v3540_v44, -inf }
 0x27d   : > { %v3255_v18 = vrot.slane %v3254_v29, 4  ;;  %v3261_v1 = vsel %vm3015_vm9, %v2495_v46, -inf  ;;  %v2622_v57 = vrot.slane %v2295_v16, %v14978_v2  ;;  %v2629_v50 = vrot.slane %v2615_v34, %v14978_v2 }
 0x27e   : > { %v3243_v43 = vrot.slane %v3242_v8, 2  ;;  %v3249_v4 = vmax.f32 %v3247_v25, %v3248_v19  ;;  %v3262_v63 = vrot.slane %v3261_v1, 4  ;;  %v15195_v49 = vmax.f32 %v3545_v15, %v3546_v26 }
 0x27f   : > { %v3256_v7 = vmax.f32 %v3254_v29, %v3255_v18  ;;  %v2630_v5 = vcombine.high %v2622_v57, %v2622_v57  ;;  %v3464_v52 = vsel %vm3015_vm9, %v2622_v57, -inf  ;;  %v2631_v9 = vcombine.high %v2629_v50, %v2629_v50 }
 0x280   : > { %v3244_v11 = vmax.f32 %v3242_v8, %v3243_v43  ;;  %v3250_v12 = vrot.slane %v3249_v4, 2  ;;  %v3263_v32 = vmax.f32 %v3261_v1, %v3262_v63  ;;  %v3465_v41 = vrot.slane %v3464_v52, 4 }
 0x281   : > { %v3257_v37 = vrot.slane %v3256_v7, 2  ;;  %v3471_v21 = vsel %vm3015_vm9, %v2630_v5, -inf  ;;  %v3478_v16 = vsel %vm3015_vm9, %v2629_v50, -inf  ;;  %v3485_v36 = vsel %vm3015_vm9, %v2631_v9, -inf }
 0x282   : > { %v3245_v14 = vrot.slane %v3244_v11, 1  ;;  %v3251_v27 = vmax.f32 %v3249_v4, %v3250_v12  ;;  %v3264_v6 = vrot.slane %v3263_v32, 2  ;;  %v3472_v17 = vrot.slane %v3471_v21, 4 }
 0x283   : > { %v3258_v31 = vmax.f32 %v3256_v7, %v3257_v37  ;;  %v3466_v58 = vmax.f32 %v3464_v52, %v3465_v41  ;;  %v3479_v60 = vrot.slane %v3478_v16, 4  ;;  %v3486_v20 = vrot.slane %v3485_v36, 4 }
 0x284   : > { %v3246_v38 = vmax.f32 %v3244_v11, %v3245_v14  ;;  %v3252_v33 = vrot.slane %v3251_v27, 1  ;;  %v3265_v23 = vmax.f32 %v3263_v32, %v3264_v6  ;;  %v3473_v3 = vmax.f32 %v3471_v21, %v3472_v17 }
 0x285   : > { %v3259_v15 = vrot.slane %v3258_v31, 1  ;;  %v3467_v61 = vrot.slane %v3466_v58, 2  ;;  %v3480_v51 = vmax.f32 %v3478_v16, %v3479_v60  ;;  %v3487_v1 = vmax.f32 %v3485_v36, %v3486_v20 }
 0x286   : > { %v3253_v47 = vmax.f32 %v3251_v27, %v3252_v33  ;;  %v3266_v44 = vrot.slane %v3265_v23, 1  ;;  %v3961_v53 = vsel %vm3912_vm10, %v3246_v38, -inf  ;;  %v3474_v34 = vrot.slane %v3473_v3, 2 }
 0x287   : > { %v3260_v26 = vmax.f32 %v3258_v31, %v3259_v15  ;;  %v3963_v46 = vmax.f32 %v3961_v53, %v15166_v24  ;;  %v3468_v25 = vmax.f32 %v3466_v58, %v3467_v61  ;;  %v3481_v29 = vrot.slane %v3480_v51, 2 }
 0x288   : > { %v3267_v8 = vmax.f32 %v3265_v23, %v3266_v44  ;;  %v3964_v19 = vsel %vm3912_vm10, %v3253_v47, -inf  ;;  %v3475_v18 = vmax.f32 %v3473_v3, %v3474_v34  ;;  %v3488_v21 = vrot.slane %v3487_v1, 2 }
 0x289   : > { %v3966_v57 = vmax.f32 %v3964_v19, %v15170_v30  ;;  %v3967_v43 = vsel %vm3912_vm10, %v3260_v26, -inf  ;;  %v12405_v4 = vpack.c.bf16 %v3963_v46, %v3963_v46  ;;  %v3469_v63 = vrot.slane %v3468_v25, 1 }
 0x28a   : > { %v3969_v50 = vmax.f32 %v3967_v43, %v15173_v22  ;;  %v3970_v7 = vsel %vm3912_vm10, %v3267_v8, -inf  ;;  %v3476_v5 = vrot.slane %v3475_v18, 1  ;;  %v3482_v52 = vmax.f32 %v3480_v51, %v3481_v29  ;;  %v15213_v22 = vld [vmem:[%s16804_s2] ss:$0 sm:$0xff] }
 0x28b   : > { %v3972_v24 = vmax.f32 %v3970_v7, %v15177_v62  ;;  %v12406_v11 = vpack.c.bf16 %v3966_v57, %v3966_v57  ;;  %v4399_v12 = vunpack.c.l.b16 %v12405_v4  ;;  %v3470_v32 = vmax.f32 %v3468_v25, %v3469_v63 }
 0x28c   : > { %v12407_v9 = vpack.c.bf16 %v3969_v50, %v3969_v50  ;;  %v3477_v37 = vmax.f32 %v3475_v18, %v3476_v5  ;;  %v3483_v41 = vrot.slane %v3482_v52, 1  ;;  %v2196_v27 = vadd.f32 %v15213_v22, %v15131_v35 }
 0x28d   : > { %v12408_v30 = vpack.c.bf16 %v3972_v24, %v3972_v24  ;;  %v4400_v16 = vunpack.c.l.b16 %v12406_v11  ;;  %v4009_v14 = vsel %vm3912_vm10, %v3470_v32, -inf  ;;  %v3489_v17 = vmax.f32 %v3487_v1, %v3488_v21 }
 0x28e   : > { %v4401_v62 = vunpack.c.l.b16 %v12407_v9  ;;  %v3484_v6 = vmax.f32 %v3482_v52, %v3483_v41  ;;  %v4011_v31 = vmax.f32 %v4009_v14, %v15184_v59  ;;  %v4019_v58 = vsel %vm3912_vm10, %v15195_v49, -inf }
 0x28f   : > { %v4465_v60 = vsel %vm4447_vm11, %v4400_v16, %v4399_v12  ;;  %v4012_v36 = vsel %vm3912_vm10, %v3477_v37, -inf  ;;  %v2290_v38 = vmax.f32 %v2196_v27, 0.0  ;;  %v3490_v23 = vrot.slane %v3489_v17, 1 }
 0x290   : > { %v15223_v33 = vsel %vm4449_vm12, %v4401_v62, %v4465_v60  ;;  %v4014_v3 = vmax.f32 %v4012_v36, %v15187_v13  ;;  %v4015_v35 = vsel %vm3912_vm10, %v3484_v6, -inf  ;;  %v12421_v61 = vpack.c.bf16 %v4011_v31, %v4011_v31 }
 0x291   : > { %v4017_v15 = vmax.f32 %v4015_v35, %v15190_v56  ;;  %v2530_v59 = vcombine.high %v2290_v38, %v2290_v38  ;;  %v2537_v51 = vrot.slane %v2290_v38, %v14978_v2  ;;  %v15229_v49 = vunpack.c.l.b16 %v12408_v30 }
 0x292   : > { %v3491_v20 = vmax.f32 %v3489_v17, %v3490_v23  ;;  %v12422_v47 = vpack.c.bf16 %v4014_v3, %v4014_v3  ;;  %v2228_v44 = vadd.f32 %v15213_v22, %v15124_v10  ;;  %v4415_v34 = vunpack.c.l.b16 %v12421_v61 }
 0x293   : > { %v12423_v53 = vpack.c.bf16 %v4017_v15, %v4017_v15  ;;  %v2544_v26 = vrot.slane %v2530_v59, %v14978_v2  ;;  %v2545_v13 = vcombine.high %v2537_v51, %v2537_v51  ;;  %v3324_v56 = vsel %vm3015_vm9, %v2537_v51, -inf }
 0x294   : > { %v4018_v46 = vsel %vm3912_vm10, %v3491_v20, -inf  ;;  %v4416_v25 = vunpack.c.l.b16 %v12422_v47  ;;  %v2298_v29 = vmax.f32 %v2228_v44, 0.0  ;;  %v3325_v1 = vrot.slane %v3324_v56, 4 }
 0x295   : > { %v4020_v8 = vmax.f32 %v4018_v46, %v4019_v58  ;;  %v4417_v19 = vunpack.c.l.b16 %v12423_v53  ;;  %v2546_v18 = vcombine.high %v2544_v26, %v2544_v26  ;;  %v3331_v43 = vsel %vm3015_vm9, %v2545_v13, -inf }
 0x296   : > { %v4477_v57 = vsel %vm4447_vm11, %v4416_v25, %v4415_v34  ;;  %v3338_v10 = vsel %vm3015_vm9, %v2544_v26, -inf  ;;  %v2666_v4 = vcombine.high %v2298_v29, %v2298_v29  ;;  %v3326_v50 = vmax.f32 %v3324_v56, %v3325_v1 }
 0x297   : > { %v15240_v63 = vsel %vm4449_vm12, %v4417_v19, %v4477_v57  ;;  %v3332_v7 = vrot.slane %v3331_v43, 4  ;;  %v2188_v5 = vadd.f32 %v15213_v22, %v15138_v45  ;;  %v3339_v52 = vrot.slane %v3338_v10, 4 }
 0x298   : > { %v3345_v24 = vsel %vm3015_vm9, %v2546_v18, -inf  ;;  %v2673_v11 = vrot.slane %v2298_v29, %v14978_v2  ;;  %v2680_v12 = vrot.slane %v2666_v4, %v14978_v2  ;;  %v12424_v32 = vpack.c.bf16 %v4020_v8, %v4020_v8 }
 0x299   : > { %v3327_v9 = vrot.slane %v3326_v50, 2  ;;  %v3333_v37 = vmax.f32 %v3331_v43, %v3332_v7  ;;  %v3346_v41 = vrot.slane %v3345_v24, 4  ;;  %v3340_v30 = vmax.f32 %v3338_v10, %v3339_v52 }
 0x29a   : > { %v15247_v21 = vpop.f32.mrb[12].mxu0  ;;  %v2681_v16 = vcombine.high %v2673_v11, %v2673_v11  ;;  %v2682_v14 = vcombine.high %v2680_v12, %v2680_v12  ;;  %v3548_v27 = vsel %vm3015_vm9, %v2673_v11, -inf  ;;  %v3562_v38 = vsel %vm3015_vm9, %v2680_v12, -inf }
 0x29b   : > { %v15250_v62 = vpop.f32.mrb[13].mxu0  ;;  %v3328_v45 = vmax.f32 %v3326_v50, %v3327_v9  ;;  %v3334_v6 = vrot.slane %v3333_v37, 2  ;;  %v3347_v17 = vmax.f32 %v3345_v24, %v3346_v41  ;;  %v3549_v31 = vrot.slane %v3548_v27, 4 }
 0x29c   : > { %v15252_v58 = vpop.f32.mrb[14].mxu0  ;;  %v3341_v60 = vrot.slane %v3340_v30, 2  ;;  %v3555_v36 = vsel %vm3015_vm9, %v2681_v16, -inf  ;;  %v3569_v23 = vsel %vm3015_vm9, %v2682_v14, -inf  ;;  %v3563_v47 = vrot.slane %v3562_v38, 4 }
 0x29d   : > { %v15257_v3 = vpop.f32.mrb[15].mxu0  ;;  %v3329_v35 = vrot.slane %v3328_v45, 1  ;;  %v3335_v15 = vmax.f32 %v3333_v37, %v3334_v6  ;;  %v3348_v61 = vrot.slane %v3347_v17, 2  ;;  %v3550_v59 = vmax.f32 %v3548_v27, %v3549_v31 }
 0x29e   : > { %v3342_v51 = vmax.f32 %v3340_v30, %v3341_v60  ;;  %v3556_v20 = vrot.slane %v3555_v36, 4  ;;  %v3570_v44 = vrot.slane %v3569_v23, 4  ;;  %v3564_v8 = vmax.f32 %v3562_v38, %v3563_v47 }
 0x29f   : > { %v15259_v53 = vpop.f32.mrb[4].mxu1  ;;  %v3330_v34 = vmax.f32 %v3328_v45, %v3329_v35  ;;  %v3336_v26 = vrot.slane %v3335_v15, 1  ;;  %v3349_v13 = vmax.f32 %v3347_v17, %v3348_v61  ;;  %v3551_v46 = vrot.slane %v3550_v59, 2 }
 0x2a0   : > { %v15261_v25 = vpop.f32.mrb[5].mxu1  ;;  %v3343_v56 = vrot.slane %v3342_v51, 1  ;;  %v3557_v29 = vmax.f32 %v3555_v36, %v3556_v20  ;;  %v3571_v19 = vmax.f32 %v3569_v23, %v3570_v44  ;;  %v4418_v1 = vunpack.c.l.b16 %v12424_v32 }
 0x2a1   : > { %v15263_v18 = vpop.f32.mrb[6].mxu1  ;;  %v3337_v57 = vmax.f32 %v3335_v15, %v3336_v26  ;;  %v3350_v43 = vrot.slane %v3349_v13, 1  ;;  %v3552_v10 = vmax.f32 %v3550_v59, %v3551_v46  ;;  %v3565_v52 = vrot.slane %v3564_v8, 2 }
 0x2a2   : > { %v15265_v4 = vpop.f32.mrb[7].mxu1  ;;  %v3344_v50 = vmax.f32 %v3342_v51, %v3343_v56  ;;  %v3558_v7 = vrot.slane %v3557_v29, 2  ;;  %v3572_v24 = vrot.slane %v3571_v19, 2  ;;  %v15268_v12 = vsel %vm3912_vm10, %v3330_v34, -inf }
 0x2a3   : > { %v3351_v11 = vmax.f32 %v3349_v13, %v3350_v43  ;;  %v3553_v9 = vrot.slane %v3552_v10, 1  ;;  %v2288_v37 = vmax.f32 %v2188_v5, 0.0  ;;  %v15271_v41 = vsel %vm3912_vm10, %v3337_v57, -inf }
 0x2a4   : > { %v3559_v30 = vmax.f32 %v3557_v29, %v3558_v7  ;;  %v3566_v32 = vmax.f32 %v3564_v8, %v3565_v52  ;;  %v3573_v16 = vmax.f32 %v3571_v19, %v3572_v24  ;;  %v15274_v14 = vsel %vm3912_vm10, %v3344_v50, -inf }
 0x2a5   : > { %v3554_v27 = vmax.f32 %v3552_v10, %v3553_v9  ;;  %v2496_v45 = vcombine.high %v2288_v37, %v2288_v37  ;;  %v2503_v6 = vrot.slane %v2288_v37, %v14978_v2  ;;  %v15280_v5 = vsel %vm4451_vm13, %v15229_v49, %v15223_v33 }
 0x2a6   : > { %v3560_v17 = vrot.slane %v3559_v30, 1  ;;  %v3567_v31 = vrot.slane %v3566_v32, 1  ;;  %v3574_v60 = vrot.slane %v3573_v16, 1  ;;  %v15283_v36 = vsel %vm3912_vm10, %v3351_v11, -inf }
 0x2a7   : > { %v2510_v38 = vrot.slane %v2496_v45, %v14978_v2  ;;  %v2511_v23 = vcombine.high %v2503_v6, %v2503_v6  ;;  %v3268_v35 = vsel %vm3015_vm9, %v2503_v6, -inf  ;;  %v15288_v59 = vsel %vm3912_vm10, %v3554_v27, -inf }
 0x2a8   : > { %v3561_v15 = vmax.f32 %v3559_v30, %v3560_v17  ;;  %v3568_v61 = vmax.f32 %v3566_v32, %v3567_v31  ;;  %v3269_v51 = vrot.slane %v3268_v35, 4  ;;  %v2220_v49 = vadd.f32 %v15213_v22, %v15133_v48 }
 0x2a9   : > { %v2512_v20 = vcombine.high %v2510_v38, %v2510_v38  ;;  %v3275_v47 = vsel %vm3015_vm9, %v2511_v23, -inf  ;;  %v3282_v33 = vsel %vm3015_vm9, %v2510_v38, -inf  ;;  %v3575_v44 = vmax.f32 %v3573_v16, %v3574_v60 }
 0x2aa   : > { %v15295_v34 = vsel %vm3912_vm10, %v3561_v15, -inf  ;;  %v15298_v26 = vsel %vm3912_vm10, %v3568_v61, -inf  ;;  %v3270_v13 = vmax.f32 %v3268_v35, %v3269_v51  ;;  %v3276_v46 = vrot.slane %v3275_v47, 4 }
 0x2ab   : > { %v3283_v56 = vrot.slane %v3282_v33, 4  ;;  %v3289_v29 = vsel %vm3015_vm9, %v2512_v20, -inf  ;;  %v2296_v8 = vmax.f32 %v2220_v49, 0.0  ;;  %v15303_v43 = vsel %vm4451_vm13, %v4418_v1, %v15240_v63 }
 0x2ac   : > { %v3271_v19 = vrot.slane %v3270_v13, 2  ;;  %v3290_v57 = vrot.slane %v3289_v29, 4  ;;  %v2209_v48 = vadd.f32 %v15213_v22, %v15247_v21  ;;  %v3277_v10 = vmax.f32 %v3275_v47, %v3276_v46 }
 0x2ad   : > { %v3284_v50 = vmax.f32 %v3282_v33, %v3283_v56  ;;  %v2632_v7 = vcombine.high %v2296_v8, %v2296_v8  ;;  %v2639_v52 = vrot.slane %v2296_v8, %v14978_v2  ;;  %v15309_v24 = vsel %vm3912_vm10, %v3575_v44, -inf }
 0x2ae   : > { %v3272_v11 = vmax.f32 %v3270_v13, %v3271_v19  ;;  %v3291_v9 = vmax.f32 %v3289_v29, %v3290_v57  ;;  %v15311_v37 = vmax.f32 %v2209_v48, 0.0  ;;  %v3278_v30 = vrot.slane %v3277_v10, 2 }
 0x2af   : > { %v3285_v32 = vrot.slane %v3284_v50, 2  ;;  %v2646_v63 = vrot.slane %v2632_v7, %v14978_v2  ;;  %v2647_v1 = vcombine.high %v2639_v52, %v2639_v52  ;;  %v3492_v21 = vsel %vm3015_vm9, %v2639_v52, -inf }
 0x2b0   : > { %v3273_v16 = vrot.slane %v3272_v11, 1  ;;  %v3292_v27 = vrot.slane %v3291_v9, 2  ;;  %v2581_v45 = vcombine.high %v15311_v37, %v15311_v37  ;;  %v3279_v6 = vmax.f32 %v3277_v10, %v3278_v30 }
 0x2b1   : > { %v3286_v17 = vmax.f32 %v3284_v50, %v3285_v32  ;;  %v2648_v31 = vcombine.high %v2646_v63, %v2646_v63  ;;  %v3493_v60 = vrot.slane %v3492_v21, 4  ;;  %v3499_v35 = vsel %vm3015_vm9, %v2647_v1, -inf }
 0x2b2   : > { %v3274_v38 = vmax.f32 %v3272_v11, %v3273_v16  ;;  %v3293_v23 = vmax.f32 %v3291_v9, %v3292_v27  ;;  %v3506_v15 = vsel %vm3015_vm9, %v2646_v63, -inf  ;;  %v3280_v61 = vrot.slane %v3279_v6, 1 }
 0x2b3   : > { %v3287_v51 = vrot.slane %v3286_v17, 1  ;;  %v3494_v20 = vmax.f32 %v3492_v21, %v3493_v60  ;;  %v3500_v47 = vrot.slane %v3499_v35, 4  ;;  %v3507_v44 = vrot.slane %v3506_v15, 4 }
 0x2b4   : > { %v3294_v33 = vrot.slane %v3293_v23, 1  ;;  %v3973_v49 = vsel %vm3912_vm10, %v3274_v38, -inf  ;;  %v3513_v13 = vsel %vm3015_vm9, %v2648_v31, -inf  ;;  %v3281_v46 = vmax.f32 %v3279_v6, %v3280_v61 }
 0x2b5   : > { %v3288_v56 = vmax.f32 %v3286_v17, %v3287_v51  ;;  %v3975_v29 = vmax.f32 %v3973_v49, %v15268_v12  ;;  %v3495_v8 = vrot.slane %v3494_v20, 2  ;;  %v3501_v57 = vmax.f32 %v3499_v35, %v3500_v47  ;;  %v4553_v17 = vld [vmem:[#allocation3 + $0x1c] sm:$0x1] }
 0x2b6   : > { %v3295_v19 = vmax.f32 %v3293_v23, %v3294_v33  ;;  %v3508_v48 = vmax.f32 %v3506_v15, %v3507_v44  ;;  %v3514_v10 = vrot.slane %v3513_v13, 4  ;;  %v3976_v50 = vsel %vm3912_vm10, %v3281_v46, -inf }
 0x2b7   : > { %v3979_v7 = vsel %vm3912_vm10, %v3288_v56, -inf  ;;  %v12409_v52 = vpack.c.bf16 %v3975_v29, %v3975_v29  ;;  %v3496_v11 = vmax.f32 %v3494_v20, %v3495_v8  ;;  %v3978_v9 = vmax.f32 %v3976_v50, %v15271_v41  ;;  %v4550_v29 = vld [vmem:[#allocation3 + $0x18] sm:$0xf] }
 0x2b8   : > { %v3981_v30 = vmax.f32 %v3979_v7, %v15274_v14  ;;  %v3982_v32 = vsel %vm3912_vm10, %v3295_v19, -inf  ;;  %v3502_v63 = vrot.slane %v3501_v57, 2  ;;  %v3509_v27 = vrot.slane %v3508_v48, 2 }
 0x2b9   : > { %v3984_v12 = vmax.f32 %v3982_v32, %v15283_v36  ;;  %v4403_v1 = vunpack.c.l.b16 %v12409_v52  ;;  %v3497_v16 = vrot.slane %v3496_v11, 1  ;;  %v12410_v21 = vpack.c.bf16 %v3978_v9, %v3978_v9 }
 0x2ba   : > { %v12411_v6 = vpack.c.bf16 %v3981_v30, %v3981_v30  ;;  %v3503_v31 = vmax.f32 %v3501_v57, %v3502_v63  ;;  %v3515_v60 = vmax.f32 %v3513_v13, %v3514_v10  ;;  %v3510_v35 = vmax.f32 %v3508_v48, %v3509_v27 }
 0x2bb   : > { %v4468_v38 = vsel %vm4453_vm14, %v4403_v1, %v15280_v5  ;;  %v12455_v23 = vpack.c.bf16 %v3984_v12, %v3984_v12  ;;  %v3498_v41 = vmax.f32 %v3496_v11, %v3497_v16  ;;  %v4404_v14 = vunpack.c.l.b16 %v12410_v21 }
 0x2bc   : > { %v4405_v15 = vunpack.c.l.b16 %v12411_v6  ;;  %v3504_v61 = vrot.slane %v3503_v31, 1  ;;  %v3516_v51 = vrot.slane %v3515_v60, 2  ;;  %v3511_v20 = vrot.slane %v3510_v35, 1 }
 0x2bd   : > { %v4554_v36 = vsel %vm15060_vm1, %v12455_v23, %v4553_v17  ;;  %v4021_v47 = vsel %vm3912_vm10, %v3498_v41, -inf  ;;  %v2588_v33 = vrot.slane %v15311_v37, %v14978_v2  ;;  %v4469_v49 = vsel %vm4455_vm15, %v4404_v14, %v4468_v38  ;;  %v4565_v14 = vld [vmem:[#allocation3 + $0x2c] sm:$0x1] }
 0x2be   : > { %4555 = vst [vmem:[#allocation3 + $0x1c] sm:$0x1] %v4554_v36  ;;  %v3505_v5 = vmax.f32 %v3503_v31, %v3504_v61  ;;  %v3517_v44 = vmax.f32 %v3515_v60, %v3516_v51  ;;  %v4023_v13 = vmax.f32 %v4021_v47, %v15288_v59  ;;  %v4470_v56 = vsel %vm4457_vm0, %v4405_v15, %v4469_v49  ;;  %v4562_v47 = vld [vmem:[#allocation3 + $0x28] sm:$0xf] }
 0x2bf   : > { %v15337_v46 = vpop.f32.mrb[8].mxu1  ;;  %v3512_v8 = vmax.f32 %v3510_v35, %v3511_v20  ;;  %v2595_v19 = vrot.slane %v2581_v45, %v14978_v2  ;;  %v2596_v57 = vcombine.high %v2588_v33, %v2588_v33  ;;  %v4505_v10 = vpack.c.b16 %v4470_v56, %v4470_v56 }
 0x2c0   : > { %v15344_v48 = vpop.f32.mrb[9].mxu1  ;;  %v3518_v50 = vrot.slane %v3517_v44, 1  ;;  %v4024_v7 = vsel %vm3912_vm10, %v3505_v5, -inf  ;;  %v12425_v52 = vpack.c.bf16 %v4023_v13, %v4023_v13  ;;  %v3408_v32 = vsel %vm3015_vm9, %v2588_v33, -inf }
 0x2c1   : > { %v15347_v59 = vpop.f32.mrb[10].mxu1  ;;  %v4026_v11 = vmax.f32 %v4024_v7, %v15295_v34  ;;  %v4027_v9 = vsel %vm3912_vm10, %v3512_v8, -inf  ;;  %v2597_v30 = vcombine.high %v2595_v19, %v2595_v19  ;;  %v4551_v37 = vsel %vm15075_vm4, %v4505_v10, %v4550_v29 }
 0x2c2   : > { %v15352_v63 = vpop.f32.mrb[11].mxu1  ;;  %v3519_v45 = vmax.f32 %v3517_v44, %v3518_v50  ;;  %v4029_v12 = vmax.f32 %v4027_v9, %v15298_v26  ;;  %v4419_v1 = vunpack.c.l.b16 %v12425_v52  ;;  %4552 = vst [vmem:[#allocation3 + $0x18] sm:$0xf] %v4551_v37  ;;  %v3409_v27 = vrot.slane %v3408_v32, 4  ;;  %v4590_v44 = vld [vmem:[#allocation3 + $0x10] sm:$0xf] }
 0x2c3   : > { %v12426_v16 = vpack.c.bf16 %v4026_v11, %v4026_v11  ;;  %v3415_v21 = vsel %vm3015_vm9, %v2596_v57, -inf  ;;  %v3422_v34 = vsel %vm3015_vm9, %v2595_v19, -inf  ;;  %v3429_v61 = vsel %vm3015_vm9, %v2597_v30, -inf }
 0x2c4   : > { %v4030_v6 = vsel %vm3912_vm10, %v3519_v45, -inf  ;;  %v12427_v17 = vpack.c.bf16 %v4029_v12, %v4029_v12  ;;  %v4480_v31 = vsel %vm4453_vm14, %v4419_v1, %v15303_v43  ;;  %v3416_v60 = vrot.slane %v3415_v21, 4 }
 0x2c5   : > { %v4032_v38 = vmax.f32 %v4030_v6, %v15309_v24  ;;  %v4420_v23 = vunpack.c.l.b16 %v12426_v16  ;;  %v3410_v41 = vmax.f32 %v3408_v32, %v3409_v27  ;;  %v3423_v26 = vrot.slane %v3422_v34, 4 }
 0x2c6   : > { %v4421_v35 = vunpack.c.l.b16 %v12427_v17  ;;  %v3417_v15 = vmax.f32 %v3415_v21, %v3416_v60  ;;  %v2201_v51 = vadd.f32 %v15213_v22, %v15250_v62  ;;  %v3430_v5 = vrot.slane %v3429_v61, 4 }
 0x2c7   : > { %v4481_v36 = vsel %vm4455_vm15, %v4420_v23, %v4480_v31  ;;  %v12457_v20 = vpack.c.bf16 %v4032_v38, %v4032_v38  ;;  %v3411_v33 = vrot.slane %v3410_v41, 2  ;;  %v3424_v43 = vmax.f32 %v3422_v34, %v3423_v26 }
 0x2c8   : > { %v4482_v49 = vsel %vm4457_vm0, %v4421_v35, %v4481_v36  ;;  %v3418_v24 = vrot.slane %v3417_v15, 2  ;;  %v2291_v13 = vmax.f32 %v2201_v51, 0.0  ;;  %v3431_v57 = vmax.f32 %v3429_v61, %v3430_v5 }
 0x2c9   : > { %v4509_v56 = vpack.c.b16 %v4482_v49, %v4482_v49  ;;  %v4566_v29 = vsel %vm15060_vm1, %v12457_v20, %v4565_v14  ;;  %v3412_v8 = vmax.f32 %v3410_v41, %v3411_v33  ;;  %v3425_v19 = vrot.slane %v3424_v43, 2 }
 0x2ca   : > { %4567 = vst [vmem:[#allocation3 + $0x2c] sm:$0x1] %v4566_v29  ;;  %v3419_v62 = vmax.f32 %v3417_v15, %v3418_v24  ;;  %v2547_v10 = vcombine.high %v2291_v13, %v2291_v13  ;;  %v2554_v50 = vrot.slane %v2291_v13, %v14978_v2  ;;  %v15373_v9 = vcombine.low %v4590_v44, %v4590_v44 }
 0x2cb   : > { %v4563_v7 = vsel %vm15075_vm4, %v4509_v56, %v4562_v47  ;;  %v3413_v52 = vrot.slane %v3412_v8, 1  ;;  %v3426_v11 = vmax.f32 %v3424_v43, %v3425_v19  ;;  %v3432_v32 = vrot.slane %v3431_v57, 2 }
 0x2cc   : > { %4564 = vst [vmem:[#allocation3 + $0x28] sm:$0xf] %v4563_v7  ;;  %v3420_v30 = vrot.slane %v3419_v62, 1  ;;  %v2561_v37 = vrot.slane %v2547_v10, %v14978_v2  ;;  %v2562_v45 = vcombine.high %v2554_v50, %v2554_v50  ;;  %v3352_v16 = vsel %vm3015_vm9, %v2554_v50, -inf }
 0x2cd   : > { %v3414_v12 = vmax.f32 %v3412_v8, %v3413_v52  ;;  %v3427_v1 = vrot.slane %v3426_v11, 1  ;;  %v2212_v27 = vadd.f32 %v15213_v22, %v15252_v58  ;;  %v3433_v34 = vmax.f32 %v3431_v57, %v3432_v32 }
 0x2ce   : > { %v3421_v21 = vmax.f32 %v3419_v62, %v3420_v30  ;;  %v2563_v6 = vcombine.high %v2561_v37, %v2561_v37  ;;  %v3353_v17 = vrot.slane %v3352_v16, 4  ;;  %v3359_v38 = vsel %vm3015_vm9, %v2562_v45, -inf }
 0x2cf   : > { %v3428_v31 = vmax.f32 %v3426_v11, %v3427_v1  ;;  %v3986_v60 = vsel %vm3912_vm10, %v3414_v12, -inf  ;;  %v3366_v23 = vsel %vm3015_vm9, %v2561_v37, -inf  ;;  %v3434_v41 = vrot.slane %v3433_v34, 1 }
 0x2d0   : > { %v15383_v26 = vsel %vm3912_vm10, %v3421_v21, -inf  ;;  %v3354_v35 = vmax.f32 %v3352_v16, %v3353_v17  ;;  %v3360_v14 = vrot.slane %v3359_v38, 4  ;;  %v3367_v58 = vrot.slane %v3366_v23, 4 }
 0x2d1   : > { %v3992_v15 = vsel %vm3912_vm10, %v3428_v31, -inf  ;;  %v3373_v61 = vsel %vm3015_vm9, %v2563_v6, -inf  ;;  %v2294_v51 = vmax.f32 %v2212_v27, 0.0  ;;  %v3435_v36 = vmax.f32 %v3433_v34, %v3434_v41  ;;  %v4597_v49 = vld [vmem:[#allocation3 + $0x2c] sm:$0x1] }
 0x2d2   : > { %v3355_v20 = vrot.slane %v3354_v35, 2  ;;  %v3361_v47 = vmax.f32 %v3359_v38, %v3360_v14  ;;  %v3374_v33 = vrot.slane %v3373_v61, 4  ;;  %v3368_v24 = vmax.f32 %v3366_v23, %v3367_v58 }
 0x2d3   : > { %v4596_v43 = vld [vmem:[#allocation3 + $0x28] sm:$0xf]  ;;  %v2598_v5 = vcombine.high %v2294_v51, %v2294_v51  ;;  %v2605_v44 = vrot.slane %v2294_v51, %v14978_v2  ;;  %v2204_v13 = vadd.f32 %v15213_v22, %v15257_v3  ;;  %v3995_v8 = vsel %vm3912_vm10, %v3435_v36, -inf }
 0x2d4   : > { %v11717_v56 = vcombine.low %v4596_v43, %v4596_v43  ;;  %v15390_v29 = vcombine.low %v4596_v43, %v4597_v49  ;;  %v3356_v19 = vmax.f32 %v3354_v35, %v3355_v20  ;;  %v3362_v62 = vrot.slane %v3361_v47, 2 }
 0x2d5   : > { %v3369_v57 = vrot.slane %v3368_v24, 2  ;;  %v3375_v10 = vmax.f32 %v3373_v61, %v3374_v33  ;;  %v2612_v50 = vrot.slane %v2598_v5, %v14978_v2  ;;  %v2613_v3 = vcombine.high %v2605_v44, %v2605_v44 }
 0x2d6   : > { %4804 = vrot.lane.b32.xlu1 %v11717_v56, %s13784_s23  ;;  %4760 = vrot.lane.b32.xlu0 %v11717_v56, %s13786_s18  ;;  %v15397_v7 = vrot.slane %v15390_v29, 1  ;;  %v3357_v52 = vrot.slane %v3356_v19, 1  ;;  %v3436_v11 = vsel %vm3015_vm9, %v2605_v44, -inf  ;;  %v3363_v30 = vmax.f32 %v3361_v47, %v3362_v62 }
 0x2d7   : > { %v3370_v32 = vmax.f32 %v3368_v24, %v3369_v57  ;;  %v3376_v37 = vrot.slane %v3375_v10, 2  ;;  %v2614_v45 = vcombine.high %v2612_v50, %v2612_v50  ;;  %v3437_v1 = vrot.slane %v3436_v11, 4 }
 0x2d8   : > { %v3358_v12 = vmax.f32 %v3356_v19, %v3357_v52  ;;  %v3443_v16 = vsel %vm3015_vm9, %v2613_v3, -inf  ;;  %v3450_v27 = vsel %vm3015_vm9, %v2612_v50, -inf  ;;  %v3364_v21 = vrot.slane %v3363_v30, 1 }
 0x2d9   : > { %v3371_v34 = vrot.slane %v3370_v32, 1  ;;  %v3377_v6 = vmax.f32 %v3375_v10, %v3376_v37  ;;  %v3444_v17 = vrot.slane %v3443_v16, 4  ;;  %v3438_v38 = vmax.f32 %v3436_v11, %v3437_v1 }
 0x2da   : > { %4728 = vrot.lane.b32.xlu1 %v4719_v28, %s13784_s23  ;;  %4779 = vrot.lane.b32.xlu0 %v4719_v28, %s13783_s30  ;;  %v3985_v31 = vsel %vm3912_vm10, %v3358_v12, -inf  ;;  %v3451_v23 = vrot.slane %v3450_v27, 4  ;;  %v3457_v41 = vsel %vm3015_vm9, %v2614_v45, -inf  ;;  %v3365_v35 = vmax.f32 %v3363_v30, %v3364_v21 }
 0x2db   : > { %v3372_v14 = vmax.f32 %v3370_v32, %v3371_v34  ;;  %v3378_v58 = vrot.slane %v3377_v6, 1  ;;  %v3987_v61 = vmax.f32 %v3985_v31, %v3986_v60  ;;  %v3439_v51 = vrot.slane %v3438_v38, 2 }
 0x2dc   : > { %v3445_v36 = vmax.f32 %v3443_v16, %v3444_v17  ;;  %v3452_v20 = vmax.f32 %v3450_v27, %v3451_v23  ;;  %v3458_v47 = vrot.slane %v3457_v41, 4  ;;  %v3988_v43 = vsel %vm3912_vm10, %v3365_v35, -inf  ;;  %v15428_v23 = vpop.f32.mrb[12].mxu1 }
 0x2dd   : > { %v3379_v33 = vmax.f32 %v3377_v6, %v3378_v58  ;;  %v3991_v54 = vsel %vm3912_vm10, %v3372_v14, -inf  ;;  %v12413_v28 = vpack.c.bf16 %v3987_v61, %v3987_v61  ;;  %v3990_v49 = vmax.f32 %v3988_v43, %v15383_v26  ;;  %v15435_v61 = vpop.f32.mrb[13].mxu1 }
 0x2de   : > { %4736 = vrot.lane.b32.xlu1 %v15397_v7, %s13784_s23  ;;  %4787 = vrot.lane.b32.xlu0 %v15397_v7, %s13783_s30  ;;  %v3993_v24 = vmax.f32 %v3991_v54, %v3992_v15  ;;  %v3440_v60 = vmax.f32 %v3438_v38, %v3439_v51  ;;  %v3446_v5 = vrot.slane %v3445_v36, 2  ;;  %v3453_v19 = vrot.slane %v3452_v20, 2 }
 0x2df   : > { %v3994_v44 = vsel %vm3912_vm10, %v3379_v33, -inf  ;;  %v4407_v56 = vunpack.c.l.b16 %v12413_v28  ;;  %v3459_v62 = vmax.f32 %v3457_v41, %v3458_v47  ;;  %v12414_v10 = vpack.c.bf16 %v3990_v49, %v3990_v49 }
 0x2e0   : > { %v3996_v57 = vmax.f32 %v3994_v44, %v3995_v8  ;;  %v12415_v50 = vpack.c.bf16 %v3993_v24, %v3993_v24  ;;  %v3441_v52 = vrot.slane %v3440_v60, 1  ;;  %v3447_v3 = vmax.f32 %v3445_v36, %v3446_v5 }
 0x2e1   : > { %v3454_v11 = vmax.f32 %v3452_v20, %v3453_v19  ;;  %v3460_v30 = vrot.slane %v3459_v62, 2  ;;  %v2292_v32 = vmax.f32 %v2204_v13, 0.0  ;;  %v4408_v15 = vunpack.c.l.b16 %v12414_v10 }
 0x2e2   : > { %4704 = vrot.lane.b32.xlu1 %v15126_v42, %s13783_s30  ;;  %4798 = vrot.lane.b32.xlu0 %v15373_v9, %s13784_s23  ;;  %v12416_v26 = vpack.c.bf16 %v3996_v57, %v3996_v57  ;;  %v4409_v37 = vunpack.c.l.b16 %v12415_v50  ;;  %v3442_v45 = vmax.f32 %v3440_v60, %v3441_v52  ;;  %v3448_v12 = vrot.slane %v3447_v3, 1 }
 0x2e3   : > { %v3455_v1 = vrot.slane %v3454_v11, 1  ;;  %v3461_v8 = vmax.f32 %v3459_v62, %v3460_v30  ;;  %v2564_v16 = vcombine.high %v2292_v32, %v2292_v32  ;;  %v4471_v21 = vsel %vm4447_vm11, %v4408_v15, %v4407_v56 }
 0x2e4   : > { %v4410_v27 = vunpack.c.l.b16 %v12416_v26  ;;  %v15424_v34 = vsel %vm3912_vm10, %v3442_v45, -inf  ;;  %v2571_v13 = vrot.slane %v2292_v32, %v14978_v2  ;;  %v4472_v6 = vsel %vm4449_vm12, %v4409_v37, %v4471_v21 }
 0x2e5   : > { %v3449_v17 = vmax.f32 %v3447_v3, %v3448_v12  ;;  %v3456_v31 = vmax.f32 %v3454_v11, %v3455_v1  ;;  %v3462_v38 = vrot.slane %v3461_v8, 1  ;;  %v2578_v41 = vrot.slane %v2564_v16, %v14978_v2 }
 0x2e6   : > { %v2579_v35 = vcombine.high %v2571_v13, %v2571_v13  ;;  %v3380_v14 = vsel %vm3015_vm9, %v2571_v13, -inf  ;;  %v15433_v58 = vsel %vm4451_vm13, %v4410_v27, %v4472_v6  ;;  %v2241_v28 = vadd.f32 %v15213_v22, %v15259_v53 }
 0x2e7   : > { %v3463_v51 = vmax.f32 %v3461_v8, %v3462_v38  ;;  %v4001_v36 = vsel %vm3912_vm10, %v3449_v17, -inf  ;;  %v4004_v20 = vsel %vm3912_vm10, %v3456_v31, -inf  ;;  %v3381_v47 = vrot.slane %v3380_v14, 4 }
 0x2e8   : > { %v2580_v33 = vcombine.high %v2578_v41, %v2578_v41  ;;  %v3387_v43 = vsel %vm3015_vm9, %v2579_v35, -inf  ;;  %v3394_v54 = vsel %vm3015_vm9, %v2578_v41, -inf  ;;  %v2301_v56 = vmax.f32 %v2241_v28, 0.0 }
 0x2e9   : > { %v15444_v49 = vsel %vm3912_vm10, %v3463_v51, -inf  ;;  %v3382_v24 = vmax.f32 %v3380_v14, %v3381_v47  ;;  %v3388_v60 = vrot.slane %v3387_v43, 4  ;;  %v3395_v5 = vrot.slane %v3394_v54, 4 }
 0x2ea   : > { %v3401_v44 = vsel %vm3015_vm9, %v2580_v33, -inf  ;;  %v4682_v19 = vshrl.u32 %v15390_v29, 16  ;;  %v4684_v62 = vshll.u32 %v15390_v29, 16  ;;  %v2717_v3 = vcombine.high %v2301_v56, %v2301_v56 }
 0x2eb   : > { %v3383_v57 = vrot.slane %v3382_v24, 2  ;;  %v3389_v10 = vmax.f32 %v3387_v43, %v3388_v60  ;;  %v3396_v50 = vmax.f32 %v3394_v54, %v3395_v5  ;;  %v3402_v52 = vrot.slane %v3401_v44, 4 }
 0x2ec   : > { %v2724_v53 = vrot.slane %v2301_v56, %v14978_v2  ;;  %v4686_v11 = vrot.slane %v4684_v62, 1  ;;  %v15452_v30 = vadd.f32 %v15213_v22, %v15261_v25  ;;  %v2731_v45 = vrot.slane %v2717_v3, %v14978_v2 }
 0x2ed   : > { %v3384_v32 = vmax.f32 %v3382_v24, %v3383_v57  ;;  %v3390_v26 = vrot.slane %v3389_v10, 2  ;;  %v3397_v15 = vrot.slane %v3396_v50, 2  ;;  %v3403_v37 = vmax.f32 %v3401_v44, %v3402_v52 }
 0x2ee   : > { %v2732_v12 = vcombine.high %v2724_v53, %v2724_v53  ;;  %v3632_v29 = vsel %vm3015_vm9, %v2724_v53, -inf  ;;  %v15456_v1 = vor.u32 %v4686_v11, %v4682_v19  ;;  %v2733_v13 = vcombine.high %v2731_v45, %v2731_v45 }
 0x2ef   : > { %v3385_v8 = vrot.slane %v3384_v32, 1  ;;  %v3391_v16 = vmax.f32 %v3389_v10, %v3390_v26  ;;  %v3398_v27 = vmax.f32 %v3396_v50, %v3397_v15  ;;  %v3404_v21 = vrot.slane %v3403_v37, 2  ;;  %v15470_v15 = vpop.f32.mrb[14].mxu1 }
 0x2f0   : > { %v3633_v6 = vrot.slane %v3632_v29, 4  ;;  %v3639_v25 = vsel %vm3015_vm9, %v2732_v12, -inf  ;;  %v3646_v17 = vsel %vm3015_vm9, %v2731_v45, -inf  ;;  %4830 = vrot.lane.b32.xlu1 %v15456_v1, %s13786_s18  ;;  %v3653_v33 = vsel %vm3015_vm9, %v2733_v13, -inf }
 0x2f1   : > { %v3386_v31 = vmax.f32 %v3384_v32, %v3385_v8  ;;  %v3392_v38 = vrot.slane %v3391_v16, 1  ;;  %v3399_v41 = vrot.slane %v3398_v27, 1  ;;  %v3405_v35 = vmax.f32 %v3403_v37, %v3404_v21  ;;  %v4559_v8 = vld [vmem:[#allocation3 + $0x24] sm:$0x1]  ;;  %v15475_v21 = vpop.f32.mrb[15].mxu1 }
 0x2f2   : > { %v3634_v14 = vmax.f32 %v3632_v29, %v3633_v6  ;;  %v3640_v51 = vrot.slane %v3639_v25, 4  ;;  %v3647_v47 = vrot.slane %v3646_v17, 4  ;;  %v3654_v10 = vrot.slane %v3653_v33, 4 }
 0x2f3   : > { %v3393_v43 = vmax.f32 %v3391_v16, %v3392_v38  ;;  %v3400_v54 = vmax.f32 %v3398_v27, %v3399_v41  ;;  %v3406_v28 = vrot.slane %v3405_v35, 1  ;;  %v3997_v24 = vsel %vm3912_vm10, %v3386_v31, -inf }
 0x2f4   : > { %v3999_v60 = vmax.f32 %v3997_v24, %v15424_v34  ;;  %v3635_v5 = vrot.slane %v3634_v14, 2  ;;  %v3641_v44 = vmax.f32 %v3639_v25, %v3640_v51  ;;  %v3648_v56 = vmax.f32 %v3646_v17, %v3647_v47  ;;  %4712 = vrot.lane.b32.xlu1 %v15456_v1, %s13783_s30  ;;  %v4556_v47 = vld [vmem:[#allocation3 + $0x20] sm:$0xf] }
 0x2f5   : > { %v3407_v19 = vmax.f32 %v3405_v35, %v3406_v28  ;;  %v4000_v62 = vsel %vm3912_vm10, %v3393_v43, -inf  ;;  %v4003_v57 = vsel %vm3912_vm10, %v3400_v54, -inf  ;;  %v3655_v26 = vmax.f32 %v3653_v33, %v3654_v10 }
 0x2f6   : > { %v4002_v50 = vmax.f32 %v4000_v62, %v4001_v36  ;;  %v4005_v52 = vmax.f32 %v4003_v57, %v4004_v20  ;;  %v12417_v3 = vpack.c.bf16 %v3999_v60, %v3999_v60  ;;  %v3636_v53 = vmax.f32 %v3634_v14, %v3635_v5 }
 0x2f7   : > { %v4006_v11 = vsel %vm3912_vm10, %v3407_v19, -inf  ;;  %v3642_v32 = vrot.slane %v3641_v44, 2  ;;  %v3649_v34 = vrot.slane %v3648_v56, 2  ;;  %v3656_v27 = vrot.slane %v3655_v26, 2 }
 0x2f8   : > { %v4008_v37 = vmax.f32 %v4006_v11, %v15444_v49  ;;  %v12418_v45 = vpack.c.bf16 %v4002_v50, %v4002_v50  ;;  %v12419_v12 = vpack.c.bf16 %v4005_v52, %v4005_v52  ;;  %v4411_v29 = vunpack.c.l.b16 %v12417_v3  ;;  %4754 = vrot.lane.b32.xlu1 %v15373_v9, %s13786_s18 }
 0x2f9   : > { %v3637_v36 = vrot.slane %v3636_v53, 1  ;;  %v3643_v20 = vmax.f32 %v3641_v44, %v3642_v32  ;;  %v3650_v16 = vmax.f32 %v3648_v56, %v3649_v34  ;;  %v3657_v41 = vmax.f32 %v3655_v26, %v3656_v27 }
 0x2fa   : > { %v4412_v13 = vunpack.c.l.b16 %v12418_v45  ;;  %v4413_v6 = vunpack.c.l.b16 %v12419_v12  ;;  %v4474_v25 = vsel %vm4453_vm14, %v4411_v29, %v15433_v58  ;;  %v12456_v17 = vpack.c.bf16 %v4008_v37, %v4008_v37 }
 0x2fb   : > { %v3638_v49 = vmax.f32 %v3636_v53, %v3637_v36  ;;  %v3644_v31 = vrot.slane %v3643_v20, 1  ;;  %v3651_v38 = vrot.slane %v3650_v16, 1  ;;  %v2299_v14 = vmax.f32 %v15452_v30, 0.0 }
 0x2fc   : > { %v4475_v35 = vsel %vm4455_vm15, %v4412_v13, %v4474_v25  ;;  %v4560_v9 = vsel %vm15060_vm1, %v12456_v17, %v4559_v8  ;;  %v3658_v43 = vrot.slane %v3657_v41, 1  ;;  %v2244_v10 = vadd.f32 %v15213_v22, %v15263_v18 }
 0x2fd   : > { %v4476_v51 = vsel %vm4457_vm0, %v4413_v6, %v4475_v35  ;;  %4561 = vst [vmem:[#allocation3 + $0x24] sm:$0x1] %v4560_v9  ;;  %v3645_v33 = vmax.f32 %v3643_v20, %v3644_v31  ;;  %v3652_v58 = vmax.f32 %v3650_v16, %v3651_v38  ;;  %v2683_v28 = vcombine.high %v2299_v14, %v2299_v14 }
 0x2fe   : > { %v4507_v54 = vpack.c.b16 %v4476_v51, %v4476_v51  ;;  %v2690_v24 = vrot.slane %v2299_v14, %v14978_v2  ;;  %v3659_v60 = vmax.f32 %v3657_v41, %v3658_v43  ;;  %v4034_v5 = vsel %vm3912_vm10, %v3638_v49, -inf }
 0x2ff   : > { %v2697_v56 = vrot.slane %v2683_v28, %v14978_v2  ;;  %v4037_v62 = vsel %vm3912_vm10, %v3645_v33, -inf  ;;  %v2236_v50 = vadd.f32 %v15213_v22, %v15265_v4  ;;  %v4040_v52 = vsel %vm3912_vm10, %v3652_v58, -inf  ;;  %v15503_v22 = vld [vmem:[%s16804_s2] ss:$0 sm:$0xff] }
 0x300   : > { %v4557_v44 = vsel %vm15075_vm4, %v4507_v54, %v4556_v47  ;;  %v2698_v30 = vcombine.high %v2690_v24, %v2690_v24  ;;  %v3576_v19 = vsel %vm3015_vm9, %v2690_v24, -inf  ;;  %v2302_v37 = vmax.f32 %v2244_v10, 0.0 }
 0x301   : > { %4558 = vst [vmem:[#allocation3 + $0x20] sm:$0xf] %v4557_v44  ;;  %v3577_v57 = vrot.slane %v3576_v19, 4  ;;  %v2699_v3 = vcombine.high %v2697_v56, %v2697_v56  ;;  %v3590_v11 = vsel %vm3015_vm9, %v2697_v56, -inf  ;;  %v4043_v45 = vsel %vm3912_vm10, %v3659_v60, -inf }
 0x302   : > { %v3583_v53 = vsel %vm3015_vm9, %v2698_v30, -inf  ;;  %v3591_v26 = vrot.slane %v3590_v11, 4  ;;  %v2300_v29 = vmax.f32 %v2236_v50, 0.0  ;;  %v15507_v18 = vadd.f32 %v15503_v22, %v15337_v46 }
 0x303   : > { %v3578_v32 = vmax.f32 %v3576_v19, %v3577_v57  ;;  %v3584_v34 = vrot.slane %v3583_v53, 4  ;;  %v3597_v12 = vsel %vm3015_vm9, %v2699_v3, -inf  ;;  %v2734_v16 = vcombine.high %v2302_v37, %v2302_v37 }
 0x304   : > { %v3592_v36 = vmax.f32 %v3590_v11, %v3591_v26  ;;  %v3598_v20 = vrot.slane %v3597_v12, 4  ;;  %v2741_v27 = vrot.slane %v2302_v37, %v14978_v2  ;;  %v2700_v13 = vcombine.high %v2300_v29, %v2300_v29 }
 0x305   : > { %v3579_v4 = vrot.slane %v3578_v32, 2  ;;  %v3585_v8 = vmax.f32 %v3583_v53, %v3584_v34  ;;  %v15511_v6 = vrot.slane %v2300_v29, %v14978_v2  ;;  %v2748_v38 = vrot.slane %v2734_v16, %v14978_v2 }
 0x306   : > { %v3593_v49 = vrot.slane %v3592_v36, 2  ;;  %v3599_v31 = vmax.f32 %v3597_v12, %v3598_v20  ;;  %v2749_v41 = vcombine.high %v2741_v27, %v2741_v27  ;;  %v3660_v46 = vsel %vm3015_vm9, %v2741_v27, -inf }
 0x307   : > { %v3580_v25 = vmax.f32 %v3578_v32, %v3579_v4  ;;  %v3586_v17 = vrot.slane %v3585_v8, 2  ;;  %v15516_v35 = vrot.slane %v2700_v13, %v14978_v2  ;;  %v2750_v33 = vcombine.high %v2748_v38, %v2748_v38 }
 0x308   : > { %v3594_v51 = vmax.f32 %v3592_v36, %v3593_v49  ;;  %v3600_v47 = vrot.slane %v3599_v31, 2  ;;  %v3661_v43 = vrot.slane %v3660_v46, 4  ;;  %v3667_v54 = vsel %vm3015_vm9, %v2749_v41, -inf }
 0x309   : > { %v3581_v9 = vrot.slane %v3580_v25, 1  ;;  %v3587_v14 = vmax.f32 %v3585_v8, %v3586_v17  ;;  %v3674_v58 = vsel %vm3015_vm9, %v2748_v38, -inf  ;;  %v3668_v30 = vrot.slane %v3667_v54, 4 }
 0x30a   : > { %v3595_v60 = vrot.slane %v3594_v51, 1  ;;  %v3601_v44 = vmax.f32 %v3599_v31, %v3600_v47  ;;  %v3662_v56 = vmax.f32 %v3660_v46, %v3661_v43  ;;  %v3675_v19 = vrot.slane %v3674_v58, 4 }
 0x30b   : > { %v3582_v28 = vmax.f32 %v3580_v25, %v3581_v9  ;;  %v3588_v24 = vrot.slane %v3587_v14, 1  ;;  %v3681_v57 = vsel %vm3015_vm9, %v2750_v33, -inf  ;;  %v3669_v34 = vmax.f32 %v3667_v54, %v3668_v30 }
 0x30c   : > { %v3596_v50 = vmax.f32 %v3594_v51, %v3595_v60  ;;  %v3602_v3 = vrot.slane %v3601_v44, 1  ;;  %v3663_v32 = vrot.slane %v3662_v56, 2  ;;  %v3676_v26 = vmax.f32 %v3674_v58, %v3675_v19 }
 0x30d   : > { %v3589_v10 = vmax.f32 %v3587_v14, %v3588_v24  ;;  %v4033_v53 = vsel %vm3912_vm10, %v3582_v28, -inf  ;;  %v3682_v4 = vrot.slane %v3681_v57, 4  ;;  %v3670_v13 = vrot.slane %v3669_v34, 2 }
 0x30e   : > { %v4035_v11 = vmax.f32 %v4033_v53, %v4034_v5  ;;  %v3603_v37 = vmax.f32 %v3601_v44, %v3602_v3  ;;  %v4039_v29 = vsel %vm3912_vm10, %v3596_v50, -inf  ;;  %v3664_v16 = vmax.f32 %v3662_v56, %v3663_v32 }
 0x30f   : > { %v4036_v12 = vsel %vm3912_vm10, %v3589_v10, -inf  ;;  %v4041_v36 = vmax.f32 %v4039_v29, %v4040_v52  ;;  %v3677_v25 = vrot.slane %v3676_v26, 2  ;;  %v3683_v17 = vmax.f32 %v3681_v57, %v3682_v4 }
 0x310   : > { %v4038_v8 = vmax.f32 %v4036_v12, %v4037_v62  ;;  %v12429_v20 = vpack.c.bf16 %v4035_v11, %v4035_v11  ;;  %v4042_v27 = vsel %vm3912_vm10, %v3603_v37, -inf  ;;  %v3665_v41 = vrot.slane %v3664_v16, 1 }
 0x311   : > { %v4044_v49 = vmax.f32 %v4042_v27, %v4043_v45  ;;  %v12431_v31 = vpack.c.bf16 %v4041_v36, %v4041_v36  ;;  %v3671_v46 = vmax.f32 %v3669_v34, %v3670_v13  ;;  %v3678_v9 = vmax.f32 %v3676_v26, %v3677_v25 }
 0x312   : > { %v12430_v5 = vpack.c.bf16 %v4038_v8, %v4038_v8  ;;  %v4423_v38 = vunpack.c.l.b16 %v12429_v20  ;;  %v3684_v14 = vrot.slane %v3683_v17, 2  ;;  %v2715_v62 = vcombine.high %v15511_v6, %v15511_v6 }
 0x313   : > { %v12432_v51 = vpack.c.bf16 %v4044_v49, %v4044_v49  ;;  %v4425_v33 = vunpack.c.l.b16 %v12431_v31  ;;  %v3666_v52 = vmax.f32 %v3664_v16, %v3665_v41  ;;  %v3672_v43 = vrot.slane %v3671_v46, 1 }
 0x314   : > { %v4424_v47 = vunpack.c.l.b16 %v12430_v5  ;;  %v3679_v54 = vrot.slane %v3678_v9, 1  ;;  %v3685_v58 = vmax.f32 %v3683_v17, %v3684_v14  ;;  %v2716_v24 = vcombine.high %v15516_v35, %v15516_v35 }
 0x315   : > { %v4426_v28 = vunpack.c.l.b16 %v12432_v51  ;;  %v3604_v60 = vsel %vm3015_vm9, %v15511_v6, -inf  ;;  %v3673_v56 = vmax.f32 %v3671_v46, %v3672_v43  ;;  %v4046_v57 = vsel %vm3912_vm10, %v3666_v52, -inf }
 0x316   : > { %v4483_v45 = vsel %vm4447_vm11, %v4424_v47, %v4423_v38  ;;  %v3680_v30 = vmax.f32 %v3678_v9, %v3679_v54  ;;  %v3686_v19 = vrot.slane %v3685_v58, 1  ;;  %v3605_v10 = vrot.slane %v3604_v60, 4 }
 0x317   : > { %v4484_v44 = vsel %vm4449_vm12, %v4425_v33, %v4483_v45  ;;  %v3611_v50 = vsel %vm3015_vm9, %v2715_v62, -inf  ;;  %v3618_v3 = vsel %vm3015_vm9, %v15516_v35, -inf  ;;  %v4049_v11 = vsel %vm3912_vm10, %v3673_v56, -inf }
 0x318   : > { %v3687_v53 = vmax.f32 %v3685_v58, %v3686_v19  ;;  %v4052_v32 = vsel %vm3912_vm10, %v3680_v30, -inf  ;;  %v3612_v34 = vrot.slane %v3611_v50, 4  ;;  %v3606_v6 = vmax.f32 %v3604_v60, %v3605_v10 }
 0x319   : > { %v3619_v26 = vrot.slane %v3618_v3, 4  ;;  %v3625_v37 = vsel %vm3015_vm9, %v2716_v24, -inf  ;;  %v15541_v12 = vsel %vm4451_vm13, %v4426_v28, %v4484_v44  ;;  %v2305_v36 = vmax.f32 %v15507_v18, 0.0 }
 0x31a   : > { %v4055_v29 = vsel %vm3912_vm10, %v3687_v53, -inf  ;;  %v3613_v4 = vmax.f32 %v3611_v50, %v3612_v34  ;;  %v3626_v8 = vrot.slane %v3625_v37, 4  ;;  %v3607_v35 = vrot.slane %v3606_v6, 2 }
 0x31b   : > { %v3620_v20 = vmax.f32 %v3618_v3, %v3619_v26  ;;  %v2249_v16 = vadd.f32 %v15503_v22, %v15344_v48  ;;  %v2260_v27 = vadd.f32 %v15503_v22, %v15347_v59  ;;  %v2785_v17 = vcombine.high %v2305_v36, %v2305_v36 }
 0x31c   : > { %v3614_v13 = vrot.slane %v3613_v4, 2  ;;  %v3627_v25 = vmax.f32 %v3625_v37, %v3626_v8  ;;  %v2792_v49 = vrot.slane %v2305_v36, %v14978_v2  ;;  %v3608_v5 = vmax.f32 %v3606_v6, %v3607_v35 }
 0x31d   : > { %v3621_v31 = vrot.slane %v3620_v20, 2  ;;  %v15550_v38 = vmax.f32 %v2249_v16, 0.0  ;;  %v15552_v41 = vmax.f32 %v2260_v27, 0.0  ;;  %v2799_v9 = vrot.slane %v2785_v17, %v14978_v2 }
 0x31e   : > { %v3615_v18 = vmax.f32 %v3613_v4, %v3614_v13  ;;  %v3628_v46 = vrot.slane %v3627_v25, 2  ;;  %v2800_v14 = vcombine.high %v2792_v49, %v2792_v49  ;;  %v3609_v48 = vrot.slane %v3608_v5, 1 }
 0x31f   : > { %v3622_v51 = vmax.f32 %v3620_v20, %v3621_v31  ;;  %v3744_v59 = vsel %vm3015_vm9, %v2792_v49, -inf  ;;  %v2751_v47 = vcombine.high %v15550_v38, %v15550_v38  ;;  %v2801_v52 = vcombine.high %v2799_v9, %v2799_v9 }
 0x320   : > { %v3616_v33 = vrot.slane %v3615_v18, 1  ;;  %v3629_v62 = vmax.f32 %v3627_v25, %v3628_v46  ;;  %v3745_v43 = vrot.slane %v3744_v59, 4  ;;  %v3610_v54 = vmax.f32 %v3608_v5, %v3609_v48 }
 0x321   : > { %v3623_v58 = vrot.slane %v3622_v51, 1  ;;  %v3751_v28 = vsel %vm3015_vm9, %v2800_v14, -inf  ;;  %v3758_v45 = vsel %vm3015_vm9, %v2799_v9, -inf  ;;  %v3765_v50 = vsel %vm3015_vm9, %v2801_v52, -inf }
 0x322   : > { %v3617_v24 = vmax.f32 %v3615_v18, %v3616_v33  ;;  %v3630_v60 = vrot.slane %v3629_v62, 1  ;;  %v3746_v44 = vmax.f32 %v3744_v59, %v3745_v43  ;;  %v3752_v56 = vrot.slane %v3751_v28, 4 }
 0x323   : > { %v3624_v30 = vmax.f32 %v3622_v51, %v3623_v58  ;;  %v4045_v19 = vsel %vm3912_vm10, %v3610_v54, -inf  ;;  %v3759_v10 = vrot.slane %v3758_v45, 4  ;;  %v3766_v18 = vrot.slane %v3765_v50, 4  ;;  %v4568_v54 = vld [vmem:[#allocation3 + $0x30] sm:$0xf] }
 0x324   : > { %v3631_v3 = vmax.f32 %v3629_v62, %v3630_v60  ;;  %v4047_v53 = vmax.f32 %v4045_v19, %v4046_v57  ;;  %v4048_v34 = vsel %vm3912_vm10, %v3617_v24, -inf  ;;  %v3747_v6 = vrot.slane %v3746_v44, 2  ;;  %v4571_v57 = vld [vmem:[#allocation3 + $0x34] sm:$0x1] }
 0x325   : > { %v4050_v26 = vmax.f32 %v4048_v34, %v4049_v11  ;;  %v4051_v37 = vsel %vm3912_vm10, %v3624_v30, -inf  ;;  %v3753_v4 = vmax.f32 %v3751_v28, %v3752_v56  ;;  %v3760_v8 = vmax.f32 %v3758_v45, %v3759_v10 }
 0x326   : > { %v4053_v36 = vmax.f32 %v4051_v37, %v4052_v32  ;;  %v4054_v35 = vsel %vm3912_vm10, %v3631_v3, -inf  ;;  %v12433_v20 = vpack.c.bf16 %v4047_v53, %v4047_v53  ;;  %v3748_v16 = vmax.f32 %v3746_v44, %v3747_v6 }
 0x327   : > { %v4056_v27 = vmax.f32 %v4054_v35, %v4055_v29  ;;  %v12434_v13 = vpack.c.bf16 %v4050_v26, %v4050_v26  ;;  %v3754_v25 = vrot.slane %v3753_v4, 2  ;;  %v3761_v17 = vrot.slane %v3760_v8, 2 }
 0x328   : > { %v12435_v49 = vpack.c.bf16 %v4053_v36, %v4053_v36  ;;  %v4427_v5 = vunpack.c.l.b16 %v12433_v20  ;;  %v3749_v31 = vrot.slane %v3748_v16, 1  ;;  %v3767_v59 = vmax.f32 %v3765_v50, %v3766_v18 }
 0x329   : > { %v4428_v46 = vunpack.c.l.b16 %v12434_v13  ;;  %v12458_v11 = vpack.c.bf16 %v4056_v27, %v4056_v27  ;;  %v3755_v9 = vmax.f32 %v3753_v4, %v3754_v25  ;;  %v3762_v14 = vmax.f32 %v3760_v8, %v3761_v17 }
 0x32a   : > { %v4429_v48 = vunpack.c.l.b16 %v12435_v49  ;;  %v4486_v32 = vsel %vm4453_vm14, %v4427_v5, %v15541_v12  ;;  %v3750_v51 = vmax.f32 %v3748_v16, %v3749_v31  ;;  %v3768_v58 = vrot.slane %v3767_v59, 2 }
 0x32b   : > { %v4487_v29 = vsel %vm4455_vm15, %v4428_v46, %v4486_v32  ;;  %v4572_v33 = vsel %vm15060_vm1, %v12458_v11, %v4571_v57  ;;  %v3756_v62 = vrot.slane %v3755_v9, 1  ;;  %v3763_v52 = vrot.slane %v3762_v14, 1 }
 0x32c   : > { %v4488_v43 = vsel %vm4457_vm0, %v4429_v48, %v4487_v29  ;;  %4573 = vst [vmem:[#allocation3 + $0x34] sm:$0x1] %v4572_v33  ;;  %v15572_v28 = vsel %vm3912_vm10, %v3750_v51, -inf  ;;  %v2758_v12 = vrot.slane %v15550_v38, %v14978_v2  ;;  %v2765_v44 = vrot.slane %v2751_v47, %v14978_v2 }
 0x32d   : > { %v4511_v45 = vpack.c.b16 %v4488_v43, %v4488_v43  ;;  %v3757_v24 = vmax.f32 %v3755_v9, %v3756_v62  ;;  %v3764_v60 = vmax.f32 %v3762_v14, %v3763_v52  ;;  %v3769_v56 = vmax.f32 %v3767_v59, %v3768_v58 }
 0x32e   : > { %v2766_v30 = vcombine.high %v2758_v12, %v2758_v12  ;;  %v3688_v19 = vsel %vm3015_vm9, %v2758_v12, -inf  ;;  %v2802_v10 = vcombine.high %v15552_v41, %v15552_v41  ;;  %v2767_v38 = vcombine.high %v2765_v44, %v2765_v44 }
 0x32f   : > { %v4569_v50 = vsel %vm15075_vm4, %v4511_v45, %v4568_v54  ;;  %v4061_v3 = vsel %vm3912_vm10, %v3757_v24, -inf  ;;  %v4064_v53 = vsel %vm3912_vm10, %v3764_v60, -inf  ;;  %v3770_v34 = vrot.slane %v3769_v56, 1 }
 0x330   : > { %4570 = vst [vmem:[#allocation3 + $0x30] sm:$0xf] %v4569_v50  ;;  %v3689_v6 = vrot.slane %v3688_v19, 4  ;;  %v3695_v47 = vsel %vm3015_vm9, %v2766_v30, -inf  ;;  %v3702_v26 = vsel %vm3015_vm9, %v2765_v44, -inf  ;;  %v3709_v8 = vsel %vm3015_vm9, %v2767_v38, -inf }
 0x331   : > { %v3696_v37 = vrot.slane %v3695_v47, 4  ;;  %v3703_v4 = vrot.slane %v3702_v26, 4  ;;  %v2809_v36 = vrot.slane %v15552_v41, %v14978_v2  ;;  %v3771_v35 = vmax.f32 %v3769_v56, %v3770_v34 }
 0x332   : > { %v3690_v20 = vmax.f32 %v3688_v19, %v3689_v6  ;;  %v3710_v16 = vrot.slane %v3709_v8, 4  ;;  %v2816_v27 = vrot.slane %v2802_v10, %v14978_v2 }
 0x333   : > { %v3697_v13 = vmax.f32 %v3695_v47, %v3696_v37  ;;  %v3704_v25 = vmax.f32 %v3702_v26, %v3703_v4  ;;  %v2817_v17 = vcombine.high %v2809_v36, %v2809_v36  ;;  %v3772_v49 = vsel %vm3015_vm9, %v2809_v36, -inf }
 0x334   : > { %v4067_v5 = vsel %vm3912_vm10, %v3771_v35, -inf  ;;  %v3691_v57 = vrot.slane %v3690_v20, 2  ;;  %v3711_v31 = vmax.f32 %v3709_v8, %v3710_v16  ;;  %v2818_v18 = vcombine.high %v2816_v27, %v2816_v27 }
 0x335   : > { %v3698_v46 = vrot.slane %v3697_v13, 2  ;;  %v3705_v11 = vrot.slane %v3704_v25, 2  ;;  %v3773_v9 = vrot.slane %v3772_v49, 4  ;;  %v3779_v41 = vsel %vm3015_vm9, %v2817_v17, -inf }
 0x336   : > { %v3692_v14 = vmax.f32 %v3690_v20, %v3691_v57  ;;  %v3712_v48 = vrot.slane %v3711_v31, 2  ;;  %v3780_v32 = vrot.slane %v3779_v41, 4  ;;  %v3786_v51 = vsel %vm3015_vm9, %v2816_v27, -inf }
 0x337   : > { %v3699_v59 = vmax.f32 %v3697_v13, %v3698_v46  ;;  %v3706_v29 = vmax.f32 %v3704_v25, %v3705_v11  ;;  %v3774_v33 = vmax.f32 %v3772_v49, %v3773_v9  ;;  %v3787_v62 = vrot.slane %v3786_v51, 4  ;;  %v15600_v46 = vld [vmem:[#allocation3 + $0x30] sm:$0xf] }
 0x338   : > { %v3693_v52 = vrot.slane %v3692_v14, 1  ;;  %v3713_v43 = vmax.f32 %v3711_v31, %v3712_v48  ;;  %v3781_v54 = vmax.f32 %v3779_v41, %v3780_v32  ;;  %v3793_v58 = vsel %vm3015_vm9, %v2818_v18, -inf }
 0x339   : > { %v3700_v12 = vrot.slane %v3699_v59, 1  ;;  %v3707_v45 = vrot.slane %v3706_v29, 1  ;;  %v3775_v24 = vrot.slane %v3774_v33, 2  ;;  %v3788_v60 = vmax.f32 %v3786_v51, %v3787_v62 }
 0x33a   : > { %v3694_v44 = vmax.f32 %v3692_v14, %v3693_v52  ;;  %v3714_v56 = vrot.slane %v3713_v43, 1  ;;  %v3782_v30 = vrot.slane %v3781_v54, 2  ;;  %v3794_v19 = vrot.slane %v3793_v58, 4  ;;  %v15607_v52 = vld [vmem:[#allocation3 + $0x10] sm:$0xf] }
 0x33b   : > { %v3701_v10 = vmax.f32 %v3699_v59, %v3700_v12  ;;  %v3708_v50 = vmax.f32 %v3706_v29, %v3707_v45  ;;  %v3776_v38 = vmax.f32 %v3774_v33, %v3775_v24  ;;  %v3789_v34 = vrot.slane %v3788_v60, 2  ;;  %v4591_v29 = vld [vmem:[#allocation3 + $0x14] sm:$0x1] }
 0x33c   : > { %v3715_v6 = vmax.f32 %v3713_v43, %v3714_v56  ;;  %v4057_v47 = vsel %vm3912_vm10, %v3694_v44, -inf  ;;  %v3783_v26 = vmax.f32 %v3781_v54, %v3782_v30  ;;  %v3795_v37 = vmax.f32 %v3793_v58, %v3794_v19  ;;  %v12894_v54 = vld [vmem:[%s16805_s3 + $0x40] sm:$0xff]   ;;  %v4599_v24 = vld [vmem:[#allocation3 + $0x34] sm:$0x1] }
 0x33d   : > { %v4059_v4 = vmax.f32 %v4057_v47, %v15572_v28  ;;  %v4060_v8 = vsel %vm3912_vm10, %v3701_v10, -inf  ;;  %v4063_v36 = vsel %vm3912_vm10, %v3708_v50, -inf  ;;  %v3777_v35 = vrot.slane %v3776_v38, 1  ;;  %v12895_v58 = vld [vmem:[%s16805_s3] sm:$0xff]   ;;  %12495 = vmatprep.subr.bf16.mxu1 %v12894_v54 }
 0x33e   : > { %v4062_v20 = vmax.f32 %v4060_v8, %v4061_v3  ;;  %v4065_v16 = vmax.f32 %v4063_v36, %v4064_v53  ;;  %v4066_v27 = vsel %vm3912_vm10, %v3715_v6, -inf  ;;  %v3784_v13 = vrot.slane %v3783_v26, 1  ;;  %12496 = vmatpush3.bf16.msra.mxu1 %v12895_v58 }
 0x33f   : > { %v4068_v25 = vmax.f32 %v4066_v27, %v4067_v5  ;;  %v12437_v17 = vpack.c.bf16 %v4059_v4, %v4059_v4  ;;  %v3790_v49 = vmax.f32 %v3788_v60, %v3789_v34  ;;  %v3796_v18 = vrot.slane %v3795_v37, 2 }
 0x340   : > { %v12438_v57 = vpack.c.bf16 %v4062_v20, %v4062_v20  ;;  %v12439_v31 = vpack.c.bf16 %v4065_v16, %v4065_v16  ;;  %v3778_v28 = vmax.f32 %v3776_v38, %v3777_v35  ;;  %v3785_v9 = vmax.f32 %v3783_v26, %v3784_v13 }
 0x341   : > { %v12440_v11 = vpack.c.bf16 %v4068_v25, %v4068_v25  ;;  %v3791_v41 = vrot.slane %v3790_v49, 1  ;;  %v4431_v14 = vunpack.c.l.b16 %v12437_v17  ;;  %v3797_v3 = vmax.f32 %v3795_v37, %v3796_v18 }
 0x342   : > { %v4432_v48 = vunpack.c.l.b16 %v12438_v57  ;;  %v4433_v32 = vunpack.c.l.b16 %v12439_v31  ;;  %v2252_v5 = vadd.f32 %v15503_v22, %v15352_v63  ;;  %v11718_v59 = vcombine.low %v15600_v46, %v15600_v46 }
 0x343   : > { %v4434_v53 = vunpack.c.l.b16 %v12440_v11  ;;  %v3792_v51 = vmax.f32 %v3790_v49, %v3791_v41  ;;  %v3798_v62 = vrot.slane %v3797_v3, 1  ;;  %v11707_v43 = vcombine.low %v15607_v52, %v4591_v29 }
 0x344   : > { %v4489_v33 = vsel %vm4447_vm11, %v4432_v48, %v4431_v14  ;;  %v15618_v12 = vsel %vm3912_vm10, %v3778_v28, -inf  ;;  %v2304_v45 = vmax.f32 %v2252_v5, 0.0  ;;  %4762 = vrot.lane.b32.xlu1 %v11718_v59, %s13786_s18  ;;  %4806 = vrot.lane.b32.xlu0 %v11718_v59, %s13784_s23  ;;  %v15623_v60 = vsel %vm3912_vm10, %v3785_v9, -inf }
 0x345   : > { %v4490_v63 = vsel %vm4449_vm12, %v4433_v32, %v4489_v33  ;;  %v15626_v44 = vsel %vm3912_vm10, %v3792_v51, -inf  ;;  %v15632_v30 = vcombine.low %v15600_v46, %v4599_v24  ;;  %v15635_v50 = vrot.slane %v11707_v43, 1 }
 0x346   : > { %v15629_v56 = vsel %vm4451_vm13, %v4434_v53, %v4490_v63  ;;  %v2768_v19 = vcombine.high %v2304_v45, %v2304_v45  ;;  %v2775_v10 = vrot.slane %v2304_v45, %v14978_v2  ;;  %v4663_v38 = vshll.u32 %v11707_v43, 16 }
 0x347   : > { %v3799_v34 = vmax.f32 %v3797_v3, %v3798_v62  ;;  %v4661_v6 = vshrl.u32 %v11707_v43, 16  ;;  %v2273_v47 = vadd.f32 %v15503_v22, %v15428_v23  ;;  %v2265_v26 = vadd.f32 %v15503_v22, %v15435_v61  ;;  %v15650_v23 = vld [vmem:[#allocation3 + $0x18] sm:$0xf] }
 0x348   : > { %v2782_v37 = vrot.slane %v2768_v19, %v14978_v2  ;;  %v2783_v4 = vcombine.high %v2775_v10, %v2775_v10  ;;  %v3716_v8 = vsel %vm3015_vm9, %v2775_v10, -inf  ;;  %4781 = vrot.lane.b32.xlu1 %v15635_v50, %s13783_s30  ;;  %4730 = vrot.lane.b32.xlu0 %v15635_v50, %s13784_s23  ;;  %v4665_v36 = vrot.slane %v4663_v38, 1 }
 0x349   : > { %v3717_v35 = vrot.slane %v3716_v8, 4  ;;  %v15648_v20 = vrot.slane %v15632_v30, 1  ;;  %v2309_v16 = vmax.f32 %v2273_v47, 0.0  ;;  %v15652_v61 = vmax.f32 %v2265_v26, 0.0 }
 0x34a   : > { %v2784_v27 = vcombine.high %v2782_v37, %v2782_v37  ;;  %v3723_v13 = vsel %vm3015_vm9, %v2783_v4, -inf  ;;  %v3730_v25 = vsel %vm3015_vm9, %v2782_v37, -inf  ;;  %v15656_v17 = vor.u32 %v4665_v36, %v4661_v6 }
 0x34b   : > { %v3718_v49 = vmax.f32 %v3716_v8, %v3717_v35  ;;  %v3724_v57 = vrot.slane %v3723_v13, 4  ;;  %v3731_v31 = vrot.slane %v3730_v25, 4  ;;  %v2853_v18 = vcombine.high %v2309_v16, %v2309_v16 }
 0x34c   : > { %v4079_v11 = vsel %vm3912_vm10, %v3799_v34, -inf  ;;  %v3737_v28 = vsel %vm3015_vm9, %v2784_v27, -inf  ;;  %4824 = vrot.lane.b32.xlu0 %v15656_v17, %s13786_s18  ;;  %4789 = vrot.lane.b32.xlu1 %v15648_v20, %s13783_s30  ;;  %v15666_v9 = vcombine.low %v15650_v23, %v15650_v23  ;;  %v2860_v41 = vrot.slane %v2309_v16, %v14978_v2 }
 0x34d   : > { %v3719_v14 = vrot.slane %v3718_v49, 2  ;;  %v3725_v48 = vmax.f32 %v3723_v13, %v3724_v57  ;;  %v3732_v32 = vmax.f32 %v3730_v25, %v3731_v31  ;;  %v3738_v3 = vrot.slane %v3737_v28, 4 }
 0x34e   : > { %v2867_v53 = vrot.slane %v2853_v18, %v14978_v2  ;;  %v2868_v51 = vcombine.high %v2860_v41, %v2860_v41  ;;  %v3856_v5 = vsel %vm3015_vm9, %v2860_v41, -inf  ;;  %v2819_v59 = vcombine.high %v15652_v61, %v15652_v61 }
 0x34f   : > { %v3720_v29 = vmax.f32 %v3718_v49, %v3719_v14  ;;  %v3726_v33 = vrot.slane %v3725_v48, 2  ;;  %v3733_v62 = vrot.slane %v3732_v32, 2  ;;  %v3739_v43 = vmax.f32 %v3737_v28, %v3738_v3 }
 0x350   : > { %4706 = vrot.lane.b32.xlu0 %v15656_v17, %s13783_s30  ;;  %4800 = vrot.lane.b32.xlu1 %v15666_v9, %s13784_s23  ;;  %v2869_v54 = vcombine.high %v2867_v53, %v2867_v53  ;;  %v3857_v58 = vrot.slane %v3856_v5, 4  ;;  %v3863_v63 = vsel %vm3015_vm9, %v2868_v51, -inf  ;;  %v3870_v45 = vsel %vm3015_vm9, %v2867_v53, -inf }
 0x351   : > { %v3721_v24 = vrot.slane %v3720_v29, 1  ;;  %v3727_v19 = vmax.f32 %v3725_v48, %v3726_v33  ;;  %v3734_v10 = vmax.f32 %v3732_v32, %v3733_v62  ;;  %v3740_v38 = vrot.slane %v3739_v43, 2 }
 0x352   : > { %v3858_v34 = vmax.f32 %v3856_v5, %v3857_v58  ;;  %v3864_v6 = vrot.slane %v3863_v63, 4  ;;  %v3871_v47 = vrot.slane %v3870_v45, 4  ;;  %v3877_v26 = vsel %vm3015_vm9, %v2869_v54, -inf }
 0x353   : > { %v3722_v37 = vmax.f32 %v3720_v29, %v3721_v24  ;;  %v3728_v4 = vrot.slane %v3727_v19, 1  ;;  %v3735_v8 = vrot.slane %v3734_v10, 1  ;;  %v3741_v36 = vmax.f32 %v3739_v43, %v3740_v38 }
 0x354   : > { %v3859_v35 = vrot.slane %v3858_v34, 2  ;;  %v3865_v16 = vmax.f32 %v3863_v63, %v3864_v6  ;;  %v3872_v27 = vmax.f32 %v3870_v45, %v3871_v47  ;;  %v3878_v13 = vrot.slane %v3877_v26, 4 }
 0x355   : > { %v3729_v25 = vmax.f32 %v3727_v19, %v3728_v4  ;;  %v3736_v49 = vmax.f32 %v3734_v10, %v3735_v8  ;;  %v3742_v57 = vrot.slane %v3741_v36, 1  ;;  %v4069_v31 = vsel %vm3912_vm10, %v3722_v37, -inf  ;;  %v4577_v19 = vld [vmem:[#allocation3 + $0x3c] sm:$0x1]  ;;  %v4574_v8 = vld [vmem:[#allocation3 + $0x38] sm:$0xf] }
 0x356   : > { %v4071_v18 = vmax.f32 %v4069_v31, %v15618_v12  ;;  %v3860_v28 = vmax.f32 %v3858_v34, %v3859_v35  ;;  %v3866_v41 = vrot.slane %v3865_v16, 2  ;;  %v3873_v14 = vrot.slane %v3872_v27, 2 }
 0x357   : > { %v3743_v48 = vmax.f32 %v3741_v36, %v3742_v57  ;;  %v4072_v32 = vsel %vm3912_vm10, %v3729_v25, -inf  ;;  %v4075_v3 = vsel %vm3912_vm10, %v3736_v49, -inf  ;;  %v3879_v53 = vmax.f32 %v3877_v26, %v3878_v13 }
 0x358   : > { %v4074_v51 = vmax.f32 %v4072_v32, %v15623_v60  ;;  %v4077_v5 = vmax.f32 %v4075_v3, %v15626_v44  ;;  %v12441_v29 = vpack.c.bf16 %v4071_v18, %v4071_v18  ;;  %v2276_v33 = vadd.f32 %v15503_v22, %v15470_v15 }
 0x359   : > { %v4078_v62 = vsel %vm3912_vm10, %v3743_v48, -inf  ;;  %v3867_v12 = vmax.f32 %v3865_v16, %v3866_v41  ;;  %v2826_v43 = vrot.slane %v15652_v61, %v14978_v2  ;;  %v2833_v54 = vrot.slane %v2819_v59, %v14978_v2 }
 0x35a   : > { %v4080_v58 = vmax.f32 %v4078_v62, %v4079_v11  ;;  %v12442_v63 = vpack.c.bf16 %v4074_v51, %v4074_v51  ;;  %v12443_v45 = vpack.c.bf16 %v4077_v5, %v4077_v5  ;;  %v4435_v24 = vunpack.c.l.b16 %v12441_v29 }
 0x35b   : > { %v3861_v60 = vrot.slane %v3860_v28, 1  ;;  %v3874_v10 = vmax.f32 %v3872_v27, %v3873_v14  ;;  %v3880_v44 = vrot.slane %v3879_v53, 2  ;;  %v3868_v47 = vrot.slane %v3867_v12, 1 }
 0x35c   : > { %v4436_v38 = vunpack.c.l.b16 %v12442_v63  ;;  %v4492_v15 = vsel %vm4453_vm14, %v4435_v24, %v15629_v56  ;;  %v12459_v34 = vpack.c.bf16 %v4080_v58, %v4080_v58  ;;  %v4437_v6 = vunpack.c.l.b16 %v12443_v45 }
 0x35d   : > { %v2310_v26 = vmax.f32 %v2276_v33, 0.0  ;;  %v2834_v59 = vcombine.high %v2826_v43, %v2826_v43  ;;  %v2835_v37 = vcombine.high %v2833_v54, %v2833_v54  ;;  %v3862_v36 = vmax.f32 %v3860_v28, %v3861_v60 }
 0x35e   : > { %v4493_v61 = vsel %vm4455_vm15, %v4436_v38, %v4492_v15  ;;  %v4578_v11 = vsel %vm15060_vm1, %v12459_v34, %v4577_v19  ;;  %v3875_v35 = vrot.slane %v3874_v10, 1  ;;  %v3881_v16 = vmax.f32 %v3879_v53, %v3880_v44 }
 0x35f   : > { %v4494_v4 = vsel %vm4457_vm0, %v4437_v6, %v4493_v61  ;;  %4579 = vst [vmem:[#allocation3 + $0x3c] sm:$0x1] %v4578_v11  ;;  %v3800_v56 = vsel %vm3015_vm9, %v2826_v43, -inf  ;;  %v3807_v13 = vsel %vm3015_vm9, %v2834_v59, -inf  ;;  %v3814_v25 = vsel %vm3015_vm9, %v2833_v54, -inf }
 0x360   : > { %v4513_v27 = vpack.c.b16 %v4494_v4, %v4494_v4  ;;  %v3869_v49 = vmax.f32 %v3867_v12, %v3868_v47  ;;  %v3801_v57 = vrot.slane %v3800_v56, 4  ;;  %v3808_v31 = vrot.slane %v3807_v13, 4 }
 0x361   : > { %v3815_v18 = vrot.slane %v3814_v25, 4  ;;  %v3821_v14 = vsel %vm3015_vm9, %v2835_v37, -inf  ;;  %v2870_v48 = vcombine.high %v2310_v26, %v2310_v26  ;;  %v2877_v28 = vrot.slane %v2310_v26, %v14978_v2 }
 0x362   : > { %v4575_v41 = vsel %vm15075_vm4, %v4513_v27, %v4574_v8  ;;  %v3802_v32 = vmax.f32 %v3800_v56, %v3801_v57  ;;  %v3809_v3 = vmax.f32 %v3807_v13, %v3808_v31  ;;  %v3822_v51 = vrot.slane %v3821_v14, 4 }
 0x363   : > { %4576 = vst [vmem:[#allocation3 + $0x38] sm:$0xf] %v4575_v41  ;;  %v3816_v53 = vmax.f32 %v3814_v25, %v3815_v18  ;;  %v3882_v5 = vrot.slane %v3881_v16, 1  ;;  %v2884_v29 = vrot.slane %v2870_v48, %v14978_v2  ;;  %v2885_v33 = vcombine.high %v2877_v28, %v2877_v28 }
 0x364   : > { %v3884_v62 = vsel %vm3015_vm9, %v2877_v28, -inf  ;;  %v3803_v12 = vrot.slane %v3802_v32, 2  ;;  %v3810_v43 = vrot.slane %v3809_v3, 2  ;;  %v3823_v58 = vmax.f32 %v3821_v14, %v3822_v51 }
 0x365   : > { %v3817_v54 = vrot.slane %v3816_v53, 2  ;;  %v3876_v63 = vmax.f32 %v3874_v10, %v3875_v35  ;;  %v2886_v45 = vcombine.high %v2884_v29, %v2884_v29  ;;  %v3891_v24 = vsel %vm3015_vm9, %v2885_v33, -inf }
 0x366   : > { %v3898_v19 = vsel %vm3015_vm9, %v2884_v29, -inf  ;;  %v3804_v60 = vmax.f32 %v3802_v32, %v3803_v12  ;;  %v3811_v44 = vmax.f32 %v3809_v3, %v3810_v43  ;;  %v3824_v15 = vrot.slane %v3823_v58, 2  ;;  %v12897_v29 = vld [vmem:[%s16805_s3 + $0x8] sm:$0xff]  }
 0x367   : > { %v3818_v38 = vmax.f32 %v3816_v53, %v3817_v54  ;;  %v3883_v34 = vmax.f32 %v3881_v16, %v3882_v5  ;;  %v3885_v6 = vrot.slane %v3884_v62, 4  ;;  %v3892_v47 = vrot.slane %v3891_v24, 4  ;;  %v12896_v5 = vld [vmem:[%s16805_s3 + $0x48] sm:$0xff]  }
 0x368   : > { %v3905_v26 = vsel %vm3015_vm9, %v2886_v45, -inf  ;;  %v3805_v61 = vrot.slane %v3804_v60, 1  ;;  %v3812_v11 = vrot.slane %v3811_v44, 1  ;;  %v3825_v37 = vmax.f32 %v3823_v58, %v3824_v15  ;;  %12497 = vmatprep.subr.bf16.mxu1 %v12896_v5 }
 0x369   : > { %v3819_v59 = vrot.slane %v3818_v38, 1  ;;  %v4082_v10 = vsel %vm3912_vm10, %v3862_v36, -inf  ;;  %v4085_v4 = vsel %vm3912_vm10, %v3869_v49, -inf  ;;  %v4088_v8 = vsel %vm3912_vm10, %v3876_v63, -inf  ;;  %12498 = vmatpush3.bf16.msra.mxu1 %v12897_v29 }
 0x36a   : > { %v3899_v35 = vrot.slane %v3898_v19, 4  ;;  %v3806_v27 = vmax.f32 %v3804_v60, %v3805_v61  ;;  %v3813_v56 = vmax.f32 %v3811_v44, %v3812_v11  ;;  %v3826_v25 = vrot.slane %v3825_v37, 1  ;;  %v12898_v60 = vld [vmem:[%s16805_s3 + $0x50] sm:$0xff]  }
 0x36b   : > { %v3820_v13 = vmax.f32 %v3818_v38, %v3819_v59  ;;  %v4091_v16 = vsel %vm3912_vm10, %v3883_v34, -inf  ;;  %v3886_v57 = vmax.f32 %v3884_v62, %v3885_v6  ;;  %v3893_v31 = vmax.f32 %v3891_v24, %v3892_v47  ;;  %v12899_v44 = vld [vmem:[%s16805_s3 + $0x10] sm:$0xff]   ;;  %12499 = vmatprep.subr.bf16.mxu1 %v12898_v60 }
 0x36c   : > { %v3906_v18 = vrot.slane %v3905_v26, 4  ;;  %v3827_v41 = vmax.f32 %v3825_v37, %v3826_v25  ;;  %v4081_v14 = vsel %vm3912_vm10, %v3806_v27, -inf  ;;  %v4084_v48 = vsel %vm3912_vm10, %v3813_v56, -inf  ;;  %v15733_v6 = vld [vmem:[#allocation3 + $0x38] sm:$0xf]  ;;  %v12900_v25 = vld [vmem:[%s16805_s3 + $0x58] sm:$0xff]  }
 0x36d   : > { %v4087_v36 = vsel %vm3912_vm10, %v3820_v13, -inf  ;;  %v4083_v49 = vmax.f32 %v4081_v14, %v4082_v10  ;;  %v4086_v28 = vmax.f32 %v4084_v48, %v4085_v4  ;;  %v3900_v53 = vmax.f32 %v3898_v19, %v3899_v35  ;;  %12500 = vmatpush3.bf16.msra.mxu1 %v12899_v44 }
 0x36e   : > { %v4089_v32 = vmax.f32 %v4087_v36, %v4088_v8  ;;  %v4090_v3 = vsel %vm3912_vm10, %v3827_v41, -inf  ;;  %v2268_v51 = vadd.f32 %v15503_v22, %v15475_v21  ;;  %v3887_v54 = vrot.slane %v3886_v57, 2  ;;  %v4593_v8 = vld [vmem:[#allocation3 + $0x1c] sm:$0x1]  ;;  %12501 = vmatprep.subr.bf16.mxu1 %v12900_v25 }
 0x36f   : > { %v4092_v33 = vmax.f32 %v4090_v3, %v4091_v16  ;;  %v12445_v62 = vpack.c.bf16 %v4083_v49, %v4083_v49  ;;  %v12446_v12 = vpack.c.bf16 %v4086_v28, %v4086_v28  ;;  %v3894_v58 = vrot.slane %v3893_v31, 2  ;;  %v12901_v16 = vld [vmem:[%s16805_s3 + $0x18] sm:$0xff]  }
 0x370   : > { %v12447_v43 = vpack.c.bf16 %v4089_v32, %v4089_v32  ;;  %v3907_v63 = vmax.f32 %v3905_v26, %v3906_v18  ;;  %v3901_v22 = vrot.slane %v3900_v53, 2  ;;  %v2308_v34 = vmax.f32 %v2268_v51, 0.0 }
 0x371   : > { %v12448_v45 = vpack.c.bf16 %v4092_v33, %v4092_v33  ;;  %v4439_v24 = vunpack.c.l.b16 %v12445_v62  ;;  %v4440_v19 = vunpack.c.l.b16 %v12446_v12  ;;  %v3888_v26 = vmax.f32 %v3886_v57, %v3887_v54  ;;  %12502 = vmatpush3.bf16.msra.mxu1 %v12901_v16  ;;  %v12902_v62 = vld [vmem:[%s16805_s3 + $0x60] sm:$0xff]  }
 0x372   : > { %v4441_v21 = vunpack.c.l.b16 %v12447_v43  ;;  %v3895_v61 = vmax.f32 %v3893_v31, %v3894_v58  ;;  %v3908_v11 = vrot.slane %v3907_v63, 2  ;;  %v2836_v59 = vcombine.high %v2308_v34, %v2308_v34  ;;  %v12903_v12 = vld [vmem:[%s16805_s3 + $0x20] sm:$0xff]   ;;  %v12904_v43 = vld [vmem:[%s16805_s3 + $0x68] sm:$0xff]   ;;  %12503 = vmatprep.subr.bf16.mxu1 %v12902_v62 }
 0x373   : > { %v4442_v38 = vunpack.c.l.b16 %v12448_v45  ;;  %v4495_v15 = vsel %vm4447_vm11, %v4440_v19, %v4439_v24  ;;  %v2843_v37 = vrot.slane %v2308_v34, %v14978_v2  ;;  %v4691_v4 = vshll.u32 %v15632_v30, 16  ;;  %v12905_v34 = vld [vmem:[%s16805_s3 + $0x28] sm:$0xff]  }
 0x374   : > { %v4496_v47 = vsel %vm4449_vm12, %v4441_v21, %v4495_v15  ;;  %v3902_v35 = vmax.f32 %v3900_v53, %v3901_v22  ;;  %v4689_v27 = vshrl.u32 %v15632_v30, 16  ;;  %v11708_v56 = vcombine.low %v15650_v23, %v4593_v8  ;;  %v4601_v53 = vld [vmem:[#allocation3 + $0x3c] sm:$0x1] }
 0x375   : > { %v15738_v10 = vsel %vm4451_vm13, %v4442_v38, %v4496_v47  ;;  %v15745_v13 = vcombine.low %v15733_v6, %v15733_v6  ;;  %v2850_v57 = vrot.slane %v2836_v59, %v14978_v2  ;;  %v2851_v31 = vcombine.high %v2843_v37, %v2843_v37  ;;  %12504 = vmatpush3.bf16.msra.mxu1 %v12903_v12 }
 0x376   : > { %v3828_v18 = vsel %vm3015_vm9, %v2843_v37, -inf  ;;  %v4693_v30 = vrot.slane %v4691_v4, 1  ;;  %v3889_v41 = vrot.slane %v3888_v26, 1  ;;  %v3896_v14 = vrot.slane %v3895_v61, 1  ;;  %12505 = vmatprep.subr.bf16.mxu1 %v12904_v43  ;;  %v12906_v4 = vld [vmem:[%s16805_s3 + $0x70] sm:$0xff]  }
 0x377   : > { %v3909_v48 = vmax.f32 %v3907_v63, %v3908_v11  ;;  %v3829_v36 = vrot.slane %v3828_v18, 4  ;;  %4808 = vrot.lane.b32.xlu1 %v15745_v13, %s13784_s23  ;;  %v2852_v49 = vcombine.high %v2850_v57, %v2850_v57  ;;  %v3835_v28 = vsel %vm3015_vm9, %v2851_v31, -inf  ;;  %v15806_v43 = vld [vmem:[#allocation3 + $0x20] sm:$0xf] }
 0x378   : > { %v3842_v32 = vsel %vm3015_vm9, %v2850_v57, -inf  ;;  %v15759_v3 = vor.u32 %v4693_v30, %v4689_v27  ;;  %v3836_v5 = vrot.slane %v3835_v28, 4  ;;  %v15761_v33 = vrot.slane %v11708_v56, 1 }
 0x379   : > { %v3830_v51 = vmax.f32 %v3828_v18, %v3829_v36  ;;  %v3843_v29 = vrot.slane %v3842_v32, 4  ;;  %v3903_v54 = vrot.slane %v3902_v35, 1  ;;  %v3849_v58 = vsel %vm3015_vm9, %v2852_v49, -inf  ;;  %12506 = vmatpush3.bf16.msra.mxu1 %v12905_v34  ;;  %v12907_v36 = vld [vmem:[%s16805_s3 + $0x30] sm:$0xff]  }
 0x37a   : > { %4832 = vrot.lane.b32.xlu0 %v15759_v3, %s13786_s18  ;;  %v15776_v63 = vcombine.low %v15733_v6, %v4601_v53  ;;  %v4670_v45 = vshll.u32 %v11708_v56, 16  ;;  %v3837_v19 = vmax.f32 %v3835_v28, %v3836_v5  ;;  %v3850_v22 = vrot.slane %v3849_v58, 4  ;;  %12507 = vmatprep.subr.bf16.mxu1 %v12906_v4  ;;  %v15830_v4 = vld [vmem:[%s16805_s3 + $0x80] sm:$0xff]  }
 0x37b   : > { %v3831_v24 = vrot.slane %v3830_v51, 2  ;;  %v3844_v21 = vmax.f32 %v3842_v32, %v3843_v29  ;;  %4732 = vrot.lane.b32.xlu1 %v15761_v33, %s13784_s23  ;;  %v3890_v60 = vmax.f32 %v3888_v26, %v3889_v41  ;;  %v3910_v44 = vrot.slane %v3909_v48, 1  ;;  %v12908_v29 = vld [vmem:[%s16805_s3 + $0x78] sm:$0xff]  }
 0x37c   : > { %v4668_v38 = vshrl.u32 %v11708_v56, 16  ;;  %v4672_v15 = vrot.slane %v4670_v45, 1  ;;  %v3838_v11 = vrot.slane %v3837_v19, 2  ;;  %v3851_v37 = vmax.f32 %v3849_v58, %v3850_v22 }
 0x37d   : > { %v3832_v47 = vmax.f32 %v3830_v51, %v3831_v24  ;;  %v3845_v59 = vrot.slane %v3844_v21, 2  ;;  %v3897_v8 = vmax.f32 %v3895_v61, %v3896_v14  ;;  %v3904_v27 = vmax.f32 %v3902_v35, %v3903_v54  ;;  %12508 = vmatpush3.bf16.msra.mxu1 %v12907_v36  ;;  %v4604_v36 = vld [vmem:[#allocation3 + $0x48] sm:$0xf] }
 0x37e   : > { %4714 = vrot.lane.b32.xlu0 %v15759_v3, %s13783_s30  ;;  %v15788_v26 = vor.u32 %v4672_v15, %v4668_v38  ;;  %v4698_v56 = vshll.u32 %v15776_v63, 16  ;;  %v3839_v16 = vmax.f32 %v3837_v19, %v3838_v11  ;;  %v3852_v31 = vrot.slane %v3851_v37, 2  ;;  %v12909_v19 = vld [vmem:[%s16805_s3 + $0x38] sm:$0xff]   ;;  %12509 = vmatprep.subr.bf16.mxu1 %v12908_v29 }
 0x37f   : > { %v3833_v25 = vrot.slane %v3832_v47, 1  ;;  %v3846_v57 = vmax.f32 %v3844_v21, %v3845_v59  ;;  %v3911_v18 = vmax.f32 %v3909_v48, %v3910_v44  ;;  %v4094_v30 = vsel %vm3912_vm10, %v3890_v60, -inf  ;;  %v4595_v44 = vld [vmem:[#allocation3 + $0x24] sm:$0x1] }
 0x380   : > { %4826 = vrot.lane.b32.xlu1 %v15788_v26, %s13786_s18  ;;  %v3840_v35 = vrot.slane %v3839_v16, 1  ;;  %v3853_v14 = vmax.f32 %v3851_v37, %v3852_v31  ;;  %v4097_v49 = vsel %vm3912_vm10, %v3897_v8, -inf  ;;  %v4100_v28 = vsel %vm3912_vm10, %v3904_v27, -inf  ;;  %v4583_v37 = vld [vmem:[#allocation3 + $0x44] sm:$0x1] }
 0x381   : > { %v3834_v61 = vmax.f32 %v3832_v47, %v3833_v25  ;;  %v3847_v41 = vrot.slane %v3846_v57, 1  ;;  %v4700_v48 = vrot.slane %v4698_v56, 1  ;;  %v4103_v62 = vsel %vm3912_vm10, %v3911_v18, -inf  ;;  %12510 = vmatpush3.bf16.msra.mxu1 %v12909_v19 }
 0x382   : > { %4756 = vrot.lane.b32.xlu0 %v15666_v9, %s13786_s18  ;;  %v3841_v32 = vmax.f32 %v3839_v16, %v3840_v35  ;;  %v3854_v51 = vrot.slane %v3853_v14, 1  ;;  %v4696_v9 = vshrl.u32 %v15776_v63, 16  ;;  %v15814_v24 = vrot.slane %v15776_v63, 1  ;;  %12670 = vmatprep.subr.bf16.mxu1 %v15830_v4 }
 0x383   : > { %v3848_v53 = vmax.f32 %v3846_v57, %v3847_v41  ;;  %v4093_v5 = vsel %vm3912_vm10, %v3834_v61, -inf  ;;  %v11709_v34 = vcombine.low %v15806_v43, %v4595_v44  ;;  %v11716_v31 = vcombine.low %v15806_v43, %v15806_v43  ;;  %v15875_v44 = vpop.permute.xlu1 %4804 }
 0x384   : > { %v4095_v12 = vmax.f32 %v4093_v5, %v4094_v30  ;;  %4708 = vrot.lane.b32.xlu1 %v15788_v26, %s13783_s30  ;;  %v3855_v54 = vmax.f32 %v3853_v14, %v3854_v51  ;;  %v4096_v58 = vsel %vm3912_vm10, %v3841_v32, -inf  ;;  %v15821_v38 = vor.u32 %v4700_v48, %v4696_v9  ;;  %v4580_v30 = vld [vmem:[#allocation3 + $0x40] sm:$0xf] }
 0x385   : > { %v4099_v45 = vsel %vm3912_vm10, %v3848_v53, -inf  ;;  %v4098_v21 = vmax.f32 %v4096_v58, %v4097_v49  ;;  %v4677_v18 = vshll.u32 %v11709_v34, 16  ;;  %v15848_v41 = vrot.slane %v11709_v34, 1  ;;  %v4605_v49 = vld [vmem:[#allocation3 + $0x4c] sm:$0x1] }
 0x386   : > { %v4101_v22 = vmax.f32 %v4099_v45, %v4100_v28  ;;  %v12449_v60 = vpack.c.bf16 %v4095_v12, %v4095_v12  ;;  %4783 = vrot.lane.b32.xlu0 %v15761_v33, %s13783_s30  ;;  %v4102_v15 = vsel %vm3912_vm10, %v3855_v54, -inf  ;;  %v4675_v14 = vshrl.u32 %v11709_v34, 16 }
 0x387   : > { %v4104_v63 = vmax.f32 %v4102_v15, %v4103_v62  ;;  %v12450_v47 = vpack.c.bf16 %v4098_v21, %v4098_v21  ;;  %v4679_v39 = vrot.slane %v4677_v18, 1  ;;  %v11723_v48 = vcombine.low %v4604_v36, %v4605_v49  ;;  %v4703_v15 = vpop.permute.xlu0 %4702  ;;  %v4729_v34 = vpop.permute.xlu1 %4728  ;;  %v13604_v49 = vld [vmem:[#allocation3] sm:$0xf] }
 0x388   : > { %v12451_v11 = vpack.c.bf16 %v4101_v22, %v4101_v22  ;;  %v4443_v59 = vunpack.c.l.b16 %v12449_v60  ;;  %4834 = vrot.lane.b32.xlu1 %v15821_v38, %s13786_s18  ;;  %v11722_v62 = vcombine.low %v4604_v36, %v4604_v36  ;;  %vm13788_vm9 = vmmov 0  }
 0x389   : > { %v4444_v8 = vunpack.c.l.b16 %v12450_v47  ;;  %v12460_v56 = vpack.c.bf16 %v4104_v63, %v4104_v63  ;;  %v15853_v28 = vor.u32 %v4679_v39, %v4675_v14  ;;  %v4840_v5 = vrot.slane %v11723_v48, 1 }
 0x38a   : > { %v4498_v27 = vsel %vm4453_vm14, %v4443_v59, %v15738_v10  ;;  %4791 = vrot.lane.b32.xlu0 %v15814_v24, %s13783_s30  ;;  %v4445_v25 = vunpack.c.l.b16 %v12451_v11  ;;  %v4820_v9 = vshll.u32 %v11723_v48, 16  ;;  %v4818_v45 = vshrl.u32 %v11723_v48, 16 }
 0x38b   : > { %v4499_v16 = vsel %vm4455_vm15, %v4444_v8, %v4498_v27  ;;  %v4584_v57 = vsel %vm15060_vm1, %v12460_v56, %v4583_v37  ;;  %v4727_v63 = vpop.permute.xlu0 %4726  ;;  %v15880_v47 = vpop.permute.xlu1 %4736  ;;  %v4843_v48 = vsel %vm3912_vm10, %v13604_v49, %v4703_v15 }
 0x38c   : > { %4716 = vrot.lane.b32.xlu1 %v15821_v38, %s13783_s30  ;;  %v4500_v10 = vsel %vm4457_vm0, %v4445_v25, %v4499_v16  ;;  %4585 = vst [vmem:[#allocation3 + $0x44] sm:$0x1] %v4584_v57  ;;  %v4822_v19 = vrot.slane %v4820_v9, 1 }
 0x38d   : > { %v4515_v61 = vpack.c.b16 %v4500_v10, %v4500_v10 }
 0x38e   : > { %4802 = vrot.lane.b32.xlu0 %v11716_v31, %s13784_s23  ;;  %v4823_v60 = vor.u32 %v4822_v19, %v4818_v45 }
 0x38f   : > { %v4581_v35 = vsel %vm15075_vm4, %v4515_v61, %v4580_v30  ;;  %v4753_v11 = vpop.permute.xlu0 %4752  ;;  %v4705_v59 = vpop.permute.xlu1 %4704 }
 0x390   : > { %4758 = vrot.lane.b32.xlu1 %v11716_v31, %s13786_s18  ;;  %4582 = vst [vmem:[#allocation3 + $0x40] sm:$0xf] %v4581_v35 }
 0x392   : > { %4734 = vrot.lane.b32.xlu0 %v15848_v41, %s13784_s23 }
 0x393   : > { %v4603_v32 = vld [vmem:[#allocation3 + $0x44] sm:$0x1]  ;;  %v15882_v37 = vpop.permute.xlu0 %4760  ;;  %v15884_v8 = vpop.permute.xlu1 %4830 }
 0x394   : > { %4785 = vrot.lane.b32.xlu1 %v15848_v41, %s13783_s30 }
 0x396   : > { %4828 = vrot.lane.b32.xlu0 %v15853_v28, %s13786_s18 }
 0x397   : > { %v4602_v40 = vld [vmem:[#allocation3 + $0x40] sm:$0xf]  ;;  %v4780_v27 = vpop.permute.xlu0 %4779  ;;  %v15886_v56 = vpop.permute.xlu1 %4712 }
 0x398   : > { %v11720_v53 = vcombine.low %v4602_v40, %v4602_v40  ;;  %v11721_v51 = vcombine.low %v4602_v40, %v4603_v32  ;;  %v13605_v32 = vld [vmem:[#allocation3 + $0x8] sm:$0xf] }
 0x39a   : > { %4810 = vrot.lane.b32.xlu0 %v11720_v53, %s13784_s23  ;;  %v4778_v29 = vrot.slane %v11721_v51, 1  ;;  %v4774_v12 = vshll.u32 %v11721_v51, 16  ;;  %v4772_v21 = vshrl.u32 %v11721_v51, 16  ;;  %v4867_v51 = vsel %vm4865_vm6, %v4843_v48, %v4727_v63 }
 0x39b   : > { %v4788_v25 = vpop.permute.xlu0 %4787  ;;  %v4755_v16 = vpop.permute.xlu1 %4754  ;;  %v4884_v15 = vsel %vm4882_vm5, %v4867_v51, %v4753_v11 }
 0x39c   : > { %4793 = vrot.lane.b32.xlu1 %v4778_v29, %s13783_s30  ;;  %v15861_v54 = vcombine.low %v4778_v29, %v4840_v5  ;;  %v4776_v58 = vrot.slane %v4774_v12, 1  ;;  %v4901_v29 = vsel %vm3912_vm10, %v15126_v42, %v4780_v27  ;;  %v4913_v48 = vsel %vm3912_vm10, %v15456_v1, %v4788_v25 }
 0x39e   : > { %4710 = vrot.lane.b32.xlu0 %v15853_v28, %s13783_s30  ;;  %v15870_v22 = vor.u32 %v4776_v58, %v4772_v21  ;;  %s529_s30 = sand.u32 1, %s16867_s15  }
 0x39f   : > { %v4799_v57 = vpop.permute.xlu0 %4798  ;;  %s530_s28 = scalar_lea.vmem [#allocation12], %s529_s30  ;;  %s11468_s20 = scalar_lea.sflag [#allocation8], %s529_s30 }
 0x3a0   : > { %4812 = vrot.lane.b32.xlu1 %v11722_v62, %s13784_s23  ;;  %v4924_v9 = vsel %vm4865_vm6, %v4901_v29, %v4799_v57  ;;  %s11480_s27 = sshll.u32 %s530_s28, 4  ;;  %s16762_s27 = int_to_ptr.vmem [resolvable:$true] %s11480_s27 }
 0x3a1   : > { %s13692_s17 = scalar_lea.vmem %s16762_s27, 16  ;;  %p13699_p4 = scmp.lt.s32.totalorder %s16762_s27, %s13697_s26 }
 0x3a2   : > { %4738 = vrot.lane.b32.xlu0 %v15648_v20, %s13784_s23  ;;  %p13693_p10 = scmp.ne.s32.totalorder %s16762_s27, %s13692_s17  ;;  %p13700_p7 = scmp.lt.s32.totalorder %s13698_s14, %s13692_s17 }
 0x3a4   : > { %4740 = vrot.lane.b32.xlu1 %v15814_v24, %s13784_s23  ;;  %p13701_p8 = por %p13700_p7, %p13699_p4 }
 0x3a6   : > { %4836 = vrot.lane.b32.xlu0 %v15870_v22, %s13786_s18 }
 0x3a8   : > { %4838 = vrot.lane.b32.xlu1 %v4823_v60, %s13786_s18 }
 0x3aa   : > { %4764 = vrot.lane.b32.xlu0 %v15745_v13, %s13786_s18 }
 0x3ac   : > { %4766 = vrot.lane.b32.xlu1 %v11720_v53, %s13786_s18  ;;  %v4846_v53 = vsel %vm3912_vm10, %v13605_v32, %v4705_v59 }
 0x3ad   : > { %v4869_v62 = vsel %vm4865_vm6, %v4846_v53, %v4729_v34 }
 0x3ae   : > { %v4886_v58 = vsel %vm4882_vm5, %v4869_v62, %v4755_v16 }
 0x3af   : > { %v11725_v59 = vcombine.low %v4884_v15, %v4886_v58 }
 0x3b6   : > { %v15888_v13 = vpop.permute.xlu1 %4762  ;;  %v15890_v31 = vpop.permute.xlu0 %4806 }
 0x3ba   : > { %v4782_v18 = vpop.permute.xlu1 %4781  ;;  %v4731_v10 = vpop.permute.xlu0 %4730 }
 0x3bb   : > { %v4904_v12 = vsel %vm3912_vm10, %v15656_v17, %v4782_v18  ;;  %v12911_v17 = vld [vmem:[%s16805_s3 + $0x88] sm:$0xff]  }
 0x3be   : > { %v4790_v30 = vpop.permute.xlu1 %4789  ;;  %v4825_v61 = vpop.permute.xlu0 %4824 }
 0x3bf   : > { %v4940_v21 = vsel %vm4882_vm5, %v4924_v9, %v4825_v61 }
 0x3c2   : > { %v4801_v35 = vpop.permute.xlu1 %4800  ;;  %v4707_v39 = vpop.permute.xlu0 %4706 }
 0x3c3   : > { %v4926_v45 = vsel %vm4865_vm6, %v4904_v12, %v4801_v35  ;;  %v4849_v32 = vsel %vm3912_vm10, %v15607_v52, %v4707_v39 }
 0x3e9   : > { %v4809_v14 = vpop.permute.xlu1 %4808 }
 0x3ec   : > { %v4833_v36 = vpop.permute.xlu0 %4832 }
 0x3ed   : > { %v4733_v40 = vpop.permute.xlu1 %4732 }
 0x3f0   : > { %v15895_v5 = vpop.permute.xlu0 %4714 }
 0x3f2   : > { %v4827_v19 = vpop.permute.xlu1 %4826 }
 0x3f3   : > { %v4942_v60 = vsel %vm4882_vm5, %v4926_v45, %v4827_v19  ;;  %v13606_v19 = vld [vmem:[#allocation3 + $0x28] sm:$0xf] }
 0x3f4   : > { %v4757_v63 = vpop.permute.xlu0 %4756  ;;  %v11726_v42 = vcombine.low %v4940_v21, %v4942_v60  ;;  %v4858_v21 = vsel %vm3912_vm10, %v13606_v19, %v15886_v56 }
 0x3f5   : > { %v4877_v60 = vsel %vm4865_vm6, %v4858_v21, %v15880_v47 }
 0x3f6   : > { %v4709_v34 = vpop.permute.xlu1 %4708  ;;  %5210 = vmatprep.mubr.bf16.mxu1 %v11726_v42 }
 0x3f7   : > { %5211 = vmatmul.mubr.bf16.vlgmr.msra.gmra.mrb[16].mxu1 %v11725_v59  ;;  %v4852_v49 = vsel %vm3912_vm10, %v15650_v23, %v4709_v34 }
 0x3f8   : > { %v4784_v27 = vpop.permute.xlu0 %4783  ;;  %12671 = vmatpush3.bf16.msra.mxu1 %v15830_v4  ;;  %v4916_v4 = vsel %vm3912_vm10, %v15759_v3, %v4790_v30  ;;  %v4873_v29 = vsel %vm4865_vm6, %v4852_v49, %v4733_v40  ;;  %v4871_v3 = vsel %vm4865_vm6, %v4849_v32, %v4731_v10  ;;  %v4861_v49 = vsel %vm3912_vm10, %v15600_v46, %v15895_v5 }
 0x3f9   : > { %12672 = vmatprep.subr.bf16.mxu1 %v12911_v17  ;;  %v4907_v51 = vsel %vm3912_vm10, %v15788_v26, %v4784_v27  ;;  %v4934_v23 = vsel %vm4865_vm6, %v4916_v4, %v4809_v14  ;;  %v4888_v14 = vsel %vm4882_vm5, %v4871_v3, %v4757_v63  ;;  %v4894_v63 = vsel %vm4882_vm5, %v4877_v60, %v15888_v13 }
 0x3fa   : > { %v4835_v16 = vpop.permute.xlu1 %4834  ;;  %v11730_v46 = vcombine.low %v15848_v41, %v15397_v7 }
 0x3fb   : > { %v4950_v26 = vsel %vm4882_vm5, %v4934_v23, %v4835_v16 }
 0x3fc   : > { %v4792_v57 = vpop.permute.xlu0 %4791  ;;  %12673 = vmatpush3.bf16.msra.mxu1 %v12911_v17 }
 0x3fe   : > { %v4717_v18 = vpop.permute.xlu1 %4716 }
 0x400   : > { %v4803_v61 = vpop.permute.xlu0 %4802 }
 0x401   : > { %v4928_v12 = vsel %vm4865_vm6, %v4907_v51, %v4803_v61  ;;  %v11727_v51 = vcombine.low %v15635_v50, %v15761_v33 }
 0x402   : > { %v4759_v11 = vpop.permute.xlu1 %4758 }
 0x403   : > { %v4890_v25 = vsel %vm4882_vm5, %v4873_v29, %v4759_v11 }
 0x404   : > { %v4735_v35 = vpop.permute.xlu0 %4734  ;;  %v11728_v58 = vcombine.low %v4888_v14, %v4890_v25 }
 0x406   : > { %v4786_v53 = vpop.permute.xlu1 %4785 }
 0x407   : > { %v4910_v62 = vsel %vm3912_vm10, %v15853_v28, %v4786_v53  ;;  %v4932_v28 = vsel %vm4865_vm6, %v4913_v48, %v15890_v31 }
 0x408   : > { %v4829_v1 = vpop.permute.xlu0 %4828  ;;  %v4930_v52 = vsel %vm4865_vm6, %v4910_v62, %v15875_v44  ;;  %v4948_v9 = vsel %vm4882_vm5, %v4932_v28, %v4833_v36 }
 0x409   : > { %v4944_v30 = vsel %vm4882_vm5, %v4928_v12, %v4829_v1  ;;  %v4946_v39 = vsel %vm4882_vm5, %v4930_v52, %v15884_v8  ;;  %v11732_v45 = vcombine.low %v4948_v9, %v4950_v26 }
 0x40a   : > { %v11729_v40 = vcombine.low %v4944_v30, %v4946_v39  ;;  %v5888_v30 = vld [vmem:[#allocation4] sm:$0x7] }
 0x40b   : > { %v15992_v39 = vcombine.low %v5888_v30, %v5888_v30  ;;  %v12918_v30 = vld [vmem:[%s16807_s5 + $0x40] sm:$0xff]  }
 0x40c   : > { %5218 = vmatprep.mubr.bf16.mxu1 %v11729_v40  ;;  %v4811_v44 = vpop.permute.xlu0 %4810  ;;  %12541 = vmatprep.subr.bf16.mxu0 %v12918_v30 }
 0x40d   : > { %5219 = vmatmul.mubr.bf16.gmra.mrb[20].mxu1 %v11728_v58  ;;  %v5907_v28 = vshrl.u32 %v15992_v39, 16  ;;  %v5909_v14 = vshll.u32 %v15992_v39, 16 }
 0x40e   : > { %5226 = vmatprep.mubr.bf16.mxu1 %v11732_v45  ;;  %v4794_v10 = vpop.permute.xlu1 %4793 }
 0x40f   : > { %v4922_v47 = vsel %vm3912_vm10, %v15870_v22, %v4794_v10  ;;  %v5911_v40 = vrot.slane %v5909_v14, 1 }
 0x410   : > { %v4711_v8 = vpop.permute.xlu0 %4710 }
 0x411   : > { %v4855_v31 = vsel %vm3912_vm10, %v15806_v43, %v4711_v8  ;;  %v4919_v43 = vsel %vm3912_vm10, %v15821_v38, %v4792_v57  ;;  %v4864_v38 = vsel %vm3912_vm10, %v15733_v6, %v4717_v18  ;;  %v11733_v6 = vcombine.low %v15648_v20, %v15814_v24  ;;  %v16000_v8 = vld [vmem:[%s16806_s4] ss:$0 sm:$0xff] }
 0x412   : > { %v4875_v36 = vsel %vm4865_vm6, %v4855_v31, %v4735_v35  ;;  %v4813_v15 = vpop.permute.xlu1 %4812  ;;  %v4936_v27 = vsel %vm4865_vm6, %v4919_v43, %v4811_v44  ;;  %v5912_v9 = vor.u32 %v5911_v40, %v5907_v28  ;;  %v12919_v28 = vld [vmem:[%s16807_s5] sm:$0xff]  }
 0x413   : > { %v4892_v42 = vsel %vm4882_vm5, %v4875_v36, %v15882_v37  ;;  %v4938_v16 = vsel %vm4865_vm6, %v4922_v47, %v4813_v15  ;;  %12542 = vmatpush3.bf16.msra.mxu0 %v12919_v28 }
 0x414   : > { %v4739_v59 = vpop.permute.xlu0 %4738  ;;  %v11731_v17 = vcombine.low %v4892_v42, %v4894_v63  ;;  %5934 = vrot.lane.b32.xlu0 %v5912_v9, %s13784_s23 }
 0x415   : > { %v4879_v22 = vsel %vm4865_vm6, %v4861_v49, %v4739_v59 }
 0x416   : > { %v4741_v34 = vpop.permute.xlu1 %4740  ;;  %5227 = vmatmul.mubr.bf16.gmra.mrb[24].mxu1 %v11731_v17 }
 0x417   : > { %v4881_v57 = vsel %vm4865_vm6, %v4864_v38, %v4741_v34 }
 0x418   : > { %v4837_v56 = vpop.permute.xlu0 %4836 }
 0x419   : > { %v4952_v13 = vsel %vm4882_vm5, %v4936_v27, %v4837_v56 }
 0x41a   : > { %v4839_v61 = vpop.permute.xlu1 %4838 }
 0x41b   : > { %v4954_v37 = vsel %vm4882_vm5, %v4938_v16, %v4839_v61 }
 0x41c   : > { %v11735_v11 = vcombine.low %v4952_v13, %v4954_v37  ;;  %v4765_v35 = vpop.permute.xlu0 %4764 }
 0x41d   : > { %v4896_v32 = vsel %vm4882_vm5, %v4879_v22, %v4765_v35 }
 0x41e   : > { %v4767_v48 = vpop.permute.xlu1 %4766  ;;  %5234 = vmatprep.mubr.bf16.mxu1 %v11735_v11 }
 0x41f   : > { %v4898_v53 = vsel %vm4882_vm5, %v4881_v57, %v4767_v48 }
 0x420   : > { %v11734_v4 = vcombine.low %v4896_v32, %v4898_v53 }
 0x422   : > { %5235 = vmatmul.mubr.bf16.gmra.mrb[28].mxu1 %v11734_v4 }
 0x423   : > { %12674 = vmatprep.mubr.msk.bf16.mxu1 %vm3912_vm10, %v11727_v51 }
 0x42a   : > { %12675 = vmatmul.mubr.msk.bf16.vlgmr.msra.gmra.mrb[32].mxu1 %vm3912_vm10, %v11730_v46 }
 0x42b   : > { %12678 = vmatprep.mubr.msk.bf16.mxu1 %vm3912_vm10, %v11733_v6 }
 0x432   : > { %12679 = vmatmul.mubr.msk.bf16.gmra.mrb[36].mxu1 %vm3912_vm10, %v15861_v54  ;;  %vm6664_vm10 = vcmask 1041408  }
 0x4ca   : > { %v12511_v7 = vpop.f32.mrb[16].mxu1 }
 0x4cb   : > { %v12512_v50 = vpop.f32.mrb[17].mxu1 }
 0x4cc   : > { %v12513_v20 = vadd.f32 %v12512_v50, %v12511_v7  ;;  %v12514_v33 = vpop.f32.mrb[18].mxu1 }
 0x4cd   : > { %v12515_v24 = vpop.f32.mrb[19].mxu1 }
 0x4ce   : > { %v12516_v41 = vadd.f32 %v12515_v24, %v12514_v33  ;;  %v5213_v36 = vadd.f32 %v12513_v20, %v16000_v8 }
 0x4d0   : > { %v5216_v34 = vadd.f32 %v12516_v41, %v16000_v8 }
 0x4e0   : > { %v12517_v54 = vpop.f32.mrb[20].mxu1 }
 0x4e1   : > { %v12518_v5 = vpop.f32.mrb[21].mxu1 }
 0x4e2   : > { %v12519_v18 = vadd.f32 %v12518_v5, %v12517_v54  ;;  %v12520_v29 = vpop.f32.mrb[22].mxu1 }
 0x4e3   : > { %v12521_v62 = vpop.f32.mrb[23].mxu1 }
 0x4e4   : > { %v12522_v23 = vadd.f32 %v12521_v62, %v12520_v29  ;;  %v5221_v31 = vadd.f32 %v12519_v18, %v16000_v8 }
 0x4e6   : > { %v5224_v42 = vadd.f32 %v12522_v23, %v16000_v8 }
 0x4e9   : > { %v12523_v12 = vpop.f32.mrb[24].mxu1 }
 0x4ea   : > { %v12524_v1 = vpop.f32.mrb[25].mxu1 }
 0x4eb   : > { %v12525_v25 = vadd.f32 %v12524_v1, %v12523_v12  ;;  %v12526_v52 = vpop.f32.mrb[26].mxu1 }
 0x4ec   : > { %v12527_v3 = vpop.f32.mrb[27].mxu1 }
 0x4ed   : > { %v15990_v26 = vadd.f32 %v12527_v3, %v12526_v52  ;;  %v16007_v61 = vadd.f32 %v12525_v25, %v16000_v8 }
 0x4f5   : > { %v12529_v58 = vpop.f32.mrb[28].mxu1 }
 0x4f6   : > { %v12530_v45 = vpop.f32.mrb[29].mxu1 }
 0x4f7   : > { %v12531_v44 = vadd.f32 %v12530_v45, %v12529_v58  ;;  %v12532_v10 = vpop.f32.mrb[30].mxu1  ;;  %v12920_v45 = vld [vmem:[%s16807_s5 + $0x48] sm:$0xff]  }
 0x4f8   : > { %v12533_v19 = vpop.f32.mrb[31].mxu1  ;;  %12543 = vmatprep.subr.bf16.mxu0 %v12920_v45 }
 0x4f9   : > { %v12534_v21 = vadd.f32 %v12533_v19, %v12532_v10  ;;  %v16013_v35 = vadd.f32 %v12531_v44, %v16000_v8 }
 0x4fb   : > { %v16019_v57 = vadd.f32 %v12534_v21, %v16000_v8 }
 0x4fd   : > { %v12676_v60 = vpop.f32.mrb[32].mxu1 }
 0x4fe   : > { %v5286_v15 = vadd.f32 %v12676_v60, %v5221_v31  ;;  %v5277_v63 = vpop.f32.mrb[33].mxu1 }
 0x4ff   : > { %v5278_v59 = vadd.f32 %v5277_v63, %v5213_v36  ;;  %v12677_v17 = vpop.f32.mrb[34].mxu1  ;;  %v12921_v63 = vld [vmem:[%s16807_s5 + $0x8] sm:$0xff]  }
 0x500   : > { %v5310_v56 = vmax.f32 %v5286_v15, 0.0  ;;  %v5289_v43 = vadd.f32 %v12677_v17, %v5224_v42  ;;  %v5280_v47 = vpop.f32.mrb[35].mxu1  ;;  %12544 = vmatpush3.bf16.msra.mxu0 %v12921_v63 }
 0x501   : > { %v5308_v27 = vmax.f32 %v5278_v59, 0.0  ;;  %v5281_v16 = vadd.f32 %v5280_v47, %v5216_v34 }
 0x502   : > { %v5358_v13 = vcombine.high %v5310_v56, %v5310_v56  ;;  %v5365_v37 = vrot.slane %v5310_v56, %v14978_v2  ;;  %v16010_v11 = vmax.f32 %v5289_v43, 0.0 }
 0x503   : > { %v5324_v49 = vcombine.high %v5308_v27, %v5308_v27  ;;  %v5331_v38 = vrot.slane %v5308_v27, %v14978_v2  ;;  %v16016_v22 = vmax.f32 %v5281_v16, 0.0 }
 0x504   : > { %v5372_v48 = vrot.slane %v5358_v13, %v14978_v2  ;;  %v5373_v32 = vcombine.high %v5365_v37, %v5365_v37  ;;  %v5549_v53 = vsel %vm5492_vm8, %v5365_v37, -inf  ;;  %v5375_v4 = vcombine.high %v16010_v11, %v16010_v11 }
 0x505   : > { %v5550_v51 = vrot.slane %v5549_v53, 4  ;;  %v5338_v46 = vrot.slane %v5324_v49, %v14978_v2  ;;  %v5339_v6 = vcombine.high %v5331_v38, %v5331_v38  ;;  %v5493_v7 = vsel %vm5492_vm8, %v5331_v38, -inf  ;;  %v16027_v50 = vpop.f32.mrb[36].mxu1 }
 0x506   : > { %v5374_v20 = vcombine.high %v5372_v48, %v5372_v48  ;;  %v5556_v33 = vsel %vm5492_vm8, %v5373_v32, -inf  ;;  %v5563_v24 = vsel %vm5492_vm8, %v5372_v48, -inf  ;;  %v5494_v41 = vrot.slane %v5493_v7, 4  ;;  %v16031_v54 = vpop.f32.mrb[37].mxu1 }
 0x507   : > { %v5551_v5 = vmax.f32 %v5549_v53, %v5550_v51  ;;  %v5557_v18 = vrot.slane %v5556_v33, 4  ;;  %v5564_v29 = vrot.slane %v5563_v24, 4  ;;  %v5340_v62 = vcombine.high %v5338_v46, %v5338_v46  ;;  %v16033_v23 = vpop.f32.mrb[38].mxu1 }
 0x508   : > { %v5570_v12 = vsel %vm5492_vm8, %v5374_v20, -inf  ;;  %v5495_v1 = vmax.f32 %v5493_v7, %v5494_v41  ;;  %v5500_v25 = vsel %vm5492_vm8, %v5339_v6, -inf  ;;  %v5507_v52 = vsel %vm5492_vm8, %v5338_v46, -inf  ;;  %v16038_v3 = vpop.f32.mrb[39].mxu1 }
 0x509   : > { %v5552_v14 = vrot.slane %v5551_v5, 2  ;;  %v5558_v40 = vmax.f32 %v5556_v33, %v5557_v18  ;;  %v5565_v9 = vmax.f32 %v5563_v24, %v5564_v29  ;;  %v5571_v58 = vrot.slane %v5570_v12, 4 }
 0x50a   : > { %v5496_v44 = vrot.slane %v5495_v1, 2  ;;  %v5501_v10 = vrot.slane %v5500_v25, 4  ;;  %v5508_v19 = vrot.slane %v5507_v52, 4  ;;  %v5514_v21 = vsel %vm5492_vm8, %v5340_v62, -inf }
 0x50b   : > { %v5553_v31 = vmax.f32 %v5551_v5, %v5552_v14  ;;  %v5559_v60 = vrot.slane %v5558_v40, 2  ;;  %v5566_v36 = vrot.slane %v5565_v9, 2  ;;  %v5572_v15 = vmax.f32 %v5570_v12, %v5571_v58 }
 0x50c   : > { %v5497_v42 = vmax.f32 %v5495_v1, %v5496_v44  ;;  %v5502_v59 = vmax.f32 %v5500_v25, %v5501_v10  ;;  %v5509_v17 = vmax.f32 %v5507_v52, %v5508_v19  ;;  %v5515_v34 = vrot.slane %v5514_v21, 4 }
 0x50d   : > { %v5554_v56 = vrot.slane %v5553_v31, 1  ;;  %v5560_v43 = vmax.f32 %v5558_v40, %v5559_v60  ;;  %v5567_v47 = vmax.f32 %v5565_v9, %v5566_v36  ;;  %v5573_v27 = vrot.slane %v5572_v15, 2 }
 0x50e   : > { %v5498_v16 = vrot.slane %v5497_v42, 1  ;;  %v5503_v13 = vrot.slane %v5502_v59, 2  ;;  %v5510_v37 = vrot.slane %v5509_v17, 2  ;;  %v5516_v49 = vmax.f32 %v5514_v21, %v5515_v34 }
 0x50f   : > { %v5555_v38 = vmax.f32 %v5553_v31, %v5554_v56  ;;  %v5561_v48 = vrot.slane %v5560_v43, 1  ;;  %v5568_v32 = vrot.slane %v5567_v47, 1  ;;  %v5574_v53 = vmax.f32 %v5572_v15, %v5573_v27 }
 0x510   : > { %v5499_v51 = vmax.f32 %v5497_v42, %v5498_v16  ;;  %v5504_v46 = vmax.f32 %v5502_v59, %v5503_v13  ;;  %v5511_v6 = vmax.f32 %v5509_v17, %v5510_v37  ;;  %v5517_v7 = vrot.slane %v5516_v49, 2 }
 0x511   : > { %v5562_v20 = vmax.f32 %v5560_v43, %v5561_v48  ;;  %v5569_v33 = vmax.f32 %v5567_v47, %v5568_v32  ;;  %v5575_v24 = vrot.slane %v5574_v53, 1  ;;  %v16054_v41 = vsel %vm4865_vm6, %v5555_v38, -inf }
 0x512   : > { %v5505_v5 = vrot.slane %v5504_v46, 1  ;;  %v5512_v18 = vrot.slane %v5511_v6, 1  ;;  %v5518_v29 = vmax.f32 %v5516_v49, %v5517_v7  ;;  %v16057_v62 = vsel %vm4865_vm6, %v5499_v51, -inf }
 0x513   : > { %v5576_v12 = vmax.f32 %v5574_v53, %v5575_v24  ;;  %v16060_v1 = vsel %vm4865_vm6, %v5562_v20, -inf  ;;  %v16063_v25 = vsel %vm4865_vm6, %v5569_v33, -inf  ;;  %v5382_v52 = vrot.slane %v16010_v11, %v14978_v2 }
 0x514   : > { %v5506_v30 = vmax.f32 %v5504_v46, %v5505_v5  ;;  %v5513_v28 = vmax.f32 %v5511_v6, %v5512_v18  ;;  %v5519_v14 = vrot.slane %v5518_v29, 1  ;;  %v5389_v40 = vrot.slane %v5375_v4, %v14978_v2 }
 0x515   : > { %v16072_v9 = vsel %vm4865_vm6, %v5576_v12, -inf  ;;  %v5390_v58 = vcombine.high %v5382_v52, %v5382_v52  ;;  %v5577_v45 = vsel %vm5492_vm8, %v5382_v52, -inf  ;;  %v5341_v44 = vcombine.high %v16016_v22, %v16016_v22 }
 0x516   : > { %v5520_v10 = vmax.f32 %v5518_v29, %v5519_v14  ;;  %v16078_v19 = vsel %vm4865_vm6, %v5506_v30, -inf  ;;  %v16081_v21 = vsel %vm4865_vm6, %v5513_v28, -inf  ;;  %v5391_v31 = vcombine.high %v5389_v40, %v5389_v40 }
 0x517   : > { %v5578_v60 = vrot.slane %v5577_v45, 4  ;;  %v5584_v11 = vsel %vm5492_vm8, %v5390_v58, -inf  ;;  %v5591_v4 = vsel %vm5492_vm8, %v5389_v40, -inf  ;;  %v5348_v36 = vrot.slane %v16016_v22, %v14978_v2 }
 0x518   : > { %v16088_v15 = vsel %vm4865_vm6, %v5520_v10, -inf  ;;  %v5585_v63 = vrot.slane %v5584_v11, 4  ;;  %v5592_v42 = vrot.slane %v5591_v4, 4  ;;  %v5598_v59 = vsel %vm5492_vm8, %v5391_v31, -inf }
 0x519   : > { %v5579_v17 = vmax.f32 %v5577_v45, %v5578_v60  ;;  %v5599_v34 = vrot.slane %v5598_v59, 4  ;;  %v5355_v56 = vrot.slane %v5341_v44, %v14978_v2  ;;  %v5356_v43 = vcombine.high %v5348_v36, %v5348_v36 }
 0x51a   : > { %v5586_v47 = vmax.f32 %v5584_v11, %v5585_v63  ;;  %v5593_v27 = vmax.f32 %v5591_v4, %v5592_v42  ;;  %v5521_v16 = vsel %vm5492_vm8, %v5348_v36, -inf  ;;  %v16095_v13 = vadd.f32 %v16027_v50, %v16013_v35 }
 0x51b   : > { %v5580_v22 = vrot.slane %v5579_v17, 2  ;;  %v5600_v37 = vmax.f32 %v5598_v59, %v5599_v34  ;;  %v5357_v49 = vcombine.high %v5355_v56, %v5355_v56  ;;  %v5522_v38 = vrot.slane %v5521_v16, 4 }
 0x51c   : > { %v5587_v48 = vrot.slane %v5586_v47, 2  ;;  %v5594_v32 = vrot.slane %v5593_v27, 2  ;;  %v5528_v53 = vsel %vm5492_vm8, %v5356_v43, -inf  ;;  %v5535_v51 = vsel %vm5492_vm8, %v5355_v56, -inf }
 0x51d   : > { %v5581_v46 = vmax.f32 %v5579_v17, %v5580_v22  ;;  %v5601_v6 = vrot.slane %v5600_v37, 2  ;;  %v5523_v7 = vmax.f32 %v5521_v16, %v5522_v38  ;;  %v5529_v20 = vrot.slane %v5528_v53, 4 }
 0x51e   : > { %v5588_v33 = vmax.f32 %v5586_v47, %v5587_v48  ;;  %v5595_v24 = vmax.f32 %v5593_v27, %v5594_v32  ;;  %v5536_v5 = vrot.slane %v5535_v51, 4  ;;  %v5542_v35 = vsel %vm5492_vm8, %v5357_v49, -inf }
 0x51f   : > { %v5582_v50 = vrot.slane %v5581_v46, 1  ;;  %v5602_v18 = vmax.f32 %v5600_v37, %v5601_v6  ;;  %v5524_v29 = vrot.slane %v5523_v7, 2  ;;  %v5530_v12 = vmax.f32 %v5528_v53, %v5529_v20 }
 0x520   : > { %v5589_v52 = vrot.slane %v5588_v33, 1  ;;  %v5596_v30 = vrot.slane %v5595_v24, 1  ;;  %v5537_v28 = vmax.f32 %v5535_v51, %v5536_v5  ;;  %v5543_v14 = vrot.slane %v5542_v35, 4 }
 0x521   : > { %v5583_v40 = vmax.f32 %v5581_v46, %v5582_v50  ;;  %v5603_v58 = vrot.slane %v5602_v18, 1  ;;  %v5525_v45 = vmax.f32 %v5523_v7, %v5524_v29  ;;  %v5531_v44 = vrot.slane %v5530_v12, 2 }
 0x522   : > { %v5590_v10 = vmax.f32 %v5588_v33, %v5589_v52  ;;  %v5597_v31 = vmax.f32 %v5595_v24, %v5596_v30  ;;  %v5538_v60 = vrot.slane %v5537_v28, 2  ;;  %v5544_v11 = vmax.f32 %v5542_v35, %v5543_v14 }
 0x523   : > { %v5604_v4 = vmax.f32 %v5602_v18, %v5603_v58  ;;  %v5730_v36 = vsel %vm4865_vm6, %v5583_v40, -inf  ;;  %v5526_v63 = vrot.slane %v5525_v45, 1  ;;  %v5532_v42 = vmax.f32 %v5530_v12, %v5531_v44  ;;  %v12931_v40 = vld [vmem:[%s16807_s5 + $0x88] sm:$0xff]  }
 0x524   : > { %v5731_v59 = vmax.f32 %v16054_v41, %v5730_v36  ;;  %v5733_v17 = vsel %vm4865_vm6, %v5590_v10, -inf  ;;  %v5736_v34 = vsel %vm4865_vm6, %v5597_v31, -inf  ;;  %v5539_v56 = vmax.f32 %v5537_v28, %v5538_v60 }
 0x525   : > { %v5734_v43 = vmax.f32 %v16060_v1, %v5733_v17  ;;  %v5737_v47 = vmax.f32 %v16063_v25, %v5736_v34  ;;  %v5739_v27 = vsel %vm4865_vm6, %v5604_v4, -inf  ;;  %v5527_v16 = vmax.f32 %v5525_v45, %v5526_v63 }
 0x526   : > { %v5740_v22 = vmax.f32 %v16072_v9, %v5739_v27  ;;  %v12465_v37 = vpack.c.bf16 %v5731_v59, %v5731_v59  ;;  %v5533_v49 = vrot.slane %v5532_v42, 1  ;;  %v5540_v38 = vrot.slane %v5539_v56, 1 }
 0x527   : > { %v12466_v48 = vpack.c.bf16 %v5734_v43, %v5734_v43  ;;  %v12467_v32 = vpack.c.bf16 %v5737_v47, %v5737_v47  ;;  %v5545_v41 = vrot.slane %v5544_v11, 2  ;;  %v5718_v53 = vsel %vm4865_vm6, %v5527_v16, -inf }
 0x528   : > { %v12468_v51 = vpack.c.bf16 %v5740_v22, %v5740_v22  ;;  %v5840_v46 = vunpack.c.l.b16 %v12465_v37  ;;  %v5534_v6 = vmax.f32 %v5532_v42, %v5533_v49  ;;  %v5541_v7 = vmax.f32 %v5539_v56, %v5540_v38 }
 0x529   : > { %v5841_v1 = vunpack.c.l.b16 %v12466_v48  ;;  %v5842_v20 = vunpack.c.l.b16 %v12467_v32  ;;  %v5546_v25 = vmax.f32 %v5544_v11, %v5545_v41  ;;  %v5719_v33 = vmax.f32 %v16057_v62, %v5718_v53 }
 0x52a   : > { %v5843_v24 = vunpack.c.l.b16 %v12468_v51  ;;  %v5721_v9 = vsel %vm4865_vm6, %v5534_v6, -inf  ;;  %v5724_v5 = vsel %vm4865_vm6, %v5541_v7, -inf  ;;  %v5314_v35 = vmax.f32 %v16095_v13, 0.0  ;;  %v5879_v13 = vld [vmem:[#allocation4 + $0x8] sm:$0x7] }
 0x52b   : > { %v5855_v50 = vsel %vm4447_vm11, %v5841_v1, %v5840_v46  ;;  %v5547_v18 = vrot.slane %v5546_v25, 1  ;;  %v5722_v29 = vmax.f32 %v16078_v19, %v5721_v9  ;;  %v5725_v12 = vmax.f32 %v16081_v21, %v5724_v5  ;;  %v5876_v1 = vld [vmem:[#allocation4 + $0x4] sm:$0x7] }
 0x52c   : > { %v5856_v52 = vsel %vm4449_vm12, %v5842_v20, %v5855_v50  ;;  %v12461_v30 = vpack.c.bf16 %v5719_v33, %v5719_v33  ;;  %v5426_v28 = vcombine.high %v5314_v35, %v5314_v35  ;;  %v5433_v62 = vrot.slane %v5314_v35, %v14978_v2 }
 0x52d   : > { %v5857_v14 = vsel %vm4451_vm13, %v5843_v24, %v5856_v52  ;;  %v5548_v58 = vmax.f32 %v5546_v25, %v5547_v18  ;;  %v12462_v45 = vpack.c.bf16 %v5722_v29, %v5722_v29  ;;  %v12463_v19 = vpack.c.bf16 %v5725_v12, %v5725_v12 }
 0x52e   : > { %v5865_v44 = vpack.c.b16 %v5857_v14, %v5857_v14  ;;  %v5836_v21 = vunpack.c.l.b16 %v12461_v30  ;;  %v5440_v10 = vrot.slane %v5426_v28, %v14978_v2  ;;  %v5441_v31 = vcombine.high %v5433_v62, %v5433_v62 }
 0x52f   : > { %v5727_v60 = vsel %vm4865_vm6, %v5548_v58, -inf  ;;  %v5837_v11 = vunpack.c.l.b16 %v12462_v45  ;;  %v5838_v4 = vunpack.c.l.b16 %v12463_v19  ;;  %v5661_v36 = vsel %vm5492_vm8, %v5433_v62, -inf }
 0x530   : > { %v5880_v63 = vsel %vm16121_vm3, %v5865_v44, %v5879_v13  ;;  %v5728_v42 = vmax.f32 %v16088_v15, %v5727_v60  ;;  %v5442_v59 = vcombine.high %v5440_v10, %v5440_v10  ;;  %v5662_v17 = vrot.slane %v5661_v36, 4 }
 0x531   : > { %5881 = vst [vmem:[#allocation4 + $0x8] sm:$0x7] %v5880_v63  ;;  %v5852_v34 = vsel %vm4447_vm11, %v5837_v11, %v5836_v21  ;;  %v5668_v56 = vsel %vm5492_vm8, %v5441_v31, -inf  ;;  %v5675_v43 = vsel %vm5492_vm8, %v5440_v10, -inf  ;;  %v5294_v47 = vadd.f32 %v16031_v54, %v16007_v61 }
 0x532   : > { %v12464_v27 = vpack.c.bf16 %v5728_v42, %v5728_v42  ;;  %v5853_v16 = vsel %vm4449_vm12, %v5838_v4, %v5852_v34  ;;  %v5663_v22 = vmax.f32 %v5661_v36, %v5662_v17  ;;  %v5669_v37 = vrot.slane %v5668_v56, 4 }
 0x533   : > { %v5676_v49 = vrot.slane %v5675_v43, 4  ;;  %v5682_v15 = vsel %vm5492_vm8, %v5442_v59, -inf  ;;  %v5312_v38 = vmax.f32 %v5294_v47, 0.0  ;;  %v5305_v48 = vadd.f32 %v16033_v23, %v16019_v57 }
 0x534   : > { %v5839_v32 = vunpack.c.l.b16 %v12464_v27  ;;  %v5664_v41 = vrot.slane %v5663_v22, 2  ;;  %v5670_v53 = vmax.f32 %v5668_v56, %v5669_v37  ;;  %v5683_v51 = vrot.slane %v5682_v15, 4 }
 0x535   : > { %v5677_v46 = vmax.f32 %v5675_v43, %v5676_v49  ;;  %v5392_v6 = vcombine.high %v5312_v38, %v5312_v38  ;;  %v5399_v61 = vrot.slane %v5312_v38, %v14978_v2  ;;  %v5315_v54 = vmax.f32 %v5305_v48, 0.0 }
 0x536   : > { %v5854_v7 = vsel %vm4451_vm13, %v5839_v32, %v5853_v16  ;;  %v5665_v20 = vmax.f32 %v5663_v22, %v5664_v41  ;;  %v5671_v25 = vrot.slane %v5670_v53, 2  ;;  %v5684_v33 = vmax.f32 %v5682_v15, %v5683_v51 }
 0x537   : > { %v5864_v24 = vpack.c.b16 %v5854_v7, %v5854_v7  ;;  %v5678_v9 = vrot.slane %v5677_v46, 2  ;;  %v5406_v5 = vrot.slane %v5392_v6, %v14978_v2  ;;  %v5407_v57 = vcombine.high %v5399_v61, %v5399_v61 }
 0x538   : > { %v5666_v23 = vrot.slane %v5665_v20, 1  ;;  %v5672_v35 = vmax.f32 %v5670_v53, %v5671_v25  ;;  %v5685_v50 = vrot.slane %v5684_v33, 2  ;;  %v5605_v18 = vsel %vm5492_vm8, %v5399_v61, -inf  ;;  %v12922_v61 = vld [vmem:[%s16807_s5 + $0x50] sm:$0xff]  }
 0x539   : > { %v5877_v29 = vsel %vm16121_vm3, %v5864_v24, %v5876_v1  ;;  %v5679_v12 = vmax.f32 %v5677_v46, %v5678_v9  ;;  %v5408_v52 = vcombine.high %v5406_v5, %v5406_v5  ;;  %v5606_v30 = vrot.slane %v5605_v18, 4  ;;  %12545 = vmatprep.subr.bf16.mxu0 %v12922_v61 }
 0x53a   : > { %5878 = vst [vmem:[#allocation4 + $0x4] sm:$0x7] %v5877_v29  ;;  %v5667_v28 = vmax.f32 %v5665_v20, %v5666_v23  ;;  %v5673_v62 = vrot.slane %v5672_v35, 1  ;;  %v5686_v14 = vmax.f32 %v5684_v33, %v5685_v50  ;;  %v5612_v13 = vsel %vm5492_vm8, %v5407_v57, -inf  ;;  %v16176_v50 = vld [vmem:[#allocation4 + $0x8] sm:$0x7] }
 0x53b   : > { %v5680_v58 = vrot.slane %v5679_v12, 1  ;;  %v5607_v45 = vmax.f32 %v5605_v18, %v5606_v30  ;;  %v5613_v19 = vrot.slane %v5612_v13, 4  ;;  %v5619_v44 = vsel %vm5492_vm8, %v5406_v5, -inf }
 0x53c   : > { %v5674_v21 = vmax.f32 %v5672_v35, %v5673_v62  ;;  %v5687_v10 = vrot.slane %v5686_v14, 1  ;;  %v5620_v31 = vrot.slane %v5619_v44, 4  ;;  %v5626_v4 = vsel %vm5492_vm8, %v5408_v52, -inf }
 0x53d   : > { %v5608_v60 = vrot.slane %v5607_v45, 2  ;;  %v5614_v11 = vmax.f32 %v5612_v13, %v5613_v19  ;;  %v5232_v36 = vadd.f32 %v15990_v26, %v16000_v8  ;;  %v5681_v63 = vmax.f32 %v5679_v12, %v5680_v58 }
 0x53e   : > { %v16152_v42 = vsel %vm4865_vm6, %v5667_v28, -inf  ;;  %v5621_v59 = vmax.f32 %v5619_v44, %v5620_v31  ;;  %v5627_v17 = vrot.slane %v5626_v4, 4  ;;  %v5688_v34 = vmax.f32 %v5686_v14, %v5687_v10 }
 0x53f   : > { %v5609_v56 = vmax.f32 %v5607_v45, %v5608_v60  ;;  %v5615_v43 = vrot.slane %v5614_v11, 2  ;;  %v5443_v47 = vcombine.high %v5315_v54, %v5315_v54  ;;  %v16155_v27 = vsel %vm4865_vm6, %v5674_v21, -inf }
 0x540   : > { %v5622_v16 = vrot.slane %v5621_v59, 2  ;;  %v5628_v22 = vmax.f32 %v5626_v4, %v5627_v17  ;;  %v5450_v37 = vrot.slane %v5315_v54, %v14978_v2  ;;  %v5297_v8 = vadd.f32 %v16038_v3, %v5232_v36  ;;  %v12923_v54 = vld [vmem:[%s16807_s5 + $0x10] sm:$0xff]  }
 0x541   : > { %v5610_v49 = vrot.slane %v5609_v56, 1  ;;  %v5616_v15 = vmax.f32 %v5614_v11, %v5615_v43  ;;  %v5457_v26 = vrot.slane %v5443_v47, %v14978_v2  ;;  %v16170_v25 = vsel %vm4865_vm6, %v5681_v63, -inf  ;;  %12546 = vmatpush3.bf16.msra.mxu0 %v12923_v54  ;;  %v16186_v13 = vld [vmem:[#allocation4 + $0x4] sm:$0x7] }
 0x542   : > { %v5623_v38 = vmax.f32 %v5621_v59, %v5622_v16  ;;  %v5629_v48 = vrot.slane %v5628_v22, 2  ;;  %v5458_v32 = vcombine.high %v5450_v37, %v5450_v37  ;;  %v5689_v41 = vsel %vm5492_vm8, %v5450_v37, -inf }
 0x543   : > { %v5611_v53 = vmax.f32 %v5609_v56, %v5610_v49  ;;  %v5617_v51 = vrot.slane %v5616_v15, 1  ;;  %v5459_v46 = vcombine.high %v5457_v26, %v5457_v26  ;;  %v5690_v6 = vrot.slane %v5689_v41, 4 }
 0x544   : > { %v5624_v7 = vrot.slane %v5623_v38, 1  ;;  %v5630_v1 = vmax.f32 %v5628_v22, %v5629_v48  ;;  %v5696_v3 = vsel %vm5492_vm8, %v5458_v32, -inf  ;;  %v5703_v20 = vsel %vm5492_vm8, %v5457_v26, -inf }
 0x545   : > { %v5618_v33 = vmax.f32 %v5616_v15, %v5617_v51  ;;  %v5691_v24 = vmax.f32 %v5689_v41, %v5690_v6  ;;  %v5697_v9 = vrot.slane %v5696_v3, 4  ;;  %v16173_v5 = vsel %vm4865_vm6, %v5688_v34, -inf }
 0x546   : > { %v5631_v57 = vrot.slane %v5630_v1, 1  ;;  %v5704_v23 = vrot.slane %v5703_v20, 4  ;;  %v5710_v35 = vsel %vm5492_vm8, %v5459_v46, -inf  ;;  %v16179_v18 = vsel %vm4865_vm6, %v5611_v53, -inf }
 0x547   : > { %v5692_v29 = vrot.slane %v5691_v24, 2  ;;  %v5698_v12 = vmax.f32 %v5696_v3, %v5697_v9  ;;  %v5711_v52 = vrot.slane %v5710_v35, 4  ;;  %v16181_v30 = vmax.f32 %v5623_v38, %v5624_v7 }
 0x548   : > { %v16184_v28 = vsel %vm4865_vm6, %v5618_v33, -inf  ;;  %v5705_v62 = vmax.f32 %v5703_v20, %v5704_v23  ;;  %v5313_v14 = vmax.f32 %v5297_v8, 0.0  ;;  %v16190_v44 = vcombine.low %v16176_v50, %v16176_v50 }
 0x549   : > { %v5693_v58 = vmax.f32 %v5691_v24, %v5692_v29  ;;  %v5699_v45 = vrot.slane %v5698_v12, 2  ;;  %v5712_v19 = vmax.f32 %v5710_v35, %v5711_v52  ;;  %v16192_v21 = vmax.f32 %v5630_v1, %v5631_v57  ;;  %v12924_v1 = vld [vmem:[%s16807_s5 + $0x58] sm:$0xff]  }
 0x54a   : > { %v5706_v10 = vrot.slane %v5705_v62, 2  ;;  %v5409_v31 = vcombine.high %v5313_v14, %v5313_v14  ;;  %v5416_v60 = vrot.slane %v5313_v14, %v14978_v2  ;;  %5951 = vrot.lane.b32.xlu1 %v16190_v44, %s13784_s23  ;;  %v16199_v63 = vcombine.low %v16186_v13, %v16186_v13  ;;  %12547 = vmatprep.subr.bf16.mxu0 %v12924_v1  ;;  %v16245_v1 = vld [vmem:[#allocation4 + $0x14] sm:$0x7] }
 0x54b   : > { %v5694_v11 = vrot.slane %v5693_v58, 1  ;;  %v5700_v4 = vmax.f32 %v5698_v12, %v5699_v45  ;;  %v5713_v36 = vrot.slane %v5712_v19, 2 }
 0x54c   : > { %v5707_v59 = vmax.f32 %v5705_v62, %v5706_v10  ;;  %v5423_v17 = vrot.slane %v5409_v31, %v14978_v2  ;;  %v5424_v34 = vcombine.high %v5416_v60, %v5416_v60  ;;  %v5633_v56 = vsel %vm5492_vm8, %v5416_v60, -inf  ;;  %5949 = vrot.lane.b32.xlu0 %v16199_v63, %s13784_s23 }
 0x54d   : > { %v5695_v43 = vmax.f32 %v5693_v58, %v5694_v11  ;;  %v5701_v47 = vrot.slane %v5700_v4, 1  ;;  %v5714_v16 = vmax.f32 %v5712_v19, %v5713_v36  ;;  %v5634_v22 = vrot.slane %v5633_v56, 4 }
 0x54e   : > { %v5708_v37 = vrot.slane %v5707_v59, 1  ;;  %v5425_v49 = vcombine.high %v5423_v17, %v5423_v17  ;;  %v5640_v15 = vsel %vm5492_vm8, %v5424_v34, -inf  ;;  %v5647_v26 = vsel %vm5492_vm8, %v5423_v17, -inf }
 0x54f   : > { %v5702_v8 = vmax.f32 %v5700_v4, %v5701_v47  ;;  %v5715_v38 = vrot.slane %v5714_v16, 1  ;;  %v5754_v48 = vsel %vm4865_vm6, %v5695_v43, -inf  ;;  %v5635_v32 = vmax.f32 %v5633_v56, %v5634_v22  ;;  %v5885_v56 = vld [vmem:[#allocation4 + $0x10] sm:$0x7] }
 0x550   : > { %v5709_v41 = vmax.f32 %v5707_v59, %v5708_v37  ;;  %v5755_v53 = vmax.f32 %v16152_v42, %v5754_v48  ;;  %v5641_v51 = vrot.slane %v5640_v15, 4  ;;  %v5648_v46 = vrot.slane %v5647_v26, 4 }
 0x551   : > { %v5716_v6 = vmax.f32 %v5714_v16, %v5715_v38  ;;  %v5757_v61 = vsel %vm4865_vm6, %v5702_v8, -inf  ;;  %v5636_v54 = vrot.slane %v5635_v32, 2  ;;  %v5654_v7 = vsel %vm5492_vm8, %v5425_v49, -inf  ;;  %v12926_v8 = vld [vmem:[%s16807_s5 + $0xc0] sm:$0xff]  }
 0x552   : > { %v5758_v3 = vmax.f32 %v16155_v27, %v5757_v61  ;;  %v5760_v20 = vsel %vm4865_vm6, %v5709_v41, -inf  ;;  %v12473_v33 = vpack.c.bf16 %v5755_v53, %v5755_v53  ;;  %v5642_v24 = vmax.f32 %v5640_v15, %v5641_v51  ;;  %v12927_v38 = vld [vmem:[%s16807_s5 + $0x80] sm:$0xff]   ;;  %12563 = vmatprep.subr.bf16.mxu1 %v12926_v8 }
 0x553   : > { %v5761_v42 = vmax.f32 %v16170_v25, %v5760_v20  ;;  %v5763_v9 = vsel %vm4865_vm6, %v5716_v6, -inf  ;;  %v5637_v57 = vmax.f32 %v5635_v32, %v5636_v54  ;;  %v5649_v23 = vmax.f32 %v5647_v26, %v5648_v46  ;;  %v12925_v26 = vld [vmem:[%s16807_s5 + $0x18] sm:$0xff]   ;;  %12564 = vmatpush3.bf16.msra.mxu1 %v12927_v38 }
 0x554   : > { %v5764_v35 = vmax.f32 %v16173_v5, %v5763_v9  ;;  %v12474_v29 = vpack.c.bf16 %v5758_v3, %v5758_v3  ;;  %v5848_v12 = vunpack.c.l.b16 %v12473_v33  ;;  %v5643_v52 = vrot.slane %v5642_v24, 2  ;;  %12548 = vmatpush3.bf16.msra.mxu0 %v12925_v26 }
 0x555   : > { %v12475_v62 = vpack.c.bf16 %v5761_v42, %v5761_v42  ;;  %v5638_v14 = vrot.slane %v5637_v57, 1  ;;  %v5650_v58 = vrot.slane %v5649_v23, 2  ;;  %v5655_v27 = vrot.slane %v5654_v7, 4 }
 0x556   : > { %v12476_v45 = vpack.c.bf16 %v5764_v35, %v5764_v35  ;;  %v5849_v19 = vunpack.c.l.b16 %v12474_v29  ;;  %v5644_v10 = vmax.f32 %v5642_v24, %v5643_v52  ;;  %v5921_v31 = vshrl.u32 %v16190_v44, 16 }
 0x557   : > { %v5850_v25 = vunpack.c.l.b16 %v12475_v62  ;;  %v5639_v60 = vmax.f32 %v5637_v57, %v5638_v14  ;;  %v5651_v11 = vmax.f32 %v5649_v23, %v5650_v58  ;;  %v5656_v4 = vmax.f32 %v5654_v7, %v5655_v27 }
 0x558   : > { %v5851_v36 = vunpack.c.l.b16 %v12476_v45  ;;  %v5861_v59 = vsel %vm4447_vm11, %v5849_v19, %v5848_v12  ;;  %v5645_v5 = vrot.slane %v5644_v10, 1  ;;  %v5923_v17 = vshll.u32 %v16190_v44, 16 }
 0x559   : > { %v5862_v34 = vsel %vm4449_vm12, %v5850_v25, %v5861_v59  ;;  %v5652_v43 = vrot.slane %v5651_v11, 1  ;;  %v5657_v47 = vrot.slane %v5656_v4, 2  ;;  %v5742_v16 = vsel %vm4865_vm6, %v5639_v60, -inf  ;;  %v5882_v25 = vld [vmem:[#allocation4 + $0xc] sm:$0x7] }
 0x55a   : > { %v5863_v22 = vsel %vm4451_vm13, %v5851_v36, %v5862_v34  ;;  %v5646_v37 = vmax.f32 %v5644_v10, %v5645_v5  ;;  %v5743_v49 = vmax.f32 %v16179_v18, %v5742_v16  ;;  %v5925_v15 = vrot.slane %v5923_v17, 1  ;;  %v12928_v17 = vld [vmem:[%s16807_s5 + $0x60] sm:$0xff]  }
 0x55b   : > { %v5747_v48 = vsel %vm4865_vm6, %v16181_v30, -inf  ;;  %v5867_v32 = vpack.c.b16 %v5863_v22, %v5863_v22  ;;  %v5653_v41 = vmax.f32 %v5651_v11, %v5652_v43  ;;  %v5658_v53 = vmax.f32 %v5656_v4, %v5657_v47  ;;  %v12929_v34 = vld [vmem:[%s16807_s5 + $0x20] sm:$0xff]   ;;  %12549 = vmatprep.subr.bf16.mxu0 %v12928_v17  ;;  %v12932_v43 = vld [vmem:[%s16807_s5 + $0x68] sm:$0xff]  }
 0x55c   : > { %v5745_v18 = vsel %vm4865_vm6, %v5646_v37, -inf  ;;  %v12469_v51 = vpack.c.bf16 %v5743_v49, %v5743_v49  ;;  %v16238_v46 = vor.u32 %v5925_v15, %v5921_v31  ;;  %v5916_v6 = vshll.u32 %v16199_v63, 16  ;;  %12550 = vmatpush3.bf16.msra.mxu0 %v12929_v34  ;;  %v12933_v22 = vld [vmem:[%s16807_s5 + $0x28] sm:$0xff]   ;;  %v12934_v37 = vld [vmem:[%s16807_s5 + $0xd0] sm:$0xff]  }
 0x55d   : > { %v5886_v61 = vsel %vm16121_vm3, %v5867_v32, %v5885_v56  ;;  %v5659_v54 = vrot.slane %v5658_v53, 1  ;;  %v5746_v7 = vmax.f32 %v16184_v28, %v5745_v18  ;;  %v5748_v30 = vsel %vm4865_vm6, %v5653_v41, -inf  ;;  %v12930_v56 = vld [vmem:[%s16807_s5 + $0xc8] sm:$0xff]   ;;  %12551 = vmatprep.subr.bf16.mxu0 %v12932_v43  ;;  %v12935_v49 = vld [vmem:[%s16807_s5 + $0x90] sm:$0xff]   ;;  %v12939_v18 = vld [vmem:[%s16807_s5 + $0x98] sm:$0xff]  }
 0x55e   : > { %5887 = vst [vmem:[#allocation4 + $0x10] sm:$0x7] %v5886_v61  ;;  %v5749_v3 = vmax.f32 %v5747_v48, %v5748_v30  ;;  %5938 = vrot.lane.b32.xlu0 %v16238_v46, %s13784_s23  ;;  %v5914_v20 = vshrl.u32 %v16199_v63, 16  ;;  %v5918_v33 = vrot.slane %v5916_v6, 1  ;;  %v16254_v28 = vcombine.low %v16245_v1, %v16245_v1  ;;  %12565 = vmatprep.subr.bf16.mxu1 %v12930_v56  ;;  %v12936_v15 = vld [vmem:[%s16807_s5 + $0x70] sm:$0xff]   ;;  %v12942_v6 = vld [vmem:[%s16807_s5 + $0xe0] sm:$0xff]  }
 0x55f   : > { %v5660_v24 = vmax.f32 %v5658_v53, %v5659_v54  ;;  %v12470_v42 = vpack.c.bf16 %v5746_v7, %v5746_v7  ;;  %v5750_v23 = vsel %vm4865_vm6, %v16192_v21, -inf  ;;  %v5844_v29 = vunpack.c.l.b16 %v12469_v51  ;;  %12566 = vmatpush3.bf16.msra.mxu1 %v12931_v40  ;;  %v12937_v41 = vld [vmem:[%s16807_s5 + $0x30] sm:$0xff]   ;;  %v12938_v53 = vld [vmem:[%s16807_s5 + $0xd8] sm:$0xff]  }
 0x560   : > { %v12471_v9 = vpack.c.bf16 %v5749_v3, %v5749_v3  ;;  %v16250_v57 = vor.u32 %v5918_v33, %v5914_v20  ;;  %v5987_v45 = vrot.slane %v16254_v28, 1  ;;  %12552 = vmatpush3.bf16.msra.mxu0 %v12933_v22  ;;  %v5943_v8 = vrot.slane %v16199_v63, 1  ;;  %12567 = vmatprep.subr.bf16.mxu1 %v12934_v37  ;;  %v12940_v51 = vld [vmem:[%s16807_s5 + $0x78] sm:$0xff]   ;;  %v12943_v20 = vld [vmem:[%s16807_s5 + $0xa0] sm:$0xff]  }
 0x561   : > { %v5751_v35 = vsel %vm4865_vm6, %v5660_v24, -inf  ;;  %v5845_v12 = vunpack.c.l.b16 %v12470_v42  ;;  %12553 = vmatprep.subr.bf16.mxu0 %v12936_v15  ;;  %v12941_v54 = vld [vmem:[%s16807_s5 + $0x38] sm:$0xff]   ;;  %v5979_v3 = vshll.u32 %v16254_v28, 16  ;;  %v16354_v33 = vrot.slane %v16190_v44, 1  ;;  %v12944_v44 = vld [vmem:[%s16807_s5 + $0xe8] sm:$0xff]  }
 0x562   : > { %v5752_v52 = vmax.f32 %v5750_v23, %v5751_v35  ;;  %v5846_v62 = vunpack.c.l.b16 %v12471_v9  ;;  %5936 = vrot.lane.b32.xlu1 %v16250_v57, %s13784_s23  ;;  %v16275_v11 = vrot.slane %v5987_v45, %v14978_v2  ;;  %v13787_v42 = vmov 0.0  }
 0x563   : > { %v5858_v14 = vsel %vm4447_vm11, %v5845_v12, %v5844_v29  ;;  %12568 = vmatpush3.bf16.msra.mxu1 %v12935_v49  ;;  %v5977_v23 = vshrl.u32 %v16254_v28, 16  ;;  %v5981_v35 = vrot.slane %v5979_v3, 1  ;;  %v12946_v29 = vld [vmem:[%s16807_s5 + $0xa8] sm:$0xff]   ;;  %v12947_v12 = vld [vmem:[%s16807_s5 + $0xf0] sm:$0xff]  }
 0x564   : > { %v12472_v58 = vpack.c.bf16 %v5752_v52, %v5752_v52  ;;  %v5859_v27 = vsel %vm4449_vm12, %v5846_v62, %v5858_v14  ;;  %12554 = vmatpush3.bf16.msra.mxu0 %v12937_v41  ;;  %12569 = vmatprep.subr.bf16.mxu1 %v12938_v53  ;;  %v12949_v52 = vld [vmem:[%s16807_s5 + $0xb0] sm:$0xff]   ;;  %v12950_v62 = vld [vmem:[%s16807_s5 + $0xf8] sm:$0xff]   ;;  %vm6823_vm12 = vsmask.f32 1282 }
 0x565   : > { %v16264_v19 = vld [vmem:[#allocation4 + $0x10] sm:$0x7]  ;;  %12555 = vmatprep.subr.bf16.mxu0 %v12940_v51  ;;  %v5982_v28 = vor.u32 %v5981_v35, %v5977_v23 }
 0x566   : > { %v5847_v10 = vunpack.c.l.b16 %v12472_v58  ;;  %v16268_v21 = vcombine.low %v16264_v19, %v16264_v19  ;;  %v12952_v14 = vld [vmem:[%s16807_s5 + $0xb8] sm:$0xff]   ;;  %v5935_v58 = vpop.permute.xlu0 %5934 }
 0x567   : > { %12570 = vmatpush3.bf16.msra.mxu1 %v12939_v18 }
 0x568   : > { %v5860_v31 = vsel %vm4451_vm13, %v5847_v10, %v5859_v27  ;;  %5955 = vrot.lane.b32.xlu1 %v16268_v21, %s13784_s23  ;;  %v5964_v60 = vrot.slane %v16268_v21, 1  ;;  %v5960_v32 = vshll.u32 %v16268_v21, 16  ;;  %12571 = vmatprep.subr.bf16.mxu1 %v12942_v6  ;;  %v5958_v24 = vshrl.u32 %v16268_v21, 16  ;;  %vm16479_vm13 = vmand %vm6664_vm10, %vm6823_vm12 }
 0x569   : > { %v5866_v4 = vpack.c.b16 %v5860_v31, %v5860_v31  ;;  %12556 = vmatpush3.bf16.msra.mxu0 %v12941_v54  ;;  %v5942_v31 = vrot.slane %v15992_v39, 1 }
 0x56a   : > { %v16280_v36 = vrot.slane %v5964_v60, %v14978_v2  ;;  %v5962_v30 = vrot.slane %v5960_v32, 1  ;;  %12682 = vmatprep.subr.bf16.mxu0 %v13787_v42 }
 0x56b   : > { %v5883_v59 = vsel %vm16121_vm3, %v5866_v4, %v5882_v25  ;;  %12572 = vmatpush3.bf16.msra.mxu1 %v12943_v20 }
 0x56c   : > { %5884 = vst [vmem:[#allocation4 + $0xc] sm:$0x7] %v5883_v59  ;;  %v6256_v5 = vcombine.low %v16280_v36, %v16275_v11  ;;  %v16360_v9 = vor.u32 %v5962_v30, %v5958_v24  ;;  %12573 = vmatprep.subr.bf16.mxu1 %v12944_v44  ;;  %v13607_v59 = vld [vmem:[#allocation4] sm:$0x7]  ;;  %v12965_v36 = vld [vmem:[#allocation6 + $0x34] ss:$8 sps:$4 sm:$0xff]  }
 0x56d   : > { %v5990_v17 = vsel %vm4865_vm6, %v13607_v59, %v5935_v58  ;;  %v12960_v11 = vld [vmem:[#allocation6 + $0x20] ss:$8 sps:$4 sm:$0xff]  }
 0x56f   : > { %12574 = vmatpush3.bf16.msra.mxu1 %v12946_v29 }
 0x570   : > { %12575 = vmatprep.subr.bf16.mxu1 %v12947_v12 }
 0x573   : > { %v16301_v47 = vld [vmem:[#allocation4 + $0xc] sm:$0x7]  ;;  %12576 = vmatpush3.bf16.msra.mxu1 %v12949_v52 }
 0x574   : > { %v11778_v16 = vcombine.low %v16301_v47, %v16301_v47  ;;  %12577 = vmatprep.subr.bf16.mxu1 %v12950_v62 }
 0x576   : > { %5953 = vrot.lane.b32.xlu0 %v11778_v16, %s13784_s23  ;;  %v5930_v26 = vshll.u32 %v11778_v16, 16  ;;  %v5928_v38 = vshrl.u32 %v11778_v16, 16  ;;  %v16345_v7 = vrot.slane %v11778_v16, 1 }
 0x577   : > { %12578 = vmatpush3.bf16.msra.mxu1 %v12952_v14 }
 0x578   : > { %v5932_v48 = vrot.slane %v5930_v26, 1  ;;  %v6091_v14 = vrot.slane %v16345_v7, %v14978_v2 }
 0x57a   : > { %5965 = vrot.lane.b32.xlu0 %v5943_v8, %s13784_s23  ;;  %v16338_v61 = vor.u32 %v5932_v48, %v5928_v38 }
 0x57c   : > { %5940 = vrot.lane.b32.xlu1 %v16338_v61, %s13784_s23 }
 0x57e   : > { %5969 = vrot.lane.b32.xlu0 %v16345_v7, %s13784_s23 }
 0x580   : > { %5967 = vrot.lane.b32.xlu1 %v16354_v33, %s13784_s23 }
 0x582   : > { %5983 = vrot.lane.b32.xlu0 %v16360_v9, %s13784_s23 }
 0x584   : > { %5971 = vrot.lane.b32.xlu1 %v5964_v60, %s13784_s23 }
 0x588   : > { %5985 = vrot.lane.b32.xlu1 %v5982_v28, %s13784_s23  ;;  %s16869_s23 = sld [smem:[#allocation22_spill]] }
 0x58e   : > { %p16871_p1 = scmp.ne.s32.totalorder %s16869_s23, 0 }
 0x590   : > { %p13694_p2 = pnand %p13693_p10, %p16871_p1 }
 0x592   : > { %p13695_p3 = pneg %p13694_p2 }
 0x594   : > { %p13702_p11 = pnand %p13701_p8, %p13695_p3 }
 0x5bc   : > { %v5952_v45 = vpop.permute.xlu1 %5951 }
 0x5bd   : > { %v6005_v34 = vsel %vm4865_vm6, %v5943_v8, %v5952_v45 }
 0x5be   : > { %v5950_v27 = vpop.permute.xlu0 %5949 }
 0x5bf   : > { %v6002_v56 = vsel %vm4865_vm6, %v5942_v31, %v5950_v27  ;;  %v6067_v27 = vrot.slane %v16354_v33, %v14978_v2 }
 0x5c0   : > { %v6044_v16 = vcombine.low %v5990_v17, %v6002_v56  ;;  %v12956_v56 = vld [vmem:[#allocation6 + $0x4] ss:$8 sps:$4 sm:$0xff]  }
 0x5c2   : > { %v6052_v26 = vrot.slane %v6044_v16, %v14978_v2  ;;  %v12962_v16 = vld [vmem:[#allocation6 + $0x24] ss:$8 sps:$4 sm:$0xff]  }
 0x5d0   : > { %v5939_v10 = vpop.permute.xlu0 %5938 }
 0x5d4   : > { %v5937_v21 = vpop.permute.xlu1 %5936 }
 0x5d5   : > { %v5993_v25 = vsel %vm4865_vm6, %v16186_v13, %v5937_v21  ;;  %v5996_v13 = vsel %vm4865_vm6, %v16176_v50, %v5939_v10  ;;  %v12951_v10 = vld [vmem:[%s16807_s5 + $0x110] sm:$0xff]   ;;  %v6255_v21 = vcombine.low %v6067_v27, %v6091_v14 }
 0x5d6   : > { %v6068_v40 = vcombine.low %v5993_v25, %v6005_v34  ;;  %v12954_v34 = vld [vmem:[#allocation6] ss:$8 sps:$4 sm:$0xff]  }
 0x5d7   : > { %v6263_v59 = vrot.slane %v6255_v21, %v14978_v2 }
 0x5d8   : > { %v6076_v22 = vrot.slane %v6068_v40, %v14978_v2  ;;  %v12959_v40 = vld [vmem:[#allocation6 + $0x14] ss:$8 sps:$4 sm:$0xff]  }
 0x5da   : > { %v5956_v4 = vpop.permute.xlu1 %5955  ;;  %v11782_v48 = vcombine.low %v6052_v26, %v6076_v22  ;;  %v12969_v22 = vld [vmem:[#allocation6 + $0x50] ss:$8 sps:$4 sm:$0xff]   ;;  %v12980_v26 = vld [vmem:[#allocation6 + $0x84] ss:$8 sps:$4 sm:$0xff]  }
 0x5db   : > { %v6011_v63 = vsel %vm4865_vm6, %v16345_v7, %v5956_v4  ;;  %v6270_v4 = vrot.slane %v6256_v5, %v14978_v2  ;;  %v12963_v5 = vld [vmem:[#allocation6 + $0x30] ss:$8 sps:$4 sm:$0xff]  }
 0x5dc   : > { %v6229_v30 = vrot.slane %v11782_v48, %v14978_v2  ;;  %v12981_v48 = vld [vmem:[#allocation6 + $0x90] ss:$8 sps:$4 sm:$0xff]  }
 0x5dd   : > { %v6271_v17 = vcombine.low %v6263_v59, %v6270_v4 }
 0x5e8   : > { %v5954_v60 = vpop.permute.xlu0 %5953 }
 0x5e9   : > { %v6008_v43 = vsel %vm4865_vm6, %v16354_v33, %v5954_v60  ;;  %v12953_v33 = vld [vmem:[%s16807_s5 + $0x118] sm:$0xff]  }
 0x5ea   : > { %v6092_v37 = vcombine.low %v5996_v13, %v6008_v43  ;;  %v12957_v43 = vld [vmem:[#allocation6 + $0x10] ss:$8 sps:$4 sm:$0xff]  }
 0x5ec   : > { %v5966_v39 = vpop.permute.xlu0 %5965  ;;  %v6100_v32 = vrot.slane %v6092_v37, %v14978_v2  ;;  %v12974_v37 = vld [vmem:[#allocation6 + $0x64] ss:$8 sps:$4 sm:$0xff]  }
 0x5ed   : > { %v6014_v6 = vsel %vm4865_vm6, %v16250_v57, %v5966_v39  ;;  %v12966_v39 = vld [vmem:[#allocation6 + $0x40] ss:$8 sps:$4 sm:$0xff]  }
 0x5ee   : > { %v5941_v49 = vpop.permute.xlu1 %5940  ;;  %v6045_v24 = vcombine.low %v6014_v6, %v5996_v13  ;;  %v12971_v13 = vld [vmem:[#allocation6 + $0x54] ss:$8 sps:$4 sm:$0xff]  }
 0x5ef   : > { %v5999_v15 = vsel %vm4865_vm6, %v16301_v47, %v5941_v49  ;;  %v12972_v49 = vld [vmem:[#allocation6 + $0x60] ss:$8 sps:$4 sm:$0xff]   ;;  %v12995_v6 = vld [vmem:[#allocation6 + $0xd4] ss:$8 sps:$4 sm:$0xff]  }
 0x5f0   : > { %v6116_v8 = vcombine.low %v5999_v15, %v6011_v63  ;;  %v5970_v38 = vpop.permute.xlu0 %5969  ;;  %v6059_v52 = vrot.slane %v6045_v24, %v14978_v2  ;;  %v12977_v63 = vld [vmem:[#allocation6 + $0x74] ss:$8 sps:$4 sm:$0xff]   ;;  %v13004_v24 = vld [vmem:[#allocation6 + $0x104] ss:$8 sps:$4 sm:$0xff]  }
 0x5f1   : > { %v6020_v44 = vsel %vm4865_vm6, %v16338_v61, %v5970_v38  ;;  %v12948_v61 = vld [vmem:[%s16807_s5 + $0x108] sm:$0xff]   ;;  %v12983_v38 = vld [vmem:[#allocation6 + $0x94] ss:$8 sps:$4 sm:$0xff]  }
 0x5f2   : > { %v6124_v41 = vrot.slane %v6116_v8, %v14978_v2  ;;  %v5968_v50 = vpop.permute.xlu1 %5967  ;;  %v12978_v8 = vld [vmem:[#allocation6 + $0x80] ss:$8 sps:$4 sm:$0xff]  }
 0x5f3   : > { %v6017_v53 = vsel %vm4865_vm6, %v16238_v46, %v5968_v50  ;;  %v12945_v46 = vld [vmem:[%s16807_s5 + $0x100] sm:$0xff]  }
 0x5f4   : > { %v11784_v18 = vcombine.low %v6100_v32, %v6124_v41  ;;  %v5984_v51 = vpop.permute.xlu0 %5983  ;;  %v6069_v54 = vcombine.low %v6017_v53, %v5999_v15  ;;  %v12975_v15 = vld [vmem:[#allocation6 + $0x70] ss:$8 sps:$4 sm:$0xff]   ;;  %v12986_v32 = vld [vmem:[#allocation6 + $0xa4] ss:$8 sps:$4 sm:$0xff]   ;;  %v12984_v41 = vld [vmem:[#allocation6 + $0xa0] ss:$8 sps:$4 sm:$0xff]  }
 0x5f5   : > { %v6026_v20 = vsel %vm4865_vm6, %v16264_v19, %v5984_v51  ;;  %v12989_v50 = vld [vmem:[#allocation6 + $0xb4] ss:$8 sps:$4 sm:$0xff]   ;;  %v12987_v53 = vld [vmem:[#allocation6 + $0xb0] ss:$8 sps:$4 sm:$0xff]   ;;  %v12990_v51 = vld [vmem:[#allocation6 + $0xc0] ss:$8 sps:$4 sm:$0xff]  }
 0x5f6   : > { %v5972_v47 = vpop.permute.xlu1 %5971  ;;  %v6243_v3 = vrot.slane %v11784_v18, %v14978_v2  ;;  %v6083_v57 = vrot.slane %v6069_v54, %v14978_v2  ;;  %v6093_v29 = vcombine.low %v6020_v44, %v6026_v20  ;;  %v12992_v18 = vld [vmem:[#allocation6 + $0xc4] ss:$8 sps:$4 sm:$0xff]   ;;  %v12993_v54 = vld [vmem:[#allocation6 + $0xd0] ss:$8 sps:$4 sm:$0xff]  }
 0x5f7   : > { %v6023_v28 = vsel %vm4865_vm6, %v16360_v9, %v5972_v47  ;;  %v12998_v47 = vld [vmem:[#allocation6 + $0xe4] ss:$8 sps:$4 sm:$0xff]   ;;  %v12999_v20 = vld [vmem:[#allocation6 + $0xf0] ss:$8 sps:$4 sm:$0xff]  }
 0x5f8   : > { %v6251_v23 = vcombine.low %v6229_v30, %v6243_v3  ;;  %v6252_v35 = vcombine.high %v6229_v30, %v6243_v3  ;;  %v11783_v9 = vcombine.low %v6059_v52, %v6083_v57  ;;  %v12996_v30 = vld [vmem:[#allocation6 + $0xe0] ss:$8 sps:$4 sm:$0xff]   ;;  %v13001_v3 = vld [vmem:[#allocation6 + $0xf4] ss:$8 sps:$4 sm:$0xff]  }
 0x5fa   : > { %v5986_v12 = vpop.permute.xlu1 %5985  ;;  %6527 = vmatprep.mubr.bf16.mxu0 %v6252_v35  ;;  %v6236_v7 = vrot.slane %v11783_v9, %v14978_v2 }
 0x5fb   : > { %v6029_v19 = vsel %vm4865_vm6, %v16245_v1, %v5986_v12  ;;  %6528 = vmatmul.mubr.bf16.vlgmr.msra.gmra.mrb[16].mxu0 %v6251_v23  ;;  %v6107_v1 = vrot.slane %v6093_v29, %v14978_v2  ;;  %v11781_v12 = vld [vmem:[%s16808_s6] ss:$0 sm:$0xff] }
 0x5fc   : > { %v6117_v62 = vcombine.low %v6023_v28, %v6029_v19  ;;  %12683 = vmatpush3.bf16.msra.mxu0 %v12945_v46  ;;  %12690 = vmatprep.mubr.msk.bf16.mxu0 %vm13788_vm9, %v13787_v42 }
 0x5fd   : > { %12684 = vmatprep.subr.bf16.mxu0 %v13787_v42 }
 0x5fe   : > { %v6131_v58 = vrot.slane %v6117_v62, %v14978_v2 }
 0x600   : > { %v11785_v45 = vcombine.low %v6107_v1, %v6131_v58  ;;  %12685 = vmatpush3.bf16.msra.mxu0 %v12948_v61 }
 0x601   : > { %12686 = vmatprep.subr.bf16.mxu0 %v13787_v42 }
 0x602   : > { %v6250_v31 = vrot.slane %v11785_v45, %v14978_v2 }
 0x604   : > { %12687 = vmatpush3.bf16.msra.mxu0 %v12951_v10  ;;  %v6253_v25 = vcombine.low %v6236_v7, %v6250_v31  ;;  %v6254_v60 = vcombine.high %v6236_v7, %v6250_v31 }
 0x605   : > { %12688 = vmatprep.subr.bf16.mxu0 %v13787_v42  ;;  %v12968_v42 = vld [vmem:[#allocation6 + $0x44] ss:$8 sps:$4 sm:$0xff]  }
 0x606   : > { %6568 = vmatprep.mubr.bf16.mxu1 %v6254_v60 }
 0x607   : > { %6569 = vmatmul.mubr.bf16.vlgmr.msra.gmra.mrb[40].mxu1 %v6253_v25 }
 0x608   : > { %12689 = vmatpush3.bf16.msra.mxu0 %v12953_v33 }
 0x609   : > { %7975 = vmatprep.subr.bf16.mxu0 %v12956_v56 }
 0x60b   : > { %12691 = vmatmul.mubr.msk.bf16.vlgmr.msra.gmra.mrb[20].mxu0 %vm4865_vm6, %v6271_v17 }
 0x60c   : > { %7976 = vmatpush1.bf16.msra.mxu0 %v12954_v34 }
 0x60d   : > { %7977 = vmatprep.subr.bf16.mxu0 %v12959_v40 }
 0x610   : > { %7978 = vmatpush1.bf16.msra.mxu0 %v12957_v43 }
 0x611   : > { %7979 = vmatprep.subr.bf16.mxu0 %v12962_v16 }
 0x614   : > { %7980 = vmatpush1.bf16.msra.mxu0 %v12960_v11 }
 0x615   : > { %7981 = vmatprep.subr.bf16.mxu0 %v12965_v36 }
 0x618   : > { %7982 = vmatpush1.bf16.msra.mxu0 %v12963_v5 }
 0x619   : > { %7983 = vmatprep.subr.bf16.mxu0 %v12968_v42 }
 0x61c   : > { %7984 = vmatpush1.bf16.msra.mxu0 %v12966_v39 }
 0x61d   : > { %7985 = vmatprep.subr.bf16.mxu0 %v12971_v13 }
 0x620   : > { %7986 = vmatpush1.bf16.msra.mxu0 %v12969_v22 }
 0x621   : > { %7987 = vmatprep.subr.bf16.mxu0 %v12974_v37 }
 0x624   : > { %7988 = vmatpush1.bf16.msra.mxu0 %v12972_v49 }
 0x625   : > { %7989 = vmatprep.subr.bf16.mxu0 %v12977_v63 }
 0x628   : > { %7990 = vmatpush1.bf16.msra.mxu0 %v12975_v15 }
 0x629   : > { %7991 = vmatprep.subr.bf16.mxu0 %v12980_v26 }
 0x62c   : > { %7992 = vmatpush1.bf16.msra.mxu0 %v12978_v8 }
 0x62d   : > { %7993 = vmatprep.subr.bf16.mxu0 %v12983_v38 }
 0x630   : > { %7994 = vmatpush1.bf16.msra.mxu0 %v12981_v48 }
 0x631   : > { %7995 = vmatprep.subr.bf16.mxu0 %v12986_v32 }
 0x634   : > { %7996 = vmatpush1.bf16.msra.mxu0 %v12984_v41 }
 0x635   : > { %7997 = vmatprep.subr.bf16.mxu0 %v12989_v50 }
 0x638   : > { %7998 = vmatpush1.bf16.msra.mxu0 %v12987_v53 }
 0x639   : > { %7999 = vmatprep.subr.bf16.mxu0 %v12992_v18 }
 0x63c   : > { %8000 = vmatpush1.bf16.msra.mxu0 %v12990_v51 }
 0x63d   : > { %8001 = vmatprep.subr.bf16.mxu0 %v12995_v6 }
 0x640   : > { %8002 = vmatpush1.bf16.msra.mxu0 %v12993_v54 }
 0x641   : > { %8003 = vmatprep.subr.bf16.mxu0 %v12998_v47 }
 0x644   : > { %8004 = vmatpush1.bf16.msra.mxu0 %v12996_v30 }
 0x645   : > { %8005 = vmatprep.subr.bf16.mxu0 %v13001_v3 }
 0x648   : > { %8006 = vmatpush1.bf16.msra.mxu0 %v12999_v20 }
 0x649   : > { %8016 = vmatprep.subr.bf16.mxu0 %v13004_v24 }
 0x6ce   : > { %v12557_v23 = vpop.f32.mrb[16].mxu0 }
 0x6cf   : > { %v12558_v35 = vpop.f32.mrb[17].mxu0 }
 0x6d0   : > { %v12559_v46 = vadd.f32 %v12558_v35, %v12557_v23  ;;  %v12560_v44 = vpop.f32.mrb[18].mxu0 }
 0x6d1   : > { %v12561_v57 = vpop.f32.mrb[19].mxu0 }
 0x6d2   : > { %v12562_v29 = vadd.f32 %v12561_v57, %v12560_v44  ;;  %v6530_v52 = vadd.f32 %v12559_v46, %v11781_v12 }
 0x6d4   : > { %v6533_v9 = vadd.f32 %v12562_v29, %v11781_v12 }
 0x6da   : > { %v12579_v28 = vpop.f32.mrb[40].mxu1 }
 0x6db   : > { %v12580_v19 = vpop.f32.mrb[41].mxu1 }
 0x6dc   : > { %v12581_v62 = vadd.f32 %v12580_v19, %v12579_v28  ;;  %v12582_v61 = vpop.f32.mrb[42].mxu1 }
 0x6dd   : > { %v12583_v14 = vpop.f32.mrb[43].mxu1 }
 0x6de   : > { %v12584_v1 = vadd.f32 %v12583_v14, %v12582_v61  ;;  %v6571_v58 = vadd.f32 %v12581_v62, %v6530_v52  ;;  %v6611_v27 = vpop.f32.mrb[20].mxu0 }
 0x6df   : > { %v12692_v45 = vpop.f32.mrb[21].mxu0 }
 0x6e0   : > { %v6612_v10 = vadd.f32 %v6611_v27, %v6571_v58  ;;  %v6574_v21 = vadd.f32 %v12584_v1, %v6533_v9  ;;  %v6614_v7 = vpop.f32.mrb[22].mxu0 }
 0x6e1   : > { %v12693_v31 = vpop.f32.mrb[23].mxu0 }
 0x6e2   : > { %v6618_v25 = vmax.f32 %v6612_v10, 0.0  ;;  %v6615_v60 = vadd.f32 %v6614_v7, %v6574_v21 }
 0x6e4   : > { %v6622_v33 = vcombine.high %v6618_v25, %v6618_v25  ;;  %v6629_v4 = vrot.slane %v6618_v25, %v14978_v2  ;;  %v6619_v59 = vmax.f32 %v6615_v60, 0.0 }
 0x6e6   : > { %v6636_v17 = vrot.slane %v6622_v33, %v14978_v2  ;;  %v6637_v34 = vcombine.high %v6629_v4, %v6629_v4  ;;  %v6665_v56 = vsel %vm6664_vm10, %v6629_v4, -inf  ;;  %v6639_v40 = vcombine.high %v6619_v59, %v6619_v59 }
 0x6e7   : > { %v6666_v43 = vrot.slane %v6665_v56, 4  ;;  %v6646_v16 = vrot.slane %v6619_v59, %v14978_v2 }
 0x6e8   : > { %v6638_v11 = vcombine.high %v6636_v17, %v6636_v17  ;;  %v6672_v36 = vsel %vm6664_vm10, %v6637_v34, -inf  ;;  %v6679_v5 = vsel %vm6664_vm10, %v6636_v17, -inf  ;;  %v6653_v42 = vrot.slane %v6639_v40, %v14978_v2 }
 0x6e9   : > { %v6667_v39 = vmax.f32 %v6665_v56, %v6666_v43  ;;  %v6673_v13 = vrot.slane %v6672_v36, 4  ;;  %v6680_v22 = vrot.slane %v6679_v5, 4  ;;  %v6654_v37 = vcombine.high %v6646_v16, %v6646_v16 }
 0x6ea   : > { %v6686_v49 = vsel %vm6664_vm10, %v6638_v11, -inf  ;;  %v6655_v63 = vcombine.high %v6653_v42, %v6653_v42  ;;  %v6693_v15 = vsel %vm6664_vm10, %v6646_v16, -inf  ;;  %v6707_v26 = vsel %vm6664_vm10, %v6653_v42, -inf }
 0x6eb   : > { %v6668_v8 = vrot.slane %v6667_v39, 2  ;;  %v6674_v38 = vmax.f32 %v6672_v36, %v6673_v13  ;;  %v6681_v48 = vmax.f32 %v6679_v5, %v6680_v22  ;;  %v6687_v32 = vrot.slane %v6686_v49, 4 }
 0x6ec   : > { %v6694_v41 = vrot.slane %v6693_v15, 4  ;;  %v6700_v50 = vsel %vm6664_vm10, %v6654_v37, -inf  ;;  %v6708_v53 = vrot.slane %v6707_v26, 4  ;;  %v6714_v18 = vsel %vm6664_vm10, %v6655_v63, -inf }
 0x6ed   : > { %v6669_v51 = vmax.f32 %v6667_v39, %v6668_v8  ;;  %v6675_v6 = vrot.slane %v6674_v38, 2  ;;  %v6682_v54 = vrot.slane %v6681_v48, 2  ;;  %v6688_v47 = vmax.f32 %v6686_v49, %v6687_v32 }
 0x6ee   : > { %v6695_v30 = vmax.f32 %v6693_v15, %v6694_v41  ;;  %v6701_v3 = vrot.slane %v6700_v50, 4  ;;  %v6709_v20 = vmax.f32 %v6707_v26, %v6708_v53  ;;  %v6715_v24 = vrot.slane %v6714_v18, 4  ;;  %v6831_v41 = vld [vmem:[#allocation5] sm:$0x3] }
 0x6ef   : > { %v6670_v23 = vrot.slane %v6669_v51, 1  ;;  %v6676_v35 = vmax.f32 %v6674_v38, %v6675_v6  ;;  %v6683_v46 = vmax.f32 %v6681_v48, %v6682_v54  ;;  %v6689_v44 = vrot.slane %v6688_v47, 2 }
 0x6f0   : > { %v6696_v57 = vrot.slane %v6695_v30, 2  ;;  %v6702_v29 = vmax.f32 %v6700_v50, %v6701_v3  ;;  %v6710_v12 = vrot.slane %v6709_v20, 2  ;;  %v6716_v28 = vmax.f32 %v6714_v18, %v6715_v24  ;;  %v13002_v3 = vld [vmem:[#allocation6 + $0x100] ss:$8 sps:$4 sm:$0xff]  }
 0x6f1   : > { %v6677_v19 = vrot.slane %v6676_v35, 1  ;;  %v6684_v52 = vrot.slane %v6683_v46, 1  ;;  %v6690_v62 = vmax.f32 %v6688_v47, %v6689_v44  ;;  %v6671_v58 = vmax.f32 %v6669_v51, %v6670_v23 }
 0x6f2   : > { %v6697_v61 = vmax.f32 %v6695_v30, %v6696_v57  ;;  %v6703_v14 = vrot.slane %v6702_v29, 2  ;;  %v6711_v9 = vmax.f32 %v6709_v20, %v6710_v12  ;;  %v6717_v1 = vrot.slane %v6716_v28, 2  ;;  %v6825_v20 = vld [vmem:[#allocation5 + $0x2] sm:$0x3]  ;;  %v6828_v57 = vld [vmem:[#allocation5 + $0x4] sm:$0x3] }
 0x6f3   : > { %v6685_v27 = vmax.f32 %v6683_v46, %v6684_v52  ;;  %v6691_v45 = vrot.slane %v6690_v62, 1  ;;  %v6678_v25 = vmax.f32 %v6676_v35, %v6677_v19  ;;  %v6843_v6 = vrot.slane %v6831_v41, %v14978_v2  ;;  %v16488_v12 = vld [vmem:[#allocation5 + $0x6] sm:$0x3] }
 0x6f4   : > { %v6698_v10 = vrot.slane %v6697_v61, 1  ;;  %v6704_v21 = vmax.f32 %v6702_v29, %v6703_v14  ;;  %v6712_v7 = vrot.slane %v6711_v9, 1  ;;  %v6718_v31 = vmax.f32 %v6716_v28, %v6717_v1 }
 0x6f5   : > { %v6692_v60 = vmax.f32 %v6690_v62, %v6691_v45  ;;  %v6721_v33 = vmax.f32 %v6671_v58, %v6685_v27  ;;  %v6854_v46 = vshll.u32 %v6843_v6, 16  ;;  %v13789_v28 = vmov 1966171168  }
 0x6f6   : > { %v6699_v4 = vmax.f32 %v6697_v61, %v6698_v10  ;;  %v6705_v59 = vrot.slane %v6704_v21, 1  ;;  %v6713_v17 = vmax.f32 %v6711_v9, %v6712_v7  ;;  %v6719_v34 = vrot.slane %v6718_v31, 1 }
 0x6f7   : > { %v6722_v56 = vmax.f32 %v6678_v25, %v6692_v60  ;;  %v6725_v40 = vpack.c.bf16 %v6721_v33, %v6721_v33  ;;  %v6904_v19 = vunpack.c.l.s4 %v13789_v28  ;;  %v6852_v62 = vshrl.u32 %v6843_v6, 16  ;;  %v13016_v28 = vld [vmem:[#allocation6 + $0x144] ss:$8 sps:$4 sm:$0xff]  }
 0x6f8   : > { %v6706_v43 = vmax.f32 %v6704_v21, %v6705_v59  ;;  %v6720_v16 = vmax.f32 %v6718_v31, %v6719_v34  ;;  %v6723_v11 = vmax.f32 %v6699_v4, %v6713_v17  ;;  %v6856_v61 = vrot.slane %v6854_v46, 1  ;;  %v13010_v46 = vld [vmem:[#allocation6 + $0x124] ss:$8 sps:$4 sm:$0xff]  }
 0x6f9   : > { %v6726_v36 = vpack.c.bf16 %v6722_v56, %v6722_v56  ;;  %v6743_v5 = vrot.slane %v6725_v40, %v14978_v2  ;;  %v16494_v14 = vrot.slane %v16488_v12, %v14978_v2  ;;  %v6905_v9 = vunpack.c.0.s8 %v6904_v19  ;;  %v13014_v19 = vld [vmem:[#allocation6 + $0x140] ss:$8 sps:$4 sm:$0xff]  }
 0x6fa   : > { %v6724_v42 = vmax.f32 %v6706_v43, %v6720_v16  ;;  %v6727_v39 = vpack.c.bf16 %v6723_v11, %v6723_v11  ;;  %v6857_v1 = vor.u32 %v6856_v61, %v6852_v62  ;;  %v6865_v58 = vrot.slane %v6843_v6, 1  ;;  %v13017_v62 = vld [vmem:[#allocation6 + $0x150] ss:$8 sps:$4 sm:$0xff]   ;;  %v13022_v61 = vld [vmem:[#allocation6 + $0x164] ss:$8 sps:$4 sm:$0xff]  }
 0x6fb   : > { %v6750_v13 = vrot.slane %v6726_v36, %v14978_v2  ;;  %v6771_v22 = vrot.slane %v6743_v5, %v14978_v2  ;;  %v6898_v45 = vrot.slane %v16494_v14, 1  ;;  %v16499_v21 = vsub.s32 %v6905_v9, %v14962_v55  ;;  %v13020_v9 = vld [vmem:[#allocation6 + $0x160] ss:$8 sps:$4 sm:$0xff]  }
 0x6fc   : > { %v6728_v37 = vpack.c.bf16 %v6724_v42, %v6724_v42  ;;  %v6757_v49 = vrot.slane %v6727_v39, %v14978_v2  ;;  %v6899_v60 = vcombine.low %v6831_v41, %v6857_v1  ;;  %v13025_v1 = vld [vmem:[#allocation6 + $0x174] ss:$8 sps:$4 sm:$0xff]  }
 0x6fd   : > { %v6778_v63 = vrot.slane %v6750_v13, %v14978_v2  ;;  %v6793_v15 = vunpack.c.l.b16 %v6771_v22  ;;  %v7017_v59 = vrot.slane %v6898_v45, %v16499_v21  ;;  %v13028_v45 = vld [vmem:[#allocation6 + $0x184] ss:$8 sps:$4 sm:$0xff]  }
 0x6fe   : > { %v6764_v26 = vrot.slane %v6728_v37, %v14978_v2  ;;  %v6785_v8 = vrot.slane %v6757_v49, %v14978_v2  ;;  %v6909_v16 = vrot.slane %v6899_v60, %v16499_v21 }
 0x6ff   : > { %v6794_v38 = vunpack.c.l.b16 %v6778_v63  ;;  %v6797_v50 = vrot.slane %v6793_v15, 7  ;;  %v7024_v13 = vrot.slane %v7017_v59, %v16499_v21  ;;  %v13034_v59 = vld [vmem:[#allocation6 + $0x1a4] ss:$8 sps:$4 sm:$0xff]  }
 0x700   : > { %v6792_v48 = vrot.slane %v6764_v26, %v14978_v2  ;;  %v6795_v32 = vunpack.c.l.b16 %v6785_v8 }
 0x701   : > { %v6798_v53 = vrot.slane %v6794_v38, 6 }
 0x702   : > { %v6796_v18 = vunpack.c.l.b16 %v6792_v48  ;;  %v6800_v47 = vrot.slane %v6795_v32, 7 }
 0x703   : > { %v6799_v51 = vsel %vm4447_vm11, %v6798_v53, %v6797_v50 }
 0x704   : > { %v6803_v54 = vpack.c.b16 %v6799_v51, %v6799_v51  ;;  %v6801_v30 = vrot.slane %v6796_v18, 6 }
 0x706   : > { %v6811_v24 = vrot.slane %v6803_v54, %v14978_v2  ;;  %v6802_v23 = vsel %vm4447_vm11, %v6801_v30, %v6800_v47 }
 0x707   : > { %v6804_v35 = vpack.c.b16 %v6802_v23, %v6802_v23 }
 0x708   : > { %v6826_v44 = vsel %vm16479_vm13, %v6811_v24, %v6825_v20  ;;  %v13007_v24 = vld [vmem:[#allocation6 + $0x114] ss:$8 sps:$4 sm:$0xff]  }
 0x709   : > { %6827 = vst [vmem:[#allocation5 + $0x2] sm:$0x3] %v6826_v44  ;;  %v6818_v29 = vrot.slane %v6804_v35, %v14978_v2  ;;  %v13005_v35 = vld [vmem:[#allocation6 + $0x110] ss:$8 sps:$4 sm:$0xff]   ;;  %v13008_v44 = vld [vmem:[#allocation6 + $0x120] ss:$8 sps:$4 sm:$0xff]  }
 0x70b   : > { %v6829_v52 = vsel %vm16479_vm13, %v6818_v29, %v6828_v57  ;;  %v13013_v57 = vld [vmem:[#allocation6 + $0x134] ss:$8 sps:$4 sm:$0xff]   ;;  %v13011_v29 = vld [vmem:[#allocation6 + $0x130] ss:$8 sps:$4 sm:$0xff]  }
 0x70c   : > { %6830 = vst [vmem:[#allocation5 + $0x4] sm:$0x3] %v6829_v52  ;;  %v13019_v52 = vld [vmem:[#allocation6 + $0x154] ss:$8 sps:$4 sm:$0xff]  }
 0x710   : > { %v6832_v27 = vld [vmem:[#allocation5 + $0x2] sm:$0x3] }
 0x711   : > { %v6850_v10 = vrot.slane %v6832_v27, %v14978_v2  ;;  %v6900_v33 = vcombine.low %v6865_v58, %v6832_v27  ;;  %v6894_v58 = vshll.u32 %v16494_v14, 16 }
 0x713   : > { %v6833_v7 = vld [vmem:[#allocation5 + $0x4] sm:$0x3]  ;;  %v6861_v31 = vshll.u32 %v6850_v10, 16  ;;  %v6866_v25 = vrot.slane %v6850_v10, 1  ;;  %v6859_v17 = vshrl.u32 %v6850_v10, 16  ;;  %v6916_v11 = vrot.slane %v6900_v33, %v16499_v21 }
 0x714   : > { %v16502_v4 = vrot.slane %v6833_v7, %v14978_v2  ;;  %v6892_v10 = vshrl.u32 %v16494_v14, 16  ;;  %v13029_v33 = vld [vmem:[#allocation6 + $0x190] ss:$8 sps:$4 sm:$0xff]   ;;  %v13037_v14 = vld [vmem:[#allocation6 + $0x1b4] ss:$8 sps:$4 sm:$0xff]  }
 0x715   : > { %v6863_v34 = vrot.slane %v6861_v31, 1  ;;  %v6963_v36 = vcombine.low %v6866_v25, %v6833_v7  ;;  %v6931_v15 = vcombine.low %v6909_v16, %v6916_v11  ;;  %v13026_v31 = vld [vmem:[#allocation6 + $0x180] ss:$8 sps:$4 sm:$0xff]   ;;  %v13035_v11 = vld [vmem:[#allocation6 + $0x1b0] ss:$8 sps:$4 sm:$0xff]  }
 0x716   : > { %v6878_v56 = vshll.u32 %v16502_v4, 16  ;;  %v6882_v40 = vrot.slane %v16502_v4, 1  ;;  %v6876_v5 = vshrl.u32 %v16502_v4, 16  ;;  %v13043_v4 = vld [vmem:[#allocation6 + $0x1d4] ss:$8 sps:$4 sm:$0xff]  }
 0x717   : > { %v6864_v43 = vor.u32 %v6863_v34, %v6859_v17  ;;  %v6979_v8 = vrot.slane %v6963_v36, %v16499_v21  ;;  %v6939_v53 = vrot.slane %v6931_v15, %v16499_v21  ;;  %v13040_v36 = vld [vmem:[#allocation6 + $0x1c4] ss:$8 sps:$4 sm:$0xff]   ;;  %v13047_v15 = vld [vmem:[#allocation6 + $0x1f0] ss:$8 sps:$4 sm:$0xff]  }
 0x718   : > { %v6880_v42 = vrot.slane %v6878_v56, 1  ;;  %v6954_v39 = vrot.slane %v6882_v40, %v16499_v21  ;;  %v13032_v56 = vld [vmem:[#allocation6 + $0x1a0] ss:$8 sps:$4 sm:$0xff]  }
 0x719   : > { %v6962_v22 = vcombine.low %v6832_v27, %v6864_v43  ;;  %v6901_v37 = vcombine.low %v6864_v43, %v6866_v25  ;;  %v13023_v27 = vld [vmem:[#allocation6 + $0x170] ss:$8 sps:$4 sm:$0xff]   ;;  %v13031_v25 = vld [vmem:[#allocation6 + $0x194] ss:$8 sps:$4 sm:$0xff]  }
 0x71a   : > { %v16514_v49 = vor.u32 %v6880_v42, %v6876_v5  ;;  %v6961_v63 = vrot.slane %v6954_v39, %v16499_v21  ;;  %v13038_v42 = vld [vmem:[#allocation6 + $0x1c0] ss:$8 sps:$4 sm:$0xff]   ;;  %v13041_v39 = vld [vmem:[#allocation6 + $0x1d0] ss:$8 sps:$4 sm:$0xff]  }
 0x71b   : > { %v6972_v26 = vrot.slane %v6962_v22, %v16499_v21  ;;  %v6923_v41 = vrot.slane %v6901_v37, %v16499_v21  ;;  %v13044_v37 = vld [vmem:[#allocation6 + $0x1e0] ss:$8 sps:$4 sm:$0xff]  }
 0x71c   : > { %v6902_v38 = vcombine.low %v6833_v7, %v16514_v49  ;;  %v16520_v48 = vcombine.low %v6961_v63, %v7024_v13  ;;  %v6896_v7 = vrot.slane %v6894_v58, 1  ;;  %v6964_v17 = vcombine.low %v16514_v49, %v6882_v40  ;;  %v13046_v13 = vld [vmem:[#allocation6 + $0x1e4] ss:$8 sps:$4 sm:$0xff]   ;;  %v13049_v49 = vld [vmem:[#allocation6 + $0x1f4] ss:$8 sps:$4 sm:$0xff]  }
 0x71d   : > { %v6994_v32 = vcombine.low %v6972_v26, %v6979_v8  ;;  %v13052_v26 = vld [vmem:[#allocation6 + $0x204] ss:$8 sps:$4 sm:$0xff]  }
 0x71e   : > { %v6930_v50 = vrot.slane %v6902_v38, %v16499_v21  ;;  %v6897_v60 = vor.u32 %v6896_v7, %v6892_v10  ;;  %v6986_v43 = vrot.slane %v6964_v17, %v16499_v21  ;;  %v13050_v38 = vld [vmem:[#allocation6 + $0x200] ss:$8 sps:$4 sm:$0xff]   ;;  %v13082_v58 = vld [vmem:[#allocation6 + $0x2a4] ss:$8 sps:$4 sm:$0xff]  }
 0x71f   : > { %v7002_v18 = vrot.slane %v6994_v32, %v16499_v21  ;;  %v8265_v10 = vld [vmem:[#allocation9 + $0xa0] sm:$0xff] }
 0x720   : > { %v16526_v51 = vcombine.low %v6923_v41, %v6930_v50  ;;  %v6965_v34 = vcombine.low %v16488_v12, %v6897_v60  ;;  %v13055_v41 = vld [vmem:[#allocation6 + $0x214] ss:$8 sps:$4 sm:$0xff]  }
 0x721   : > { %v11823_v6 = vcombine.low %v6939_v53, %v7002_v18  ;;  %v13053_v53 = vld [vmem:[#allocation6 + $0x210] ss:$8 sps:$4 sm:$0xff]   ;;  %v13058_v18 = vld [vmem:[#allocation6 + $0x224] ss:$8 sps:$4 sm:$0xff]   ;;  %v13085_v60 = vld [vmem:[#allocation6 + $0x2b4] ss:$8 sps:$4 sm:$0xff]  }
 0x722   : > { %v6993_v16 = vrot.slane %v6965_v34, %v16499_v21  ;;  %v6946_v12 = vrot.slane %v16526_v51, %v16499_v21  ;;  %v13056_v51 = vld [vmem:[#allocation6 + $0x220] ss:$8 sps:$4 sm:$0xff]   ;;  %v13083_v34 = vld [vmem:[#allocation6 + $0x2b0] ss:$8 sps:$4 sm:$0xff]  }
 0x723   : > { %v7189_v54 = vrot.slane %v11823_v6, %v16499_v21  ;;  %v13061_v6 = vld [vmem:[#allocation6 + $0x234] ss:$8 sps:$4 sm:$0xff]  }
 0x724   : > { %v6995_v5 = vcombine.low %v6986_v43, %v6993_v16  ;;  %v8277_v43 = vld [vmem:[#allocation9 + $0x100] sm:$0xff] }
 0x725   : > { %v7197_v47 = vcombine.high %v7189_v54, %v7189_v54  ;;  %v16531_v20 = vrot.slane %v7189_v54, %v16499_v21  ;;  %v13059_v54 = vld [vmem:[#allocation6 + $0x230] ss:$8 sps:$4 sm:$0xff]   ;;  %v8281_v16 = vld [vmem:[#allocation9 + $0x120] sm:$0xff] }
 0x726   : > { %v7009_v40 = vrot.slane %v6995_v5, %v16499_v21  ;;  %v12002_v5 = vcombine.high %v8277_v43, %v8281_v16 }
 0x727   : > { %v7219_v30 = vrot.slane %v7197_v47, %v16499_v21  ;;  %v7227_v32 = vcombine.high %v16531_v20, %v16531_v20  ;;  %v13064_v47 = vld [vmem:[#allocation6 + $0x244] ss:$8 sps:$4 sm:$0xff]  }
 0x728   : > { %v11824_v22 = vcombine.low %v6946_v12, %v7009_v40  ;;  %v8289_v12 = vld [vmem:[#allocation9 + $0x160] sm:$0xff]  ;;  %v12001_v40 = vcombine.low %v8277_v43, %v8281_v16 }
 0x729   : > { %8007 = vmatprep.mubr.bf16.mxu0 %v7219_v30  ;;  %v7229_v23 = vcombine.high %v7219_v30, %v7219_v30  ;;  %v13062_v30 = vld [vmem:[#allocation6 + $0x240] ss:$8 sps:$4 sm:$0xff]  }
 0x72a   : > { %8008 = vmatmul.mubr.bf16.vlgmr.msra.gmra.mrb[24].mxu0 %v16531_v20  ;;  %v16546_v63 = vrot.slane %v11824_v22, %v16499_v21  ;;  %v13065_v20 = vld [vmem:[#allocation6 + $0x250] ss:$8 sps:$4 sm:$0xff]   ;;  %v13094_v22 = vld [vmem:[#allocation6 + $0x2e4] ss:$8 sps:$4 sm:$0xff]   ;;  %v13146_v43 = vld [vmem:[#allocation6 + $0x400] ss:$8 sps:$4 sm:$0xff]  }
 0x72b   : > { %8017 = vmatpush1.bf16.msra.mxu0 %v13002_v3  ;;  %8048 = vmatprep.mubr.bf16.mxu0 %v7229_v23  ;;  %v13067_v3 = vld [vmem:[#allocation6 + $0x254] ss:$8 sps:$4 sm:$0xff]   ;;  %v13068_v23 = vld [vmem:[#allocation6 + $0x260] ss:$8 sps:$4 sm:$0xff]  }
 0x72c   : > { %8018 = vmatprep.subr.bf16.mxu0 %v13007_v24  ;;  %v7198_v8 = vcombine.high %v16546_v63, %v16546_v63  ;;  %v13070_v24 = vld [vmem:[#allocation6 + $0x264] ss:$8 sps:$4 sm:$0xff]  }
 0x72e   : > { %v16553_v50 = vrot.slane %v7198_v8, %v16499_v21 }
 0x72f   : > { %8019 = vmatpush1.bf16.msra.mxu0 %v13005_v35  ;;  %v13073_v35 = vld [vmem:[#allocation6 + $0x274] ss:$8 sps:$4 sm:$0xff]  }
 0x730   : > { %8020 = vmatprep.subr.bf16.mxu0 %v13010_v46  ;;  %v13071_v46 = vld [vmem:[#allocation6 + $0x270] ss:$8 sps:$4 sm:$0xff]  }
 0x733   : > { %8021 = vmatpush1.bf16.msra.mxu0 %v13008_v44  ;;  %v13076_v44 = vld [vmem:[#allocation6 + $0x284] ss:$8 sps:$4 sm:$0xff]  }
 0x734   : > { %8022 = vmatprep.subr.bf16.mxu0 %v13013_v57  ;;  %v13074_v57 = vld [vmem:[#allocation6 + $0x280] ss:$8 sps:$4 sm:$0xff]  }
 0x737   : > { %8023 = vmatpush1.bf16.msra.mxu0 %v13011_v29  ;;  %v13079_v29 = vld [vmem:[#allocation6 + $0x294] ss:$8 sps:$4 sm:$0xff]  }
 0x738   : > { %8024 = vmatprep.subr.bf16.mxu0 %v13016_v28  ;;  %v8245_v28 = vld [vmem:[#allocation9] sm:$0xff] }
 0x73b   : > { %8025 = vmatpush1.bf16.msra.mxu0 %v13014_v19  ;;  %v8249_v19 = vld [vmem:[#allocation9 + $0x20] sm:$0xff] }
 0x73c   : > { %8026 = vmatprep.subr.bf16.mxu0 %v13019_v52  ;;  %v8253_v52 = vld [vmem:[#allocation9 + $0x40] sm:$0xff] }
 0x73f   : > { %8027 = vmatpush1.bf16.msra.mxu0 %v13017_v62  ;;  %v13077_v62 = vld [vmem:[#allocation6 + $0x290] ss:$8 sps:$4 sm:$0xff]  }
 0x740   : > { %8028 = vmatprep.subr.bf16.mxu0 %v13022_v61  ;;  %v11969_v61 = vcombine.low %v8245_v28, %v8249_v19 }
 0x743   : > { %8029 = vmatpush1.bf16.msra.mxu0 %v13020_v9  ;;  %v11970_v9 = vcombine.high %v8245_v28, %v8249_v19  ;;  %v13118_v28 = vld [vmem:[#allocation6 + $0x364] ss:$8 sps:$4 sm:$0xff]   ;;  %v13116_v19 = vld [vmem:[#allocation6 + $0x360] ss:$8 sps:$4 sm:$0xff]  }
 0x744   : > { %8030 = vmatprep.subr.bf16.mxu0 %v13025_v1  ;;  %v8257_v1 = vld [vmem:[#allocation9 + $0x60] sm:$0xff] }
 0x745   : > { %9055 = vmatprep.subr.bf16.mxu1 %v11970_v9  ;;  %v11977_v7 = vcombine.low %v8253_v52, %v8257_v1  ;;  %v13122_v9 = vld [vmem:[#allocation6 + $0x380] ss:$8 sps:$4 sm:$0xff]  }
 0x746   : > { %9056 = vmatpush1.bf16.msra.mxu1 %v11969_v61  ;;  %v13124_v61 = vld [vmem:[#allocation6 + $0x384] ss:$8 sps:$4 sm:$0xff]  }
 0x747   : > { %8031 = vmatpush1.bf16.msra.mxu0 %v13023_v27  ;;  %v11978_v27 = vcombine.high %v8253_v52, %v8257_v1  ;;  %v13121_v52 = vld [vmem:[#allocation6 + $0x374] ss:$8 sps:$4 sm:$0xff]  }
 0x748   : > { %8032 = vmatprep.subr.bf16.mxu0 %v13028_v45  ;;  %v8261_v45 = vld [vmem:[#allocation9 + $0x80] sm:$0xff]  ;;  %v13127_v1 = vld [vmem:[#allocation6 + $0x394] ss:$8 sps:$4 sm:$0xff]  }
 0x749   : > { %9057 = vmatprep.subr.bf16.mxu1 %v11978_v27  ;;  %v11985_v17 = vcombine.low %v8261_v45, %v8265_v10  ;;  %v13130_v27 = vld [vmem:[#allocation6 + $0x3a4] ss:$8 sps:$4 sm:$0xff]  }
 0x74a   : > { %9058 = vmatpush1.bf16.msra.mxu1 %v11977_v7  ;;  %v13131_v7 = vld [vmem:[#allocation6 + $0x3b0] ss:$8 sps:$4 sm:$0xff]  }
 0x74b   : > { %8033 = vmatpush1.bf16.msra.mxu0 %v13026_v31  ;;  %v13080_v31 = vld [vmem:[#allocation6 + $0x2a0] ss:$8 sps:$4 sm:$0xff]  }
 0x74c   : > { %8034 = vmatprep.subr.bf16.mxu0 %v13031_v25  ;;  %v11986_v25 = vcombine.high %v8261_v45, %v8265_v10  ;;  %v13128_v45 = vld [vmem:[#allocation6 + $0x3a0] ss:$8 sps:$4 sm:$0xff]   ;;  %v13133_v10 = vld [vmem:[#allocation6 + $0x3b4] ss:$8 sps:$4 sm:$0xff]  }
 0x74e   : > { %9059 = vmatprep.subr.bf16.mxu1 %v11986_v25  ;;  %v13134_v25 = vld [vmem:[#allocation6 + $0x3c0] ss:$8 sps:$4 sm:$0xff]  }
 0x74f   : > { %8035 = vmatpush1.bf16.msra.mxu0 %v13029_v33  ;;  %v8269_v33 = vld [vmem:[#allocation9 + $0xc0] sm:$0xff]  ;;  %9060 = vmatpush1.bf16.msra.mxu1 %v11985_v17 }
 0x750   : > { %8036 = vmatprep.subr.bf16.mxu0 %v13034_v59  ;;  %v8273_v59 = vld [vmem:[#allocation9 + $0xe0] sm:$0xff] }
 0x751   : > { %v13140_v17 = vld [vmem:[#allocation6 + $0x3e0] ss:$8 sps:$4 sm:$0xff]  }
 0x753   : > { %8037 = vmatpush1.bf16.msra.mxu0 %v13032_v56  ;;  %v11994_v56 = vcombine.high %v8269_v33, %v8273_v59 }
 0x754   : > { %8038 = vmatprep.subr.bf16.mxu0 %v13037_v14  ;;  %v13088_v14 = vld [vmem:[#allocation6 + $0x2c4] ss:$8 sps:$4 sm:$0xff]  }
 0x755   : > { %9061 = vmatprep.subr.bf16.mxu1 %v11994_v56  ;;  %v13143_v56 = vld [vmem:[#allocation6 + $0x3f0] ss:$8 sps:$4 sm:$0xff]  }
 0x757   : > { %8039 = vmatpush1.bf16.msra.mxu0 %v13035_v11  ;;  %v11993_v11 = vcombine.low %v8269_v33, %v8273_v59  ;;  %v13137_v33 = vld [vmem:[#allocation6 + $0x3d0] ss:$8 sps:$4 sm:$0xff]   ;;  %v13142_v59 = vld [vmem:[#allocation6 + $0x3e4] ss:$8 sps:$4 sm:$0xff]  }
 0x758   : > { %8040 = vmatprep.subr.bf16.mxu0 %v13040_v36  ;;  %v13086_v36 = vld [vmem:[#allocation6 + $0x2c0] ss:$8 sps:$4 sm:$0xff]  }
 0x759   : > { %9062 = vmatpush1.bf16.msra.mxu1 %v11993_v11  ;;  %v13151_v11 = vld [vmem:[#allocation6 + $0x414] ss:$8 sps:$4 sm:$0xff]  }
 0x75a   : > { %9063 = vmatprep.subr.bf16.mxu1 %v12002_v5  ;;  %v13154_v5 = vld [vmem:[#allocation6 + $0x424] ss:$8 sps:$4 sm:$0xff]  }
 0x75b   : > { %8041 = vmatpush1.bf16.msra.mxu0 %v13038_v42  ;;  %v13091_v42 = vld [vmem:[#allocation6 + $0x2d4] ss:$8 sps:$4 sm:$0xff]  }
 0x75c   : > { %8042 = vmatprep.subr.bf16.mxu0 %v13043_v4  ;;  %v8285_v4 = vld [vmem:[#allocation9 + $0x140] sm:$0xff] }
 0x75d   : > { %9064 = vmatpush1.bf16.msra.mxu1 %v12001_v40  ;;  %v13160_v40 = vld [vmem:[#allocation6 + $0x444] ss:$8 sps:$4 sm:$0xff]  }
 0x75f   : > { %8043 = vmatpush1.bf16.msra.mxu0 %v13041_v39  ;;  %v13089_v39 = vld [vmem:[#allocation6 + $0x2d0] ss:$8 sps:$4 sm:$0xff]  }
 0x760   : > { %8044 = vmatprep.subr.bf16.mxu0 %v13046_v13  ;;  %v12010_v13 = vcombine.high %v8285_v4, %v8289_v12 }
 0x762   : > { %9065 = vmatprep.subr.bf16.mxu1 %v12010_v13  ;;  %v13163_v13 = vld [vmem:[#allocation6 + $0x454] ss:$8 sps:$4 sm:$0xff]  }
 0x763   : > { %8045 = vmatpush1.bf16.msra.mxu0 %v13044_v37  ;;  %v8293_v37 = vld [vmem:[#allocation9 + $0x180] sm:$0xff] }
 0x764   : > { %8046 = vmatprep.subr.bf16.mxu0 %v13049_v49  ;;  %v8297_v49 = vld [vmem:[#allocation9 + $0x1a0] sm:$0xff] }
 0x765   : > { %v12018_v8 = vcombine.high %v8293_v37, %v8297_v49 }
 0x767   : > { %8047 = vmatpush1.bf16.msra.mxu0 %v13047_v15  ;;  %v12009_v15 = vcombine.low %v8285_v4, %v8289_v12  ;;  %v13157_v4 = vld [vmem:[#allocation6 + $0x434] ss:$8 sps:$4 sm:$0xff]   ;;  %v13155_v12 = vld [vmem:[#allocation6 + $0x430] ss:$8 sps:$4 sm:$0xff]  }
 0x768   : > { %8057 = vmatprep.subr.bf16.mxu0 %v13052_v26  ;;  %v13092_v26 = vld [vmem:[#allocation6 + $0x2e0] ss:$8 sps:$4 sm:$0xff]  }
 0x769   : > { %9066 = vmatpush1.bf16.msra.mxu1 %v12009_v15  ;;  %v13167_v15 = vld [vmem:[#allocation6 + $0x470] ss:$8 sps:$4 sm:$0xff]  }
 0x76a   : > { %8049 = vmatmul.mubr.bf16.vlgmr.msra.gmra.mrb[24].mxu0 %v7227_v32  ;;  %v8301_v32 = vld [vmem:[#allocation9 + $0x1c0] sm:$0xff]  ;;  %9067 = vmatprep.subr.bf16.mxu1 %v12018_v8 }
 0x76b   : > { %8058 = vmatpush1.bf16.msra.mxu0 %v13050_v38  ;;  %8089 = vmatprep.mubr.bf16.mxu0 %v16553_v50  ;;  %v13097_v38 = vld [vmem:[#allocation6 + $0x2f4] ss:$8 sps:$4 sm:$0xff]  }
 0x76c   : > { %8059 = vmatprep.subr.bf16.mxu0 %v13055_v41  ;;  %v8305_v41 = vld [vmem:[#allocation9 + $0x1e0] sm:$0xff] }
 0x76f   : > { %8060 = vmatpush1.bf16.msra.mxu0 %v13053_v53  ;;  %v12017_v53 = vcombine.low %v8293_v37, %v8297_v49  ;;  %v13166_v37 = vld [vmem:[#allocation6 + $0x464] ss:$8 sps:$4 sm:$0xff]   ;;  %v13169_v49 = vld [vmem:[#allocation6 + $0x474] ss:$8 sps:$4 sm:$0xff]  }
 0x770   : > { %8061 = vmatprep.subr.bf16.mxu0 %v13058_v18  ;;  %v13095_v18 = vld [vmem:[#allocation6 + $0x2f0] ss:$8 sps:$4 sm:$0xff]  }
 0x771   : > { %9068 = vmatpush1.bf16.msra.mxu1 %v12017_v53 }
 0x773   : > { %8062 = vmatpush1.bf16.msra.mxu0 %v13056_v51  ;;  %v12026_v51 = vcombine.high %v8301_v32, %v8305_v41 }
 0x774   : > { %8063 = vmatprep.subr.bf16.mxu0 %v13061_v6  ;;  %v13100_v6 = vld [vmem:[#allocation6 + $0x304] ss:$8 sps:$4 sm:$0xff]  }
 0x775   : > { %9069 = vmatprep.subr.bf16.mxu1 %v12026_v51  ;;  %v8321_v51 = vld [vmem:[#allocation9 + $0x260] sm:$0xff] }
 0x777   : > { %8064 = vmatpush1.bf16.msra.mxu0 %v13059_v54  ;;  %v12025_v54 = vcombine.low %v8301_v32, %v8305_v41  ;;  %v8313_v32 = vld [vmem:[#allocation9 + $0x220] sm:$0xff] }
 0x778   : > { %8065 = vmatprep.subr.bf16.mxu0 %v13064_v47  ;;  %v13098_v47 = vld [vmem:[#allocation6 + $0x300] ss:$8 sps:$4 sm:$0xff]  }
 0x779   : > { %9070 = vmatpush1.bf16.msra.mxu1 %v12025_v54  ;;  %v8317_v41 = vld [vmem:[#allocation9 + $0x240] sm:$0xff] }
 0x77a   : > { %v8325_v54 = vld [vmem:[#allocation9 + $0x280] sm:$0xff] }
 0x77b   : > { %8066 = vmatpush1.bf16.msra.mxu0 %v13062_v30  ;;  %v16558_v30 = vrot.slane %v16546_v63, %v16499_v21  ;;  %v13107_v63 = vld [vmem:[#allocation6 + $0x330] ss:$8 sps:$4 sm:$0xff]  }
 0x77c   : > { %8067 = vmatprep.subr.bf16.mxu0 %v13067_v3  ;;  %v13103_v3 = vld [vmem:[#allocation6 + $0x314] ss:$8 sps:$4 sm:$0xff]  }
 0x77d   : > { %v7228_v16 = vcombine.high %v16558_v30, %v16558_v30 }
 0x77f   : > { %8068 = vmatpush1.bf16.msra.mxu0 %v13065_v20  ;;  %v7230_v20 = vcombine.high %v16553_v50, %v16553_v50  ;;  %v13115_v50 = vld [vmem:[#allocation6 + $0x354] ss:$8 sps:$4 sm:$0xff]  }
 0x780   : > { %8069 = vmatprep.subr.bf16.mxu0 %v13070_v24  ;;  %v13101_v24 = vld [vmem:[#allocation6 + $0x310] ss:$8 sps:$4 sm:$0xff]  }
 0x783   : > { %8070 = vmatpush1.bf16.msra.mxu0 %v13068_v23  ;;  %v13106_v23 = vld [vmem:[#allocation6 + $0x324] ss:$8 sps:$4 sm:$0xff]  }
 0x784   : > { %8071 = vmatprep.subr.bf16.mxu0 %v13073_v35  ;;  %v13104_v35 = vld [vmem:[#allocation6 + $0x320] ss:$8 sps:$4 sm:$0xff]  }
 0x787   : > { %8072 = vmatpush1.bf16.msra.mxu0 %v13071_v46  ;;  %v13109_v46 = vld [vmem:[#allocation6 + $0x334] ss:$8 sps:$4 sm:$0xff]  }
 0x788   : > { %8073 = vmatprep.subr.bf16.mxu0 %v13076_v44  ;;  %v13112_v44 = vld [vmem:[#allocation6 + $0x344] ss:$8 sps:$4 sm:$0xff]  }
 0x78b   : > { %8074 = vmatpush1.bf16.msra.mxu0 %v13074_v57  ;;  %v13110_v57 = vld [vmem:[#allocation6 + $0x340] ss:$8 sps:$4 sm:$0xff]  }
 0x78c   : > { %8075 = vmatprep.subr.bf16.mxu0 %v13079_v29  ;;  %v13113_v29 = vld [vmem:[#allocation6 + $0x350] ss:$8 sps:$4 sm:$0xff]  }
 0x78f   : > { %8076 = vmatpush1.bf16.msra.mxu0 %v13077_v62  ;;  %v13119_v62 = vld [vmem:[#allocation6 + $0x370] ss:$8 sps:$4 sm:$0xff]  }
 0x790   : > { %8077 = vmatprep.subr.bf16.mxu0 %v13082_v58  ;;  %v13125_v58 = vld [vmem:[#allocation6 + $0x390] ss:$8 sps:$4 sm:$0xff]  }
 0x793   : > { %8078 = vmatpush1.bf16.msra.mxu0 %v13080_v31  ;;  %v13136_v31 = vld [vmem:[#allocation6 + $0x3c4] ss:$8 sps:$4 sm:$0xff]  }
 0x794   : > { %8079 = vmatprep.subr.bf16.mxu0 %v13085_v60  ;;  %v13139_v60 = vld [vmem:[#allocation6 + $0x3d4] ss:$8 sps:$4 sm:$0xff]  }
 0x797   : > { %8080 = vmatpush1.bf16.msra.mxu0 %v13083_v34  ;;  %v13145_v34 = vld [vmem:[#allocation6 + $0x3f4] ss:$8 sps:$4 sm:$0xff]  }
 0x798   : > { %8081 = vmatprep.subr.bf16.mxu0 %v13088_v14  ;;  %v13148_v14 = vld [vmem:[#allocation6 + $0x404] ss:$8 sps:$4 sm:$0xff]  }
 0x79b   : > { %8082 = vmatpush1.bf16.msra.mxu0 %v13086_v36  ;;  %v13149_v36 = vld [vmem:[#allocation6 + $0x410] ss:$8 sps:$4 sm:$0xff]  }
 0x79c   : > { %8083 = vmatprep.subr.bf16.mxu0 %v13091_v42  ;;  %v13152_v42 = vld [vmem:[#allocation6 + $0x420] ss:$8 sps:$4 sm:$0xff]  }
 0x79f   : > { %8084 = vmatpush1.bf16.msra.mxu0 %v13089_v39  ;;  %v13158_v39 = vld [vmem:[#allocation6 + $0x440] ss:$8 sps:$4 sm:$0xff]  }
 0x7a0   : > { %8085 = vmatprep.subr.bf16.mxu0 %v13094_v22  ;;  %v13161_v22 = vld [vmem:[#allocation6 + $0x450] ss:$8 sps:$4 sm:$0xff]  }
 0x7a3   : > { %8086 = vmatpush1.bf16.msra.mxu0 %v13092_v26  ;;  %v7238_v26 = vrot.slane %v16520_v48, %v16499_v21  ;;  %v8337_v48 = vld [vmem:[#allocation9 + $0x2e0] sm:$0xff] }
 0x7a4   : > { %8087 = vmatprep.subr.bf16.mxu0 %v13097_v38  ;;  %v8309_v38 = vld [vmem:[#allocation9 + $0x200] sm:$0xff] }
 0x7a5   : > { %v7245_v8 = vrot.slane %v7238_v26, %v16499_v21  ;;  %v12033_v53 = vcombine.low %v8309_v38, %v8313_v32 }
 0x7a7   : > { %8088 = vmatpush1.bf16.msra.mxu0 %v13095_v18  ;;  %v12034_v18 = vcombine.high %v8309_v38, %v8313_v32 }
 0x7a8   : > { %8098 = vmatprep.subr.bf16.mxu0 %v13100_v6  ;;  %v12042_v6 = vcombine.high %v8317_v41, %v8321_v51 }
 0x7a9   : > { %9071 = vmatprep.subr.bf16.mxu1 %v12034_v18 }
 0x7aa   : > { %8090 = vmatmul.mubr.bf16.vlgmr.msra.gmra.mrb[24].mxu0 %v16558_v30  ;;  %9072 = vmatpush1.bf16.msra.mxu1 %v12033_v53  ;;  %v12041_v30 = vcombine.low %v8317_v41, %v8321_v51 }
 0x7ab   : > { %8099 = vmatpush1.bf16.msra.mxu0 %v13098_v47  ;;  %8130 = vmatprep.mubr.bf16.mxu0 %v7230_v20  ;;  %v8329_v47 = vld [vmem:[#allocation9 + $0x2a0] sm:$0xff] }
 0x7ac   : > { %8100 = vmatprep.subr.bf16.mxu0 %v13103_v3  ;;  %9073 = vmatprep.subr.bf16.mxu1 %v12042_v6  ;;  %v12050_v3 = vcombine.high %v8325_v54, %v8329_v47  ;;  %v8333_v20 = vld [vmem:[#allocation9 + $0x2c0] sm:$0xff] }
 0x7ad   : > { %v12058_v21 = vcombine.high %v8333_v20, %v8337_v48 }
 0x7ae   : > { %9074 = vmatpush1.bf16.msra.mxu1 %v12041_v30 }
 0x7af   : > { %8101 = vmatpush1.bf16.msra.mxu0 %v13101_v24  ;;  %v12049_v24 = vcombine.low %v8325_v54, %v8329_v47  ;;  %9075 = vmatprep.subr.bf16.mxu1 %v12050_v3 }
 0x7b0   : > { %8102 = vmatprep.subr.bf16.mxu0 %v13106_v23  ;;  %v8341_v23 = vld [vmem:[#allocation9 + $0x300] sm:$0xff] }
 0x7b2   : > { %9076 = vmatpush1.bf16.msra.mxu1 %v12049_v24 }
 0x7b3   : > { %8103 = vmatpush1.bf16.msra.mxu0 %v13104_v35  ;;  %v8345_v35 = vld [vmem:[#allocation9 + $0x320] sm:$0xff]  ;;  %9077 = vmatprep.subr.bf16.mxu1 %v12058_v21 }
 0x7b4   : > { %8104 = vmatprep.subr.bf16.mxu0 %v13109_v46  ;;  %v12057_v46 = vcombine.low %v8333_v20, %v8337_v48 }
 0x7b6   : > { %9078 = vmatpush1.bf16.msra.mxu1 %v12057_v46 }
 0x7b7   : > { %8105 = vmatpush1.bf16.msra.mxu0 %v13107_v63  ;;  %v12066_v63 = vcombine.high %v8341_v23, %v8345_v35 }
 0x7b8   : > { %8106 = vmatprep.subr.bf16.mxu0 %v13112_v44  ;;  %v8349_v44 = vld [vmem:[#allocation9 + $0x340] sm:$0xff] }
 0x7b9   : > { %9079 = vmatprep.subr.bf16.mxu1 %v12066_v63 }
 0x7bb   : > { %8107 = vmatpush1.bf16.msra.mxu0 %v13110_v57  ;;  %v8353_v57 = vld [vmem:[#allocation9 + $0x360] sm:$0xff] }
 0x7bc   : > { %8108 = vmatprep.subr.bf16.mxu0 %v13115_v50  ;;  %v12065_v50 = vcombine.low %v8341_v23, %v8345_v35 }
 0x7be   : > { %9080 = vmatpush1.bf16.msra.mxu1 %v12065_v50 }
 0x7bf   : > { %8109 = vmatpush1.bf16.msra.mxu0 %v13113_v29  ;;  %v16569_v29 = vld [vmem:[#allocation9 + $0x8] sm:$0xff] }
 0x7c0   : > { %8110 = vmatprep.subr.bf16.mxu0 %v13118_v28  ;;  %v16571_v28 = vld [vmem:[#allocation9 + $0x28] sm:$0xff] }
 0x7c3   : > { %8111 = vmatpush1.bf16.msra.mxu0 %v13116_v19  ;;  %v12074_v19 = vcombine.high %v8349_v44, %v8353_v57 }
 0x7c4   : > { %8112 = vmatprep.subr.bf16.mxu0 %v13121_v52  ;;  %v11971_v52 = vcombine.low %v16569_v29, %v16571_v28 }
 0x7c5   : > { %9081 = vmatprep.subr.bf16.mxu1 %v12074_v19 }
 0x7c7   : > { %8113 = vmatpush1.bf16.msra.mxu0 %v13119_v62  ;;  %v8357_v62 = vld [vmem:[#allocation9 + $0x380] sm:$0xff] }
 0x7c8   : > { %8114 = vmatprep.subr.bf16.mxu0 %v13124_v61  ;;  %v8361_v61 = vld [vmem:[#allocation9 + $0x3a0] sm:$0xff] }
 0x7cb   : > { %8115 = vmatpush1.bf16.msra.mxu0 %v13122_v9  ;;  %v12073_v9 = vcombine.low %v8349_v44, %v8353_v57 }
 0x7cc   : > { %8116 = vmatprep.subr.bf16.mxu0 %v13127_v1  ;;  %v12082_v1 = vcombine.high %v8357_v62, %v8361_v61 }
 0x7cd   : > { %9082 = vmatpush1.bf16.msra.mxu1 %v12073_v9 }
 0x7ce   : > { %9083 = vmatprep.subr.bf16.mxu1 %v12082_v1 }
 0x7cf   : > { %8117 = vmatpush1.bf16.msra.mxu0 %v13125_v58  ;;  %v8365_v58 = vld [vmem:[#allocation9 + $0x3c0] sm:$0xff] }
 0x7d0   : > { %8118 = vmatprep.subr.bf16.mxu0 %v13130_v27  ;;  %v8369_v27 = vld [vmem:[#allocation9 + $0x3e0] sm:$0xff] }
 0x7d3   : > { %8119 = vmatpush1.bf16.msra.mxu0 %v13128_v45  ;;  %v12081_v45 = vcombine.low %v8357_v62, %v8361_v61  ;;  %v8254_v62 = vld [vmem:[#allocation9 + $0x48] sm:$0xff] }
 0x7d4   : > { %8120 = vmatprep.subr.bf16.mxu0 %v13133_v10  ;;  %v12090_v10 = vcombine.high %v8365_v58, %v8369_v27  ;;  %v8258_v61 = vld [vmem:[#allocation9 + $0x68] sm:$0xff] }
 0x7d5   : > { %9084 = vmatpush1.bf16.msra.mxu1 %v12081_v45  ;;  %v8266_v45 = vld [vmem:[#allocation9 + $0xa8] sm:$0xff] }
 0x7d6   : > { %9085 = vmatprep.subr.bf16.mxu1 %v12090_v10  ;;  %v11979_v10 = vcombine.low %v8254_v62, %v8258_v61 }
 0x7d7   : > { %8121 = vmatpush1.bf16.msra.mxu0 %v13131_v7  ;;  %v12089_v7 = vcombine.low %v8365_v58, %v8369_v27  ;;  %v11980_v58 = vcombine.high %v8254_v62, %v8258_v61  ;;  %v8262_v27 = vld [vmem:[#allocation9 + $0x88] sm:$0xff] }
 0x7d8   : > { %8122 = vmatprep.subr.bf16.mxu0 %v13136_v31  ;;  %v11972_v31 = vcombine.high %v16569_v29, %v16571_v28  ;;  %v8290_v29 = vld [vmem:[#allocation9 + $0x168] sm:$0xff] }
 0x7d9   : > { %9086 = vmatpush1.bf16.msra.mxu1 %v12089_v7  ;;  %v11988_v7 = vcombine.high %v8262_v27, %v8266_v45 }
 0x7da   : > { %9096 = vmatprep.subr.bf16.mxu1 %v11972_v31  ;;  %v8270_v31 = vld [vmem:[#allocation9 + $0xc8] sm:$0xff] }
 0x7db   : > { %8123 = vmatpush1.bf16.msra.mxu0 %v13134_v25  ;;  %v16578_v25 = vsub.s32 0, %v14962_v55 }
 0x7dc   : > { %8124 = vmatprep.subr.bf16.mxu0 %v13139_v60  ;;  %v7169_v60 = vld [vmem:[%s16810_s8] sm:$0x3] }
 0x7df   : > { %8125 = vmatpush1.bf16.msra.mxu0 %v13137_v33  ;;  %v16584_v33 = vsub.s32 1, %v14962_v55 }
 0x7e0   : > { %8126 = vmatprep.subr.bf16.mxu0 %v13142_v59  ;;  %v7174_v59 = vrot.slane %v7169_v60, %v16578_v25 }
 0x7e3   : > { %8127 = vmatpush1.bf16.msra.mxu0 %v13140_v17  ;;  %v7178_v17 = vrot.slane %v7169_v60, %v16584_v33  ;;  %v8274_v60 = vld [vmem:[#allocation9 + $0xe8] sm:$0xff] }
 0x7e4   : > { %8128 = vmatprep.subr.bf16.mxu0 %v13145_v34 }
 0x7e7   : > { %8129 = vmatpush1.bf16.msra.mxu0 %v13143_v56 }
 0x7e8   : > { %8139 = vmatprep.subr.bf16.mxu0 %v13148_v14 }
 0x7ea   : > { %8131 = vmatmul.mubr.bf16.vlgmr.msra.gmra.mrb[24].mxu0 %v7228_v16 }
 0x7eb   : > { %8140 = vmatpush1.bf16.msra.mxu0 %v13146_v43  ;;  %8171 = vmatprep.mubr.bf16.mxu0 %v13773_v0  ;;  %v13164_v0 = vld [vmem:[#allocation6 + $0x460] ss:$8 sps:$4 sm:$0xff]  }
 0x7ec   : > { %8141 = vmatprep.subr.bf16.mxu0 %v13151_v11 }
 0x7ef   : > { %8142 = vmatpush1.bf16.msra.mxu0 %v13149_v36 }
 0x7f0   : > { %8143 = vmatprep.subr.bf16.mxu0 %v13154_v5 }
 0x7f3   : > { %8144 = vmatpush1.bf16.msra.mxu0 %v13152_v42 }
 0x7f4   : > { %8145 = vmatprep.subr.bf16.mxu0 %v13157_v4 }
 0x7f7   : > { %8146 = vmatpush1.bf16.msra.mxu0 %v13155_v12 }
 0x7f8   : > { %8147 = vmatprep.subr.bf16.mxu0 %v13160_v40 }
 0x7fb   : > { %8148 = vmatpush1.bf16.msra.mxu0 %v13158_v39 }
 0x7fc   : > { %8149 = vmatprep.subr.bf16.mxu0 %v13163_v13 }
 0x7ff   : > { %8150 = vmatpush1.bf16.msra.mxu0 %v13161_v22 }
 0x800   : > { %8151 = vmatprep.subr.bf16.mxu0 %v13166_v37 }
 0x803   : > { %8152 = vmatpush1.bf16.msra.mxu0 %v13164_v0 }
 0x804   : > { %8153 = vmatprep.subr.bf16.mxu0 %v13169_v49 }
 0x807   : > { %8154 = vmatpush1.bf16.msra.mxu0 %v13167_v15 }
 0x80a   : > { %8172 = vmatmul.mubr.bf16.vlgmr.msra.gmra.mrb[24].mxu0 %v7245_v8 }
 0x8dd   : > { %v8173_v34 = vpop.f32.mrb[24].mxu0 }
 0x8de   : > { %v12698_v56 = vadd.f32 %v8173_v34, %v7174_v59  ;;  %v8175_v14 = vpop.f32.mrb[25].mxu0  ;;  %v11987_v59 = vcombine.low %v8262_v27, %v8266_v45  ;;  %v8278_v34 = vld [vmem:[#allocation9 + $0x108] sm:$0xff] }
 0x8df   : > { %v12699_v43 = vadd.f32 %v8175_v14, %v7178_v17  ;;  %v8177_v16 = vpop.f32.mrb[26].mxu0  ;;  %v11996_v17 = vcombine.high %v8270_v31, %v8274_v60  ;;  %v11995_v14 = vcombine.low %v8270_v31, %v8274_v60  ;;  %v13187_v27 = vld [vmem:[#allocation11 + $0xac] ss:$16 sps:$4 sm:$0xff]   ;;  %v13188_v60 = vld [vmem:[#allocation11 + $0xc8] ss:$16 sps:$4 sm:$0xff]  }
 0x8e0   : > { %v8180_v11 = vmax.f32 %v12698_v56, 0.0  ;;  %v8178_v36 = vpop.f32.mrb[27].mxu0  ;;  %v8282_v56 = vld [vmem:[#allocation9 + $0x128] sm:$0xff] }
 0x8e1   : > { %v8181_v5 = vmax.f32 %v12699_v43, 0.0  ;;  %v12004_v43 = vcombine.high %v8278_v34, %v8282_v56  ;;  %v8286_v16 = vld [vmem:[#allocation9 + $0x148] sm:$0xff]  ;;  %v12003_v28 = vcombine.low %v8278_v34, %v8282_v56 }
 0x8e2   : > { %v8298_v36 = vld [vmem:[#allocation9 + $0x1a8] sm:$0xff] }
 0x8e3   : > { %v8184_v42 = vcombine.low %v8180_v11, %v8181_v5  ;;  %v8294_v11 = vld [vmem:[#allocation9 + $0x188] sm:$0xff]  ;;  %v12011_v5 = vcombine.low %v8286_v16, %v8290_v29 }
 0x8e4   : > { %v8358_v45 = vld [vmem:[#allocation9 + $0x388] sm:$0xff] }
 0x8e5   : > { %v8191_v4 = vrot.slane %v8184_v42, %v14978_v2  ;;  %v12020_v42 = vcombine.high %v8294_v11, %v8298_v36  ;;  %v8370_v34 = vld [vmem:[#allocation9 + $0x3e8] sm:$0xff] }
 0x8e7   : > { %v8192_v12 = vcombine.high %v8191_v4, %v8191_v4  ;;  %v8199_v40 = vrot.slane %v8191_v4, %v14978_v2  ;;  %v8302_v4 = vld [vmem:[#allocation9 + $0x1c8] sm:$0xff] }
 0x8e9   : > { %v8200_v39 = vcombine.high %v8199_v40, %v8199_v40  ;;  %v8207_v13 = vrot.slane %v8192_v12, %v14978_v2  ;;  %v8213_v22 = vsel %vm6664_vm10, %v8199_v40, -inf  ;;  %v8306_v12 = vld [vmem:[#allocation9 + $0x1e8] sm:$0xff]  ;;  %v12019_v40 = vcombine.low %v8294_v11, %v8298_v36 }
 0x8ea   : > { %v8214_v37 = vrot.slane %v8213_v22, 4  ;;  %v13194_v36 = vld [vmem:[#allocation11 + $0x108] ss:$16 sps:$4 sm:$0xff]  }
 0x8eb   : > { %v8208_v0 = vcombine.high %v8207_v13, %v8207_v13  ;;  %v8220_v49 = vsel %vm6664_vm10, %v8200_v39, -inf  ;;  %v8227_v15 = vsel %vm6664_vm10, %v8207_v13, -inf  ;;  %v12028_v39 = vcombine.high %v8302_v4, %v8306_v12  ;;  %v8310_v13 = vld [vmem:[#allocation9 + $0x208] sm:$0xff] }
 0x8ec   : > { %v8215_v26 = vmax.f32 %v8213_v22, %v8214_v37  ;;  %v8221_v8 = vrot.slane %v8220_v49, 4  ;;  %v8228_v38 = vrot.slane %v8227_v15, 4  ;;  %v8314_v22 = vld [vmem:[#allocation9 + $0x228] sm:$0xff]  ;;  %v12027_v37 = vcombine.low %v8302_v4, %v8306_v12  ;;  %v8259_v4 = vld [vmem:[#allocation9 + $0x70] sm:$0xff] }
 0x8ed   : > { %v8234_v32 = vsel %vm6664_vm10, %v8208_v0, -inf  ;;  %v12036_v0 = vcombine.high %v8310_v13, %v8314_v22 }
 0x8ee   : > { %v8216_v41 = vrot.slane %v8215_v26, 2  ;;  %v8222_v53 = vmax.f32 %v8220_v49, %v8221_v8  ;;  %v8229_v18 = vmax.f32 %v8227_v15, %v8228_v38  ;;  %v8235_v51 = vrot.slane %v8234_v32, 4  ;;  %v13170_v49 = vld [vmem:[#allocation11 + $0x8] ss:$16 sps:$4 sm:$0xff]   ;;  %v13172_v15 = vld [vmem:[#allocation11 + $0xc] ss:$16 sps:$4 sm:$0xff]  }
 0x8ef   : > { %v8322_v8 = vld [vmem:[#allocation9 + $0x268] sm:$0xff]  ;;  %10957 = vmatprep.subr.bf16.mxu0 %v13172_v15  ;;  %v12035_v38 = vcombine.low %v8310_v13, %v8314_v22  ;;  %v8267_v13 = vld [vmem:[#allocation9 + $0xb0] sm:$0xff] }
 0x8f0   : > { %v8223_v6 = vrot.slane %v8222_v53, 2  ;;  %v8236_v54 = vmax.f32 %v8234_v32, %v8235_v51  ;;  %v8217_v2 = vmax.f32 %v8215_v26, %v8216_v41  ;;  %v8230_v47 = vrot.slane %v8229_v18, 2  ;;  %v8318_v26 = vld [vmem:[#allocation9 + $0x248] sm:$0xff]  ;;  %10958 = vmatpush1.bf16.msra.mxu0 %v13170_v49 }
 0x8f1   : > { %v12044_v32 = vcombine.high %v8318_v26, %v8322_v8  ;;  %v13173_v41 = vld [vmem:[#allocation11 + $0x28] ss:$16 sps:$4 sm:$0xff]   ;;  %v13208_v15 = vld [vmem:[#allocation11 + $0x14c] ss:$16 sps:$4 sm:$0xff]  }
 0x8f2   : > { %v8224_v30 = vmax.f32 %v8222_v53, %v8223_v6  ;;  %v8237_v3 = vrot.slane %v8236_v54, 2  ;;  %v8231_v20 = vmax.f32 %v8229_v18, %v8230_v47  ;;  %v8218_v48 = vrot.slane %v8217_v2, 1  ;;  %v13175_v53 = vld [vmem:[#allocation11 + $0x2c] ss:$16 sps:$4 sm:$0xff]   ;;  %v13200_v22 = vld [vmem:[#allocation11 + $0x128] ss:$16 sps:$4 sm:$0xff]  }
 0x8f3   : > { %v8326_v18 = vld [vmem:[#allocation9 + $0x288] sm:$0xff]  ;;  %10959 = vmatprep.subr.bf16.mxu0 %v13175_v53  ;;  %v12043_v6 = vcombine.low %v8318_v26, %v8322_v8  ;;  %v8271_v26 = vld [vmem:[#allocation9 + $0xd0] sm:$0xff] }
 0x8f4   : > { %v8225_v24 = vrot.slane %v8224_v30, 1  ;;  %v8238_v21 = vmax.f32 %v8236_v54, %v8237_v3  ;;  %v8232_v23 = vrot.slane %v8231_v20, 1  ;;  %v8219_v63 = vmax.f32 %v8217_v2, %v8218_v48  ;;  %v8330_v51 = vld [vmem:[#allocation9 + $0x2a8] sm:$0xff]  ;;  %10960 = vmatpush1.bf16.msra.mxu0 %v13173_v41  ;;  %v8275_v8 = vld [vmem:[#allocation9 + $0xf0] sm:$0xff] }
 0x8f5   : > { %v12052_v54 = vcombine.high %v8326_v18, %v8330_v51  ;;  %v13176_v2 = vld [vmem:[#allocation11 + $0x48] ss:$16 sps:$4 sm:$0xff]   ;;  %v13178_v47 = vld [vmem:[#allocation11 + $0x4c] ss:$16 sps:$4 sm:$0xff]   ;;  %v11998_v41 = vcombine.high %v8271_v26, %v8275_v8 }
 0x8f6   : > { %v8239_v35 = vrot.slane %v8238_v21, 1  ;;  %v8233_v46 = vmax.f32 %v8231_v20, %v8232_v23  ;;  %v8226_v44 = vmax.f32 %v8224_v30, %v8225_v24  ;;  %v8334_v30 = vld [vmem:[#allocation9 + $0x2c8] sm:$0xff]  ;;  %10961 = vmatprep.subr.bf16.mxu0 %v13178_v47  ;;  %v12051_v20 = vcombine.low %v8326_v18, %v8330_v51  ;;  %v8279_v18 = vld [vmem:[#allocation9 + $0x110] sm:$0xff] }
 0x8f7   : > { %v8338_v3 = vld [vmem:[#allocation9 + $0x2e8] sm:$0xff]  ;;  %v8283_v51 = vld [vmem:[#allocation9 + $0x130] sm:$0xff] }
 0x8f8   : > { %v8240_v57 = vmax.f32 %v8238_v21, %v8239_v35  ;;  %v8241_v50 = vmax.f32 %v8219_v63, %v8233_v46  ;;  %10962 = vmatpush1.bf16.msra.mxu0 %v13176_v2  ;;  %v12060_v48 = vcombine.high %v8334_v30, %v8338_v3  ;;  %v13179_v24 = vld [vmem:[#allocation11 + $0x68] ss:$16 sps:$4 sm:$0xff]   ;;  %v13181_v21 = vld [vmem:[#allocation11 + $0x6c] ss:$16 sps:$4 sm:$0xff]   ;;  %v12059_v46 = vcombine.low %v8334_v30, %v8338_v3  ;;  %v8287_v30 = vld [vmem:[#allocation9 + $0x150] sm:$0xff] }
 0x8f9   : > { %v8342_v23 = vld [vmem:[#allocation9 + $0x308] sm:$0xff]  ;;  %10963 = vmatprep.subr.bf16.mxu0 %v13181_v21  ;;  %v12006_v2 = vcombine.high %v8279_v18, %v8283_v51  ;;  %v8291_v3 = vld [vmem:[#allocation9 + $0x170] sm:$0xff] }
 0x8fa   : > { %v8242_v19 = vmax.f32 %v8226_v44, %v8240_v57  ;;  %v16597_v1 = vpack.c.bf16 %v8241_v50, %v8241_v50  ;;  %v8346_v35 = vld [vmem:[#allocation9 + $0x328] sm:$0xff] }
 0x8fb   : > { %v12068_v63 = vcombine.high %v8342_v23, %v8346_v35  ;;  %v13182_v44 = vld [vmem:[#allocation11 + $0x88] ss:$16 sps:$4 sm:$0xff]   ;;  %v13184_v57 = vld [vmem:[#allocation11 + $0x8c] ss:$16 sps:$4 sm:$0xff]   ;;  %v12067_v62 = vcombine.low %v8342_v23, %v8346_v35  ;;  %v8295_v23 = vld [vmem:[#allocation9 + $0x190] sm:$0xff] }
 0x8fc   : > { %v16595_v9 = vpack.c.bf16 %v8242_v19, %v8242_v19  ;;  %10964 = vmatpush1.bf16.msra.mxu0 %v13179_v24  ;;  %v8350_v50 = vld [vmem:[#allocation9 + $0x348] sm:$0xff]  ;;  %v12014_v24 = vcombine.high %v8287_v30, %v8291_v3  ;;  %v8299_v35 = vld [vmem:[#allocation9 + $0x1b0] sm:$0xff] }
 0x8fd   : > { %v8354_v19 = vld [vmem:[#allocation9 + $0x368] sm:$0xff]  ;;  %10965 = vmatprep.subr.bf16.mxu0 %v13184_v57  ;;  %v8303_v57 = vld [vmem:[#allocation9 + $0x1d0] sm:$0xff] }
 0x8fe   : > { %9087 = vmatprep.mubr.bf16.mxu1 %v16595_v9  ;;  %v12076_v61 = vcombine.high %v8350_v50, %v8354_v19  ;;  %v13214_v53 = vld [vmem:[#allocation11 + $0x16c] ss:$16 sps:$4 sm:$0xff]  }
 0x8ff   : > { %9088 = vmatmul.mubr.bf16.vlgmr.msra.gmra.mrb[44].mxu1 %v16597_v1  ;;  %v13220_v47 = vld [vmem:[#allocation11 + $0x18c] ss:$16 sps:$4 sm:$0xff]  }
 0x900   : > { %9097 = vmatpush1.bf16.msra.mxu1 %v11971_v52  ;;  %9128 = vmatprep.mubr.bf16.mxu1 %v16595_v9  ;;  %v12012_v52 = vcombine.high %v8286_v16, %v8290_v29  ;;  %v13193_v16 = vld [vmem:[#allocation11 + $0xec] ss:$16 sps:$4 sm:$0xff]   ;;  %v8247_v29 = vld [vmem:[#allocation9 + $0x10] sm:$0xff] }
 0x901   : > { %9098 = vmatprep.subr.bf16.mxu1 %v11980_v58  ;;  %10966 = vmatpush1.bf16.msra.mxu0 %v13182_v44  ;;  %v13185_v58 = vld [vmem:[#allocation11 + $0xa8] ss:$16 sps:$4 sm:$0xff]   ;;  %v13226_v21 = vld [vmem:[#allocation11 + $0x1ac] ss:$16 sps:$4 sm:$0xff]   ;;  %v12022_v44 = vcombine.high %v8295_v23, %v8299_v35 }
 0x902   : > { %10967 = vmatprep.subr.bf16.mxu0 %v13187_v27  ;;  %v13230_v27 = vld [vmem:[#allocation11 + $0x1c8] ss:$16 sps:$4 sm:$0xff]  }
 0x904   : > { %9099 = vmatpush1.bf16.msra.mxu1 %v11979_v10  ;;  %v8362_v10 = vld [vmem:[#allocation9 + $0x3a8] sm:$0xff] }
 0x905   : > { %9100 = vmatprep.subr.bf16.mxu1 %v11988_v7  ;;  %v12075_v7 = vcombine.low %v8350_v50, %v8354_v19  ;;  %10968 = vmatpush1.bf16.msra.mxu0 %v13185_v58  ;;  %v12084_v31 = vcombine.high %v8358_v45, %v8362_v10  ;;  %v12083_v56 = vcombine.low %v8358_v45, %v8362_v10  ;;  %v8307_v50 = vld [vmem:[#allocation9 + $0x1f0] sm:$0xff]  ;;  %v13232_v10 = vld [vmem:[#allocation11 + $0x1cc] ss:$16 sps:$4 sm:$0xff]  }
 0x906   : > { %v12021_v19 = vcombine.low %v8295_v23, %v8299_v35  ;;  %v8315_v58 = vld [vmem:[#allocation9 + $0x230] sm:$0xff]  ;;  %v12029_v45 = vcombine.low %v8303_v57, %v8307_v50  ;;  %v8276_v23 = vld [vmem:[#allocation9 + $0xf8] sm:$0xff] }
 0x908   : > { %9101 = vmatpush1.bf16.msra.mxu1 %v11987_v59  ;;  %v13190_v59 = vld [vmem:[#allocation11 + $0xcc] ss:$16 sps:$4 sm:$0xff]  }
 0x909   : > { %9102 = vmatprep.subr.bf16.mxu1 %v11996_v17  ;;  %v8366_v17 = vld [vmem:[#allocation9 + $0x3c8] sm:$0xff]  ;;  %10969 = vmatprep.subr.bf16.mxu0 %v13190_v59  ;;  %v8323_v59 = vld [vmem:[#allocation9 + $0x270] sm:$0xff] }
 0x90a   : > { %10970 = vmatpush1.bf16.msra.mxu0 %v13188_v60  ;;  %v8319_v60 = vld [vmem:[#allocation9 + $0x250] sm:$0xff] }
 0x90b   : > { %10971 = vmatprep.subr.bf16.mxu0 %v13193_v16  ;;  %v8331_v16 = vld [vmem:[#allocation9 + $0x2b0] sm:$0xff] }
 0x90c   : > { %9103 = vmatpush1.bf16.msra.mxu1 %v11995_v14  ;;  %v12092_v14 = vcombine.high %v8366_v17, %v8370_v34 }
 0x90d   : > { %9104 = vmatprep.subr.bf16.mxu1 %v12004_v43  ;;  %v13191_v43 = vld [vmem:[#allocation11 + $0xe8] ss:$16 sps:$4 sm:$0xff]  }
 0x90e   : > { %10972 = vmatpush1.bf16.msra.mxu0 %v13191_v43  ;;  %v8327_v43 = vld [vmem:[#allocation9 + $0x290] sm:$0xff] }
 0x910   : > { %9105 = vmatpush1.bf16.msra.mxu1 %v12003_v28  ;;  %v8251_v28 = vld [vmem:[#allocation9 + $0x30] sm:$0xff] }
 0x911   : > { %9106 = vmatprep.subr.bf16.mxu1 %v12012_v52  ;;  %v12091_v52 = vcombine.low %v8366_v17, %v8370_v34  ;;  %v11974_v11 = vcombine.high %v8247_v29, %v8251_v28  ;;  %v11973_v12 = vcombine.low %v8247_v29, %v8251_v28  ;;  %v13236_v17 = vld [vmem:[#allocation11 + $0x1e8] ss:$16 sps:$4 sm:$0xff]   ;;  %v12045_v29 = vcombine.low %v8319_v60, %v8323_v59 }
 0x912   : > { %v12054_v28 = vcombine.high %v8327_v43, %v8331_v16 }
 0x914   : > { %9107 = vmatpush1.bf16.msra.mxu1 %v12011_v5  ;;  %v13196_v5 = vld [vmem:[#allocation11 + $0x10c] ss:$16 sps:$4 sm:$0xff]  }
 0x915   : > { %9108 = vmatprep.subr.bf16.mxu1 %v12020_v42  ;;  %v8255_v42 = vld [vmem:[#allocation9 + $0x50] sm:$0xff]  ;;  %10973 = vmatprep.subr.bf16.mxu0 %v13196_v5 }
 0x916   : > { %10974 = vmatpush1.bf16.msra.mxu0 %v13194_v36  ;;  %v12053_v36 = vcombine.low %v8327_v43, %v8331_v16  ;;  %v8320_v43 = vld [vmem:[#allocation9 + $0x258] sm:$0xff] }
 0x917   : > { %v8324_v16 = vld [vmem:[#allocation9 + $0x278] sm:$0xff] }
 0x918   : > { %9109 = vmatpush1.bf16.msra.mxu1 %v12019_v40  ;;  %v11982_v40 = vcombine.high %v8255_v42, %v8259_v4 }
 0x919   : > { %9110 = vmatprep.subr.bf16.mxu1 %v12028_v39  ;;  %v8263_v39 = vld [vmem:[#allocation9 + $0x90] sm:$0xff] }
 0x91a   : > { %v11990_v49 = vcombine.high %v8263_v39, %v8267_v13 }
 0x91c   : > { %9111 = vmatpush1.bf16.msra.mxu1 %v12027_v37  ;;  %v11981_v37 = vcombine.low %v8255_v42, %v8259_v4  ;;  %v8343_v42 = vld [vmem:[#allocation9 + $0x310] sm:$0xff] }
 0x91d   : > { %9112 = vmatprep.subr.bf16.mxu1 %v12036_v0  ;;  %v13202_v0 = vld [vmem:[#allocation11 + $0x12c] ss:$16 sps:$4 sm:$0xff]   ;;  %v8347_v4 = vld [vmem:[#allocation9 + $0x330] sm:$0xff] }
 0x91e   : > { %10975 = vmatprep.subr.bf16.mxu0 %v13202_v0  ;;  %v8359_v0 = vld [vmem:[#allocation9 + $0x390] sm:$0xff] }
 0x91f   : > { %10976 = vmatpush1.bf16.msra.mxu0 %v13200_v22  ;;  %v12069_v22 = vcombine.low %v8343_v42, %v8347_v4 }
 0x920   : > { %9113 = vmatpush1.bf16.msra.mxu1 %v12035_v38  ;;  %v13206_v38 = vld [vmem:[#allocation11 + $0x148] ss:$16 sps:$4 sm:$0xff]   ;;  %10977 = vmatprep.subr.bf16.mxu0 %v13208_v15 }
 0x921   : > { %9114 = vmatprep.subr.bf16.mxu1 %v12044_v32  ;;  %v11989_v32 = vcombine.low %v8263_v39, %v8267_v13  ;;  %v8351_v39 = vld [vmem:[#allocation9 + $0x350] sm:$0xff] }
 0x922   : > { %v8355_v13 = vld [vmem:[#allocation9 + $0x370] sm:$0xff] }
 0x923   : > { %10978 = vmatpush1.bf16.msra.mxu0 %v13206_v38  ;;  %v12077_v15 = vcombine.low %v8351_v39, %v8355_v13  ;;  %v8371_v38 = vld [vmem:[#allocation9 + $0x3f0] sm:$0xff] }
 0x924   : > { %9115 = vmatpush1.bf16.msra.mxu1 %v12043_v6  ;;  %v13212_v6 = vld [vmem:[#allocation11 + $0x168] ss:$16 sps:$4 sm:$0xff]   ;;  %10979 = vmatprep.subr.bf16.mxu0 %v13214_v53 }
 0x925   : > { %9116 = vmatprep.subr.bf16.mxu1 %v12052_v54  ;;  %v11997_v54 = vcombine.low %v8271_v26, %v8275_v8  ;;  %v8367_v8 = vld [vmem:[#allocation9 + $0x3d0] sm:$0xff]  ;;  %v8248_v53 = vld [vmem:[#allocation9 + $0x18] sm:$0xff] }
 0x927   : > { %10980 = vmatpush1.bf16.msra.mxu0 %v13212_v6 }
 0x928   : > { %9117 = vmatpush1.bf16.msra.mxu1 %v12051_v20  ;;  %v13218_v20 = vld [vmem:[#allocation11 + $0x188] ss:$16 sps:$4 sm:$0xff]   ;;  %10981 = vmatprep.subr.bf16.mxu0 %v13220_v47 }
 0x929   : > { %9118 = vmatprep.subr.bf16.mxu1 %v12060_v48  ;;  %v12005_v48 = vcombine.low %v8279_v18, %v8283_v51  ;;  %v8252_v18 = vld [vmem:[#allocation9 + $0x38] sm:$0xff]  ;;  %v12093_v51 = vcombine.low %v8367_v8, %v8371_v38 }
 0x92a   : > { %v11976_v6 = vcombine.high %v8248_v53, %v8252_v18  ;;  %v11975_v47 = vcombine.low %v8248_v53, %v8252_v18  ;;  %v8368_v53 = vld [vmem:[#allocation9 + $0x3d8] sm:$0xff] }
 0x92b   : > { %10982 = vmatpush1.bf16.msra.mxu0 %v13218_v20  ;;  %v8268_v20 = vld [vmem:[#allocation9 + $0xb8] sm:$0xff] }
 0x92c   : > { %9119 = vmatpush1.bf16.msra.mxu1 %v12059_v46  ;;  %v13224_v46 = vld [vmem:[#allocation11 + $0x1a8] ss:$16 sps:$4 sm:$0xff]   ;;  %10983 = vmatprep.subr.bf16.mxu0 %v13226_v21 }
 0x92d   : > { %9120 = vmatprep.subr.bf16.mxu1 %v12068_v63  ;;  %v12013_v63 = vcombine.low %v8287_v30, %v8291_v3  ;;  %v8264_v3 = vld [vmem:[#allocation9 + $0x98] sm:$0xff] }
 0x92e   : > { %v8272_v21 = vld [vmem:[#allocation9 + $0xd8] sm:$0xff]  ;;  %v11991_v35 = vcombine.low %v8264_v3, %v8268_v20 }
 0x92f   : > { %10984 = vmatpush1.bf16.msra.mxu0 %v13224_v46  ;;  %v12000_v46 = vcombine.high %v8272_v21, %v8276_v23  ;;  %v8372_v18 = vld [vmem:[#allocation9 + $0x3f8] sm:$0xff] }
 0x930   : > { %9121 = vmatpush1.bf16.msra.mxu1 %v12067_v62  ;;  %v12030_v62 = vcombine.high %v8303_v57, %v8307_v50  ;;  %10985 = vmatprep.subr.bf16.mxu0 %v13232_v10  ;;  %v11999_v57 = vcombine.low %v8272_v21, %v8276_v23  ;;  %v13215_v21 = vld [vmem:[#allocation11 + $0x60] ss:$16 sps:$4 sm:$0xff]   ;;  %v13223_v23 = vld [vmem:[#allocation11 + $0x84] ss:$16 sps:$4 sm:$0xff]  }
 0x931   : > { %9122 = vmatprep.subr.bf16.mxu1 %v12076_v61  ;;  %v8311_v61 = vld [vmem:[#allocation9 + $0x210] sm:$0xff] }
 0x932   : > { %v12037_v34 = vcombine.low %v8311_v61, %v8315_v58 }
 0x933   : > { %10986 = vmatpush1.bf16.msra.mxu0 %v13230_v27  ;;  %v8300_v27 = vld [vmem:[#allocation9 + $0x1b8] sm:$0xff] }
 0x934   : > { %9123 = vmatpush1.bf16.msra.mxu1 %v12075_v7  ;;  %v12038_v7 = vcombine.high %v8311_v61, %v8315_v58  ;;  %v8296_v58 = vld [vmem:[#allocation9 + $0x198] sm:$0xff] }
 0x935   : > { %9124 = vmatprep.subr.bf16.mxu1 %v12084_v31  ;;  %v13238_v31 = vld [vmem:[#allocation11 + $0x1ec] ss:$16 sps:$4 sm:$0xff]   ;;  %v12024_v10 = vcombine.high %v8296_v58, %v8300_v27 }
 0x936   : > { %10987 = vmatprep.subr.bf16.mxu0 %v13238_v31  ;;  %v8308_v31 = vld [vmem:[#allocation9 + $0x1f8] sm:$0xff] }
 0x937   : > { %10988 = vmatpush1.bf16.msra.mxu0 %v13236_v17  ;;  %v8312_v17 = vld [vmem:[#allocation9 + $0x218] sm:$0xff] }
 0x938   : > { %9125 = vmatpush1.bf16.msra.mxu1 %v12083_v56  ;;  %v13244_v56 = vld [vmem:[#allocation11 + $0x20c] ss:$16 sps:$4 sm:$0xff]  }
 0x939   : > { %9126 = vmatprep.subr.bf16.mxu1 %v12092_v14  ;;  %v12046_v14 = vcombine.high %v8319_v60, %v8323_v59  ;;  %10998 = vmatprep.subr.bf16.mxu0 %v13244_v56  ;;  %v12023_v60 = vcombine.low %v8296_v58, %v8300_v27  ;;  %v13233_v27 = vld [vmem:[#allocation11 + $0xc0] ss:$16 sps:$4 sm:$0xff]  }
 0x93c   : > { %9127 = vmatpush1.bf16.msra.mxu1 %v12091_v52  ;;  %v8335_v52 = vld [vmem:[#allocation9 + $0x2d0] sm:$0xff] }
 0x93d   : > { %9137 = vmatprep.subr.bf16.mxu1 %v11974_v11  ;;  %v8339_v11 = vld [vmem:[#allocation9 + $0x2f0] sm:$0xff] }
 0x93e   : > { %v12062_v5 = vcombine.high %v8335_v52, %v8339_v11 }
 0x93f   : > { %9129 = vmatmul.mubr.bf16.vlgmr.msra.gmra.mrb[48].mxu1 %v16597_v1 }
 0x940   : > { %9138 = vmatpush1.bf16.msra.mxu1 %v11973_v12  ;;  %9169 = vmatprep.mubr.bf16.mxu1 %v16595_v9  ;;  %v12061_v12 = vcombine.low %v8335_v52, %v8339_v11  ;;  %v8328_v52 = vld [vmem:[#allocation9 + $0x298] sm:$0xff] }
 0x941   : > { %9139 = vmatprep.subr.bf16.mxu1 %v11982_v40  ;;  %v12070_v40 = vcombine.high %v8343_v42, %v8347_v4  ;;  %v8332_v11 = vld [vmem:[#allocation9 + $0x2b8] sm:$0xff] }
 0x942   : > { %v8336_v42 = vld [vmem:[#allocation9 + $0x2d8] sm:$0xff] }
 0x943   : > { %v8340_v4 = vld [vmem:[#allocation9 + $0x2f8] sm:$0xff] }
 0x944   : > { %9140 = vmatpush1.bf16.msra.mxu1 %v11981_v37  ;;  %v12078_v37 = vcombine.high %v8351_v39, %v8355_v13  ;;  %v8344_v39 = vld [vmem:[#allocation9 + $0x318] sm:$0xff] }
 0x945   : > { %9141 = vmatprep.subr.bf16.mxu1 %v11990_v49  ;;  %v8363_v49 = vld [vmem:[#allocation9 + $0x3b0] sm:$0xff]  ;;  %v8348_v13 = vld [vmem:[#allocation9 + $0x338] sm:$0xff] }
 0x946   : > { %v12086_v26 = vcombine.high %v8359_v0, %v8363_v49 }
 0x948   : > { %9142 = vmatpush1.bf16.msra.mxu1 %v11989_v32  ;;  %v12085_v32 = vcombine.low %v8359_v0, %v8363_v49  ;;  %v8352_v0 = vld [vmem:[#allocation9 + $0x358] sm:$0xff] }
 0x949   : > { %9143 = vmatprep.subr.bf16.mxu1 %v11998_v41  ;;  %v12094_v41 = vcombine.high %v8367_v8, %v8371_v38  ;;  %v8356_v49 = vld [vmem:[#allocation9 + $0x378] sm:$0xff] }
 0x94a   : > { %v8360_v8 = vld [vmem:[#allocation9 + $0x398] sm:$0xff] }
 0x94b   : > { %v8364_v38 = vld [vmem:[#allocation9 + $0x3b8] sm:$0xff] }
 0x94c   : > { %9144 = vmatpush1.bf16.msra.mxu1 %v11997_v54  ;;  %v8256_v54 = vld [vmem:[#allocation9 + $0x58] sm:$0xff] }
 0x94d   : > { %9145 = vmatprep.subr.bf16.mxu1 %v12006_v2  ;;  %v8260_v2 = vld [vmem:[#allocation9 + $0x78] sm:$0xff] }
 0x94e   : > { %v11984_v30 = vcombine.high %v8256_v54, %v8260_v2 }
 0x950   : > { %9146 = vmatpush1.bf16.msra.mxu1 %v12005_v48  ;;  %v11983_v48 = vcombine.low %v8256_v54, %v8260_v2  ;;  %v12095_v54 = vcombine.low %v8368_v53, %v8372_v18  ;;  %v13199_v2 = vld [vmem:[#allocation11 + $0x4] ss:$16 sps:$4 sm:$0xff]  }
 0x951   : > { %9147 = vmatprep.subr.bf16.mxu1 %v12014_v24  ;;  %v11992_v24 = vcombine.high %v8264_v3, %v8268_v20  ;;  %v13203_v3 = vld [vmem:[#allocation11 + $0x20] ss:$16 sps:$4 sm:$0xff]   ;;  %v13211_v20 = vld [vmem:[#allocation11 + $0x44] ss:$16 sps:$4 sm:$0xff]  }
 0x954   : > { %9148 = vmatpush1.bf16.msra.mxu1 %v12013_v63  ;;  %v8280_v63 = vld [vmem:[#allocation9 + $0x118] sm:$0xff] }
 0x955   : > { %9149 = vmatprep.subr.bf16.mxu1 %v12022_v44  ;;  %v8284_v44 = vld [vmem:[#allocation9 + $0x138] sm:$0xff] }
 0x956   : > { %v12008_v50 = vcombine.high %v8280_v63, %v8284_v44  ;;  %v12007_v61 = vcombine.low %v8280_v63, %v8284_v44  ;;  %v13227_v44 = vld [vmem:[#allocation11 + $0xa0] ss:$16 sps:$4 sm:$0xff]  }
 0x958   : > { %9150 = vmatpush1.bf16.msra.mxu1 %v12021_v19  ;;  %v8288_v19 = vld [vmem:[#allocation9 + $0x158] sm:$0xff] }
 0x959   : > { %9151 = vmatprep.subr.bf16.mxu1 %v12030_v62  ;;  %v8292_v62 = vld [vmem:[#allocation9 + $0x178] sm:$0xff] }
 0x95c   : > { %9152 = vmatpush1.bf16.msra.mxu1 %v12029_v45  ;;  %v12015_v45 = vcombine.low %v8288_v19, %v8292_v62 }
 0x95d   : > { %9153 = vmatprep.subr.bf16.mxu1 %v12038_v7  ;;  %v8304_v7 = vld [vmem:[#allocation9 + $0x1d8] sm:$0xff] }
 0x95e   : > { %v12032_v59 = vcombine.high %v8304_v7, %v8308_v31  ;;  %v12031_v56 = vcombine.low %v8304_v7, %v8308_v31  ;;  %v13241_v7 = vld [vmem:[#allocation11 + $0xe4] ss:$16 sps:$4 sm:$0xff]  }
 0x960   : > { %9154 = vmatpush1.bf16.msra.mxu1 %v12037_v34  ;;  %v8316_v34 = vld [vmem:[#allocation9 + $0x238] sm:$0xff] }
 0x961   : > { %9155 = vmatprep.subr.bf16.mxu1 %v12046_v14  ;;  %v12040_v14 = vcombine.high %v8312_v17, %v8316_v34 }
 0x964   : > { %9156 = vmatpush1.bf16.msra.mxu1 %v12045_v29  ;;  %v12039_v29 = vcombine.low %v8312_v17, %v8316_v34  ;;  %v13242_v17 = vld [vmem:[#allocation11 + $0x208] ss:$16 sps:$4 sm:$0xff]  }
 0x965   : > { %9157 = vmatprep.subr.bf16.mxu1 %v12054_v28  ;;  %v12048_v28 = vcombine.high %v8320_v43, %v8324_v16 }
 0x968   : > { %9158 = vmatpush1.bf16.msra.mxu1 %v12053_v36  ;;  %v12047_v36 = vcombine.low %v8320_v43, %v8324_v16  ;;  %v13245_v43 = vld [vmem:[#allocation11 + $0x100] ss:$16 sps:$4 sm:$0xff]   ;;  %v13248_v16 = vld [vmem:[#allocation11 + $0x228] ss:$16 sps:$4 sm:$0xff]  }
 0x969   : > { %9159 = vmatprep.subr.bf16.mxu1 %v12062_v5  ;;  %v12056_v5 = vcombine.high %v8328_v52, %v8332_v11 }
 0x96c   : > { %9160 = vmatpush1.bf16.msra.mxu1 %v12061_v12  ;;  %v12055_v12 = vcombine.low %v8328_v52, %v8332_v11  ;;  %v13251_v52 = vld [vmem:[#allocation11 + $0x120] ss:$16 sps:$4 sm:$0xff]   ;;  %v13254_v11 = vld [vmem:[#allocation11 + $0x248] ss:$16 sps:$4 sm:$0xff]  }
 0x96d   : > { %9161 = vmatprep.subr.bf16.mxu1 %v12070_v40  ;;  %v12064_v40 = vcombine.high %v8336_v42, %v8340_v4 }
 0x970   : > { %9162 = vmatpush1.bf16.msra.mxu1 %v12069_v22  ;;  %v12063_v22 = vcombine.low %v8336_v42, %v8340_v4  ;;  %v13257_v42 = vld [vmem:[#allocation11 + $0x140] ss:$16 sps:$4 sm:$0xff]   ;;  %v13260_v4 = vld [vmem:[#allocation11 + $0x268] ss:$16 sps:$4 sm:$0xff]  }
 0x971   : > { %9163 = vmatprep.subr.bf16.mxu1 %v12078_v37  ;;  %v12072_v37 = vcombine.high %v8344_v39, %v8348_v13 }
 0x974   : > { %9164 = vmatpush1.bf16.msra.mxu1 %v12077_v15  ;;  %v12071_v15 = vcombine.low %v8344_v39, %v8348_v13  ;;  %v13263_v39 = vld [vmem:[#allocation11 + $0x160] ss:$16 sps:$4 sm:$0xff]   ;;  %v13266_v13 = vld [vmem:[#allocation11 + $0x288] ss:$16 sps:$4 sm:$0xff]  }
 0x975   : > { %9165 = vmatprep.subr.bf16.mxu1 %v12086_v26  ;;  %v12080_v26 = vcombine.high %v8352_v0, %v8356_v49 }
 0x978   : > { %9166 = vmatpush1.bf16.msra.mxu1 %v12085_v32  ;;  %v12079_v32 = vcombine.low %v8352_v0, %v8356_v49  ;;  %v13269_v0 = vld [vmem:[#allocation11 + $0x180] ss:$16 sps:$4 sm:$0xff]   ;;  %v13272_v49 = vld [vmem:[#allocation11 + $0x2a8] ss:$16 sps:$4 sm:$0xff]  }
 0x979   : > { %9167 = vmatprep.subr.bf16.mxu1 %v12094_v41  ;;  %v12088_v41 = vcombine.high %v8360_v8, %v8364_v38 }
 0x97c   : > { %9168 = vmatpush1.bf16.msra.mxu1 %v12093_v51  ;;  %v12087_v51 = vcombine.low %v8360_v8, %v8364_v38  ;;  %v13275_v8 = vld [vmem:[#allocation11 + $0x1a0] ss:$16 sps:$4 sm:$0xff]   ;;  %v13278_v38 = vld [vmem:[#allocation11 + $0x2c8] ss:$16 sps:$4 sm:$0xff]  }
 0x97d   : > { %9178 = vmatprep.subr.bf16.mxu1 %v11976_v6  ;;  %v12096_v6 = vcombine.high %v8368_v53, %v8372_v18  ;;  %v13281_v53 = vld [vmem:[#allocation11 + $0x1c0] ss:$16 sps:$4 sm:$0xff]   ;;  %v13284_v18 = vld [vmem:[#allocation11 + $0x2e8] ss:$16 sps:$4 sm:$0xff]  }
 0x97f   : > { %9170 = vmatmul.mubr.bf16.vlgmr.msra.gmra.mrb[52].mxu1 %v16597_v1 }
 0x980   : > { %9179 = vmatpush1.bf16.msra.mxu1 %v11975_v47  ;;  %9210 = vmatprep.mubr.bf16.mxu1 %v16595_v9  ;;  %v12016_v9 = vcombine.high %v8288_v19, %v8292_v62  ;;  %v13197_v47 = vld [vmem:[#allocation11] ss:$16 sps:$4 sm:$0xff]  }
 0x981   : > { %9180 = vmatprep.subr.bf16.mxu1 %v11984_v30  ;;  %v13205_v30 = vld [vmem:[#allocation11 + $0x24] ss:$16 sps:$4 sm:$0xff]  }
 0x984   : > { %9181 = vmatpush1.bf16.msra.mxu1 %v11983_v48  ;;  %v13209_v48 = vld [vmem:[#allocation11 + $0x40] ss:$16 sps:$4 sm:$0xff]  }
 0x985   : > { %9182 = vmatprep.subr.bf16.mxu1 %v11992_v24  ;;  %v13217_v24 = vld [vmem:[#allocation11 + $0x64] ss:$16 sps:$4 sm:$0xff]  }
 0x988   : > { %9183 = vmatpush1.bf16.msra.mxu1 %v11991_v35  ;;  %v13221_v35 = vld [vmem:[#allocation11 + $0x80] ss:$16 sps:$4 sm:$0xff]  }
 0x989   : > { %9184 = vmatprep.subr.bf16.mxu1 %v12000_v46  ;;  %v16613_v46 = vld [vmem:[%s16812_s10] sm:$0xff] }
 0x98a   : > { %v9018_v63 = vrot.slane %v16613_v46, %v16578_v25 }
 0x98c   : > { %9185 = vmatpush1.bf16.msra.mxu1 %v11999_v57  ;;  %v9022_v57 = vrot.slane %v16613_v46, %v16584_v33 }
 0x98d   : > { %9186 = vmatprep.subr.bf16.mxu1 %v12008_v50  ;;  %v13235_v50 = vld [vmem:[#allocation11 + $0xc4] ss:$16 sps:$4 sm:$0xff]  }
 0x990   : > { %9187 = vmatpush1.bf16.msra.mxu1 %v12007_v61 }
 0x991   : > { %9188 = vmatprep.subr.bf16.mxu1 %v12016_v9 }
 0x994   : > { %9189 = vmatpush1.bf16.msra.mxu1 %v12015_v45 }
 0x995   : > { %9190 = vmatprep.subr.bf16.mxu1 %v12024_v10 }
 0x998   : > { %9191 = vmatpush1.bf16.msra.mxu1 %v12023_v60 }
 0x999   : > { %9192 = vmatprep.subr.bf16.mxu1 %v12032_v59  ;;  %v13239_v59 = vld [vmem:[#allocation11 + $0xe0] ss:$16 sps:$4 sm:$0xff]  }
 0x99c   : > { %9193 = vmatpush1.bf16.msra.mxu1 %v12031_v56  ;;  %v13247_v56 = vld [vmem:[#allocation11 + $0x104] ss:$16 sps:$4 sm:$0xff]  }
 0x99d   : > { %9194 = vmatprep.subr.bf16.mxu1 %v12040_v14  ;;  %v13250_v14 = vld [vmem:[#allocation11 + $0x22c] ss:$16 sps:$4 sm:$0xff]  }
 0x9a0   : > { %9195 = vmatpush1.bf16.msra.mxu1 %v12039_v29  ;;  %v13253_v29 = vld [vmem:[#allocation11 + $0x124] ss:$16 sps:$4 sm:$0xff]  }
 0x9a1   : > { %9196 = vmatprep.subr.bf16.mxu1 %v12048_v28  ;;  %v13256_v28 = vld [vmem:[#allocation11 + $0x24c] ss:$16 sps:$4 sm:$0xff]  }
 0x9a4   : > { %9197 = vmatpush1.bf16.msra.mxu1 %v12047_v36  ;;  %v13259_v36 = vld [vmem:[#allocation11 + $0x144] ss:$16 sps:$4 sm:$0xff]  }
 0x9a5   : > { %9198 = vmatprep.subr.bf16.mxu1 %v12056_v5  ;;  %v13262_v5 = vld [vmem:[#allocation11 + $0x26c] ss:$16 sps:$4 sm:$0xff]  }
 0x9a8   : > { %9199 = vmatpush1.bf16.msra.mxu1 %v12055_v12  ;;  %v13265_v12 = vld [vmem:[#allocation11 + $0x164] ss:$16 sps:$4 sm:$0xff]  }
 0x9a9   : > { %9200 = vmatprep.subr.bf16.mxu1 %v12064_v40  ;;  %v13268_v40 = vld [vmem:[#allocation11 + $0x28c] ss:$16 sps:$4 sm:$0xff]  }
 0x9ac   : > { %9201 = vmatpush1.bf16.msra.mxu1 %v12063_v22  ;;  %v13271_v22 = vld [vmem:[#allocation11 + $0x184] ss:$16 sps:$4 sm:$0xff]  }
 0x9ad   : > { %9202 = vmatprep.subr.bf16.mxu1 %v12072_v37  ;;  %v13274_v37 = vld [vmem:[#allocation11 + $0x2ac] ss:$16 sps:$4 sm:$0xff]  }
 0x9b0   : > { %9203 = vmatpush1.bf16.msra.mxu1 %v12071_v15  ;;  %v13277_v15 = vld [vmem:[#allocation11 + $0x1a4] ss:$16 sps:$4 sm:$0xff]  }
 0x9b1   : > { %9204 = vmatprep.subr.bf16.mxu1 %v12080_v26  ;;  %v13280_v26 = vld [vmem:[#allocation11 + $0x2cc] ss:$16 sps:$4 sm:$0xff]  }
 0x9b4   : > { %9205 = vmatpush1.bf16.msra.mxu1 %v12079_v32  ;;  %v13283_v32 = vld [vmem:[#allocation11 + $0x1c4] ss:$16 sps:$4 sm:$0xff]  }
 0x9b5   : > { %9206 = vmatprep.subr.bf16.mxu1 %v12088_v41  ;;  %v13286_v41 = vld [vmem:[#allocation11 + $0x2ec] ss:$16 sps:$4 sm:$0xff]  }
 0x9b8   : > { %9207 = vmatpush1.bf16.msra.mxu1 %v12087_v51  ;;  %v13289_v51 = vld [vmem:[#allocation11 + $0x1e4] ss:$16 sps:$4 sm:$0xff]  }
 0x9b9   : > { %9208 = vmatprep.subr.bf16.mxu1 %v12096_v6  ;;  %v13292_v6 = vld [vmem:[#allocation11 + $0x30c] ss:$16 sps:$4 sm:$0xff]  }
 0x9bc   : > { %9209 = vmatpush1.bf16.msra.mxu1 %v12095_v54  ;;  %v13287_v54 = vld [vmem:[#allocation11 + $0x1e0] ss:$16 sps:$4 sm:$0xff]  }
 0x9bd   : > { %10793 = vmatprep.subr.bf16.mxu1 %v13199_v2  ;;  %v13290_v2 = vld [vmem:[#allocation11 + $0x308] ss:$16 sps:$4 sm:$0xff]  }
 0x9bf   : > { %9211 = vmatmul.mubr.bf16.vlgmr.msra.gmra.mrb[56].mxu1 %v16597_v1  ;;  %v13229_v1 = vld [vmem:[#allocation11 + $0xa4] ss:$16 sps:$4 sm:$0xff]  }
 0x9c0   : > { %10794 = vmatpush1.bf16.msra.mxu1 %v13197_v47  ;;  %v13295_v47 = vld [vmem:[#allocation11 + $0x204] ss:$16 sps:$4 sm:$0xff]  }
 0x9c1   : > { %10795 = vmatprep.subr.bf16.mxu1 %v13205_v30  ;;  %v13298_v30 = vld [vmem:[#allocation11 + $0x32c] ss:$16 sps:$4 sm:$0xff]  }
 0x9c4   : > { %10796 = vmatpush1.bf16.msra.mxu1 %v13203_v3  ;;  %v13293_v3 = vld [vmem:[#allocation11 + $0x200] ss:$16 sps:$4 sm:$0xff]  }
 0x9c5   : > { %10797 = vmatprep.subr.bf16.mxu1 %v13211_v20  ;;  %v13296_v20 = vld [vmem:[#allocation11 + $0x328] ss:$16 sps:$4 sm:$0xff]  }
 0x9c8   : > { %10798 = vmatpush1.bf16.msra.mxu1 %v13209_v48  ;;  %v13301_v48 = vld [vmem:[#allocation11 + $0x224] ss:$16 sps:$4 sm:$0xff]  }
 0x9c9   : > { %10799 = vmatprep.subr.bf16.mxu1 %v13217_v24  ;;  %v13304_v24 = vld [vmem:[#allocation11 + $0x34c] ss:$16 sps:$4 sm:$0xff]  }
 0x9cc   : > { %10800 = vmatpush1.bf16.msra.mxu1 %v13215_v21  ;;  %v13299_v21 = vld [vmem:[#allocation11 + $0x220] ss:$16 sps:$4 sm:$0xff]  }
 0x9cd   : > { %10801 = vmatprep.subr.bf16.mxu1 %v13223_v23  ;;  %v13302_v23 = vld [vmem:[#allocation11 + $0x348] ss:$16 sps:$4 sm:$0xff]  }
 0x9d0   : > { %10802 = vmatpush1.bf16.msra.mxu1 %v13221_v35  ;;  %v13307_v35 = vld [vmem:[#allocation11 + $0x244] ss:$16 sps:$4 sm:$0xff]  }
 0x9d1   : > { %10803 = vmatprep.subr.bf16.mxu1 %v13229_v1  ;;  %v13310_v1 = vld [vmem:[#allocation11 + $0x36c] ss:$16 sps:$4 sm:$0xff]  }
 0x9d2   : > { %v9089_v19 = vpop.f32.mrb[44].mxu1 }
 0x9d3   : > { %v9090_v62 = vadd.f32 %v9089_v19, %v9018_v63  ;;  %v9091_v61 = vpop.f32.mrb[45].mxu1  ;;  %v13305_v63 = vld [vmem:[#allocation11 + $0x240] ss:$16 sps:$4 sm:$0xff]  }
 0x9d4   : > { %v9092_v9 = vadd.f32 %v9091_v61, %v9022_v57  ;;  %10804 = vmatpush1.bf16.msra.mxu1 %v13227_v44  ;;  %v9093_v58 = vpop.f32.mrb[46].mxu1  ;;  %v13308_v44 = vld [vmem:[#allocation11 + $0x368] ss:$16 sps:$4 sm:$0xff]   ;;  %v13313_v57 = vld [vmem:[#allocation11 + $0x264] ss:$16 sps:$4 sm:$0xff]  }
 0x9d5   : > { %v9219_v45 = vmax.f32 %v9090_v62, 0.0  ;;  %v9094_v10 = vpop.f32.mrb[47].mxu1  ;;  %10805 = vmatprep.subr.bf16.mxu1 %v13235_v50  ;;  %v13316_v50 = vld [vmem:[#allocation11 + $0x38c] ss:$16 sps:$4 sm:$0xff]   ;;  %v13311_v19 = vld [vmem:[#allocation11 + $0x260] ss:$16 sps:$4 sm:$0xff]  }
 0x9d6   : > { %v9220_v31 = vmax.f32 %v9092_v9, 0.0  ;;  %v13314_v62 = vld [vmem:[#allocation11 + $0x388] ss:$16 sps:$4 sm:$0xff]   ;;  %v13319_v61 = vld [vmem:[#allocation11 + $0x284] ss:$16 sps:$4 sm:$0xff]   ;;  %v9025_v58 = vsub.s32 2, %v14962_v55 }
 0x9d7   : > { %v16619_v34 = vpack.c.bf16 %v9219_v45, %v9219_v45  ;;  %v13322_v9 = vld [vmem:[#allocation11 + $0x3ac] ss:$16 sps:$4 sm:$0xff]   ;;  %v13320_v45 = vld [vmem:[#allocation11 + $0x3a8] ss:$16 sps:$4 sm:$0xff]   ;;  %v9029_v10 = vsub.s32 3, %v14962_v55 }
 0x9d8   : > { %v9228_v60 = vpack.c.bf16 %v9220_v31, %v9220_v31  ;;  %10806 = vmatpush1.bf16.msra.mxu1 %v13233_v27  ;;  %v13317_v27 = vld [vmem:[#allocation11 + $0x280] ss:$16 sps:$4 sm:$0xff]   ;;  %v13328_v31 = vld [vmem:[#allocation11 + $0x3cc] ss:$16 sps:$4 sm:$0xff]  }
 0x9d9   : > { %10807 = vmatprep.subr.bf16.mxu1 %v13241_v7  ;;  %v13325_v7 = vld [vmem:[#allocation11 + $0x2a4] ss:$16 sps:$4 sm:$0xff]  }
 0x9da   : > { %10825 = vmatprep.mubr.bf16.mxu1 %v9228_v60  ;;  %10989 = vmatprep.mubr.bf16.mxu0 %v9228_v60  ;;  %v9026_v60 = vrot.slane %v16613_v46, %v9025_v58 }
 0x9db   : > { %10990 = vmatmul.mubr.bf16.vlgmr.msra.gmra.mrb[28].mxu0 %v16619_v34 }
 0x9dc   : > { %10808 = vmatpush1.bf16.msra.mxu1 %v13239_v59  ;;  %10999 = vmatpush1.bf16.msra.mxu0 %v13242_v17  ;;  %v9030_v59 = vrot.slane %v16613_v46, %v9029_v10  ;;  %v13323_v17 = vld [vmem:[#allocation11 + $0x2a0] ss:$16 sps:$4 sm:$0xff]  }
 0x9dd   : > { %10809 = vmatprep.subr.bf16.mxu1 %v13247_v56  ;;  %11000 = vmatprep.subr.bf16.mxu0 %v13250_v14  ;;  %v13331_v56 = vld [vmem:[#allocation11 + $0x2c4] ss:$16 sps:$4 sm:$0xff]   ;;  %v13334_v14 = vld [vmem:[#allocation11 + $0x3ec] ss:$16 sps:$4 sm:$0xff]  }
 0x9e0   : > { %10810 = vmatpush1.bf16.msra.mxu1 %v13245_v43  ;;  %11001 = vmatpush1.bf16.msra.mxu0 %v13248_v16 }
 0x9e1   : > { %10811 = vmatprep.subr.bf16.mxu1 %v13253_v29  ;;  %11002 = vmatprep.subr.bf16.mxu0 %v13256_v28 }
 0x9e4   : > { %10812 = vmatpush1.bf16.msra.mxu1 %v13251_v52  ;;  %11003 = vmatpush1.bf16.msra.mxu0 %v13254_v11  ;;  %v13329_v11 = vld [vmem:[#allocation11 + $0x2c0] ss:$16 sps:$4 sm:$0xff]  }
 0x9e5   : > { %10813 = vmatprep.subr.bf16.mxu1 %v13259_v36  ;;  %11004 = vmatprep.subr.bf16.mxu0 %v13262_v5  ;;  %v13332_v36 = vld [vmem:[#allocation11 + $0x3e8] ss:$16 sps:$4 sm:$0xff]  }
 0x9e8   : > { %10814 = vmatpush1.bf16.msra.mxu1 %v13257_v42  ;;  %11005 = vmatpush1.bf16.msra.mxu0 %v13260_v4  ;;  %v13337_v4 = vld [vmem:[#allocation11 + $0x2e4] ss:$16 sps:$4 sm:$0xff]  }
 0x9e9   : > { %10815 = vmatprep.subr.bf16.mxu1 %v13265_v12  ;;  %11006 = vmatprep.subr.bf16.mxu0 %v13268_v40  ;;  %v13340_v12 = vld [vmem:[#allocation11 + $0x40c] ss:$16 sps:$4 sm:$0xff]  }
 0x9ec   : > { %10816 = vmatpush1.bf16.msra.mxu1 %v13263_v39  ;;  %11007 = vmatpush1.bf16.msra.mxu0 %v13266_v13  ;;  %v13335_v13 = vld [vmem:[#allocation11 + $0x2e0] ss:$16 sps:$4 sm:$0xff]  }
 0x9ed   : > { %10817 = vmatprep.subr.bf16.mxu1 %v13271_v22  ;;  %11008 = vmatprep.subr.bf16.mxu0 %v13274_v37  ;;  %v13338_v22 = vld [vmem:[#allocation11 + $0x408] ss:$16 sps:$4 sm:$0xff]  }
 0x9f0   : > { %10818 = vmatpush1.bf16.msra.mxu1 %v13269_v0  ;;  %11009 = vmatpush1.bf16.msra.mxu0 %v13272_v49  ;;  %v13343_v0 = vld [vmem:[#allocation11 + $0x304] ss:$16 sps:$4 sm:$0xff]   ;;  %v13346_v49 = vld [vmem:[#allocation11 + $0x42c] ss:$16 sps:$4 sm:$0xff]  }
 0x9f1   : > { %10819 = vmatprep.subr.bf16.mxu1 %v13277_v15  ;;  %11010 = vmatprep.subr.bf16.mxu0 %v13280_v26  ;;  %v13341_v15 = vld [vmem:[#allocation11 + $0x300] ss:$16 sps:$4 sm:$0xff]   ;;  %v13344_v26 = vld [vmem:[#allocation11 + $0x428] ss:$16 sps:$4 sm:$0xff]  }
 0x9f4   : > { %10820 = vmatpush1.bf16.msra.mxu1 %v13275_v8  ;;  %11011 = vmatpush1.bf16.msra.mxu0 %v13278_v38  ;;  %v13349_v8 = vld [vmem:[#allocation11 + $0x324] ss:$16 sps:$4 sm:$0xff]   ;;  %v13352_v38 = vld [vmem:[#allocation11 + $0x44c] ss:$16 sps:$4 sm:$0xff]  }
 0x9f5   : > { %10821 = vmatprep.subr.bf16.mxu1 %v13283_v32  ;;  %11012 = vmatprep.subr.bf16.mxu0 %v13286_v41  ;;  %v13347_v32 = vld [vmem:[#allocation11 + $0x320] ss:$16 sps:$4 sm:$0xff]   ;;  %v13350_v41 = vld [vmem:[#allocation11 + $0x448] ss:$16 sps:$4 sm:$0xff]  }
 0x9f8   : > { %10822 = vmatpush1.bf16.msra.mxu1 %v13281_v53  ;;  %11013 = vmatpush1.bf16.msra.mxu0 %v13284_v18  ;;  %v13355_v53 = vld [vmem:[#allocation11 + $0x344] ss:$16 sps:$4 sm:$0xff]   ;;  %v13358_v18 = vld [vmem:[#allocation11 + $0x46c] ss:$16 sps:$4 sm:$0xff]  }
 0x9f9   : > { %10823 = vmatprep.subr.bf16.mxu1 %v13289_v51  ;;  %11014 = vmatprep.subr.bf16.mxu0 %v13292_v6  ;;  %v13353_v51 = vld [vmem:[#allocation11 + $0x340] ss:$16 sps:$4 sm:$0xff]   ;;  %v13356_v6 = vld [vmem:[#allocation11 + $0x468] ss:$16 sps:$4 sm:$0xff]  }
 0x9fc   : > { %10824 = vmatpush1.bf16.msra.mxu1 %v13287_v54  ;;  %11015 = vmatpush1.bf16.msra.mxu0 %v13290_v2  ;;  %v13361_v54 = vld [vmem:[#allocation11 + $0x364] ss:$16 sps:$4 sm:$0xff]   ;;  %v13364_v2 = vld [vmem:[#allocation11 + $0x48c] ss:$16 sps:$4 sm:$0xff]  }
 0x9fd   : > { %10834 = vmatprep.subr.bf16.mxu1 %v13295_v47  ;;  %11016 = vmatprep.subr.bf16.mxu0 %v13298_v30  ;;  %v13359_v47 = vld [vmem:[#allocation11 + $0x360] ss:$16 sps:$4 sm:$0xff]   ;;  %v13362_v30 = vld [vmem:[#allocation11 + $0x488] ss:$16 sps:$4 sm:$0xff]  }
 0x9ff   : > { %10826 = vmatmul.mubr.bf16.vlgmr.msra.gmra.mrb[60].mxu1 %v16619_v34  ;;  %v13326_v34 = vld [vmem:[#allocation11 + $0x3c8] ss:$16 sps:$4 sm:$0xff]  }
 0xa00   : > { %10835 = vmatpush1.bf16.msra.mxu1 %v13293_v3  ;;  %11017 = vmatpush1.bf16.msra.mxu0 %v13296_v20  ;;  %v13367_v3 = vld [vmem:[#allocation11 + $0x384] ss:$16 sps:$4 sm:$0xff]   ;;  %v13370_v20 = vld [vmem:[#allocation11 + $0x4ac] ss:$16 sps:$4 sm:$0xff]  }
 0xa01   : > { %10836 = vmatprep.subr.bf16.mxu1 %v13301_v48  ;;  %11018 = vmatprep.subr.bf16.mxu0 %v13304_v24  ;;  %v13365_v48 = vld [vmem:[#allocation11 + $0x380] ss:$16 sps:$4 sm:$0xff]   ;;  %v13368_v24 = vld [vmem:[#allocation11 + $0x4a8] ss:$16 sps:$4 sm:$0xff]  }
 0xa04   : > { %10837 = vmatpush1.bf16.msra.mxu1 %v13299_v21  ;;  %11019 = vmatpush1.bf16.msra.mxu0 %v13302_v23  ;;  %v13373_v21 = vld [vmem:[#allocation11 + $0x3a4] ss:$16 sps:$4 sm:$0xff]   ;;  %v13376_v23 = vld [vmem:[#allocation11 + $0x4cc] ss:$16 sps:$4 sm:$0xff]  }
 0xa05   : > { %10838 = vmatprep.subr.bf16.mxu1 %v13307_v35  ;;  %11020 = vmatprep.subr.bf16.mxu0 %v13310_v1  ;;  %v13371_v35 = vld [vmem:[#allocation11 + $0x3a0] ss:$16 sps:$4 sm:$0xff]   ;;  %v13374_v1 = vld [vmem:[#allocation11 + $0x4c8] ss:$16 sps:$4 sm:$0xff]  }
 0xa08   : > { %10839 = vmatpush1.bf16.msra.mxu1 %v13305_v63  ;;  %11021 = vmatpush1.bf16.msra.mxu0 %v13308_v44  ;;  %v13379_v63 = vld [vmem:[#allocation11 + $0x3c4] ss:$16 sps:$4 sm:$0xff]   ;;  %v13382_v44 = vld [vmem:[#allocation11 + $0x4ec] ss:$16 sps:$4 sm:$0xff]  }
 0xa09   : > { %10840 = vmatprep.subr.bf16.mxu1 %v13313_v57  ;;  %11022 = vmatprep.subr.bf16.mxu0 %v13316_v50  ;;  %v13377_v57 = vld [vmem:[#allocation11 + $0x3c0] ss:$16 sps:$4 sm:$0xff]   ;;  %v13380_v50 = vld [vmem:[#allocation11 + $0x4e8] ss:$16 sps:$4 sm:$0xff]  }
 0xa0c   : > { %10841 = vmatpush1.bf16.msra.mxu1 %v13311_v19  ;;  %11023 = vmatpush1.bf16.msra.mxu0 %v13314_v62  ;;  %v13385_v19 = vld [vmem:[#allocation11 + $0x3e4] ss:$16 sps:$4 sm:$0xff]   ;;  %v13388_v62 = vld [vmem:[#allocation11 + $0x50c] ss:$16 sps:$4 sm:$0xff]  }
 0xa0d   : > { %10842 = vmatprep.subr.bf16.mxu1 %v13319_v61  ;;  %11024 = vmatprep.subr.bf16.mxu0 %v13322_v9  ;;  %v13383_v61 = vld [vmem:[#allocation11 + $0x3e0] ss:$16 sps:$4 sm:$0xff]   ;;  %v13386_v9 = vld [vmem:[#allocation11 + $0x508] ss:$16 sps:$4 sm:$0xff]  }
 0xa10   : > { %10843 = vmatpush1.bf16.msra.mxu1 %v13317_v27  ;;  %11025 = vmatpush1.bf16.msra.mxu0 %v13320_v45  ;;  %v13391_v27 = vld [vmem:[#allocation11 + $0x404] ss:$16 sps:$4 sm:$0xff]   ;;  %v13394_v45 = vld [vmem:[#allocation11 + $0x52c] ss:$16 sps:$4 sm:$0xff]  }
 0xa11   : > { %10844 = vmatprep.subr.bf16.mxu1 %v13325_v7  ;;  %11026 = vmatprep.subr.bf16.mxu0 %v13328_v31  ;;  %v13389_v7 = vld [vmem:[#allocation11 + $0x400] ss:$16 sps:$4 sm:$0xff]   ;;  %v13392_v31 = vld [vmem:[#allocation11 + $0x528] ss:$16 sps:$4 sm:$0xff]  }
 0xa12   : > { %v9130_v43 = vpop.f32.mrb[48].mxu1 }
 0xa13   : > { %v9131_v16 = vadd.f32 %v9130_v43, %v9026_v60  ;;  %v9132_v29 = vpop.f32.mrb[49].mxu1  ;;  %v13397_v60 = vld [vmem:[#allocation11 + $0x424] ss:$16 sps:$4 sm:$0xff]   ;;  %v13401_v43 = vld [vmem:[#allocation11 + $0x440] ss:$16 sps:$4 sm:$0xff]  }
 0xa14   : > { %v9133_v28 = vadd.f32 %v9132_v29, %v9030_v59  ;;  %v9134_v52 = vpop.f32.mrb[50].mxu1  ;;  %10845 = vmatpush1.bf16.msra.mxu1 %v13323_v17  ;;  %11027 = vmatpush1.bf16.msra.mxu0 %v13326_v34  ;;  %v13400_v59 = vld [vmem:[#allocation11 + $0x54c] ss:$16 sps:$4 sm:$0xff]   ;;  %v13395_v17 = vld [vmem:[#allocation11 + $0x420] ss:$16 sps:$4 sm:$0xff]  }
 0xa15   : > { %v9221_v5 = vmax.f32 %v9131_v16, 0.0  ;;  %v9135_v42 = vpop.f32.mrb[51].mxu1  ;;  %10846 = vmatprep.subr.bf16.mxu1 %v13331_v56  ;;  %11028 = vmatprep.subr.bf16.mxu0 %v13334_v14  ;;  %v13398_v34 = vld [vmem:[#allocation11 + $0x548] ss:$16 sps:$4 sm:$0xff]   ;;  %v13403_v56 = vld [vmem:[#allocation11 + $0x444] ss:$16 sps:$4 sm:$0xff]  }
 0xa16   : > { %v9222_v40 = vmax.f32 %v9133_v28, 0.0  ;;  %v13406_v14 = vld [vmem:[#allocation11 + $0x56c] ss:$16 sps:$4 sm:$0xff]   ;;  %v13404_v16 = vld [vmem:[#allocation11 + $0x568] ss:$16 sps:$4 sm:$0xff]   ;;  %v9033_v42 = vsub.s32 4, %v14962_v55 }
 0xa17   : > { %v16631_v37 = vpack.c.bf16 %v9221_v5, %v9221_v5  ;;  %v13409_v29 = vld [vmem:[#allocation11 + $0x464] ss:$16 sps:$4 sm:$0xff]   ;;  %v13412_v28 = vld [vmem:[#allocation11 + $0x58c] ss:$16 sps:$4 sm:$0xff]   ;;  %v13407_v52 = vld [vmem:[#allocation11 + $0x460] ss:$16 sps:$4 sm:$0xff]  }
 0xa18   : > { %v9230_v39 = vpack.c.bf16 %v9222_v40, %v9222_v40  ;;  %10847 = vmatpush1.bf16.msra.mxu1 %v13329_v11  ;;  %11029 = vmatpush1.bf16.msra.mxu0 %v13332_v36  ;;  %v13410_v11 = vld [vmem:[#allocation11 + $0x588] ss:$16 sps:$4 sm:$0xff]   ;;  %v13415_v36 = vld [vmem:[#allocation11 + $0x484] ss:$16 sps:$4 sm:$0xff]   ;;  %v13418_v5 = vld [vmem:[#allocation11 + $0x5ac] ss:$16 sps:$4 sm:$0xff]  }
 0xa19   : > { %10848 = vmatprep.subr.bf16.mxu1 %v13337_v4  ;;  %11039 = vmatprep.subr.bf16.mxu0 %v13340_v12  ;;  %v13413_v4 = vld [vmem:[#allocation11 + $0x480] ss:$16 sps:$4 sm:$0xff]   ;;  %v13416_v12 = vld [vmem:[#allocation11 + $0x5a8] ss:$16 sps:$4 sm:$0xff]   ;;  %v9037_v40 = vsub.s32 5, %v14962_v55 }
 0xa1a   : > { %10866 = vmatprep.mubr.bf16.mxu1 %v9230_v39  ;;  %11030 = vmatprep.mubr.bf16.mxu0 %v9230_v39  ;;  %v13421_v39 = vld [vmem:[#allocation11 + $0x4a4] ss:$16 sps:$4 sm:$0xff]  }
 0xa1b   : > { %11031 = vmatmul.mubr.bf16.vlgmr.msra.gmra.mrb[28].mxu0 %v16631_v37 }
 0xa1c   : > { %10849 = vmatpush1.bf16.msra.mxu1 %v13335_v13  ;;  %11040 = vmatpush1.bf16.msra.mxu0 %v13338_v22  ;;  %v13424_v13 = vld [vmem:[#allocation11 + $0x5cc] ss:$16 sps:$4 sm:$0xff]   ;;  %v9034_v22 = vrot.slane %v16613_v46, %v9033_v42  ;;  %v13479_v42 = vld [vmem:[#allocation11 + $0x5e0] ss:$16 sps:$4 sm:$0xff]  }
 0xa1d   : > { %10850 = vmatprep.subr.bf16.mxu1 %v13343_v0  ;;  %11041 = vmatprep.subr.bf16.mxu0 %v13346_v49  ;;  %v13419_v0 = vld [vmem:[#allocation11 + $0x4a0] ss:$16 sps:$4 sm:$0xff]   ;;  %v13422_v49 = vld [vmem:[#allocation11 + $0x5c8] ss:$16 sps:$4 sm:$0xff]  }
 0xa20   : > { %10851 = vmatpush1.bf16.msra.mxu1 %v13341_v15  ;;  %11042 = vmatpush1.bf16.msra.mxu0 %v13344_v26  ;;  %v13427_v15 = vld [vmem:[#allocation11 + $0x4c4] ss:$16 sps:$4 sm:$0xff]   ;;  %v13430_v26 = vld [vmem:[#allocation11 + $0x5ec] ss:$16 sps:$4 sm:$0xff]  }
 0xa21   : > { %10852 = vmatprep.subr.bf16.mxu1 %v13349_v8  ;;  %11043 = vmatprep.subr.bf16.mxu0 %v13352_v38 }
 0xa24   : > { %10853 = vmatpush1.bf16.msra.mxu1 %v13347_v32  ;;  %11044 = vmatpush1.bf16.msra.mxu0 %v13350_v41 }
 0xa25   : > { %10854 = vmatprep.subr.bf16.mxu1 %v13355_v53  ;;  %11045 = vmatprep.subr.bf16.mxu0 %v13358_v18  ;;  %v13425_v18 = vld [vmem:[#allocation11 + $0x4c0] ss:$16 sps:$4 sm:$0xff]  }
 0xa28   : > { %10855 = vmatpush1.bf16.msra.mxu1 %v13353_v51  ;;  %11046 = vmatpush1.bf16.msra.mxu0 %v13356_v6  ;;  %v13428_v51 = vld [vmem:[#allocation11 + $0x5e8] ss:$16 sps:$4 sm:$0xff]  }
 0xa29   : > { %10856 = vmatprep.subr.bf16.mxu1 %v13361_v54  ;;  %11047 = vmatprep.subr.bf16.mxu0 %v13364_v2  ;;  %v13433_v2 = vld [vmem:[#allocation11 + $0x4e4] ss:$16 sps:$4 sm:$0xff]  }
 0xa2c   : > { %10857 = vmatpush1.bf16.msra.mxu1 %v13359_v47  ;;  %11048 = vmatpush1.bf16.msra.mxu0 %v13362_v30  ;;  %v13436_v47 = vld [vmem:[#allocation11 + $0x60c] ss:$16 sps:$4 sm:$0xff]  }
 0xa2d   : > { %10858 = vmatprep.subr.bf16.mxu1 %v13367_v3  ;;  %11049 = vmatprep.subr.bf16.mxu0 %v13370_v20  ;;  %v13431_v20 = vld [vmem:[#allocation11 + $0x4e0] ss:$16 sps:$4 sm:$0xff]  }
 0xa30   : > { %10859 = vmatpush1.bf16.msra.mxu1 %v13365_v48  ;;  %11050 = vmatpush1.bf16.msra.mxu0 %v13368_v24  ;;  %v13434_v48 = vld [vmem:[#allocation11 + $0x608] ss:$16 sps:$4 sm:$0xff]  }
 0xa31   : > { %10860 = vmatprep.subr.bf16.mxu1 %v13373_v21  ;;  %11051 = vmatprep.subr.bf16.mxu0 %v13376_v23  ;;  %v13439_v21 = vld [vmem:[#allocation11 + $0x504] ss:$16 sps:$4 sm:$0xff]   ;;  %v13442_v23 = vld [vmem:[#allocation11 + $0x62c] ss:$16 sps:$4 sm:$0xff]  }
 0xa34   : > { %10861 = vmatpush1.bf16.msra.mxu1 %v13371_v35  ;;  %11052 = vmatpush1.bf16.msra.mxu0 %v13374_v1  ;;  %v13437_v35 = vld [vmem:[#allocation11 + $0x500] ss:$16 sps:$4 sm:$0xff]   ;;  %v13440_v1 = vld [vmem:[#allocation11 + $0x628] ss:$16 sps:$4 sm:$0xff]  }
 0xa35   : > { %10862 = vmatprep.subr.bf16.mxu1 %v13379_v63  ;;  %11053 = vmatprep.subr.bf16.mxu0 %v13382_v44  ;;  %v13445_v63 = vld [vmem:[#allocation11 + $0x524] ss:$16 sps:$4 sm:$0xff]   ;;  %v13448_v44 = vld [vmem:[#allocation11 + $0x64c] ss:$16 sps:$4 sm:$0xff]  }
 0xa38   : > { %10863 = vmatpush1.bf16.msra.mxu1 %v13377_v57  ;;  %11054 = vmatpush1.bf16.msra.mxu0 %v13380_v50  ;;  %v13443_v57 = vld [vmem:[#allocation11 + $0x520] ss:$16 sps:$4 sm:$0xff]   ;;  %v13446_v50 = vld [vmem:[#allocation11 + $0x648] ss:$16 sps:$4 sm:$0xff]  }
 0xa39   : > { %10864 = vmatprep.subr.bf16.mxu1 %v13385_v19  ;;  %11055 = vmatprep.subr.bf16.mxu0 %v13388_v62  ;;  %v13451_v19 = vld [vmem:[#allocation11 + $0x544] ss:$16 sps:$4 sm:$0xff]   ;;  %v13454_v62 = vld [vmem:[#allocation11 + $0x66c] ss:$16 sps:$4 sm:$0xff]  }
 0xa3c   : > { %10865 = vmatpush1.bf16.msra.mxu1 %v13383_v61  ;;  %11056 = vmatpush1.bf16.msra.mxu0 %v13386_v9  ;;  %v13449_v61 = vld [vmem:[#allocation11 + $0x540] ss:$16 sps:$4 sm:$0xff]   ;;  %v13452_v9 = vld [vmem:[#allocation11 + $0x668] ss:$16 sps:$4 sm:$0xff]  }
 0xa3d   : > { %10875 = vmatprep.subr.bf16.mxu1 %v13391_v27  ;;  %11057 = vmatprep.subr.bf16.mxu0 %v13394_v45  ;;  %v13457_v27 = vld [vmem:[#allocation11 + $0x564] ss:$16 sps:$4 sm:$0xff]   ;;  %v13460_v45 = vld [vmem:[#allocation11 + $0x68c] ss:$16 sps:$4 sm:$0xff]  }
 0xa3f   : > { %10867 = vmatmul.mubr.bf16.vlgmr.msra.gmra.mrb[60].mxu1 %v16631_v37  ;;  %v9038_v37 = vrot.slane %v16613_v46, %v9037_v40  ;;  %v13490_v40 = vld [vmem:[#allocation11 + $0x72c] ss:$16 sps:$4 sm:$0xff]  }
 0xa40   : > { %10876 = vmatpush1.bf16.msra.mxu1 %v13389_v7  ;;  %11058 = vmatpush1.bf16.msra.mxu0 %v13392_v31  ;;  %v13455_v7 = vld [vmem:[#allocation11 + $0x560] ss:$16 sps:$4 sm:$0xff]   ;;  %v13458_v31 = vld [vmem:[#allocation11 + $0x688] ss:$16 sps:$4 sm:$0xff]  }
 0xa41   : > { %10877 = vmatprep.subr.bf16.mxu1 %v13397_v60  ;;  %11059 = vmatprep.subr.bf16.mxu0 %v13400_v59  ;;  %v13463_v60 = vld [vmem:[#allocation11 + $0x584] ss:$16 sps:$4 sm:$0xff]   ;;  %v13466_v59 = vld [vmem:[#allocation11 + $0x6ac] ss:$16 sps:$4 sm:$0xff]  }
 0xa44   : > { %10878 = vmatpush1.bf16.msra.mxu1 %v13395_v17  ;;  %11060 = vmatpush1.bf16.msra.mxu0 %v13398_v34  ;;  %v13461_v17 = vld [vmem:[#allocation11 + $0x580] ss:$16 sps:$4 sm:$0xff]   ;;  %v13464_v34 = vld [vmem:[#allocation11 + $0x6a8] ss:$16 sps:$4 sm:$0xff]  }
 0xa45   : > { %10879 = vmatprep.subr.bf16.mxu1 %v13403_v56  ;;  %11061 = vmatprep.subr.bf16.mxu0 %v13406_v14  ;;  %v13469_v56 = vld [vmem:[#allocation11 + $0x5a4] ss:$16 sps:$4 sm:$0xff]   ;;  %v13472_v14 = vld [vmem:[#allocation11 + $0x6cc] ss:$16 sps:$4 sm:$0xff]  }
 0xa48   : > { %10880 = vmatpush1.bf16.msra.mxu1 %v13401_v43  ;;  %11062 = vmatpush1.bf16.msra.mxu0 %v13404_v16  ;;  %v13467_v43 = vld [vmem:[#allocation11 + $0x5a0] ss:$16 sps:$4 sm:$0xff]   ;;  %v13470_v16 = vld [vmem:[#allocation11 + $0x6c8] ss:$16 sps:$4 sm:$0xff]  }
 0xa49   : > { %10881 = vmatprep.subr.bf16.mxu1 %v13409_v29  ;;  %11063 = vmatprep.subr.bf16.mxu0 %v13412_v28  ;;  %v13475_v29 = vld [vmem:[#allocation11 + $0x5c4] ss:$16 sps:$4 sm:$0xff]   ;;  %v13478_v28 = vld [vmem:[#allocation11 + $0x6ec] ss:$16 sps:$4 sm:$0xff]  }
 0xa4c   : > { %10882 = vmatpush1.bf16.msra.mxu1 %v13407_v52  ;;  %11064 = vmatpush1.bf16.msra.mxu0 %v13410_v11  ;;  %v13473_v52 = vld [vmem:[#allocation11 + $0x5c0] ss:$16 sps:$4 sm:$0xff]   ;;  %v13476_v11 = vld [vmem:[#allocation11 + $0x6e8] ss:$16 sps:$4 sm:$0xff]  }
 0xa4d   : > { %10883 = vmatprep.subr.bf16.mxu1 %v13415_v36  ;;  %11065 = vmatprep.subr.bf16.mxu0 %v13418_v5  ;;  %v13481_v36 = vld [vmem:[#allocation11 + $0x5e4] ss:$16 sps:$4 sm:$0xff]   ;;  %v13484_v5 = vld [vmem:[#allocation11 + $0x70c] ss:$16 sps:$4 sm:$0xff]  }
 0xa50   : > { %10884 = vmatpush1.bf16.msra.mxu1 %v13413_v4  ;;  %11066 = vmatpush1.bf16.msra.mxu0 %v13416_v12  ;;  %v13482_v4 = vld [vmem:[#allocation11 + $0x708] ss:$16 sps:$4 sm:$0xff]   ;;  %v13487_v12 = vld [vmem:[#allocation11 + $0x604] ss:$16 sps:$4 sm:$0xff]  }
 0xa51   : > { %10885 = vmatprep.subr.bf16.mxu1 %v13421_v39  ;;  %11067 = vmatprep.subr.bf16.mxu0 %v13424_v13  ;;  %v13485_v39 = vld [vmem:[#allocation11 + $0x600] ss:$16 sps:$4 sm:$0xff]   ;;  %v13488_v13 = vld [vmem:[#allocation11 + $0x728] ss:$16 sps:$4 sm:$0xff]  }
 0xa52   : > { %v9171_v8 = vpop.f32.mrb[52].mxu1 }
 0xa53   : > { %v9172_v38 = vadd.f32 %v9171_v8, %v9034_v22  ;;  %v9173_v32 = vpop.f32.mrb[53].mxu1  ;;  %v13493_v22 = vld [vmem:[#allocation11 + $0x624] ss:$16 sps:$4 sm:$0xff]   ;;  %v13497_v8 = vld [vmem:[#allocation11 + $0x640] ss:$16 sps:$4 sm:$0xff]  }
 0xa54   : > { %v9174_v41 = vadd.f32 %v9173_v32, %v9038_v37  ;;  %v9175_v53 = vpop.f32.mrb[54].mxu1  ;;  %10886 = vmatpush1.bf16.msra.mxu1 %v13419_v0  ;;  %11068 = vmatpush1.bf16.msra.mxu0 %v13422_v49  ;;  %v13496_v37 = vld [vmem:[#allocation11 + $0x74c] ss:$16 sps:$4 sm:$0xff]   ;;  %v13491_v0 = vld [vmem:[#allocation11 + $0x620] ss:$16 sps:$4 sm:$0xff]  }
 0xa55   : > { %v9223_v6 = vmax.f32 %v9172_v38, 0.0  ;;  %v9176_v54 = vpop.f32.mrb[55].mxu1  ;;  %10887 = vmatprep.subr.bf16.mxu1 %v13427_v15  ;;  %11069 = vmatprep.subr.bf16.mxu0 %v13430_v26  ;;  %v13494_v49 = vld [vmem:[#allocation11 + $0x748] ss:$16 sps:$4 sm:$0xff]   ;;  %v13499_v15 = vld [vmem:[#allocation11 + $0x644] ss:$16 sps:$4 sm:$0xff]  }
 0xa56   : > { %v9224_v30 = vmax.f32 %v9174_v41, 0.0  ;;  %v13502_v26 = vld [vmem:[#allocation11 + $0x76c] ss:$16 sps:$4 sm:$0xff]   ;;  %v13500_v38 = vld [vmem:[#allocation11 + $0x768] ss:$16 sps:$4 sm:$0xff]   ;;  %v9041_v54 = vsub.s32 6, %v14962_v55 }
 0xa57   : > { %v16639_v24 = vpack.c.bf16 %v9223_v6, %v9223_v6  ;;  %v13505_v32 = vld [vmem:[#allocation11 + $0x664] ss:$16 sps:$4 sm:$0xff]   ;;  %v13508_v41 = vld [vmem:[#allocation11 + $0x78c] ss:$16 sps:$4 sm:$0xff]   ;;  %v13503_v53 = vld [vmem:[#allocation11 + $0x660] ss:$16 sps:$4 sm:$0xff]  }
 0xa58   : > { %v9232_v3 = vpack.c.bf16 %v9224_v30, %v9224_v30  ;;  %10888 = vmatpush1.bf16.msra.mxu1 %v13425_v18  ;;  %11070 = vmatpush1.bf16.msra.mxu0 %v13428_v51  ;;  %v13506_v18 = vld [vmem:[#allocation11 + $0x788] ss:$16 sps:$4 sm:$0xff]   ;;  %v13511_v51 = vld [vmem:[#allocation11 + $0x684] ss:$16 sps:$4 sm:$0xff]   ;;  %v13514_v6 = vld [vmem:[#allocation11 + $0x7ac] ss:$16 sps:$4 sm:$0xff]  }
 0xa59   : > { %10889 = vmatprep.subr.bf16.mxu1 %v13433_v2  ;;  %11080 = vmatprep.subr.bf16.mxu0 %v13436_v47  ;;  %v13509_v2 = vld [vmem:[#allocation11 + $0x680] ss:$16 sps:$4 sm:$0xff]   ;;  %v13512_v47 = vld [vmem:[#allocation11 + $0x7a8] ss:$16 sps:$4 sm:$0xff]   ;;  %v9045_v30 = vsub.s32 7, %v14962_v55 }
 0xa5a   : > { %10907 = vmatprep.mubr.bf16.mxu1 %v9232_v3  ;;  %11071 = vmatprep.mubr.bf16.mxu0 %v9232_v3  ;;  %v13517_v3 = vld [vmem:[#allocation11 + $0x6a4] ss:$16 sps:$4 sm:$0xff]  }
 0xa5b   : > { %11072 = vmatmul.mubr.bf16.vlgmr.msra.gmra.mrb[28].mxu0 %v16639_v24 }
 0xa5c   : > { %10890 = vmatpush1.bf16.msra.mxu1 %v13431_v20  ;;  %11081 = vmatpush1.bf16.msra.mxu0 %v13434_v48  ;;  %v13520_v20 = vld [vmem:[#allocation11 + $0x7cc] ss:$16 sps:$4 sm:$0xff]   ;;  %v9042_v48 = vrot.slane %v16613_v46, %v9041_v54 }
 0xa5d   : > { %10891 = vmatprep.subr.bf16.mxu1 %v13439_v21  ;;  %11082 = vmatprep.subr.bf16.mxu0 %v13442_v23  ;;  %v13515_v21 = vld [vmem:[#allocation11 + $0x6a0] ss:$16 sps:$4 sm:$0xff]   ;;  %v13518_v23 = vld [vmem:[#allocation11 + $0x7c8] ss:$16 sps:$4 sm:$0xff]  }
 0xa5e   : > { %v13571_v54 = vld [vmem:[%s16815_s13] sm:$0xff]  }
 0xa60   : > { %10892 = vmatpush1.bf16.msra.mxu1 %v13437_v35  ;;  %11083 = vmatpush1.bf16.msra.mxu0 %v13440_v1  ;;  %v13523_v35 = vld [vmem:[#allocation11 + $0x6c4] ss:$16 sps:$4 sm:$0xff]   ;;  %v13526_v1 = vld [vmem:[#allocation11 + $0x7ec] ss:$16 sps:$4 sm:$0xff]  }
 0xa61   : > { %10893 = vmatprep.subr.bf16.mxu1 %v13445_v63  ;;  %11084 = vmatprep.subr.bf16.mxu0 %v13448_v44 }
 0xa64   : > { %10894 = vmatpush1.bf16.msra.mxu1 %v13443_v57  ;;  %11085 = vmatpush1.bf16.msra.mxu0 %v13446_v50 }
 0xa65   : > { %10895 = vmatprep.subr.bf16.mxu1 %v13451_v19  ;;  %11086 = vmatprep.subr.bf16.mxu0 %v13454_v62  ;;  %v13521_v62 = vld [vmem:[#allocation11 + $0x6c0] ss:$16 sps:$4 sm:$0xff]  }
 0xa68   : > { %10896 = vmatpush1.bf16.msra.mxu1 %v13449_v61  ;;  %11087 = vmatpush1.bf16.msra.mxu0 %v13452_v9  ;;  %v13524_v61 = vld [vmem:[#allocation11 + $0x7e8] ss:$16 sps:$4 sm:$0xff]  }
 0xa69   : > { %10897 = vmatprep.subr.bf16.mxu1 %v13457_v27  ;;  %11088 = vmatprep.subr.bf16.mxu0 %v13460_v45  ;;  %v13554_v45 = vld [vmem:[%s16815_s13 + $0xc0] sm:$0xff]  }
 0xa6c   : > { %10898 = vmatpush1.bf16.msra.mxu1 %v13455_v7  ;;  %11089 = vmatpush1.bf16.msra.mxu0 %v13458_v31 }
 0xa6d   : > { %10899 = vmatprep.subr.bf16.mxu1 %v13463_v60  ;;  %11090 = vmatprep.subr.bf16.mxu0 %v13466_v59  ;;  %v13527_v60 = vld [vmem:[#allocation11 + $0x6e0] ss:$16 sps:$4 sm:$0xff]   ;;  %v13555_v59 = vld [vmem:[%s16815_s13 + $0x80] sm:$0xff]  }
 0xa70   : > { %10900 = vmatpush1.bf16.msra.mxu1 %v13461_v17  ;;  %11091 = vmatpush1.bf16.msra.mxu0 %v13464_v34  ;;  %v13532_v34 = vld [vmem:[#allocation11 + $0x704] ss:$16 sps:$4 sm:$0xff]  }
 0xa71   : > { %10901 = vmatprep.subr.bf16.mxu1 %v13469_v56  ;;  %11092 = vmatprep.subr.bf16.mxu0 %v13472_v14  ;;  %v13556_v56 = vld [vmem:[%s16815_s13 + $0xc8] sm:$0xff]  }
 0xa72   : > { %v13530_v14 = vld [vmem:[#allocation11 + $0x700] ss:$16 sps:$4 sm:$0xff]  }
 0xa74   : > { %10902 = vmatpush1.bf16.msra.mxu1 %v13467_v43  ;;  %11093 = vmatpush1.bf16.msra.mxu0 %v13470_v16  ;;  %v13557_v43 = vld [vmem:[%s16815_s13 + $0x88] sm:$0xff]  }
 0xa75   : > { %10903 = vmatprep.subr.bf16.mxu1 %v13475_v29  ;;  %11094 = vmatprep.subr.bf16.mxu0 %v13478_v28  ;;  %v13535_v16 = vld [vmem:[#allocation11 + $0x724] ss:$16 sps:$4 sm:$0xff]   ;;  %v13558_v29 = vld [vmem:[%s16815_s13 + $0xd0] sm:$0xff]   ;;  %v13533_v28 = vld [vmem:[#allocation11 + $0x720] ss:$16 sps:$4 sm:$0xff]  }
 0xa78   : > { %10904 = vmatpush1.bf16.msra.mxu1 %v13473_v52  ;;  %11095 = vmatpush1.bf16.msra.mxu0 %v13476_v11  ;;  %v13559_v52 = vld [vmem:[%s16815_s13 + $0x90] sm:$0xff]   ;;  %v13538_v11 = vld [vmem:[#allocation11 + $0x744] ss:$16 sps:$4 sm:$0xff]  }
 0xa79   : > { %10905 = vmatprep.subr.bf16.mxu1 %v13481_v36  ;;  %11096 = vmatprep.subr.bf16.mxu0 %v13484_v5  ;;  %v13560_v36 = vld [vmem:[%s16815_s13 + $0xd8] sm:$0xff]  }
 0xa7a   : > { %v13536_v5 = vld [vmem:[#allocation11 + $0x740] ss:$16 sps:$4 sm:$0xff]  }
 0xa7c   : > { %10906 = vmatpush1.bf16.msra.mxu1 %v13479_v42  ;;  %11097 = vmatpush1.bf16.msra.mxu0 %v13482_v4  ;;  %v13561_v42 = vld [vmem:[%s16815_s13 + $0x98] sm:$0xff]  }
 0xa7d   : > { %10916 = vmatprep.subr.bf16.mxu1 %v13487_v12  ;;  %11098 = vmatprep.subr.bf16.mxu0 %v13490_v40  ;;  %v13541_v4 = vld [vmem:[#allocation11 + $0x764] ss:$16 sps:$4 sm:$0xff]   ;;  %v13562_v12 = vld [vmem:[%s16815_s13 + $0xe0] sm:$0xff]   ;;  %v13539_v40 = vld [vmem:[#allocation11 + $0x760] ss:$16 sps:$4 sm:$0xff]  }
 0xa7f   : > { %10908 = vmatmul.mubr.bf16.vlgmr.msra.gmra.mrb[60].mxu1 %v16639_v24  ;;  %v9046_v24 = vrot.slane %v16613_v46, %v9045_v30  ;;  %v13529_v46 = vld [vmem:[#allocation11 + $0x6e4] ss:$16 sps:$4 sm:$0xff]   ;;  %v13574_v30 = vld [vmem:[%s16815_s13 + $0x50] sm:$0xff]  }
 0xa80   : > { %10917 = vmatpush1.bf16.msra.mxu1 %v13485_v39  ;;  %11099 = vmatpush1.bf16.msra.mxu0 %v13488_v13  ;;  %v13563_v39 = vld [vmem:[%s16815_s13 + $0xa0] sm:$0xff]   ;;  %v13544_v13 = vld [vmem:[#allocation11 + $0x784] ss:$16 sps:$4 sm:$0xff]  }
 0xa81   : > { %10918 = vmatprep.subr.bf16.mxu1 %v13493_v22  ;;  %11100 = vmatprep.subr.bf16.mxu0 %v13496_v37  ;;  %v13564_v22 = vld [vmem:[%s16815_s13 + $0xe8] sm:$0xff]  }
 0xa82   : > { %v13542_v37 = vld [vmem:[#allocation11 + $0x780] ss:$16 sps:$4 sm:$0xff]  }
 0xa84   : > { %10919 = vmatpush1.bf16.msra.mxu1 %v13491_v0  ;;  %11101 = vmatpush1.bf16.msra.mxu0 %v13494_v49  ;;  %v13565_v0 = vld [vmem:[%s16815_s13 + $0xa8] sm:$0xff]  }
 0xa85   : > { %10920 = vmatprep.subr.bf16.mxu1 %v13499_v15  ;;  %11102 = vmatprep.subr.bf16.mxu0 %v13502_v26  ;;  %v13547_v49 = vld [vmem:[#allocation11 + $0x7a4] ss:$16 sps:$4 sm:$0xff]   ;;  %v13545_v15 = vld [vmem:[#allocation11 + $0x7a0] ss:$16 sps:$4 sm:$0xff]  }
 0xa86   : > { %v13550_v26 = vld [vmem:[#allocation11 + $0x7c4] ss:$16 sps:$4 sm:$0xff]  }
 0xa88   : > { %10921 = vmatpush1.bf16.msra.mxu1 %v13497_v8  ;;  %11103 = vmatpush1.bf16.msra.mxu0 %v13500_v38  ;;  %v13548_v8 = vld [vmem:[#allocation11 + $0x7c0] ss:$16 sps:$4 sm:$0xff]   ;;  %v13553_v38 = vld [vmem:[#allocation11 + $0x7e4] ss:$16 sps:$4 sm:$0xff]  }
 0xa89   : > { %10922 = vmatprep.subr.bf16.mxu1 %v13505_v32  ;;  %11104 = vmatprep.subr.bf16.mxu0 %v13508_v41  ;;  %v13551_v32 = vld [vmem:[#allocation11 + $0x7e0] ss:$16 sps:$4 sm:$0xff]   ;;  %v13566_v41 = vld [vmem:[%s16815_s13 + $0xf0] sm:$0xff]  }
 0xa8c   : > { %10923 = vmatpush1.bf16.msra.mxu1 %v13503_v53  ;;  %11105 = vmatpush1.bf16.msra.mxu0 %v13506_v18  ;;  %v13567_v53 = vld [vmem:[%s16815_s13 + $0xb0] sm:$0xff]   ;;  %v13568_v18 = vld [vmem:[%s16815_s13 + $0xf8] sm:$0xff]  }
 0xa8d   : > { %10924 = vmatprep.subr.bf16.mxu1 %v13511_v51  ;;  %11106 = vmatprep.subr.bf16.mxu0 %v13514_v6  ;;  %v13569_v51 = vld [vmem:[%s16815_s13 + $0xb8] sm:$0xff]   ;;  %v13570_v6 = vld [vmem:[%s16815_s13 + $0x40] sm:$0xff]  }
 0xa90   : > { %10925 = vmatpush1.bf16.msra.mxu1 %v13509_v2  ;;  %11107 = vmatpush1.bf16.msra.mxu0 %v13512_v47  ;;  %v13572_v2 = vld [vmem:[%s16815_s13 + $0x48] sm:$0xff]  }
 0xa91   : > { %10926 = vmatprep.subr.bf16.mxu1 %v13517_v3  ;;  %11108 = vmatprep.subr.bf16.mxu0 %v13520_v20  ;;  %v13573_v47 = vld [vmem:[%s16815_s13 + $0x8] sm:$0xff]   ;;  %v13575_v3 = vld [vmem:[%s16815_s13 + $0x10] sm:$0xff]   ;;  %v13576_v20 = vld [vmem:[%s16815_s13 + $0x58] sm:$0xff]  }
 0xa92   : > { %v9212_v63 = vpop.f32.mrb[56].mxu1 }
 0xa93   : > { %v9213_v44 = vadd.f32 %v9212_v63, %v9042_v48  ;;  %v9214_v57 = vpop.f32.mrb[57].mxu1  ;;  %v13577_v48 = vld [vmem:[%s16815_s13 + $0x18] sm:$0xff]   ;;  %v13583_v63 = vld [vmem:[%s16815_s13 + $0x30] sm:$0xff]  }
 0xa94   : > { %v9215_v50 = vadd.f32 %v9214_v57, %v9046_v24  ;;  %v9216_v19 = vpop.f32.mrb[58].mxu1  ;;  %10927 = vmatpush1.bf16.msra.mxu1 %v13515_v21  ;;  %11109 = vmatpush1.bf16.msra.mxu0 %v13518_v23  ;;  %v13578_v24 = vld [vmem:[%s16815_s13 + $0x60] sm:$0xff]   ;;  %v13580_v23 = vld [vmem:[%s16815_s13 + $0x68] sm:$0xff]   ;;  %v13585_v57 = vld [vmem:[%s16815_s13 + $0x38] sm:$0xff]  }
 0xa95   : > { %v9225_v9 = vmax.f32 %v9213_v44, 0.0  ;;  %v9217_v27 = vpop.f32.mrb[59].mxu1  ;;  %10928 = vmatprep.subr.bf16.mxu1 %v13523_v35  ;;  %11110 = vmatprep.subr.bf16.mxu0 %v13526_v1  ;;  %v13579_v21 = vld [vmem:[%s16815_s13 + $0x20] sm:$0xff]   ;;  %v13581_v35 = vld [vmem:[%s16815_s13 + $0x28] sm:$0xff]   ;;  %v13582_v1 = vld [vmem:[%s16815_s13 + $0x70] sm:$0xff]  }
 0xa96   : > { %v9226_v7 = vmax.f32 %v9215_v50, 0.0  ;;  %v13584_v44 = vld [vmem:[%s16815_s13 + $0x78] sm:$0xff]   ;;  %v9491_v50 = vld [vmem:[%s16814_s12] sm:$0xf] }
 0xa97   : > { %v9233_v17 = vpack.c.bf16 %v9225_v9, %v9225_v9  ;;  %v10784_v19 = vrot.slane %v9491_v50, %v9025_v58 }
 0xa98   : > { %v9234_v31 = vpack.c.bf16 %v9226_v7, %v9226_v7  ;;  %10929 = vmatpush1.bf16.msra.mxu1 %v13521_v62  ;;  %11111 = vmatpush1.bf16.msra.mxu0 %v13524_v61  ;;  %v10788_v62 = vrot.slane %v9491_v50, %v9029_v10 }
 0xa99   : > { %10930 = vmatprep.subr.bf16.mxu1 %v13529_v46  ;;  %12612 = vmatprep.subr.bf16.mxu0 %v13554_v45 }
 0xa9a   : > { %10948 = vmatprep.mubr.bf16.mxu1 %v9234_v31  ;;  %11112 = vmatprep.mubr.bf16.mxu0 %v9234_v31 }
 0xa9b   : > { %11113 = vmatmul.mubr.bf16.vlgmr.msra.gmra.mrb[28].mxu0 %v9233_v17 }
 0xa9c   : > { %10931 = vmatpush1.bf16.msra.mxu1 %v13527_v60  ;;  %12613 = vmatpush3.bf16.msra.mxu0 %v13555_v59 }
 0xa9d   : > { %10932 = vmatprep.subr.bf16.mxu1 %v13532_v34  ;;  %12614 = vmatprep.subr.bf16.mxu0 %v13556_v56  ;;  %v10776_v34 = vrot.slane %v9491_v50, %v16578_v25  ;;  %v10780_v56 = vrot.slane %v9491_v50, %v16584_v33 }
 0xaa0   : > { %10933 = vmatpush1.bf16.msra.mxu1 %v13530_v14  ;;  %12615 = vmatpush3.bf16.msra.mxu0 %v13557_v43 }
 0xaa1   : > { %10934 = vmatprep.subr.bf16.mxu1 %v13535_v16  ;;  %12616 = vmatprep.subr.bf16.mxu0 %v13558_v29 }
 0xaa4   : > { %10935 = vmatpush1.bf16.msra.mxu1 %v13533_v28  ;;  %12617 = vmatpush3.bf16.msra.mxu0 %v13559_v52 }
 0xaa5   : > { %10936 = vmatprep.subr.bf16.mxu1 %v13538_v11  ;;  %12618 = vmatprep.subr.bf16.mxu0 %v13560_v36 }
 0xaa8   : > { %10937 = vmatpush1.bf16.msra.mxu1 %v13536_v5  ;;  %12619 = vmatpush3.bf16.msra.mxu0 %v13561_v42 }
 0xaa9   : > { %10938 = vmatprep.subr.bf16.mxu1 %v13541_v4  ;;  %12620 = vmatprep.subr.bf16.mxu0 %v13562_v12  ;;  %v11193_v12 = vld [vmem:[%s16868_s9] sm:$0x1] }
 0xaac   : > { %10939 = vmatpush1.bf16.msra.mxu1 %v13539_v40  ;;  %12621 = vmatpush3.bf16.msra.mxu0 %v13563_v39 }
 0xaad   : > { %10940 = vmatprep.subr.bf16.mxu1 %v13544_v13  ;;  %12622 = vmatprep.subr.bf16.mxu0 %v13564_v22 }
 0xab0   : > { %10941 = vmatpush1.bf16.msra.mxu1 %v13542_v37  ;;  %12623 = vmatpush3.bf16.msra.mxu0 %v13565_v0 }
 0xab1   : > { %10942 = vmatprep.subr.bf16.mxu1 %v13547_v49  ;;  %12624 = vmatprep.subr.bf16.mxu0 %v13566_v41 }
 0xab4   : > { %10943 = vmatpush1.bf16.msra.mxu1 %v13545_v15  ;;  %12625 = vmatpush3.bf16.msra.mxu0 %v13567_v53 }
 0xab5   : > { %10944 = vmatprep.subr.bf16.mxu1 %v13550_v26  ;;  %12626 = vmatprep.subr.bf16.mxu0 %v13568_v18 }
 0xab8   : > { %10945 = vmatpush1.bf16.msra.mxu1 %v13548_v8  ;;  %12627 = vmatpush3.bf16.msra.mxu0 %v13569_v51 }
 0xab9   : > { %10946 = vmatprep.subr.bf16.mxu1 %v13553_v38 }
 0xabc   : > { %10947 = vmatpush1.bf16.msra.mxu1 %v13551_v32 }
 0xabd   : > { %12590 = vmatprep.subr.bf16.mxu1 %v13570_v6 }
 0xabf   : > { %10949 = vmatmul.mubr.bf16.vlgmr.msra.gmra.mrb[60].mxu1 %v9233_v17 }
 0xac0   : > { %12591 = vmatpush3.bf16.msra.mxu1 %v13571_v54 }
 0xac1   : > { %12592 = vmatprep.subr.bf16.mxu1 %v13572_v2 }
 0xac4   : > { %12593 = vmatpush3.bf16.msra.mxu1 %v13573_v47 }
 0xac5   : > { %12594 = vmatprep.subr.bf16.mxu1 %v13574_v30 }
 0xac8   : > { %12595 = vmatpush3.bf16.msra.mxu1 %v13575_v3 }
 0xac9   : > { %12596 = vmatprep.subr.bf16.mxu1 %v13576_v20 }
 0xacc   : > { %12597 = vmatpush3.bf16.msra.mxu1 %v13577_v48 }
 0xacd   : > { %12598 = vmatprep.subr.bf16.mxu1 %v13578_v24 }
 0xad0   : > { %12599 = vmatpush3.bf16.msra.mxu1 %v13579_v21 }
 0xad1   : > { %12600 = vmatprep.subr.bf16.mxu1 %v13580_v23 }
 0xad4   : > { %12601 = vmatpush3.bf16.msra.mxu1 %v13581_v35 }
 0xad5   : > { %12602 = vmatprep.subr.bf16.mxu1 %v13582_v1 }
 0xad8   : > { %12603 = vmatpush3.bf16.msra.mxu1 %v13583_v63 }
 0xad9   : > { %12604 = vmatprep.subr.bf16.mxu1 %v13584_v44 }
 0xadc   : > { %12605 = vmatpush3.bf16.msra.mxu1 %v13585_v57 }
 0xb6e   : > { %v11114_v61 = vpop.f32.mrb[28].mxu0 }
 0xb6f   : > { %v12702_v9 = vadd.f32 %v11114_v61, %v10784_v19  ;;  %v11116_v27 = vpop.f32.mrb[29].mxu0 }
 0xb70   : > { %v12703_v46 = vadd.f32 %v11116_v27, %v10788_v62  ;;  %v11118_v45 = vpop.f32.mrb[30].mxu0 }
 0xb71   : > { %v11123_v7 = vmax.f32 %v12702_v9, 0.0  ;;  %v11119_v31 = vpop.f32.mrb[31].mxu0 }
 0xb72   : > { %v11124_v60 = vmax.f32 %v12703_v46, 0.0 }
 0xb73   : > { %v11127_v17 = vpack.c.bf16 %v11123_v7, %v11123_v7 }
 0xb74   : > { %v11128_v59 = vpack.c.bf16 %v11124_v60, %v11124_v60 }
 0xb76   : > { %11458 = vmatprep.mubr.bf16.mxu0 %v11128_v59 }
 0xb77   : > { %11459 = vmatmul.mubr.bf16.vlgmr.msra.gmra.mrb[32].mxu0 %v11127_v17 }
 0xb92   : > { %v10950_v58 = vpop.f32.mrb[60].mxu1 }
 0xb93   : > { %v12700_v14 = vadd.f32 %v10950_v58, %v10776_v34  ;;  %v10952_v55 = vpop.f32.mrb[61].mxu1 }
 0xb94   : > { %v12701_v10 = vadd.f32 %v10952_v55, %v10780_v56  ;;  %v10954_v43 = vpop.f32.mrb[62].mxu1 }
 0xb95   : > { %v11121_v16 = vmax.f32 %v12700_v14, 0.0  ;;  %v10955_v29 = vpop.f32.mrb[63].mxu1 }
 0xb96   : > { %v11122_v28 = vmax.f32 %v12701_v10, 0.0 }
 0xb97   : > { %v11125_v11 = vpack.c.bf16 %v11121_v16, %v11121_v16 }
 0xb98   : > { %v11126_v52 = vpack.c.bf16 %v11122_v28, %v11122_v28 }
 0xb9a   : > { %11418 = vmatprep.mubr.bf16.mxu1 %v11126_v52 }
 0xb9b   : > { %11419 = vmatmul.mubr.bf16.vlgmr.msra.gmra.mrb[64].mxu1 %v11125_v11 }
 0xc4a   : > { %v12628_v36 = vpop.f32.mrb[32].mxu0 }
 0xc4b   : > { %v12629_v5 = vpop.f32.mrb[33].mxu0 }
 0xc4c   : > { %v12630_v42 = vadd.f32 %v12629_v5, %v12628_v36  ;;  %v12631_v25 = vpop.f32.mrb[34].mxu0 }
 0xc4d   : > { %v12632_v4 = vpop.f32.mrb[35].mxu0 }
 0xc6e   : > { %v12606_v33 = vpop.f32.mrb[64].mxu1 }
 0xc6f   : > { %v12607_v40 = vpop.f32.mrb[65].mxu1 }
 0xc70   : > { %v12608_v39 = vadd.f32 %v12607_v40, %v12606_v33  ;;  %v12609_v13 = vpop.f32.mrb[66].mxu1 }
 0xc71   : > { %v12610_v22 = vpop.f32.mrb[67].mxu1 }
 0xc72   : > { %v11421_v37 = vadd.f32 %v12608_v39, %v11193_v12 }
 0xc74   : > { %v11461_v0 = vadd.f32 %v12630_v42, %v11421_v37 }
 0xc76   : > { %11466 = vst [vmem:[%s530_s28] sm:$0x1] %v11461_v0 }
 0xc77   : > { %13705 = shalt.err (!%p13702_p11)
}
 0xc78   : > { %s13706_s15 = scalar_lea.hbm %s16760_s25, 16  ;;  %s13710_s19 = scalar_lea.hbm %s16870_s29, 32 }
 0xc79   : > { %p13707_p13 = scmp.ne.s32.totalorder %s16760_s25, %s13706_s15  ;;  %p13711_p6 = scmp.lt.u32.totalorder %s16760_s25, %s16870_s29 }
 0xc7a   : > { %p13712_p9 = scmp.lt.u32.totalorder %s13710_s19, %s13706_s15  ;;  %p13714_p10 = scmp.lt.u32.totalorder %s13706_s15, %s16760_s25 }
 0xc7b   : > { %p13708_p5 = pnand %p13707_p13, %p16871_p1 }
 0xc7c   : > { %p13713_p12 = por %p13712_p9, %p13711_p6 }
 0xc7d   : > { %p13709_p0 = pneg %p13708_p5 }
 0xc7e   : > { %p13715_p2 = por %p13714_p10, %p13713_p12 }
 0xc80   : > { %p13716_p3 = pnand %p13715_p2, %p13709_p0 }
 0xc82   : > { %13719 = shalt.err (!%p13716_p3)
}
 0xc83   : > { %12756 = dma.vmem_to_hbm [thread:$0]  (%p16871_p1), %s16762_s27, 16, %s16760_s25, %s11468_s20  }
 0xc84 PF: > { %s16872_s28 = sld [smem:[#allocation19_spill]]  ;;  %s16873_s21 = sld [smem:[#allocation16_spill]] }
 0xc85   : > { %s16874_s24 = sld [smem:[#allocation23_spill]] }
 0xc8a   : > { %p12778_p4 = scmp.ge.s32.totalorder %s16872_s28, 2  ;;  %s11492_s17 = sand.u32 1, %s16873_s21  }
 0xc8b   : > { %p16875_p7 = scmp.ne.s32.totalorder %s16874_s24, 0  ;;  %s11493_s22 = scalar_lea.sflag [#allocation8], %s11492_s17 }
 0xc8d   : > { %p12769_p8 = pnand %p12778_p4, %p16875_p7 }
 0xc8f   : > { %13745 = dma.done.wait (!%p12769_p8), %s11493_s22, 16  }
 0xc90   : > { %13747 = vsyncadd (!%p12769_p8), %s11493_s22, 4294967280  ;;  %s16876_s21 = sld [smem:[#allocation20_spill]]  ;;  %s16877_s18 = sld [smem:[#allocation17_spill]] }
 0xc91   : > { %s16878_s19 = sld [smem:[#allocation18_spill]]  ;;  %s16879_s20 = sld [smem:[#allocation21_spill]] }
 0xc96   : > { %p27_p11 = scmp.ge.s32.totalorder %s16876_s21, 4  }
 0xc98   :  { %29 = sbr.rel (!%p27_p11) target bundleno = 9 (0x9), region = 132 }
 0xc9f   :  { %11497 = vsyncpa [#allocation7], 1 }
 0xca0   :  { %11499 = vsyncpa [#allocation7 + $0x1], 1 }
 0xca1   :  { %11500 = vsyncpa [#allocation10], 1 }
 0xca2   :  { %11501 = vsyncpa [#allocation8], 1 }
 0xca3   :  { %11503 = vsyncpa [#allocation8 + $0x1], 1 }

</bundles_post_ra>
